<compile_context>
chip_gen: v7x
topology: tpu7x:2x2x1
jax: 0.10.0
libtpu: 0.0.40
codegen_flags: <defaults>
</compile_context>

<pallas_src>
import jax
import jax.numpy as jnp
from jax.experimental import pallas as pl
from jax.experimental.pallas import tpu as pltpu

# Small synthetic stand-in shapes (module implies 3 input channels).
N, H, W = 2, 16, 16
HP, WP = H + 2, W + 2              # reflection-padded spatial extent
Q = N * HP * WP                    # 648: padded-grid flat index (n, hp, wp)
OFF = 128                          # lane offset of the q-grid inside the scratch
PAD_W = 896                        # scratch width >= OFF + Q + 2*WP, mult of 128
CHANS = (3, 4, 8, 16, 32)          # cnn1 channel progression
NVALID = float(N * H * W)          # BatchNorm population size
BN_EPS = 1e-5


# ----------------------------------------------------------------------------
# Kernel 1: fused conv stack (4x ReflectionPad + Conv3x3 + ReLU + BatchNorm)
# ----------------------------------------------------------------------------
def conv_stack_kernel(mask_ref, x_ref, *refs):
    """All refs are whole-array VMEM blocks (no grid).

    mask_ref : (5, Q) f32   rows: top / bottom / left / right / valid masks
    x_ref    : (3, Q) f32   reflection-padded input in q-grid layout
    refs     : (w9, b, gamma, beta) x 4 layers, then o_ref (32, Q),
               then pad_ref scratch (32, PAD_W)
               w9_l : (9, cout, cin), b/gamma/beta : (cout, 1)
    """
    *prefs, o_ref, pad_ref = refs

    tm = mask_ref[0:1, :]          # hp == 0
    bm = mask_ref[1:2, :]          # hp == HP-1
    lm = mask_ref[2:3, :]          # wp == 0
    rm = mask_ref[3:4, :]          # wp == WP-1
    vm = mask_ref[4:5, :]          # interior (the N*H*W real pixels)
    inv_cnt = 1.0 / NVALID

    # Zero the scratch (margins must be finite), then drop in the padded input.
    pad_ref[...] = jnp.zeros_like(pad_ref)
    pad_ref[0:CHANS[0], OFF:OFF + Q] = x_ref[...]

    n_layers = len(CHANS) - 1
    for l in range(n_layers):
        cin, cout = CHANS[l], CHANS[l + 1]
        w_ref, b_ref, g_ref, bt_ref = prefs[4 * l:4 * l + 4]

        # 3x3 conv = 9 shifted slab loads + 9 small MXU matmuls, f32 accumulate.
        acc = None
        for t in range(9):
            dy, dx = t // 3, t % 3
            s = (dy - 1) * WP + (dx - 1)                       # shift in q-space
            tap = pad_ref[0:cin, OFF + s:OFF + s + Q]          # (cin, Q)
            contrib = jnp.dot(w_ref[t], tap,
                              preferred_element_type=jnp.float32)
            acc = contrib if acc is None else acc + contrib    # (cout, Q)

        y = jnp.maximum(acc + b_ref[...], 0.0)                 # bias + ReLU

        # BatchNorm2d (training-mode batch stats), one masked pass.
        ym = y * vm
        s1 = jnp.sum(ym, axis=1, keepdims=True)
        s2 = jnp.sum(ym * y, axis=1, keepdims=True)
        mean = s1 * inv_cnt
        var = jnp.maximum(s2 * inv_cnt - mean * mean, 0.0)
        scale = jax.lax.rsqrt(var + BN_EPS) * g_ref[...]
        y = (y - mean) * scale + bt_ref[...]

        if l == n_layers - 1:
            o_ref[...] = y                                     # (32, Q) out
        else:
            # Store the activation, then rebuild the reflection border
            # in-place (rows hp in {0, HP-1}, then cols wp in {0, WP-1}).
            pad_ref[0:cout, OFF:OFF + Q] = y
            up = pad_ref[0:cout, OFF + 2 * WP:OFF + 2 * WP + Q]   # value at q+2*WP
            dn = pad_ref[0:cout, OFF - 2 * WP:OFF - 2 * WP + Q]   # value at q-2*WP
            y = y * (1.0 - tm - bm) + up * tm + dn * bm
            pad_ref[0:cout, OFF:OFF + Q] = y
            lf = pad_ref[0:cout, OFF + 2:OFF + 2 + Q]             # value at q+2
            rt = pad_ref[0:cout, OFF - 2:OFF - 2 + Q]             # value at q-2
            y = y * (1.0 - lm - rm) + lf * lm + rt * rm
            pad_ref[0:cout, OFF:OFF + Q] = y                      # padded for l+1


def conv_stack(x_pad_q, masks, conv_params):
    flat = []
    for (w9, b, g, bt) in conv_params:
        flat += [w9, b, g, bt]
    return pl.pallas_call(
        conv_stack_kernel,
        out_shape=jax.ShapeDtypeStruct((CHANS[-1], Q), jnp.float32),
        scratch_shapes=[pltpu.VMEM((CHANS[-1], PAD_W), jnp.float32)],
    )(masks, x_pad_q, *flat)


# ----------------------------------------------------------------------------
# Kernel 2: fused fc1 -> ReLU -> fc2 -> ReLU -> fc3  (K-tiled fc1, bf16 weights)
# ----------------------------------------------------------------------------
def fc_stack_kernel(a_ref, w1_ref, b1_ref, w2_ref, b2_ref, w3_ref, b3_ref,
                    o_ref, acc_ref):
    k = pl.program_id(0)

    @pl.when(k == 0)
    def _():
        acc_ref[...] = jnp.zeros_like(acc_ref)

    acc_ref[...] += jnp.dot(a_ref[...].astype(jnp.bfloat16), w1_ref[...],
                            preferred_element_type=jnp.float32)

    @pl.when(k == pl.num_programs(0) - 1)
    def _():
        h = jnp.maximum(acc_ref[...] + b1_ref[...], 0.0)
        h = jnp.maximum(
            jnp.dot(h, w2_ref[...], preferred_element_type=jnp.float32)
            + b2_ref[...], 0.0)
        o_ref[...] = (jnp.dot(h, w3_ref[...],
                              preferred_element_type=jnp.float32)
                      + b3_ref[...])


def _pick_tk(K):
    for t in (2048, 1024, 512, 256, 128):
        if K % t == 0:
            return t
    return K  # TODO(synk): pad K to a multiple of 128 for pathological sizes


def fc_stack(a, w1_bf16, b1, w2, b2, w3, b3):
    M, K = a.shape
    tk = _pick_tk(K)
    nk = K // tk
    n1 = w1_bf16.shape[1]
    n3 = w3.shape[1]
    return pl.pallas_call(
        fc_stack_kernel,
        out_shape=jax.ShapeDtypeStruct((M, n3), jnp.float32),
        grid_spec=pltpu.PrefetchScalarGridSpec(
            num_scalar_prefetch=0,
            grid=(nk,),
            in_specs=[
                pl.BlockSpec((M, tk), lambda k: (0, k)),
                pl.BlockSpec((tk, n1), lambda k: (k, 0)),
                pl.BlockSpec((1, n1), lambda k: (0, 0)),
                pl.BlockSpec((w2.shape[0], w2.shape[1]), lambda k: (0, 0)),
                pl.BlockSpec((1, w2.shape[1]), lambda k: (0, 0)),
                pl.BlockSpec((w3.shape[0], n3), lambda k: (0, 0)),
                pl.BlockSpec((1, n3), lambda k: (0, 0)),
            ],
            out_specs=pl.BlockSpec((M, n3), lambda k: (0, 0)),
            scratch_shapes=[pltpu.VMEM((M, n1), jnp.float32)],
        ),
        compiler_params=pltpu.CompilerParams(
            dimension_semantics=("arbitrary",)),
    )(a, w1_bf16, b1, w2, b2, w3, b3)


# ----------------------------------------------------------------------------
# Glue + full forward
# ----------------------------------------------------------------------------
def make_masks():
    q = jnp.arange(Q)
    hp = (q % (HP * WP)) // WP
    wp = q % WP
    top = hp == 0
    bot = hp == HP - 1
    left = wp == 0
    right = wp == WP - 1
    valid = (hp >= 1) & (hp <= H) & (wp >= 1) & (wp <= W)
    return jnp.stack([top, bot, left, right, valid]).astype(jnp.float32)


def siamese_forward(x_nchw, params):
    n = x_nchw.shape[0]
    masks = make_masks()

    # Tiny XLA glue: NCHW -> channel-major, reflection-padded q-grid layout.
    xt = jnp.transpose(x_nchw, (1, 0, 2, 3))                        # (C,N,H,W)
    xp = jnp.pad(xt, ((0, 0), (0, 0), (1, 1), (1, 1)), mode="reflect")
    x_q = xp.reshape(CHANS[0], Q)

    conv_out = conv_stack(x_q, masks, params["conv"])               # (32, Q)

    # Tiny XLA glue: drop the pad border, flatten in NCHW order (== .view(N,-1)).
    feat = conv_out.reshape(CHANS[-1], n, HP, WP)[:, :, 1:H + 1, 1:W + 1]
    feat = jnp.transpose(feat, (1, 0, 2, 3)).reshape(n, CHANS[-1] * H * W)

    (w1, b1), (w2, b2), (w3, b3) = params["fc"]
    return fc_stack(feat, w1.astype(jnp.bfloat16), b1, w2, b2, w3, b3)


# ----------------------------------------------------------------------------
# Deterministic synthetic parameters
# ----------------------------------------------------------------------------
def make_params(key):
    params = {"conv": []}
    for i in range(len(CHANS) - 1):
        cin, cout = CHANS[i], CHANS[i + 1]
        key, k1, k2 = jax.random.split(key, 3)
        # PyTorch conv weight layout (Cout, Cin, 3, 3) -> (9, Cout, Cin)
        w_torch = jax.random.normal(k1, (cout, cin, 3, 3), jnp.float32)
        w_torch = w_torch * (1.0 / jnp.sqrt(9.0 * cin))
        w9 = jnp.transpose(w_torch, (2, 3, 0, 1)).reshape(9, cout, cin)
        b = 0.01 * jax.random.normal(k2, (cout, 1), jnp.float32)
        gamma = jnp.ones((cout, 1), jnp.float32)
        beta = jnp.zeros((cout, 1), jnp.float32)
        params["conv"].append((w9, b, gamma, beta))

    in_feat = CHANS[-1] * H * W
    params["fc"] = []
    for fi, fo in [(in_feat, 500), (500, 500), (500, 5)]:
        key, k1, k2 = jax.random.split(key, 3)
        w = jax.random.normal(k1, (fi, fo), jnp.float32) * (1.0 / jnp.sqrt(fi))
        b = 0.01 * jax.random.normal(k2, (1, fo), jnp.float32)
        params["fc"].append((w, b))
    return params


# ----------------------------------------------------------------------------
# Pure-JAX reference (same semantics / precision choices) for a sanity check
# ----------------------------------------------------------------------------
def reference_forward(x_nchw, params):
    act = x_nchw
    for (w9, b, g, bt) in params["conv"]:
        cout = w9.shape[1]
        xp = jnp.pad(act, ((0, 0), (0, 0), (1, 1), (1, 1)), mode="reflect")
        y = 0.0
        for t in range(9):
            dy, dx = t // 3, t % 3
            patch = xp[:, :, dy:dy + H, dx:dx + W]
            y = y + jnp.einsum("oc,nchw->nohw", w9[t], patch)
        y = jnp.maximum(y + b.reshape(1, cout, 1, 1), 0.0)
        mean = jnp.mean(y, axis=(0, 2, 3), keepdims=True)
        var = jnp.mean((y - mean) ** 2, axis=(0, 2, 3), keepdims=True)
        y = (y - mean) * jax.lax.rsqrt(var + BN_EPS)
        act = y * g.reshape(1, cout, 1, 1) + bt.reshape(1, cout, 1, 1)

    flat = act.reshape(act.shape[0], -1)
    (w1, b1), (w2, b2), (w3, b3) = params["fc"]
    h = jnp.dot(flat.astype(jnp.bfloat16), w1.astype(jnp.bfloat16),
                preferred_element_type=jnp.float32) + b1
    h = jnp.maximum(h, 0.0)
    h = jnp.maximum(jnp.dot(h, w2) + b2, 0.0)
    return jnp.dot(h, w3) + b3


if __name__ == "__main__":
    key = jax.random.PRNGKey(0)
    key, kx = jax.random.split(key)

    x = jax.random.normal(kx, (N, CHANS[0], H, W), jnp.float32)
    params = make_params(key)

    fwd = jax.jit(siamese_forward)
    out = jax.block_until_ready(fwd(x, params))

    assert out.shape == (N, 5), out.shape
    assert jnp.all(jnp.isfinite(out))

    ref = reference_forward(x, params)
    assert jnp.allclose(out, ref, rtol=3e-2, atol=3e-2)

    print("KERNEL_OK")
</pallas_src>

<mosaic_0001>
module attributes {stable_mosaic.version = 11 : i64} {
  func.func @conv_stack_kernel(%arg0: memref<5x648xf32, #tpu.memory_space<vmem>>, %arg1: memref<3x648xf32, #tpu.memory_space<vmem>>, %arg2: memref<9x4x3xf32, #tpu.memory_space<vmem>>, %arg3: memref<4x1xf32, #tpu.memory_space<vmem>>, %arg4: memref<4x1xf32, #tpu.memory_space<vmem>>, %arg5: memref<4x1xf32, #tpu.memory_space<vmem>>, %arg6: memref<9x8x4xf32, #tpu.memory_space<vmem>>, %arg7: memref<8x1xf32, #tpu.memory_space<vmem>>, %arg8: memref<8x1xf32, #tpu.memory_space<vmem>>, %arg9: memref<8x1xf32, #tpu.memory_space<vmem>>, %arg10: memref<9x16x8xf32, #tpu.memory_space<vmem>>, %arg11: memref<16x1xf32, #tpu.memory_space<vmem>>, %arg12: memref<16x1xf32, #tpu.memory_space<vmem>>, %arg13: memref<16x1xf32, #tpu.memory_space<vmem>>, %arg14: memref<9x32x16xf32, #tpu.memory_space<vmem>>, %arg15: memref<32x1xf32, #tpu.memory_space<vmem>>, %arg16: memref<32x1xf32, #tpu.memory_space<vmem>>, %arg17: memref<32x1xf32, #tpu.memory_space<vmem>>, %arg18: memref<32x648xf32, #tpu.memory_space<vmem>>, %arg19: memref<32x896xf32, #tpu.memory_space<vmem>>) attributes {dimension_semantics = [], scalar_prefetch = 0 : i64, scratch_operands = 1 : i64, tpu.core_type = #tpu.core_type<tc>} {
    %c0 = arith.constant 0 : index
    %c0_0 = arith.constant 0 : index
    %0 = vector.load %arg0[%c0, %c0_0] : memref<5x648xf32, #tpu.memory_space<vmem>>, vector<1x648xf32>
    %c1 = arith.constant 1 : index
    %c0_1 = arith.constant 0 : index
    %1 = vector.load %arg0[%c1, %c0_1] : memref<5x648xf32, #tpu.memory_space<vmem>>, vector<1x648xf32>
    %c2 = arith.constant 2 : index
    %c0_2 = arith.constant 0 : index
    %2 = vector.load %arg0[%c2, %c0_2] : memref<5x648xf32, #tpu.memory_space<vmem>>, vector<1x648xf32>
    %c3 = arith.constant 3 : index
    %c0_3 = arith.constant 0 : index
    %3 = vector.load %arg0[%c3, %c0_3] : memref<5x648xf32, #tpu.memory_space<vmem>>, vector<1x648xf32>
    %c4 = arith.constant 4 : index
    %c0_4 = arith.constant 0 : index
    %4 = vector.load %arg0[%c4, %c0_4] : memref<5x648xf32, #tpu.memory_space<vmem>>, vector<1x648xf32>
    %cst = arith.constant 0.000000e+00 : f32
    %5 = vector.broadcast %cst : f32 to vector<32x896xf32>
    %c0_5 = arith.constant 0 : index
    %c0_6 = arith.constant 0 : index
    %6 = vector.load %arg19[%c0_5, %c0_6] : memref<32x896xf32, #tpu.memory_space<vmem>>, vector<32x896xf32>
    tpu.vector_store %arg19[%c0_5, %c0_6], %5 {strides = array<i32>} : memref<32x896xf32, #tpu.memory_space<vmem>>, vector<32x896xf32>,
    %c0_7 = arith.constant 0 : index
    %c0_8 = arith.constant 0 : index
    %7 = vector.load %arg1[%c0_7, %c0_8] : memref<3x648xf32, #tpu.memory_space<vmem>>, vector<3x648xf32>
    %c0_9 = arith.constant 0 : index
    %c128 = arith.constant 128 : index
    %8 = vector.load %arg19[%c0_9, %c128] : memref<32x896xf32, #tpu.memory_space<vmem>>, vector<3x648xf32>
    tpu.vector_store %arg19[%c0_9, %c128], %7 {strides = array<i32>} : memref<32x896xf32, #tpu.memory_space<vmem>>, vector<3x648xf32>,
    %c0_10 = arith.constant 0 : index
    %c109 = arith.constant 109 : index
    %9 = vector.load %arg19[%c0_10, %c109] : memref<32x896xf32, #tpu.memory_space<vmem>>, vector<3x648xf32>
    %c0_11 = arith.constant 0 : index
    %c0_12 = arith.constant 0 : index
    %c0_13 = arith.constant 0 : index
    %10 = vector.load %arg2[%c0_11, %c0_12, %c0_13] : memref<9x4x3xf32, #tpu.memory_space<vmem>>, vector<1x4x3xf32>
    %11 = vector.shape_cast %10 : vector<1x4x3xf32> to vector<4x3xf32>
    %cst_14 = arith.constant dense<0.000000e+00> : vector<4x648xf32>
    %12 = tpu.matmul %11, %9, %cst_14 {dimension_numbers = #tpu.dot_dimension_numbers<[1], [0], [0], [1], [0, 0, 1, 1], [], []>} : vector<4x3xf32>, vector<3x648xf32>, vector<4x648xf32> -> vector<4x648xf32>
    %c0_15 = arith.constant 0 : index
    %c110 = arith.constant 110 : index
    %13 = vector.load %arg19[%c0_15, %c110] : memref<32x896xf32, #tpu.memory_space<vmem>>, vector<3x648xf32>
    %c1_16 = arith.constant 1 : index
    %c0_17 = arith.constant 0 : index
    %c0_18 = arith.constant 0 : index
    %14 = vector.load %arg2[%c1_16, %c0_17, %c0_18] : memref<9x4x3xf32, #tpu.memory_space<vmem>>, vector<1x4x3xf32>
    %15 = vector.shape_cast %14 : vector<1x4x3xf32> to vector<4x3xf32>
    %cst_19 = arith.constant dense<0.000000e+00> : vector<4x648xf32>
    %16 = tpu.matmul %15, %13, %cst_19 {dimension_numbers = #tpu.dot_dimension_numbers<[1], [0], [0], [1], [0, 0, 1, 1], [], []>} : vector<4x3xf32>, vector<3x648xf32>, vector<4x648xf32> -> vector<4x648xf32>
    %17 = arith.addf %12, %16 : vector<4x648xf32>
    %c0_20 = arith.constant 0 : index
    %c111 = arith.constant 111 : index
    %18 = vector.load %arg19[%c0_20, %c111] : memref<32x896xf32, #tpu.memory_space<vmem>>, vector<3x648xf32>
    %c2_21 = arith.constant 2 : index
    %c0_22 = arith.constant 0 : index
    %c0_23 = arith.constant 0 : index
    %19 = vector.load %arg2[%c2_21, %c0_22, %c0_23] : memref<9x4x3xf32, #tpu.memory_space<vmem>>, vector<1x4x3xf32>
    %20 = vector.shape_cast %19 : vector<1x4x3xf32> to vector<4x3xf32>
    %cst_24 = arith.constant dense<0.000000e+00> : vector<4x648xf32>
    %21 = tpu.matmul %20, %18, %cst_24 {dimension_numbers = #tpu.dot_dimension_numbers<[1], [0], [0], [1], [0, 0, 1, 1], [], []>} : vector<4x3xf32>, vector<3x648xf32>, vector<4x648xf32> -> vector<4x648xf32>
    %22 = arith.addf %17, %21 : vector<4x648xf32>
    %c0_25 = arith.constant 0 : index
    %c127 = arith.constant 127 : index
    %23 = vector.load %arg19[%c0_25, %c127] : memref<32x896xf32, #tpu.memory_space<vmem>>, vector<3x648xf32>
    %c3_26 = arith.constant 3 : index
    %c0_27 = arith.constant 0 : index
    %c0_28 = arith.constant 0 : index
    %24 = vector.load %arg2[%c3_26, %c0_27, %c0_28] : memref<9x4x3xf32, #tpu.memory_space<vmem>>, vector<1x4x3xf32>
    %25 = vector.shape_cast %24 : vector<1x4x3xf32> to vector<4x3xf32>
    %cst_29 = arith.constant dense<0.000000e+00> : vector<4x648xf32>
    %26 = tpu.matmul %25, %23, %cst_29 {dimension_numbers = #tpu.dot_dimension_numbers<[1], [0], [0], [1], [0, 0, 1, 1], [], []>} : vector<4x3xf32>, vector<3x648xf32>, vector<4x648xf32> -> vector<4x648xf32>
    %27 = arith.addf %22, %26 : vector<4x648xf32>
    %c0_30 = arith.constant 0 : index
    %c128_31 = arith.constant 128 : index
    %28 = vector.load %arg19[%c0_30, %c128_31] : memref<32x896xf32, #tpu.memory_space<vmem>>, vector<3x648xf32>
    %c4_32 = arith.constant 4 : index
    %c0_33 = arith.constant 0 : index
    %c0_34 = arith.constant 0 : index
    %29 = vector.load %arg2[%c4_32, %c0_33, %c0_34] : memref<9x4x3xf32, #tpu.memory_space<vmem>>, vector<1x4x3xf32>
    %30 = vector.shape_cast %29 : vector<1x4x3xf32> to vector<4x3xf32>
    %cst_35 = arith.constant dense<0.000000e+00> : vector<4x648xf32>
    %31 = tpu.matmul %30, %28, %cst_35 {dimension_numbers = #tpu.dot_dimension_numbers<[1], [0], [0], [1], [0, 0, 1, 1], [], []>} : vector<4x3xf32>, vector<3x648xf32>, vector<4x648xf32> -> vector<4x648xf32>
    %32 = arith.addf %27, %31 : vector<4x648xf32>
    %c0_36 = arith.constant 0 : index
    %c129 = arith.constant 129 : index
    %33 = vector.load %arg19[%c0_36, %c129] : memref<32x896xf32, #tpu.memory_space<vmem>>, vector<3x648xf32>
    %c5 = arith.constant 5 : index
    %c0_37 = arith.constant 0 : index
    %c0_38 = arith.constant 0 : index
    %34 = vector.load %arg2[%c5, %c0_37, %c0_38] : memref<9x4x3xf32, #tpu.memory_space<vmem>>, vector<1x4x3xf32>
    %35 = vector.shape_cast %34 : vector<1x4x3xf32> to vector<4x3xf32>
    %cst_39 = arith.constant dense<0.000000e+00> : vector<4x648xf32>
    %36 = tpu.matmul %35, %33, %cst_39 {dimension_numbers = #tpu.dot_dimension_numbers<[1], [0], [0], [1], [0, 0, 1, 1], [], []>} : vector<4x3xf32>, vector<3x648xf32>, vector<4x648xf32> -> vector<4x648xf32>
    %37 = arith.addf %32, %36 : vector<4x648xf32>
    %c0_40 = arith.constant 0 : index
    %c145 = arith.constant 145 : index
    %38 = vector.load %arg19[%c0_40, %c145] : memref<32x896xf32, #tpu.memory_space<vmem>>, vector<3x648xf32>
    %c6 = arith.constant 6 : index
    %c0_41 = arith.constant 0 : index
    %c0_42 = arith.constant 0 : index
    %39 = vector.load %arg2[%c6, %c0_41, %c0_42] : memref<9x4x3xf32, #tpu.memory_space<vmem>>, vector<1x4x3xf32>
    %40 = vector.shape_cast %39 : vector<1x4x3xf32> to vector<4x3xf32>
    %cst_43 = arith.constant dense<0.000000e+00> : vector<4x648xf32>
    %41 = tpu.matmul %40, %38, %cst_43 {dimension_numbers = #tpu.dot_dimension_numbers<[1], [0], [0], [1], [0, 0, 1, 1], [], []>} : vector<4x3xf32>, vector<3x648xf32>, vector<4x648xf32> -> vector<4x648xf32>
    %42 = arith.addf %37, %41 : vector<4x648xf32>
    %c0_44 = arith.constant 0 : index
    %c146 = arith.constant 146 : index
    %43 = vector.load %arg19[%c0_44, %c146] : memref<32x896xf32, #tpu.memory_space<vmem>>, vector<3x648xf32>
    %c7 = arith.constant 7 : index
    %c0_45 = arith.constant 0 : index
    %c0_46 = arith.constant 0 : index
    %44 = vector.load %arg2[%c7, %c0_45, %c0_46] : memref<9x4x3xf32, #tpu.memory_space<vmem>>, vector<1x4x3xf32>
    %45 = vector.shape_cast %44 : vector<1x4x3xf32> to vector<4x3xf32>
    %cst_47 = arith.constant dense<0.000000e+00> : vector<4x648xf32>
    %46 = tpu.matmul %45, %43, %cst_47 {dimension_numbers = #tpu.dot_dimension_numbers<[1], [0], [0], [1], [0, 0, 1, 1], [], []>} : vector<4x3xf32>, vector<3x648xf32>, vector<4x648xf32> -> vector<4x648xf32>
    %47 = arith.addf %42, %46 : vector<4x648xf32>
    %c0_48 = arith.constant 0 : index
    %c147 = arith.constant 147 : index
    %48 = vector.load %arg19[%c0_48, %c147] : memref<32x896xf32, #tpu.memory_space<vmem>>, vector<3x648xf32>
    %c8 = arith.constant 8 : index
    %c0_49 = arith.constant 0 : index
    %c0_50 = arith.constant 0 : index
    %49 = vector.load %arg2[%c8, %c0_49, %c0_50] : memref<9x4x3xf32, #tpu.memory_space<vmem>>, vector<1x4x3xf32>
    %50 = vector.shape_cast %49 : vector<1x4x3xf32> to vector<4x3xf32>
    %cst_51 = arith.constant dense<0.000000e+00> : vector<4x648xf32>
    %51 = tpu.matmul %50, %48, %cst_51 {dimension_numbers = #tpu.dot_dimension_numbers<[1], [0], [0], [1], [0, 0, 1, 1], [], []>} : vector<4x3xf32>, vector<3x648xf32>, vector<4x648xf32> -> vector<4x648xf32>
    %52 = arith.addf %47, %51 : vector<4x648xf32>
    %c0_52 = arith.constant 0 : index
    %c0_53 = arith.constant 0 : index
    %53 = vector.load %arg3[%c0_52, %c0_53] : memref<4x1xf32, #tpu.memory_space<vmem>>, vector<4x1xf32>
    %54 = vector.broadcast %53 : vector<4x1xf32> to vector<4x648xf32>
    %55 = arith.addf %52, %54 : vector<4x648xf32>
    %cst_54 = arith.constant 0.000000e+00 : f32
    %56 = vector.broadcast %cst_54 : f32 to vector<4x648xf32>
    %57 = arith.maximumf %55, %56 : vector<4x648xf32>
    %58 = vector.broadcast %4 : vector<1x648xf32> to vector<4x648xf32>
    %59 = arith.mulf %57, %58 : vector<4x648xf32>
    %cst_55 = arith.constant dense<0.000000e+00> : vector<4xf32>
    %60 = vector.multi_reduction <add>, %59, %cst_55 [1] : vector<4x648xf32> to vector<4xf32>
    %61 = vector.shape_cast %60 : vector<4xf32> to vector<4x1xf32>
    %62 = arith.mulf %59, %57 : vector<4x648xf32>
    %cst_56 = arith.constant dense<0.000000e+00> : vector<4xf32>
    %63 = vector.multi_reduction <add>, %62, %cst_56 [1] : vector<4x648xf32> to vector<4xf32>
    %64 = vector.shape_cast %63 : vector<4xf32> to vector<4x1xf32>
    %cst_57 = arith.constant 0.001953125 : f32
    %65 = vector.broadcast %cst_57 : f32 to vector<4x1xf32>
    %66 = arith.mulf %61, %65 : vector<4x1xf32>
    %cst_58 = arith.constant 0.001953125 : f32
    %67 = vector.broadcast %cst_58 : f32 to vector<4x1xf32>
    %68 = arith.mulf %64, %67 : vector<4x1xf32>
    %69 = arith.mulf %66, %66 : vector<4x1xf32>
    %70 = arith.subf %68, %69 : vector<4x1xf32>
    %cst_59 = arith.constant 0.000000e+00 : f32
    %71 = vector.broadcast %cst_59 : f32 to vector<4x1xf32>
    %72 = arith.maximumf %70, %71 : vector<4x1xf32>
    %cst_60 = arith.constant 9.99999974E-6 : f32
    %73 = vector.broadcast %cst_60 : f32 to vector<4x1xf32>
    %74 = arith.addf %72, %73 : vector<4x1xf32>
    %75 = math.rsqrt %74 : vector<4x1xf32>
    %c0_61 = arith.constant 0 : index
    %c0_62 = arith.constant 0 : index
    %76 = vector.load %arg4[%c0_61, %c0_62] : memref<4x1xf32, #tpu.memory_space<vmem>>, vector<4x1xf32>
    %77 = arith.mulf %75, %76 : vector<4x1xf32>
    %78 = vector.broadcast %66 : vector<4x1xf32> to vector<4x648xf32>
    %79 = arith.subf %57, %78 : vector<4x648xf32>
    %80 = vector.broadcast %77 : vector<4x1xf32> to vector<4x648xf32>
    %81 = arith.mulf %79, %80 : vector<4x648xf32>
    %c0_63 = arith.constant 0 : index
    %c0_64 = arith.constant 0 : index
    %82 = vector.load %arg5[%c0_63, %c0_64] : memref<4x1xf32, #tpu.memory_space<vmem>>, vector<4x1xf32>
    %83 = vector.broadcast %82 : vector<4x1xf32> to vector<4x648xf32>
    %84 = arith.addf %81, %83 : vector<4x648xf32>
    %c0_65 = arith.constant 0 : index
    %c128_66 = arith.constant 128 : index
    %85 = vector.load %arg19[%c0_65, %c128_66] : memref<32x896xf32, #tpu.memory_space<vmem>>, vector<4x648xf32>
    tpu.vector_store %arg19[%c0_65, %c128_66], %84 {strides = array<i32>} : memref<32x896xf32, #tpu.memory_space<vmem>>, vector<4x648xf32>,
    %c0_67 = arith.constant 0 : index
    %c164 = arith.constant 164 : index
    %86 = vector.load %arg19[%c0_67, %c164] : memref<32x896xf32, #tpu.memory_space<vmem>>, vector<4x648xf32>
    %c0_68 = arith.constant 0 : index
    %c92 = arith.constant 92 : index
    %87 = vector.load %arg19[%c0_68, %c92] : memref<32x896xf32, #tpu.memory_space<vmem>>, vector<4x648xf32>
    %cst_69 = arith.constant 1.000000e+00 : f32
    %88 = vector.broadcast %cst_69 : f32 to vector<1x648xf32>
    %89 = arith.subf %88, %0 : vector<1x648xf32>
    %90 = arith.subf %89, %1 : vector<1x648xf32>
    %91 = vector.broadcast %90 : vector<1x648xf32> to vector<4x648xf32>
    %92 = arith.mulf %84, %91 : vector<4x648xf32>
    %93 = vector.broadcast %0 : vector<1x648xf32> to vector<4x648xf32>
    %94 = arith.mulf %86, %93 : vector<4x648xf32>
    %95 = arith.addf %92, %94 : vector<4x648xf32>
    %96 = vector.broadcast %1 : vector<1x648xf32> to vector<4x648xf32>
    %97 = arith.mulf %87, %96 : vector<4x648xf32>
    %98 = arith.addf %95, %97 : vector<4x648xf32>
    %c0_70 = arith.constant 0 : index
    %c128_71 = arith.constant 128 : index
    %99 = vector.load %arg19[%c0_70, %c128_71] : memref<32x896xf32, #tpu.memory_space<vmem>>, vector<4x648xf32>
    tpu.vector_store %arg19[%c0_70, %c128_71], %98 {strides = array<i32>} : memref<32x896xf32, #tpu.memory_space<vmem>>, vector<4x648xf32>,
    %c0_72 = arith.constant 0 : index
    %c130 = arith.constant 130 : index
    %100 = vector.load %arg19[%c0_72, %c130] : memref<32x896xf32, #tpu.memory_space<vmem>>, vector<4x648xf32>
    %c0_73 = arith.constant 0 : index
    %c126 = arith.constant 126 : index
    %101 = vector.load %arg19[%c0_73, %c126] : memref<32x896xf32, #tpu.memory_space<vmem>>, vector<4x648xf32>
    %cst_74 = arith.constant 1.000000e+00 : f32
    %102 = vector.broadcast %cst_74 : f32 to vector<1x648xf32>
    %103 = arith.subf %102, %2 : vector<1x648xf32>
    %104 = arith.subf %103, %3 : vector<1x648xf32>
    %105 = vector.broadcast %104 : vector<1x648xf32> to vector<4x648xf32>
    %106 = arith.mulf %98, %105 : vector<4x648xf32>
    %107 = vector.broadcast %2 : vector<1x648xf32> to vector<4x648xf32>
    %108 = arith.mulf %100, %107 : vector<4x648xf32>
    %109 = arith.addf %106, %108 : vector<4x648xf32>
    %110 = vector.broadcast %3 : vector<1x648xf32> to vector<4x648xf32>
    %111 = arith.mulf %101, %110 : vector<4x648xf32>
    %112 = arith.addf %109, %111 : vector<4x648xf32>
    %c0_75 = arith.constant 0 : index
    %c128_76 = arith.constant 128 : index
    %113 = vector.load %arg19[%c0_75, %c128_76] : memref<32x896xf32, #tpu.memory_space<vmem>>, vector<4x648xf32>
    tpu.vector_store %arg19[%c0_75, %c128_76], %112 {strides = array<i32>} : memref<32x896xf32, #tpu.memory_space<vmem>>, vector<4x648xf32>,
    %c0_77 = arith.constant 0 : index
    %c109_78 = arith.constant 109 : index
    %114 = vector.load %arg19[%c0_77, %c109_78] : memref<32x896xf32, #tpu.memory_space<vmem>>, vector<4x648xf32>
    %c0_79 = arith.constant 0 : index
    %c0_80 = arith.constant 0 : index
    %c0_81 = arith.constant 0 : index
    %115 = vector.load %arg6[%c0_79, %c0_80, %c0_81] : memref<9x8x4xf32, #tpu.memory_space<vmem>>, vector<1x8x4xf32>
    %116 = vector.shape_cast %115 : vector<1x8x4xf32> to vector<8x4xf32>
    %cst_82 = arith.constant dense<0.000000e+00> : vector<8x648xf32>
    %117 = tpu.matmul %116, %114, %cst_82 {dimension_numbers = #tpu.dot_dimension_numbers<[1], [0], [0], [1], [0, 0, 1, 1], [], []>} : vector<8x4xf32>, vector<4x648xf32>, vector<8x648xf32> -> vector<8x648xf32>
    %c0_83 = arith.constant 0 : index
    %c110_84 = arith.constant 110 : index
    %118 = vector.load %arg19[%c0_83, %c110_84] : memref<32x896xf32, #tpu.memory_space<vmem>>, vector<4x648xf32>
    %c1_85 = arith.constant 1 : index
    %c0_86 = arith.constant 0 : index
    %c0_87 = arith.constant 0 : index
    %119 = vector.load %arg6[%c1_85, %c0_86, %c0_87] : memref<9x8x4xf32, #tpu.memory_space<vmem>>, vector<1x8x4xf32>
    %120 = vector.shape_cast %119 : vector<1x8x4xf32> to vector<8x4xf32>
    %cst_88 = arith.constant dense<0.000000e+00> : vector<8x648xf32>
    %121 = tpu.matmul %120, %118, %cst_88 {dimension_numbers = #tpu.dot_dimension_numbers<[1], [0], [0], [1], [0, 0, 1, 1], [], []>} : vector<8x4xf32>, vector<4x648xf32>, vector<8x648xf32> -> vector<8x648xf32>
    %122 = arith.addf %117, %121 : vector<8x648xf32>
    %c0_89 = arith.constant 0 : index
    %c111_90 = arith.constant 111 : index
    %123 = vector.load %arg19[%c0_89, %c111_90] : memref<32x896xf32, #tpu.memory_space<vmem>>, vector<4x648xf32>
    %c2_91 = arith.constant 2 : index
    %c0_92 = arith.constant 0 : index
    %c0_93 = arith.constant 0 : index
    %124 = vector.load %arg6[%c2_91, %c0_92, %c0_93] : memref<9x8x4xf32, #tpu.memory_space<vmem>>, vector<1x8x4xf32>
    %125 = vector.shape_cast %124 : vector<1x8x4xf32> to vector<8x4xf32>
    %cst_94 = arith.constant dense<0.000000e+00> : vector<8x648xf32>
    %126 = tpu.matmul %125, %123, %cst_94 {dimension_numbers = #tpu.dot_dimension_numbers<[1], [0], [0], [1], [0, 0, 1, 1], [], []>} : vector<8x4xf32>, vector<4x648xf32>, vector<8x648xf32> -> vector<8x648xf32>
    %127 = arith.addf %122, %126 : vector<8x648xf32>
    %c0_95 = arith.constant 0 : index
    %c127_96 = arith.constant 127 : index
    %128 = vector.load %arg19[%c0_95, %c127_96] : memref<32x896xf32, #tpu.memory_space<vmem>>, vector<4x648xf32>
    %c3_97 = arith.constant 3 : index
    %c0_98 = arith.constant 0 : index
    %c0_99 = arith.constant 0 : index
    %129 = vector.load %arg6[%c3_97, %c0_98, %c0_99] : memref<9x8x4xf32, #tpu.memory_space<vmem>>, vector<1x8x4xf32>
    %130 = vector.shape_cast %129 : vector<1x8x4xf32> to vector<8x4xf32>
    %cst_100 = arith.constant dense<0.000000e+00> : vector<8x648xf32>
    %131 = tpu.matmul %130, %128, %cst_100 {dimension_numbers = #tpu.dot_dimension_numbers<[1], [0], [0], [1], [0, 0, 1, 1], [], []>} : vector<8x4xf32>, vector<4x648xf32>, vector<8x648xf32> -> vector<8x648xf32>
    %132 = arith.addf %127, %131 : vector<8x648xf32>
    %c0_101 = arith.constant 0 : index
    %c128_102 = arith.constant 128 : index
    %133 = vector.load %arg19[%c0_101, %c128_102] : memref<32x896xf32, #tpu.memory_space<vmem>>, vector<4x648xf32>
    %c4_103 = arith.constant 4 : index
    %c0_104 = arith.constant 0 : index
    %c0_105 = arith.constant 0 : index
    %134 = vector.load %arg6[%c4_103, %c0_104, %c0_105] : memref<9x8x4xf32, #tpu.memory_space<vmem>>, vector<1x8x4xf32>
    %135 = vector.shape_cast %134 : vector<1x8x4xf32> to vector<8x4xf32>
    %cst_106 = arith.constant dense<0.000000e+00> : vector<8x648xf32>
    %136 = tpu.matmul %135, %133, %cst_106 {dimension_numbers = #tpu.dot_dimension_numbers<[1], [0], [0], [1], [0, 0, 1, 1], [], []>} : vector<8x4xf32>, vector<4x648xf32>, vector<8x648xf32> -> vector<8x648xf32>
    %137 = arith.addf %132, %136 : vector<8x648xf32>
    %c0_107 = arith.constant 0 : index
    %c129_108 = arith.constant 129 : index
    %138 = vector.load %arg19[%c0_107, %c129_108] : memref<32x896xf32, #tpu.memory_space<vmem>>, vector<4x648xf32>
    %c5_109 = arith.constant 5 : index
    %c0_110 = arith.constant 0 : index
    %c0_111 = arith.constant 0 : index
    %139 = vector.load %arg6[%c5_109, %c0_110, %c0_111] : memref<9x8x4xf32, #tpu.memory_space<vmem>>, vector<1x8x4xf32>
    %140 = vector.shape_cast %139 : vector<1x8x4xf32> to vector<8x4xf32>
    %cst_112 = arith.constant dense<0.000000e+00> : vector<8x648xf32>
    %141 = tpu.matmul %140, %138, %cst_112 {dimension_numbers = #tpu.dot_dimension_numbers<[1], [0], [0], [1], [0, 0, 1, 1], [], []>} : vector<8x4xf32>, vector<4x648xf32>, vector<8x648xf32> -> vector<8x648xf32>
    %142 = arith.addf %137, %141 : vector<8x648xf32>
    %c0_113 = arith.constant 0 : index
    %c145_114 = arith.constant 145 : index
    %143 = vector.load %arg19[%c0_113, %c145_114] : memref<32x896xf32, #tpu.memory_space<vmem>>, vector<4x648xf32>
    %c6_115 = arith.constant 6 : index
    %c0_116 = arith.constant 0 : index
    %c0_117 = arith.constant 0 : index
    %144 = vector.load %arg6[%c6_115, %c0_116, %c0_117] : memref<9x8x4xf32, #tpu.memory_space<vmem>>, vector<1x8x4xf32>
    %145 = vector.shape_cast %144 : vector<1x8x4xf32> to vector<8x4xf32>
    %cst_118 = arith.constant dense<0.000000e+00> : vector<8x648xf32>
    %146 = tpu.matmul %145, %143, %cst_118 {dimension_numbers = #tpu.dot_dimension_numbers<[1], [0], [0], [1], [0, 0, 1, 1], [], []>} : vector<8x4xf32>, vector<4x648xf32>, vector<8x648xf32> -> vector<8x648xf32>
    %147 = arith.addf %142, %146 : vector<8x648xf32>
    %c0_119 = arith.constant 0 : index
    %c146_120 = arith.constant 146 : index
    %148 = vector.load %arg19[%c0_119, %c146_120] : memref<32x896xf32, #tpu.memory_space<vmem>>, vector<4x648xf32>
    %c7_121 = arith.constant 7 : index
    %c0_122 = arith.constant 0 : index
    %c0_123 = arith.constant 0 : index
    %149 = vector.load %arg6[%c7_121, %c0_122, %c0_123] : memref<9x8x4xf32, #tpu.memory_space<vmem>>, vector<1x8x4xf32>
    %150 = vector.shape_cast %149 : vector<1x8x4xf32> to vector<8x4xf32>
    %cst_124 = arith.constant dense<0.000000e+00> : vector<8x648xf32>
    %151 = tpu.matmul %150, %148, %cst_124 {dimension_numbers = #tpu.dot_dimension_numbers<[1], [0], [0], [1], [0, 0, 1, 1], [], []>} : vector<8x4xf32>, vector<4x648xf32>, vector<8x648xf32> -> vector<8x648xf32>
    %152 = arith.addf %147, %151 : vector<8x648xf32>
    %c0_125 = arith.constant 0 : index
    %c147_126 = arith.constant 147 : index
    %153 = vector.load %arg19[%c0_125, %c147_126] : memref<32x896xf32, #tpu.memory_space<vmem>>, vector<4x648xf32>
    %c8_127 = arith.constant 8 : index
    %c0_128 = arith.constant 0 : index
    %c0_129 = arith.constant 0 : index
    %154 = vector.load %arg6[%c8_127, %c0_128, %c0_129] : memref<9x8x4xf32, #tpu.memory_space<vmem>>, vector<1x8x4xf32>
    %155 = vector.shape_cast %154 : vector<1x8x4xf32> to vector<8x4xf32>
    %cst_130 = arith.constant dense<0.000000e+00> : vector<8x648xf32>
    %156 = tpu.matmul %155, %153, %cst_130 {dimension_numbers = #tpu.dot_dimension_numbers<[1], [0], [0], [1], [0, 0, 1, 1], [], []>} : vector<8x4xf32>, vector<4x648xf32>, vector<8x648xf32> -> vector<8x648xf32>
    %157 = arith.addf %152, %156 : vector<8x648xf32>
    %c0_131 = arith.constant 0 : index
    %c0_132 = arith.constant 0 : index
    %158 = vector.load %arg7[%c0_131, %c0_132] : memref<8x1xf32, #tpu.memory_space<vmem>>, vector<8x1xf32>
    %159 = vector.broadcast %158 : vector<8x1xf32> to vector<8x648xf32>
    %160 = arith.addf %157, %159 : vector<8x648xf32>
    %cst_133 = arith.constant 0.000000e+00 : f32
    %161 = vector.broadcast %cst_133 : f32 to vector<8x648xf32>
    %162 = arith.maximumf %160, %161 : vector<8x648xf32>
    %163 = vector.broadcast %4 : vector<1x648xf32> to vector<8x648xf32>
    %164 = arith.mulf %162, %163 : vector<8x648xf32>
    %cst_134 = arith.constant dense<0.000000e+00> : vector<8xf32>
    %165 = vector.multi_reduction <add>, %164, %cst_134 [1] : vector<8x648xf32> to vector<8xf32>
    %166 = vector.shape_cast %165 : vector<8xf32> to vector<8x1xf32>
    %167 = arith.mulf %164, %162 : vector<8x648xf32>
    %cst_135 = arith.constant dense<0.000000e+00> : vector<8xf32>
    %168 = vector.multi_reduction <add>, %167, %cst_135 [1] : vector<8x648xf32> to vector<8xf32>
    %169 = vector.shape_cast %168 : vector<8xf32> to vector<8x1xf32>
    %cst_136 = arith.constant 0.001953125 : f32
    %170 = vector.broadcast %cst_136 : f32 to vector<8x1xf32>
    %171 = arith.mulf %166, %170 : vector<8x1xf32>
    %cst_137 = arith.constant 0.001953125 : f32
    %172 = vector.broadcast %cst_137 : f32 to vector<8x1xf32>
    %173 = arith.mulf %169, %172 : vector<8x1xf32>
    %174 = arith.mulf %171, %171 : vector<8x1xf32>
    %175 = arith.subf %173, %174 : vector<8x1xf32>
    %cst_138 = arith.constant 0.000000e+00 : f32
    %176 = vector.broadcast %cst_138 : f32 to vector<8x1xf32>
    %177 = arith.maximumf %175, %176 : vector<8x1xf32>
    %cst_139 = arith.constant 9.99999974E-6 : f32
    %178 = vector.broadcast %cst_139 : f32 to vector<8x1xf32>
    %179 = arith.addf %177, %178 : vector<8x1xf32>
    %180 = math.rsqrt %179 : vector<8x1xf32>
    %c0_140 = arith.constant 0 : index
    %c0_141 = arith.constant 0 : index
    %181 = vector.load %arg8[%c0_140, %c0_141] : memref<8x1xf32, #tpu.memory_space<vmem>>, vector<8x1xf32>
    %182 = arith.mulf %180, %181 : vector<8x1xf32>
    %183 = vector.broadcast %171 : vector<8x1xf32> to vector<8x648xf32>
    %184 = arith.subf %162, %183 : vector<8x648xf32>
    %185 = vector.broadcast %182 : vector<8x1xf32> to vector<8x648xf32>
    %186 = arith.mulf %184, %185 : vector<8x648xf32>
    %c0_142 = arith.constant 0 : index
    %c0_143 = arith.constant 0 : index
    %187 = vector.load %arg9[%c0_142, %c0_143] : memref<8x1xf32, #tpu.memory_space<vmem>>, vector<8x1xf32>
    %188 = vector.broadcast %187 : vector<8x1xf32> to vector<8x648xf32>
    %189 = arith.addf %186, %188 : vector<8x648xf32>
    %c0_144 = arith.constant 0 : index
    %c128_145 = arith.constant 128 : index
    %190 = vector.load %arg19[%c0_144, %c128_145] : memref<32x896xf32, #tpu.memory_space<vmem>>, vector<8x648xf32>
    tpu.vector_store %arg19[%c0_144, %c128_145], %189 {strides = array<i32>} : memref<32x896xf32, #tpu.memory_space<vmem>>, vector<8x648xf32>,
    %c0_146 = arith.constant 0 : index
    %c164_147 = arith.constant 164 : index
    %191 = vector.load %arg19[%c0_146, %c164_147] : memref<32x896xf32, #tpu.memory_space<vmem>>, vector<8x648xf32>
    %c0_148 = arith.constant 0 : index
    %c92_149 = arith.constant 92 : index
    %192 = vector.load %arg19[%c0_148, %c92_149] : memref<32x896xf32, #tpu.memory_space<vmem>>, vector<8x648xf32>
    %cst_150 = arith.constant 1.000000e+00 : f32
    %193 = vector.broadcast %cst_150 : f32 to vector<1x648xf32>
    %194 = arith.subf %193, %0 : vector<1x648xf32>
    %195 = arith.subf %194, %1 : vector<1x648xf32>
    %196 = vector.broadcast %195 : vector<1x648xf32> to vector<8x648xf32>
    %197 = arith.mulf %189, %196 : vector<8x648xf32>
    %198 = vector.broadcast %0 : vector<1x648xf32> to vector<8x648xf32>
    %199 = arith.mulf %191, %198 : vector<8x648xf32>
    %200 = arith.addf %197, %199 : vector<8x648xf32>
    %201 = vector.broadcast %1 : vector<1x648xf32> to vector<8x648xf32>
    %202 = arith.mulf %192, %201 : vector<8x648xf32>
    %203 = arith.addf %200, %202 : vector<8x648xf32>
    %c0_151 = arith.constant 0 : index
    %c128_152 = arith.constant 128 : index
    %204 = vector.load %arg19[%c0_151, %c128_152] : memref<32x896xf32, #tpu.memory_space<vmem>>, vector<8x648xf32>
    tpu.vector_store %arg19[%c0_151, %c128_152], %203 {strides = array<i32>} : memref<32x896xf32, #tpu.memory_space<vmem>>, vector<8x648xf32>,
    %c0_153 = arith.constant 0 : index
    %c130_154 = arith.constant 130 : index
    %205 = vector.load %arg19[%c0_153, %c130_154] : memref<32x896xf32, #tpu.memory_space<vmem>>, vector<8x648xf32>
    %c0_155 = arith.constant 0 : index
    %c126_156 = arith.constant 126 : index
    %206 = vector.load %arg19[%c0_155, %c126_156] : memref<32x896xf32, #tpu.memory_space<vmem>>, vector<8x648xf32>
    %cst_157 = arith.constant 1.000000e+00 : f32
    %207 = vector.broadcast %cst_157 : f32 to vector<1x648xf32>
    %208 = arith.subf %207, %2 : vector<1x648xf32>
    %209 = arith.subf %208, %3 : vector<1x648xf32>
    %210 = vector.broadcast %209 : vector<1x648xf32> to vector<8x648xf32>
    %211 = arith.mulf %203, %210 : vector<8x648xf32>
    %212 = vector.broadcast %2 : vector<1x648xf32> to vector<8x648xf32>
    %213 = arith.mulf %205, %212 : vector<8x648xf32>
    %214 = arith.addf %211, %213 : vector<8x648xf32>
    %215 = vector.broadcast %3 : vector<1x648xf32> to vector<8x648xf32>
    %216 = arith.mulf %206, %215 : vector<8x648xf32>
    %217 = arith.addf %214, %216 : vector<8x648xf32>
    %c0_158 = arith.constant 0 : index
    %c128_159 = arith.constant 128 : index
    %218 = vector.load %arg19[%c0_158, %c128_159] : memref<32x896xf32, #tpu.memory_space<vmem>>, vector<8x648xf32>
    tpu.vector_store %arg19[%c0_158, %c128_159], %217 {strides = array<i32>} : memref<32x896xf32, #tpu.memory_space<vmem>>, vector<8x648xf32>,
    %c0_160 = arith.constant 0 : index
    %c109_161 = arith.constant 109 : index
    %219 = vector.load %arg19[%c0_160, %c109_161] : memref<32x896xf32, #tpu.memory_space<vmem>>, vector<8x648xf32>
    %c0_162 = arith.constant 0 : index
    %c0_163 = arith.constant 0 : index
    %c0_164 = arith.constant 0 : index
    %220 = vector.load %arg10[%c0_162, %c0_163, %c0_164] : memref<9x16x8xf32, #tpu.memory_space<vmem>>, vector<1x16x8xf32>
    %221 = vector.shape_cast %220 : vector<1x16x8xf32> to vector<16x8xf32>
    %cst_165 = arith.constant dense<0.000000e+00> : vector<16x648xf32>
    %222 = tpu.matmul %221, %219, %cst_165 {dimension_numbers = #tpu.dot_dimension_numbers<[1], [0], [0], [1], [0, 0, 1, 1], [], []>} : vector<16x8xf32>, vector<8x648xf32>, vector<16x648xf32> -> vector<16x648xf32>
    %c0_166 = arith.constant 0 : index
    %c110_167 = arith.constant 110 : index
    %223 = vector.load %arg19[%c0_166, %c110_167] : memref<32x896xf32, #tpu.memory_space<vmem>>, vector<8x648xf32>
    %c1_168 = arith.constant 1 : index
    %c0_169 = arith.constant 0 : index
    %c0_170 = arith.constant 0 : index
    %224 = vector.load %arg10[%c1_168, %c0_169, %c0_170] : memref<9x16x8xf32, #tpu.memory_space<vmem>>, vector<1x16x8xf32>
    %225 = vector.shape_cast %224 : vector<1x16x8xf32> to vector<16x8xf32>
    %cst_171 = arith.constant dense<0.000000e+00> : vector<16x648xf32>
    %226 = tpu.matmul %225, %223, %cst_171 {dimension_numbers = #tpu.dot_dimension_numbers<[1], [0], [0], [1], [0, 0, 1, 1], [], []>} : vector<16x8xf32>, vector<8x648xf32>, vector<16x648xf32> -> vector<16x648xf32>
    %227 = arith.addf %222, %226 : vector<16x648xf32>
    %c0_172 = arith.constant 0 : index
    %c111_173 = arith.constant 111 : index
    %228 = vector.load %arg19[%c0_172, %c111_173] : memref<32x896xf32, #tpu.memory_space<vmem>>, vector<8x648xf32>
    %c2_174 = arith.constant 2 : index
    %c0_175 = arith.constant 0 : index
    %c0_176 = arith.constant 0 : index
    %229 = vector.load %arg10[%c2_174, %c0_175, %c0_176] : memref<9x16x8xf32, #tpu.memory_space<vmem>>, vector<1x16x8xf32>
    %230 = vector.shape_cast %229 : vector<1x16x8xf32> to vector<16x8xf32>
    %cst_177 = arith.constant dense<0.000000e+00> : vector<16x648xf32>
    %231 = tpu.matmul %230, %228, %cst_177 {dimension_numbers = #tpu.dot_dimension_numbers<[1], [0], [0], [1], [0, 0, 1, 1], [], []>} : vector<16x8xf32>, vector<8x648xf32>, vector<16x648xf32> -> vector<16x648xf32>
    %232 = arith.addf %227, %231 : vector<16x648xf32>
    %c0_178 = arith.constant 0 : index
    %c127_179 = arith.constant 127 : index
    %233 = vector.load %arg19[%c0_178, %c127_179] : memref<32x896xf32, #tpu.memory_space<vmem>>, vector<8x648xf32>
    %c3_180 = arith.constant 3 : index
    %c0_181 = arith.constant 0 : index
    %c0_182 = arith.constant 0 : index
    %234 = vector.load %arg10[%c3_180, %c0_181, %c0_182] : memref<9x16x8xf32, #tpu.memory_space<vmem>>, vector<1x16x8xf32>
    %235 = vector.shape_cast %234 : vector<1x16x8xf32> to vector<16x8xf32>
    %cst_183 = arith.constant dense<0.000000e+00> : vector<16x648xf32>
    %236 = tpu.matmul %235, %233, %cst_183 {dimension_numbers = #tpu.dot_dimension_numbers<[1], [0], [0], [1], [0, 0, 1, 1], [], []>} : vector<16x8xf32>, vector<8x648xf32>, vector<16x648xf32> -> vector<16x648xf32>
    %237 = arith.addf %232, %236 : vector<16x648xf32>
    %c0_184 = arith.constant 0 : index
    %c128_185 = arith.constant 128 : index
    %238 = vector.load %arg19[%c0_184, %c128_185] : memref<32x896xf32, #tpu.memory_space<vmem>>, vector<8x648xf32>
    %c4_186 = arith.constant 4 : index
    %c0_187 = arith.constant 0 : index
    %c0_188 = arith.constant 0 : index
    %239 = vector.load %arg10[%c4_186, %c0_187, %c0_188] : memref<9x16x8xf32, #tpu.memory_space<vmem>>, vector<1x16x8xf32>
    %240 = vector.shape_cast %239 : vector<1x16x8xf32> to vector<16x8xf32>
    %cst_189 = arith.constant dense<0.000000e+00> : vector<16x648xf32>
    %241 = tpu.matmul %240, %238, %cst_189 {dimension_numbers = #tpu.dot_dimension_numbers<[1], [0], [0], [1], [0, 0, 1, 1], [], []>} : vector<16x8xf32>, vector<8x648xf32>, vector<16x648xf32> -> vector<16x648xf32>
    %242 = arith.addf %237, %241 : vector<16x648xf32>
    %c0_190 = arith.constant 0 : index
    %c129_191 = arith.constant 129 : index
    %243 = vector.load %arg19[%c0_190, %c129_191] : memref<32x896xf32, #tpu.memory_space<vmem>>, vector<8x648xf32>
    %c5_192 = arith.constant 5 : index
    %c0_193 = arith.constant 0 : index
    %c0_194 = arith.constant 0 : index
    %244 = vector.load %arg10[%c5_192, %c0_193, %c0_194] : memref<9x16x8xf32, #tpu.memory_space<vmem>>, vector<1x16x8xf32>
    %245 = vector.shape_cast %244 : vector<1x16x8xf32> to vector<16x8xf32>
    %cst_195 = arith.constant dense<0.000000e+00> : vector<16x648xf32>
    %246 = tpu.matmul %245, %243, %cst_195 {dimension_numbers = #tpu.dot_dimension_numbers<[1], [0], [0], [1], [0, 0, 1, 1], [], []>} : vector<16x8xf32>, vector<8x648xf32>, vector<16x648xf32> -> vector<16x648xf32>
    %247 = arith.addf %242, %246 : vector<16x648xf32>
    %c0_196 = arith.constant 0 : index
    %c145_197 = arith.constant 145 : index
    %248 = vector.load %arg19[%c0_196, %c145_197] : memref<32x896xf32, #tpu.memory_space<vmem>>, vector<8x648xf32>
    %c6_198 = arith.constant 6 : index
    %c0_199 = arith.constant 0 : index
    %c0_200 = arith.constant 0 : index
    %249 = vector.load %arg10[%c6_198, %c0_199, %c0_200] : memref<9x16x8xf32, #tpu.memory_space<vmem>>, vector<1x16x8xf32>
    %250 = vector.shape_cast %249 : vector<1x16x8xf32> to vector<16x8xf32>
    %cst_201 = arith.constant dense<0.000000e+00> : vector<16x648xf32>
    %251 = tpu.matmul %250, %248, %cst_201 {dimension_numbers = #tpu.dot_dimension_numbers<[1], [0], [0], [1], [0, 0, 1, 1], [], []>} : vector<16x8xf32>, vector<8x648xf32>, vector<16x648xf32> -> vector<16x648xf32>
    %252 = arith.addf %247, %251 : vector<16x648xf32>
    %c0_202 = arith.constant 0 : index
    %c146_203 = arith.constant 146 : index
    %253 = vector.load %arg19[%c0_202, %c146_203] : memref<32x896xf32, #tpu.memory_space<vmem>>, vector<8x648xf32>
    %c7_204 = arith.constant 7 : index
    %c0_205 = arith.constant 0 : index
    %c0_206 = arith.constant 0 : index
    %254 = vector.load %arg10[%c7_204, %c0_205, %c0_206] : memref<9x16x8xf32, #tpu.memory_space<vmem>>, vector<1x16x8xf32>
    %255 = vector.shape_cast %254 : vector<1x16x8xf32> to vector<16x8xf32>
    %cst_207 = arith.constant dense<0.000000e+00> : vector<16x648xf32>
    %256 = tpu.matmul %255, %253, %cst_207 {dimension_numbers = #tpu.dot_dimension_numbers<[1], [0], [0], [1], [0, 0, 1, 1], [], []>} : vector<16x8xf32>, vector<8x648xf32>, vector<16x648xf32> -> vector<16x648xf32>
    %257 = arith.addf %252, %256 : vector<16x648xf32>
    %c0_208 = arith.constant 0 : index
    %c147_209 = arith.constant 147 : index
    %258 = vector.load %arg19[%c0_208, %c147_209] : memref<32x896xf32, #tpu.memory_space<vmem>>, vector<8x648xf32>
    %c8_210 = arith.constant 8 : index
    %c0_211 = arith.constant 0 : index
    %c0_212 = arith.constant 0 : index
    %259 = vector.load %arg10[%c8_210, %c0_211, %c0_212] : memref<9x16x8xf32, #tpu.memory_space<vmem>>, vector<1x16x8xf32>
    %260 = vector.shape_cast %259 : vector<1x16x8xf32> to vector<16x8xf32>
    %cst_213 = arith.constant dense<0.000000e+00> : vector<16x648xf32>
    %261 = tpu.matmul %260, %258, %cst_213 {dimension_numbers = #tpu.dot_dimension_numbers<[1], [0], [0], [1], [0, 0, 1, 1], [], []>} : vector<16x8xf32>, vector<8x648xf32>, vector<16x648xf32> -> vector<16x648xf32>
    %262 = arith.addf %257, %261 : vector<16x648xf32>
    %c0_214 = arith.constant 0 : index
    %c0_215 = arith.constant 0 : index
    %263 = vector.load %arg11[%c0_214, %c0_215] : memref<16x1xf32, #tpu.memory_space<vmem>>, vector<16x1xf32>
    %264 = vector.broadcast %263 : vector<16x1xf32> to vector<16x648xf32>
    %265 = arith.addf %262, %264 : vector<16x648xf32>
    %cst_216 = arith.constant 0.000000e+00 : f32
    %266 = vector.broadcast %cst_216 : f32 to vector<16x648xf32>
    %267 = arith.maximumf %265, %266 : vector<16x648xf32>
    %268 = vector.broadcast %4 : vector<1x648xf32> to vector<16x648xf32>
    %269 = arith.mulf %267, %268 : vector<16x648xf32>
    %cst_217 = arith.constant dense<0.000000e+00> : vector<16xf32>
    %270 = vector.multi_reduction <add>, %269, %cst_217 [1] : vector<16x648xf32> to vector<16xf32>
    %271 = vector.shape_cast %270 : vector<16xf32> to vector<16x1xf32>
    %272 = arith.mulf %269, %267 : vector<16x648xf32>
    %cst_218 = arith.constant dense<0.000000e+00> : vector<16xf32>
    %273 = vector.multi_reduction <add>, %272, %cst_218 [1] : vector<16x648xf32> to vector<16xf32>
    %274 = vector.shape_cast %273 : vector<16xf32> to vector<16x1xf32>
    %cst_219 = arith.constant 0.001953125 : f32
    %275 = vector.broadcast %cst_219 : f32 to vector<16x1xf32>
    %276 = arith.mulf %271, %275 : vector<16x1xf32>
    %cst_220 = arith.constant 0.001953125 : f32
    %277 = vector.broadcast %cst_220 : f32 to vector<16x1xf32>
    %278 = arith.mulf %274, %277 : vector<16x1xf32>
    %279 = arith.mulf %276, %276 : vector<16x1xf32>
    %280 = arith.subf %278, %279 : vector<16x1xf32>
    %cst_221 = arith.constant 0.000000e+00 : f32
    %281 = vector.broadcast %cst_221 : f32 to vector<16x1xf32>
    %282 = arith.maximumf %280, %281 : vector<16x1xf32>
    %cst_222 = arith.constant 9.99999974E-6 : f32
    %283 = vector.broadcast %cst_222 : f32 to vector<16x1xf32>
    %284 = arith.addf %282, %283 : vector<16x1xf32>
    %285 = math.rsqrt %284 : vector<16x1xf32>
    %c0_223 = arith.constant 0 : index
    %c0_224 = arith.constant 0 : index
    %286 = vector.load %arg12[%c0_223, %c0_224] : memref<16x1xf32, #tpu.memory_space<vmem>>, vector<16x1xf32>
    %287 = arith.mulf %285, %286 : vector<16x1xf32>
    %288 = vector.broadcast %276 : vector<16x1xf32> to vector<16x648xf32>
    %289 = arith.subf %267, %288 : vector<16x648xf32>
    %290 = vector.broadcast %287 : vector<16x1xf32> to vector<16x648xf32>
    %291 = arith.mulf %289, %290 : vector<16x648xf32>
    %c0_225 = arith.constant 0 : index
    %c0_226 = arith.constant 0 : index
    %292 = vector.load %arg13[%c0_225, %c0_226] : memref<16x1xf32, #tpu.memory_space<vmem>>, vector<16x1xf32>
    %293 = vector.broadcast %292 : vector<16x1xf32> to vector<16x648xf32>
    %294 = arith.addf %291, %293 : vector<16x648xf32>
    %c0_227 = arith.constant 0 : index
    %c128_228 = arith.constant 128 : index
    %295 = vector.load %arg19[%c0_227, %c128_228] : memref<32x896xf32, #tpu.memory_space<vmem>>, vector<16x648xf32>
    tpu.vector_store %arg19[%c0_227, %c128_228], %294 {strides = array<i32>} : memref<32x896xf32, #tpu.memory_space<vmem>>, vector<16x648xf32>,
    %c0_229 = arith.constant 0 : index
    %c164_230 = arith.constant 164 : index
    %296 = vector.load %arg19[%c0_229, %c164_230] : memref<32x896xf32, #tpu.memory_space<vmem>>, vector<16x648xf32>
    %c0_231 = arith.constant 0 : index
    %c92_232 = arith.constant 92 : index
    %297 = vector.load %arg19[%c0_231, %c92_232] : memref<32x896xf32, #tpu.memory_space<vmem>>, vector<16x648xf32>
    %cst_233 = arith.constant 1.000000e+00 : f32
    %298 = vector.broadcast %cst_233 : f32 to vector<1x648xf32>
    %299 = arith.subf %298, %0 : vector<1x648xf32>
    %300 = arith.subf %299, %1 : vector<1x648xf32>
    %301 = vector.broadcast %300 : vector<1x648xf32> to vector<16x648xf32>
    %302 = arith.mulf %294, %301 : vector<16x648xf32>
    %303 = vector.broadcast %0 : vector<1x648xf32> to vector<16x648xf32>
    %304 = arith.mulf %296, %303 : vector<16x648xf32>
    %305 = arith.addf %302, %304 : vector<16x648xf32>
    %306 = vector.broadcast %1 : vector<1x648xf32> to vector<16x648xf32>
    %307 = arith.mulf %297, %306 : vector<16x648xf32>
    %308 = arith.addf %305, %307 : vector<16x648xf32>
    %c0_234 = arith.constant 0 : index
    %c128_235 = arith.constant 128 : index
    %309 = vector.load %arg19[%c0_234, %c128_235] : memref<32x896xf32, #tpu.memory_space<vmem>>, vector<16x648xf32>
    tpu.vector_store %arg19[%c0_234, %c128_235], %308 {strides = array<i32>} : memref<32x896xf32, #tpu.memory_space<vmem>>, vector<16x648xf32>,
    %c0_236 = arith.constant 0 : index
    %c130_237 = arith.constant 130 : index
    %310 = vector.load %arg19[%c0_236, %c130_237] : memref<32x896xf32, #tpu.memory_space<vmem>>, vector<16x648xf32>
    %c0_238 = arith.constant 0 : index
    %c126_239 = arith.constant 126 : index
    %311 = vector.load %arg19[%c0_238, %c126_239] : memref<32x896xf32, #tpu.memory_space<vmem>>, vector<16x648xf32>
    %cst_240 = arith.constant 1.000000e+00 : f32
    %312 = vector.broadcast %cst_240 : f32 to vector<1x648xf32>
    %313 = arith.subf %312, %2 : vector<1x648xf32>
    %314 = arith.subf %313, %3 : vector<1x648xf32>
    %315 = vector.broadcast %314 : vector<1x648xf32> to vector<16x648xf32>
    %316 = arith.mulf %308, %315 : vector<16x648xf32>
    %317 = vector.broadcast %2 : vector<1x648xf32> to vector<16x648xf32>
    %318 = arith.mulf %310, %317 : vector<16x648xf32>
    %319 = arith.addf %316, %318 : vector<16x648xf32>
    %320 = vector.broadcast %3 : vector<1x648xf32> to vector<16x648xf32>
    %321 = arith.mulf %311, %320 : vector<16x648xf32>
    %322 = arith.addf %319, %321 : vector<16x648xf32>
    %c0_241 = arith.constant 0 : index
    %c128_242 = arith.constant 128 : index
    %323 = vector.load %arg19[%c0_241, %c128_242] : memref<32x896xf32, #tpu.memory_space<vmem>>, vector<16x648xf32>
    tpu.vector_store %arg19[%c0_241, %c128_242], %322 {strides = array<i32>} : memref<32x896xf32, #tpu.memory_space<vmem>>, vector<16x648xf32>,
    %c0_243 = arith.constant 0 : index
    %c109_244 = arith.constant 109 : index
    %324 = vector.load %arg19[%c0_243, %c109_244] : memref<32x896xf32, #tpu.memory_space<vmem>>, vector<16x648xf32>
    %c0_245 = arith.constant 0 : index
    %c0_246 = arith.constant 0 : index
    %c0_247 = arith.constant 0 : index
    %325 = vector.load %arg14[%c0_245, %c0_246, %c0_247] : memref<9x32x16xf32, #tpu.memory_space<vmem>>, vector<1x32x16xf32>
    %326 = vector.shape_cast %325 : vector<1x32x16xf32> to vector<32x16xf32>
    %cst_248 = arith.constant dense<0.000000e+00> : vector<32x648xf32>
    %327 = tpu.matmul %326, %324, %cst_248 {dimension_numbers = #tpu.dot_dimension_numbers<[1], [0], [0], [1], [0, 0, 1, 1], [], []>} : vector<32x16xf32>, vector<16x648xf32>, vector<32x648xf32> -> vector<32x648xf32>
    %c0_249 = arith.constant 0 : index
    %c110_250 = arith.constant 110 : index
    %328 = vector.load %arg19[%c0_249, %c110_250] : memref<32x896xf32, #tpu.memory_space<vmem>>, vector<16x648xf32>
    %c1_251 = arith.constant 1 : index
    %c0_252 = arith.constant 0 : index
    %c0_253 = arith.constant 0 : index
    %329 = vector.load %arg14[%c1_251, %c0_252, %c0_253] : memref<9x32x16xf32, #tpu.memory_space<vmem>>, vector<1x32x16xf32>
    %330 = vector.shape_cast %329 : vector<1x32x16xf32> to vector<32x16xf32>
    %cst_254 = arith.constant dense<0.000000e+00> : vector<32x648xf32>
    %331 = tpu.matmul %330, %328, %cst_254 {dimension_numbers = #tpu.dot_dimension_numbers<[1], [0], [0], [1], [0, 0, 1, 1], [], []>} : vector<32x16xf32>, vector<16x648xf32>, vector<32x648xf32> -> vector<32x648xf32>
    %332 = arith.addf %327, %331 : vector<32x648xf32>
    %c0_255 = arith.constant 0 : index
    %c111_256 = arith.constant 111 : index
    %333 = vector.load %arg19[%c0_255, %c111_256] : memref<32x896xf32, #tpu.memory_space<vmem>>, vector<16x648xf32>
    %c2_257 = arith.constant 2 : index
    %c0_258 = arith.constant 0 : index
    %c0_259 = arith.constant 0 : index
    %334 = vector.load %arg14[%c2_257, %c0_258, %c0_259] : memref<9x32x16xf32, #tpu.memory_space<vmem>>, vector<1x32x16xf32>
    %335 = vector.shape_cast %334 : vector<1x32x16xf32> to vector<32x16xf32>
    %cst_260 = arith.constant dense<0.000000e+00> : vector<32x648xf32>
    %336 = tpu.matmul %335, %333, %cst_260 {dimension_numbers = #tpu.dot_dimension_numbers<[1], [0], [0], [1], [0, 0, 1, 1], [], []>} : vector<32x16xf32>, vector<16x648xf32>, vector<32x648xf32> -> vector<32x648xf32>
    %337 = arith.addf %332, %336 : vector<32x648xf32>
    %c0_261 = arith.constant 0 : index
    %c127_262 = arith.constant 127 : index
    %338 = vector.load %arg19[%c0_261, %c127_262] : memref<32x896xf32, #tpu.memory_space<vmem>>, vector<16x648xf32>
    %c3_263 = arith.constant 3 : index
    %c0_264 = arith.constant 0 : index
    %c0_265 = arith.constant 0 : index
    %339 = vector.load %arg14[%c3_263, %c0_264, %c0_265] : memref<9x32x16xf32, #tpu.memory_space<vmem>>, vector<1x32x16xf32>
    %340 = vector.shape_cast %339 : vector<1x32x16xf32> to vector<32x16xf32>
    %cst_266 = arith.constant dense<0.000000e+00> : vector<32x648xf32>
    %341 = tpu.matmul %340, %338, %cst_266 {dimension_numbers = #tpu.dot_dimension_numbers<[1], [0], [0], [1], [0, 0, 1, 1], [], []>} : vector<32x16xf32>, vector<16x648xf32>, vector<32x648xf32> -> vector<32x648xf32>
    %342 = arith.addf %337, %341 : vector<32x648xf32>
    %c0_267 = arith.constant 0 : index
    %c128_268 = arith.constant 128 : index
    %343 = vector.load %arg19[%c0_267, %c128_268] : memref<32x896xf32, #tpu.memory_space<vmem>>, vector<16x648xf32>
    %c4_269 = arith.constant 4 : index
    %c0_270 = arith.constant 0 : index
    %c0_271 = arith.constant 0 : index
    %344 = vector.load %arg14[%c4_269, %c0_270, %c0_271] : memref<9x32x16xf32, #tpu.memory_space<vmem>>, vector<1x32x16xf32>
    %345 = vector.shape_cast %344 : vector<1x32x16xf32> to vector<32x16xf32>
    %cst_272 = arith.constant dense<0.000000e+00> : vector<32x648xf32>
    %346 = tpu.matmul %345, %343, %cst_272 {dimension_numbers = #tpu.dot_dimension_numbers<[1], [0], [0], [1], [0, 0, 1, 1], [], []>} : vector<32x16xf32>, vector<16x648xf32>, vector<32x648xf32> -> vector<32x648xf32>
    %347 = arith.addf %342, %346 : vector<32x648xf32>
    %c0_273 = arith.constant 0 : index
    %c129_274 = arith.constant 129 : index
    %348 = vector.load %arg19[%c0_273, %c129_274] : memref<32x896xf32, #tpu.memory_space<vmem>>, vector<16x648xf32>
    %c5_275 = arith.constant 5 : index
    %c0_276 = arith.constant 0 : index
    %c0_277 = arith.constant 0 : index
    %349 = vector.load %arg14[%c5_275, %c0_276, %c0_277] : memref<9x32x16xf32, #tpu.memory_space<vmem>>, vector<1x32x16xf32>
    %350 = vector.shape_cast %349 : vector<1x32x16xf32> to vector<32x16xf32>
    %cst_278 = arith.constant dense<0.000000e+00> : vector<32x648xf32>
    %351 = tpu.matmul %350, %348, %cst_278 {dimension_numbers = #tpu.dot_dimension_numbers<[1], [0], [0], [1], [0, 0, 1, 1], [], []>} : vector<32x16xf32>, vector<16x648xf32>, vector<32x648xf32> -> vector<32x648xf32>
    %352 = arith.addf %347, %351 : vector<32x648xf32>
    %c0_279 = arith.constant 0 : index
    %c145_280 = arith.constant 145 : index
    %353 = vector.load %arg19[%c0_279, %c145_280] : memref<32x896xf32, #tpu.memory_space<vmem>>, vector<16x648xf32>
    %c6_281 = arith.constant 6 : index
    %c0_282 = arith.constant 0 : index
    %c0_283 = arith.constant 0 : index
    %354 = vector.load %arg14[%c6_281, %c0_282, %c0_283] : memref<9x32x16xf32, #tpu.memory_space<vmem>>, vector<1x32x16xf32>
    %355 = vector.shape_cast %354 : vector<1x32x16xf32> to vector<32x16xf32>
    %cst_284 = arith.constant dense<0.000000e+00> : vector<32x648xf32>
    %356 = tpu.matmul %355, %353, %cst_284 {dimension_numbers = #tpu.dot_dimension_numbers<[1], [0], [0], [1], [0, 0, 1, 1], [], []>} : vector<32x16xf32>, vector<16x648xf32>, vector<32x648xf32> -> vector<32x648xf32>
    %357 = arith.addf %352, %356 : vector<32x648xf32>
    %c0_285 = arith.constant 0 : index
    %c146_286 = arith.constant 146 : index
    %358 = vector.load %arg19[%c0_285, %c146_286] : memref<32x896xf32, #tpu.memory_space<vmem>>, vector<16x648xf32>
    %c7_287 = arith.constant 7 : index
    %c0_288 = arith.constant 0 : index
    %c0_289 = arith.constant 0 : index
    %359 = vector.load %arg14[%c7_287, %c0_288, %c0_289] : memref<9x32x16xf32, #tpu.memory_space<vmem>>, vector<1x32x16xf32>
    %360 = vector.shape_cast %359 : vector<1x32x16xf32> to vector<32x16xf32>
    %cst_290 = arith.constant dense<0.000000e+00> : vector<32x648xf32>
    %361 = tpu.matmul %360, %358, %cst_290 {dimension_numbers = #tpu.dot_dimension_numbers<[1], [0], [0], [1], [0, 0, 1, 1], [], []>} : vector<32x16xf32>, vector<16x648xf32>, vector<32x648xf32> -> vector<32x648xf32>
    %362 = arith.addf %357, %361 : vector<32x648xf32>
    %c0_291 = arith.constant 0 : index
    %c147_292 = arith.constant 147 : index
    %363 = vector.load %arg19[%c0_291, %c147_292] : memref<32x896xf32, #tpu.memory_space<vmem>>, vector<16x648xf32>
    %c8_293 = arith.constant 8 : index
    %c0_294 = arith.constant 0 : index
    %c0_295 = arith.constant 0 : index
    %364 = vector.load %arg14[%c8_293, %c0_294, %c0_295] : memref<9x32x16xf32, #tpu.memory_space<vmem>>, vector<1x32x16xf32>
    %365 = vector.shape_cast %364 : vector<1x32x16xf32> to vector<32x16xf32>
    %cst_296 = arith.constant dense<0.000000e+00> : vector<32x648xf32>
    %366 = tpu.matmul %365, %363, %cst_296 {dimension_numbers = #tpu.dot_dimension_numbers<[1], [0], [0], [1], [0, 0, 1, 1], [], []>} : vector<32x16xf32>, vector<16x648xf32>, vector<32x648xf32> -> vector<32x648xf32>
    %367 = arith.addf %362, %366 : vector<32x648xf32>
    %c0_297 = arith.constant 0 : index
    %c0_298 = arith.constant 0 : index
    %368 = vector.load %arg15[%c0_297, %c0_298] : memref<32x1xf32, #tpu.memory_space<vmem>>, vector<32x1xf32>
    %369 = vector.broadcast %368 : vector<32x1xf32> to vector<32x648xf32>
    %370 = arith.addf %367, %369 : vector<32x648xf32>
    %cst_299 = arith.constant 0.000000e+00 : f32
    %371 = vector.broadcast %cst_299 : f32 to vector<32x648xf32>
    %372 = arith.maximumf %370, %371 : vector<32x648xf32>
    %373 = vector.broadcast %4 : vector<1x648xf32> to vector<32x648xf32>
    %374 = arith.mulf %372, %373 : vector<32x648xf32>
    %cst_300 = arith.constant dense<0.000000e+00> : vector<32xf32>
    %375 = vector.multi_reduction <add>, %374, %cst_300 [1] : vector<32x648xf32> to vector<32xf32>
    %376 = vector.shape_cast %375 : vector<32xf32> to vector<32x1xf32>
    %377 = arith.mulf %374, %372 : vector<32x648xf32>
    %cst_301 = arith.constant dense<0.000000e+00> : vector<32xf32>
    %378 = vector.multi_reduction <add>, %377, %cst_301 [1] : vector<32x648xf32> to vector<32xf32>
    %379 = vector.shape_cast %378 : vector<32xf32> to vector<32x1xf32>
    %cst_302 = arith.constant 0.001953125 : f32
    %380 = vector.broadcast %cst_302 : f32 to vector<32x1xf32>
    %381 = arith.mulf %376, %380 : vector<32x1xf32>
    %cst_303 = arith.constant 0.001953125 : f32
    %382 = vector.broadcast %cst_303 : f32 to vector<32x1xf32>
    %383 = arith.mulf %379, %382 : vector<32x1xf32>
    %384 = arith.mulf %381, %381 : vector<32x1xf32>
    %385 = arith.subf %383, %384 : vector<32x1xf32>
    %cst_304 = arith.constant 0.000000e+00 : f32
    %386 = vector.broadcast %cst_304 : f32 to vector<32x1xf32>
    %387 = arith.maximumf %385, %386 : vector<32x1xf32>
    %cst_305 = arith.constant 9.99999974E-6 : f32
    %388 = vector.broadcast %cst_305 : f32 to vector<32x1xf32>
    %389 = arith.addf %387, %388 : vector<32x1xf32>
    %390 = math.rsqrt %389 : vector<32x1xf32>
    %c0_306 = arith.constant 0 : index
    %c0_307 = arith.constant 0 : index
    %391 = vector.load %arg16[%c0_306, %c0_307] : memref<32x1xf32, #tpu.memory_space<vmem>>, vector<32x1xf32>
    %392 = arith.mulf %390, %391 : vector<32x1xf32>
    %393 = vector.broadcast %381 : vector<32x1xf32> to vector<32x648xf32>
    %394 = arith.subf %372, %393 : vector<32x648xf32>
    %395 = vector.broadcast %392 : vector<32x1xf32> to vector<32x648xf32>
    %396 = arith.mulf %394, %395 : vector<32x648xf32>
    %c0_308 = arith.constant 0 : index
    %c0_309 = arith.constant 0 : index
    %397 = vector.load %arg17[%c0_308, %c0_309] : memref<32x1xf32, #tpu.memory_space<vmem>>, vector<32x1xf32>
    %398 = vector.broadcast %397 : vector<32x1xf32> to vector<32x648xf32>
    %399 = arith.addf %396, %398 : vector<32x648xf32>
    %c0_310 = arith.constant 0 : index
    %c0_311 = arith.constant 0 : index
    %400 = vector.load %arg18[%c0_310, %c0_311] : memref<32x648xf32, #tpu.memory_space<vmem>>, vector<32x648xf32>
    tpu.vector_store %arg18[%c0_310, %c0_311], %399 {strides = array<i32>} : memref<32x648xf32, #tpu.memory_space<vmem>>, vector<32x648xf32>,
    return
  }
}

module attributes {stable_mosaic.version = 11 : i64} {
  func.func @fc_stack_kernel(%arg0: i32, %arg1: memref<2x2048xf32, #tpu.memory_space<vmem>>, %arg2: memref<2048x500xbf16, #tpu.memory_space<vmem>>, %arg3: memref<1x500xf32, #tpu.memory_space<vmem>>, %arg4: memref<500x500xf32, #tpu.memory_space<vmem>>, %arg5: memref<1x500xf32, #tpu.memory_space<vmem>>, %arg6: memref<500x5xf32, #tpu.memory_space<vmem>>, %arg7: memref<1x5xf32, #tpu.memory_space<vmem>>, %arg8: memref<2x5xf32, #tpu.memory_space<vmem>>, %arg9: memref<2x500xf32, #tpu.memory_space<vmem>>) attributes {dimension_semantics = [#tpu.dimension_semantics<arbitrary>], iteration_bounds = array<i64: 4>, scalar_prefetch = 0 : i64, scratch_operands = 1 : i64, tpu.core_type = #tpu.core_type<tc>, window_params = [{transform_indices = @transform_0, window_bounds = array<i64: 2, 2048>}, {transform_indices = @transform_1, window_bounds = array<i64: 2048, 500>}, {pipeline_mode = #tpu.pipeline_mode<synchronous>, transform_indices = @transform_2, window_bounds = array<i64: 1, 500>}, {pipeline_mode = #tpu.pipeline_mode<synchronous>, transform_indices = @transform_3, window_bounds = array<i64: 500, 500>}, {pipeline_mode = #tpu.pipeline_mode<synchronous>, transform_indices = @transform_4, window_bounds = array<i64: 1, 500>}, {pipeline_mode = #tpu.pipeline_mode<synchronous>, transform_indices = @transform_5, window_bounds = array<i64: 500, 5>}, {pipeline_mode = #tpu.pipeline_mode<synchronous>, transform_indices = @transform_6, window_bounds = array<i64: 1, 5>}, {pipeline_mode = #tpu.pipeline_mode<synchronous>, transform_indices = @transform_7, window_bounds = array<i64: 2, 5>}]} {
    %c0_i32 = arith.constant 0 : i32
    %0 = arith.cmpi eq, %arg0, %c0_i32 : i32
    %1 = arith.extui %0 : i1 to i32
    %c0_i32_0 = arith.constant 0 : i32
    %2 = arith.cmpi ne, %1, %c0_i32_0 : i32
    scf.if %2 {
      %cst_9 = arith.constant 0.000000e+00 : f32
      %13 = vector.broadcast %cst_9 : f32 to vector<2x500xf32>
      %c0_10 = arith.constant 0 : index
      %c0_11 = arith.constant 0 : index
      %14 = vector.load %arg9[%c0_10, %c0_11] : memref<2x500xf32, #tpu.memory_space<vmem>>, vector<2x500xf32>
      tpu.vector_store %arg9[%c0_10, %c0_11], %13 {strides = array<i32>} : memref<2x500xf32, #tpu.memory_space<vmem>>, vector<2x500xf32>,
    } else {
    }
    %c0 = arith.constant 0 : index
    %c0_1 = arith.constant 0 : index
    %3 = vector.load %arg9[%c0, %c0_1] : memref<2x500xf32, #tpu.memory_space<vmem>>, vector<2x500xf32>
    %c0_2 = arith.constant 0 : index
    %c0_3 = arith.constant 0 : index
    %4 = vector.load %arg1[%c0_2, %c0_3] : memref<2x2048xf32, #tpu.memory_space<vmem>>, vector<2x2048xf32>
    %5 = arith.truncf %4 : vector<2x2048xf32> to vector<2x2048xbf16>
    %c0_4 = arith.constant 0 : index
    %c0_5 = arith.constant 0 : index
    %6 = vector.load %arg2[%c0_4, %c0_5] : memref<2048x500xbf16, #tpu.memory_space<vmem>>, vector<2048x500xbf16>
    %cst = arith.constant dense<0.000000e+00> : vector<2x500xf32>
    %7 = tpu.matmul %5, %6, %cst {dimension_numbers = #tpu.dot_dimension_numbers<[1], [0], [0], [1], [0, 0, 1, 1], [], []>} : vector<2x2048xbf16>, vector<2048x500xbf16>, vector<2x500xf32> -> vector<2x500xf32>
    %8 = arith.addf %3, %7 : vector<2x500xf32>
    %c0_6 = arith.constant 0 : index
    %c0_7 = arith.constant 0 : index
    %9 = vector.load %arg9[%c0_6, %c0_7] : memref<2x500xf32, #tpu.memory_space<vmem>>, vector<2x500xf32>
    tpu.vector_store %arg9[%c0_6, %c0_7], %8 {strides = array<i32>} : memref<2x500xf32, #tpu.memory_space<vmem>>, vector<2x500xf32>,
    %c3_i32 = arith.constant 3 : i32
    %10 = arith.cmpi eq, %arg0, %c3_i32 : i32
    %11 = arith.extui %10 : i1 to i32
    %c0_i32_8 = arith.constant 0 : i32
    %12 = arith.cmpi ne, %11, %c0_i32_8 : i32
    scf.if %12 {
      %c0_9 = arith.constant 0 : index
      %c0_10 = arith.constant 0 : index
      %13 = vector.load %arg9[%c0_9, %c0_10] : memref<2x500xf32, #tpu.memory_space<vmem>>, vector<2x500xf32>
      %c0_11 = arith.constant 0 : index
      %c0_12 = arith.constant 0 : index
      %14 = vector.load %arg3[%c0_11, %c0_12] : memref<1x500xf32, #tpu.memory_space<vmem>>, vector<1x500xf32>
      %15 = vector.broadcast %14 : vector<1x500xf32> to vector<2x500xf32>
      %16 = arith.addf %13, %15 : vector<2x500xf32>
      %cst_13 = arith.constant 0.000000e+00 : f32
      %17 = vector.broadcast %cst_13 : f32 to vector<2x500xf32>
      %18 = arith.maximumf %16, %17 : vector<2x500xf32>
      %c0_14 = arith.constant 0 : index
      %c0_15 = arith.constant 0 : index
      %19 = vector.load %arg4[%c0_14, %c0_15] : memref<500x500xf32, #tpu.memory_space<vmem>>, vector<500x500xf32>
      %cst_16 = arith.constant dense<0.000000e+00> : vector<2x500xf32>
      %20 = tpu.matmul %18, %19, %cst_16 {dimension_numbers = #tpu.dot_dimension_numbers<[1], [0], [0], [1], [0, 0, 1, 1], [], []>} : vector<2x500xf32>, vector<500x500xf32>, vector<2x500xf32> -> vector<2x500xf32>
      %c0_17 = arith.constant 0 : index
      %c0_18 = arith.constant 0 : index
      %21 = vector.load %arg5[%c0_17, %c0_18] : memref<1x500xf32, #tpu.memory_space<vmem>>, vector<1x500xf32>
      %22 = vector.broadcast %21 : vector<1x500xf32> to vector<2x500xf32>
      %23 = arith.addf %20, %22 : vector<2x500xf32>
      %cst_19 = arith.constant 0.000000e+00 : f32
      %24 = vector.broadcast %cst_19 : f32 to vector<2x500xf32>
      %25 = arith.maximumf %23, %24 : vector<2x500xf32>
      %c0_20 = arith.constant 0 : index
      %c0_21 = arith.constant 0 : index
      %26 = vector.load %arg6[%c0_20, %c0_21] : memref<500x5xf32, #tpu.memory_space<vmem>>, vector<500x5xf32>
      %cst_22 = arith.constant dense<0.000000e+00> : vector<2x5xf32>
      %27 = tpu.matmul %25, %26, %cst_22 {dimension_numbers = #tpu.dot_dimension_numbers<[1], [0], [0], [1], [0, 0, 1, 1], [], []>} : vector<2x500xf32>, vector<500x5xf32>, vector<2x5xf32> -> vector<2x5xf32>
      %c0_23 = arith.constant 0 : index
      %c0_24 = arith.constant 0 : index
      %28 = vector.load %arg7[%c0_23, %c0_24] : memref<1x5xf32, #tpu.memory_space<vmem>>, vector<1x5xf32>
      %29 = vector.broadcast %28 : vector<1x5xf32> to vector<2x5xf32>
      %30 = arith.addf %27, %29 : vector<2x5xf32>
      %c0_25 = arith.constant 0 : index
      %c0_26 = arith.constant 0 : index
      %31 = vector.load %arg8[%c0_25, %c0_26] : memref<2x5xf32, #tpu.memory_space<vmem>>, vector<2x5xf32>
      tpu.vector_store %arg8[%c0_25, %c0_26], %30 {strides = array<i32>} : memref<2x5xf32, #tpu.memory_space<vmem>>, vector<2x5xf32>,
    } else {
    }
    return
  }
  func.func @transform_0(%arg0: i32) -> (i32, i32) {
    %c0_i32 = arith.constant 0 : i32
    %c0_i32_0 = arith.constant 0 : i32
    return %c0_i32, %arg0 : i32, i32
  }
  func.func @transform_1(%arg0: i32) -> (i32, i32) {
    %c0_i32 = arith.constant 0 : i32
    %c0_i32_0 = arith.constant 0 : i32
    return %arg0, %c0_i32 : i32, i32
  }
  func.func @transform_2(%arg0: i32) -> (i32, i32) {
    %c0_i32 = arith.constant 0 : i32
    %c0_i32_0 = arith.constant 0 : i32
    %c0_i32_1 = arith.constant 0 : i32
    return %c0_i32, %c0_i32_0 : i32, i32
  }
  func.func @transform_3(%arg0: i32) -> (i32, i32) {
    %c0_i32 = arith.constant 0 : i32
    %c0_i32_0 = arith.constant 0 : i32
    %c0_i32_1 = arith.constant 0 : i32
    return %c0_i32, %c0_i32_0 : i32, i32
  }
  func.func @transform_4(%arg0: i32) -> (i32, i32) {
    %c0_i32 = arith.constant 0 : i32
    %c0_i32_0 = arith.constant 0 : i32
    %c0_i32_1 = arith.constant 0 : i32
    return %c0_i32, %c0_i32_0 : i32, i32
  }
  func.func @transform_5(%arg0: i32) -> (i32, i32) {
    %c0_i32 = arith.constant 0 : i32
    %c0_i32_0 = arith.constant 0 : i32
    %c0_i32_1 = arith.constant 0 : i32
    return %c0_i32, %c0_i32_0 : i32, i32
  }
  func.func @transform_6(%arg0: i32) -> (i32, i32) {
    %c0_i32 = arith.constant 0 : i32
    %c0_i32_0 = arith.constant 0 : i32
    %c0_i32_1 = arith.constant 0 : i32
    return %c0_i32, %c0_i32_0 : i32, i32
  }
  func.func @transform_7(%arg0: i32) -> (i32, i32) {
    %c0_i32 = arith.constant 0 : i32
    %c0_i32_0 = arith.constant 0 : i32
    %c0_i32_1 = arith.constant 0 : i32
    return %c0_i32, %c0_i32_0 : i32, i32
  }
}

</mosaic_0001>

<bundles_post_ra>
// kernel: siamese_forward.2
= control target key start
LH: loop header
LB: loop body
LE: loop exit
PB: predicated region body
PF: predicated region fallthrough
CT: control target
= control target key end

     0   :  { %vm123_vm0 = vcmask 59392   ;;  %v13323_v0 = vmov 0.0   ;;  %s13324_s20 = smov 18   ;;  %s13325_s21 = smov 19   ;;  %v13332_v20 = vmov 0   ;;  %vm152_vm1 = vcmask 146432   ;;  %s16714_s1 = inlined_call_operand.vmem [shape: f32[3,648], index: 1, kind: input, shape index: {}]   ;;  %s16715_s3 = inlined_call_operand.vmem [shape: f32[4,1], index: 3, kind: input, shape index: {}]   ;;  %s16716_s2 = inlined_call_operand.vmem [shape: f32[9,4,3], index: 2, kind: input, shape index: {}]   ;;  %s16717_s0 = inlined_call_operand.vmem [shape: f32[5,648], index: 0, kind: input, shape index: {}]   ;;  %s16718_s5 = inlined_call_operand.vmem [shape: f32[4,1], index: 5, kind: input, shape index: {}]   ;;  %s16719_s4 = inlined_call_operand.vmem [shape: f32[4,1], index: 4, kind: input, shape index: {}]   ;;  %s16720_s7 = inlined_call_operand.vmem [shape: f32[8,1], index: 7, kind: input, shape index: {}]   ;;  %s16721_s6 = inlined_call_operand.vmem [shape: f32[9,8,4], index: 6, kind: input, shape index: {}]   ;;  %s16722_s9 = inlined_call_operand.vmem [shape: f32[8,1], index: 9, kind: input, shape index: {}]   ;;  %s16723_s8 = inlined_call_operand.vmem [shape: f32[8,1], index: 8, kind: input, shape index: {}]   ;;  %s16724_s11 = inlined_call_operand.vmem [shape: f32[16,1], index: 11, kind: input, shape index: {}]   ;;  %s16725_s10 = inlined_call_operand.vmem [shape: f32[9,16,8], index: 10, kind: input, shape index: {}]   ;;  %s16726_s12 = inlined_call_operand.vmem [shape: f32[16,1], index: 12, kind: input, shape index: {}]   ;;  %s16727_s13 = inlined_call_operand.vmem [shape: f32[16,1], index: 13, kind: input, shape index: {}]   ;;  %s16728_s15 = inlined_call_operand.vmem [shape: f32[32,1], index: 15, kind: input, shape index: {}]   ;;  %s16729_s14 = inlined_call_operand.vmem [shape: f32[9,32,16], index: 14, kind: input, shape index: {}]   ;;  %s16730_s17 = inlined_call_operand.vmem [shape: f32[32,1], index: 17, kind: input, shape index: {}]   ;;  %s16731_s16 = inlined_call_operand.vmem [shape: f32[32,1], index: 16, kind: input, shape index: {}]   ;;  %s16732_s18 = inlined_call_operand.vmem [shape: f32[32,648], index: 18, kind: output, shape index: {}]  }
   0x1   :  { %16784 = sst [smem:[#allocation20_spill]] %s16714_s1  ;;  %78 = vst [vmem:[#allocation2] sm:$0xff] %v13323_v0  ;;  %79 = vst [vmem:[#allocation2 + $0x8] sm:$0xff] %v13323_v0  ;;  %239 = vmatprep.mubr.f32.mxu0 %v13323_v0  ;;  %310 = vmatprep.mubr.f32.mxu1 %v13323_v0  ;;  %s13326_s22 = smov 17   ;;  %vm162_vm2 = vcmask 1042432   ;;  %vm158_vm3 = vcmask 23552  }
   0x2   :  { %16785 = sst [smem:[#allocation21_spill]] %s16715_s3  ;;  %80 = vst [vmem:[#allocation2 + $0x10] sm:$0xff] %v13323_v0  ;;  %81 = vst [vmem:[#allocation2 + $0x18] sm:$0xff] %v13323_v0  ;;  %s16787_s29 = sld [smem:[#allocation20_spill]]  ;;  %13055 = vset.pattern.permute.xlu1 %v13332_v20  ;;  %13056 = vset.pattern.permute.xlu0 %v13332_v20  ;;  %vm400_vm4 = vcmask 154624   ;;  %vm648_vm5 = vcmask 138240  }
   0x3   :  { %16786 = sst [smem:[#allocation22_spill]] %s16716_s2  ;;  %82 = vst [vmem:[#allocation2 + $0x20] sm:$0xff] %v13323_v0  ;;  %83 = vst [vmem:[#allocation2 + $0x28] sm:$0xff] %v13323_v0  ;;  %s13327_s2 = smov 1   ;;  %vm918_vm6 = vcmask 7168   ;;  %vm1409_vm7 = vcmask 1039360  }
   0x4   :  { %84 = vst [vmem:[#allocation2 + $0x30] sm:$0xff] %v13323_v0  ;;  %91 = vst [vmem:[#allocation2 + $0x68] sm:$0xff] %v13323_v0  ;;  %s13328_s23 = smov 127   ;;  %s13329_s24 = smov 111   ;;  %vm1663_vm8 = vcmask 908288   ;;  %vm1917_vm9 = vcmask 900096  }
   0x5   :  { %s13330_s25 = smov 110   ;;  %s13331_s26 = smov 109   ;;  %vm2171_vm10 = vcmask 891904   ;;  %vm2466_vm11 = vcmask 1043456   ;;  %vm2476_vm12 = vcmask 60416   ;;  %vm2627_vm13 = vcmask 293888  }
   0x6   :  { %s16789_s19 = sld [smem:[#allocation22_spill]]  ;;  %s13333_s3 = smov 36   ;;  %vm2663_vm14 = vcmask 752640   ;;  %vm2859_vm15 = vcmask 15360  }
   0x7   :  { %s13335_s27 = smov 2   ;;  %s13336_s28 = smov 126  }
   0x8   :  { %v106_v1 = vld [vmem:[%s16787_s29] sm:$0x77]  ;;  %v107_v2 = vld [vmem:[%s16787_s29 + $0x8] sm:$0x77]  ;;  %v108_v3 = vld [vmem:[%s16787_s29 + $0x10] sm:$0x77] }
   0x9   :  { %118 = vst [vmem:[#allocation2 + $0x8] sm:$0x7] %v106_v1  ;;  %120 = vst [vmem:[#allocation2 + $0x18] sm:$0x7] %v107_v2  ;;  %v114_v4 = vcombine.high %v108_v3, %v108_v3  ;;  %v112_v5 = vcombine.high %v106_v1, %v106_v1  ;;  %v113_v6 = vcombine.high %v107_v2, %v107_v2  ;;  %v125_v7 = vld [vmem:[#allocation2] sm:$0x7] }
   0xa   :  { %122 = vst [vmem:[#allocation2 + $0x28] sm:$0x7] %v108_v3  ;;  %140 = vrot.lane.b32.xlu1 %v125_v7, %s13324_s20  ;;  %v888_v16 = vld [vmem:[#allocation2] sm:$0x7]  ;;  %s16788_s29 = sld [smem:[#allocation21_spill]] }
   0xb   :  { %124 = vst.msk [vmem:[#allocation2 + $0x30] sm:$0x7] %vm123_vm0, %v114_v4  ;;  %119 = vst [vmem:[#allocation2 + $0x10] sm:$0x7] %v112_v5  ;;  %vm2895_vm0 = vcmask 1031168  }
   0xc   :  { %121 = vst [vmem:[#allocation2 + $0x20] sm:$0x7] %v113_v6  ;;  %v12161_v29 = vld [vmem:[%s16789_s19 + $0x4] sm:$0xf]  ;;  %v131_v40 = vld [vmem:[%s16789_s19] sm:$0xf] }
   0xd   :  { %v12180_v51 = vld [vmem:[%s16789_s19 + $0x8] sm:$0xf]  ;;  %v12190_v63 = vld [vmem:[%s16789_s19 + $0xc] sm:$0xf] }
  0x10   :  { %v126_v8 = vld [vmem:[#allocation2 + $0x8] sm:$0x7]  ;;  %v128_v9 = vld [vmem:[#allocation2 + $0x18] sm:$0x7]  ;;  %v2411_v21 = vld [vmem:[%s16788_s29] sm:$0xf] }
  0x11   :  { %142 = vrot.lane.b32.xlu0 %v126_v8, %s13324_s20  ;;  %146 = vrot.lane.b32.xlu1 %v128_v9, %s13324_s20  ;;  %v130_v10 = vld [vmem:[#allocation2 + $0x28] sm:$0x7]  ;;  %v13478_v15 = vld [vmem:[#allocation2 + $0x18] sm:$0x7] }
  0x12   :  { %v127_v11 = vld [vmem:[#allocation2 + $0x10] sm:$0x7]  ;;  %v13472_v14 = vld [vmem:[#allocation2 + $0x8] sm:$0x7] }
  0x13   :  { %v129_v12 = vld [vmem:[#allocation2 + $0x20] sm:$0x7]  ;;  %v13470_v13 = vld [vmem:[#allocation2 + $0x10] sm:$0x7]  ;;  %v13483_v17 = vld [vmem:[#allocation2 + $0x28] sm:$0x7] }
  0x14   :  { %v13485_v18 = vld [vmem:[#allocation2 + $0x20] sm:$0x7]  ;;  %v13491_v19 = vld [vmem:[#allocation2 + $0x30] sm:$0x7] }
  0x15   :  { %390 = vrot.lane.b32.xlu0 %v126_v8, %s13325_s21  ;;  %150 = vrot.lane.b32.xlu1 %v130_v10, %s13324_s20 }
  0x19   :  { %144 = vrot.lane.b32.xlu0 %v127_v11, %s13324_s20  ;;  %392 = vrot.lane.b32.xlu1 %v127_v11, %s13325_s21 }
  0x1d   :  { %148 = vrot.lane.b32.xlu0 %v129_v12, %s13324_s20  ;;  %394 = vrot.lane.b32.xlu1 %v128_v9, %s13325_s21 }
  0x21   :  { %388 = vrot.lane.b32.xlu0 %v125_v7, %s13325_s21  ;;  %398 = vrot.lane.b32.xlu1 %v130_v10, %s13325_s21 }
  0x25   :  { %396 = vrot.lane.b32.xlu0 %v129_v12, %s13325_s21  ;;  %640 = vrot.lane.b32.xlu1 %v127_v11, %s13326_s22 }
  0x29   :  { %638 = vrot.lane.b32.xlu0 %v126_v8, %s13326_s22  ;;  %642 = vrot.lane.b32.xlu1 %v128_v9, %s13326_s22 }
  0x2d   :  { %636 = vrot.lane.b32.xlu0 %v125_v7, %s13326_s22  ;;  %646 = vrot.lane.b32.xlu1 %v130_v10, %s13326_s22 }
  0x31   :  { %644 = vrot.lane.b32.xlu0 %v129_v12, %s13326_s22  ;;  %908 = vrot.lane.b32.xlu1 %v13470_v13, %s13327_s2  ;;  %v12200_v12 = vld [vmem:[%s16789_s19 + $0x10] sm:$0xf] }
  0x35   :  { %906 = vrot.lane.b32.xlu0 %v13472_v14, %s13327_s2  ;;  %910 = vrot.lane.b32.xlu1 %v13478_v15, %s13327_s2 }
  0x39   :  { %904 = vrot.lane.b32.xlu0 %v888_v16, %s13327_s2  ;;  %914 = vrot.lane.b32.xlu1 %v13483_v17, %s13327_s2 }
  0x3d   :  { %912 = vrot.lane.b32.xlu0 %v13485_v18, %s13327_s2  ;;  %1399 = vrot.lane.b32.xlu1 %v13470_v13, %s13328_s23 }
  0x41   :  { %916 = vrot.lane.b32.xlu0 %v13491_v19, %s13327_s2  ;;  %1397 = vrot.lane.b32.xlu1 %v13472_v14, %s13328_s23 }
  0x45   :  { %1401 = vrot.lane.b32.xlu0 %v13478_v15, %s13328_s23  ;;  %1405 = vrot.lane.b32.xlu1 %v13483_v17, %s13328_s23 }
  0x49   :  { %1403 = vrot.lane.b32.xlu0 %v13485_v18, %s13328_s23  ;;  %1653 = vrot.lane.b32.xlu1 %v13470_v13, %s13329_s24 }
  0x4d   :  { %1407 = vrot.lane.b32.xlu0 %v13491_v19, %s13328_s23  ;;  %1651 = vrot.lane.b32.xlu1 %v13472_v14, %s13329_s24 }
  0x51   :  { %1655 = vrot.lane.b32.xlu0 %v13478_v15, %s13329_s24  ;;  %1659 = vrot.lane.b32.xlu1 %v13483_v17, %s13329_s24 }
  0x55   :  { %1657 = vrot.lane.b32.xlu0 %v13485_v18, %s13329_s24  ;;  %1907 = vrot.lane.b32.xlu1 %v13470_v13, %s13330_s25 }
  0x59   :  { %1661 = vrot.lane.b32.xlu0 %v13491_v19, %s13329_s24  ;;  %1905 = vrot.lane.b32.xlu1 %v13472_v14, %s13330_s25 }
  0x5d   :  { %1909 = vrot.lane.b32.xlu0 %v13478_v15, %s13330_s25  ;;  %1913 = vrot.lane.b32.xlu1 %v13483_v17, %s13330_s25 }
  0x61   :  { %1911 = vrot.lane.b32.xlu0 %v13485_v18, %s13330_s25  ;;  %2161 = vrot.lane.b32.xlu1 %v13470_v13, %s13331_s26 }
  0x65   :  { %1915 = vrot.lane.b32.xlu0 %v13491_v19, %s13330_s25  ;;  %2159 = vrot.lane.b32.xlu1 %v13472_v14, %s13331_s26 }
  0x69   :  { %2163 = vrot.lane.b32.xlu0 %v13478_v15, %s13331_s26  ;;  %2167 = vrot.lane.b32.xlu1 %v13483_v17, %s13331_s26 }
  0x6d   :  { %2165 = vrot.lane.b32.xlu0 %v13485_v18, %s13331_s26  ;;  %2414 = vperm.xlu1 %13055, %v2411_v21   ;;  %v12210_v21 = vld [vmem:[%s16789_s19 + $0x14] sm:$0xf] }
  0x71   :  { %2169 = vrot.lane.b32.xlu0 %v13491_v19, %s13331_s26 }
  0x7c   :  { %v141_v22 = vpop.permute.xlu1 %140 }
  0x83   :  { %v143_v23 = vpop.permute.xlu0 %142  ;;  %v147_v24 = vpop.permute.xlu1 %146 }
  0x84   :  { %v153_v30 = vsel %vm152_vm1, %v141_v22, %v143_v23 }
  0x87   :  { %v391_v25 = vpop.permute.xlu0 %390  ;;  %v151_v26 = vpop.permute.xlu1 %150 }
  0x8b   :  { %v145_v27 = vpop.permute.xlu0 %144  ;;  %v393_v31 = vpop.permute.xlu1 %392 }
  0x8c   :  { %v154_v28 = vsel %vm152_vm1, %v143_v23, %v145_v27  ;;  %v155_v35 = vsel %vm152_vm1, %v145_v27, %v147_v24  ;;  %v402_v36 = vsel %vm400_vm4, %v391_v25, %v393_v31 }
  0x8d   :  { %12162 = vmatprep.subr.msk.mxu0 %vm162_vm2, %v154_v28 }
  0x8e   :  { %12163 = vmatpush1.msk.msra.mxu0 %vm162_vm2, %v153_v30 }
  0x8f   :  { %12168 = vmatprep.subr.msk.mxu0 %vm162_vm2, %v151_v26  ;;  %v149_v32 = vpop.permute.xlu0 %148  ;;  %12164 = vmatmul.mubr.msk.f32.vlgmr.msra.gmra.mrb[0].mxu0 %vm158_vm3, %v12161_v29  ;;  %v395_v37 = vpop.permute.xlu1 %394 }
  0x90   :  { %v157_v33 = vsel %vm152_vm1, %v149_v32, %v151_v26  ;;  %v156_v34 = vsel %vm152_vm1, %v147_v24, %v149_v32  ;;  %381 = vmatprep.mubr.f32.mxu0 %v13323_v0  ;;  %v403_v45 = vsel %vm400_vm4, %v393_v31, %v395_v37  ;;  %v12220_v31 = vld [vmem:[%s16789_s19 + $0x18] sm:$0xf] }
  0x91   :  { %12165 = vmatprep.subr.msk.mxu1 %vm162_vm2, %v156_v34  ;;  %12169 = vmatpush1.msk.msra.mxu0 %vm162_vm2, %v157_v33 }
  0x92   :  { %12166 = vmatpush1.msk.msra.mxu1 %vm162_vm2, %v155_v35  ;;  %12171 = vmatprep.subr.msk.mxu0 %vm162_vm2, %v402_v36 }
  0x93   :  { %v389_v38 = vpop.permute.xlu0 %388  ;;  %12170 = vmatmul.mubr.msk.f32.vlgmr.msra.gmra.mrb[2].mxu0 %vm158_vm3, %v12161_v29  ;;  %12167 = vmatmul.mubr.msk.f32.vlgmr.msra.gmra.mrb[0].mxu1 %vm158_vm3, %v12161_v29  ;;  %v399_v41 = vpop.permute.xlu1 %398 }
  0x94   :  { %v401_v39 = vsel %vm400_vm4, %v389_v38, %v391_v25  ;;  %485 = vmatprep.mubr.f32.mxu0 %v13323_v0  ;;  %556 = vmatprep.mubr.f32.mxu1 %v13323_v0  ;;  %v12230_v38 = vld [vmem:[%s16789_s19 + $0x1c] sm:$0xf] }
  0x95   :  { %12172 = vmatpush1.msk.msra.mxu0 %vm162_vm2, %v401_v39 }
  0x96   :  { %12177 = vmatprep.subr.msk.mxu0 %vm162_vm2, %v399_v41 }
  0x97   :  { %v397_v42 = vpop.permute.xlu0 %396  ;;  %12173 = vmatmul.mubr.msk.f32.vlgmr.msra.gmra.mrb[0].mxu0 %vm158_vm3, %v131_v40  ;;  %v641_v46 = vpop.permute.xlu1 %640 }
  0x98   :  { %v405_v43 = vsel %vm400_vm4, %v397_v42, %v399_v41  ;;  %v404_v44 = vsel %vm400_vm4, %v395_v37, %v397_v42  ;;  %627 = vmatprep.mubr.f32.mxu0 %v13323_v0 }
  0x99   :  { %12174 = vmatprep.subr.msk.mxu1 %vm162_vm2, %v404_v44  ;;  %12178 = vmatpush1.msk.msra.mxu0 %vm162_vm2, %v405_v43 }
  0x9a   :  { %12175 = vmatpush1.msk.msra.mxu1 %vm162_vm2, %v403_v45 }
  0x9b   :  { %v639_v47 = vpop.permute.xlu0 %638  ;;  %12179 = vmatmul.mubr.msk.f32.vlgmr.msra.gmra.mrb[2].mxu0 %vm158_vm3, %v131_v40  ;;  %12176 = vmatmul.mubr.msk.f32.vlgmr.msra.gmra.mrb[0].mxu1 %vm158_vm3, %v131_v40  ;;  %v643_v49 = vpop.permute.xlu1 %642 }
  0x9c   :  { %v650_v48 = vsel %vm648_vm5, %v639_v47, %v641_v46  ;;  %733 = vmatprep.mubr.f32.mxu0 %v13323_v0  ;;  %804 = vmatprep.mubr.f32.mxu1 %v13323_v0  ;;  %v651_v57 = vsel %vm648_vm5, %v641_v46, %v643_v49 }
  0x9d   :  { %12181 = vmatprep.subr.msk.mxu0 %vm162_vm2, %v650_v48 }
  0x9f   :  { %v637_v50 = vpop.permute.xlu0 %636  ;;  %v647_v53 = vpop.permute.xlu1 %646 }
  0xa0   :  { %v649_v52 = vsel %vm648_vm5, %v637_v50, %v639_v47  ;;  %v12240_v50 = vld [vmem:[%s16789_s19 + $0x20] sm:$0xf]  ;;  %s13334_s19 = smov 92  }
  0xa1   :  { %12182 = vmatpush1.msk.msra.mxu0 %vm162_vm2, %v649_v52 }
  0xa2   :  { %12183 = vmatmul.mubr.msk.f32.vlgmr.msra.gmra.mrb[0].mxu0 %vm158_vm3, %v12180_v51  ;;  %12187 = vmatprep.subr.msk.mxu0 %vm162_vm2, %v647_v53 }
  0xa3   :  { %v645_v54 = vpop.permute.xlu0 %644  ;;  %875 = vmatprep.mubr.f32.mxu0 %v13323_v0  ;;  %v909_v58 = vpop.permute.xlu1 %908 }
  0xa4   :  { %v653_v55 = vsel %vm648_vm5, %v645_v54, %v647_v53  ;;  %v652_v56 = vsel %vm648_vm5, %v643_v49, %v645_v54 }
  0xa5   :  { %12184 = vmatprep.subr.msk.mxu1 %vm162_vm2, %v652_v56  ;;  %12188 = vmatpush1.msk.msra.mxu0 %vm162_vm2, %v653_v55 }
  0xa6   :  { %12185 = vmatpush1.msk.msra.mxu1 %vm162_vm2, %v651_v57  ;;  %12189 = vmatmul.mubr.msk.f32.vlgmr.msra.gmra.mrb[2].mxu0 %vm158_vm3, %v12180_v51 }
  0xa7   :  { %v907_v59 = vpop.permute.xlu0 %906  ;;  %12186 = vmatmul.mubr.msk.f32.vlgmr.msra.gmra.mrb[0].mxu1 %vm158_vm3, %v12180_v51  ;;  %1004 = vmatprep.mubr.f32.mxu0 %v13323_v0  ;;  %v911_v61 = vpop.permute.xlu1 %910 }
  0xa8   :  { %v920_v60 = vsel %vm918_vm6, %v907_v59, %v909_v58  ;;  %1075 = vmatprep.mubr.f32.mxu1 %v13323_v0  ;;  %v921_v5 = vsel %vm918_vm6, %v909_v58, %v911_v61  ;;  %v2430_v58 = vlaneseq }
  0xa9   :  { %12191 = vmatprep.subr.msk.mxu0 %vm162_vm2, %v920_v60  ;;  %v12159_v60 = vld [vmem:[%s16717_s0 + $0x4] ss:$8 sm:$0xf] }
  0xab   :  { %v905_v62 = vpop.permute.xlu0 %904  ;;  %v915_v2 = vpop.permute.xlu1 %914 }
  0xac   :  { %v919_v1 = vsel %vm918_vm6, %v905_v62, %v907_v59  ;;  %v2431_v59 = vshrl.u32 %v2430_v58, 7 }
  0xad   :  { %12192 = vmatpush1.msk.msra.mxu0 %vm162_vm2, %v919_v1 }
  0xae   :  { %12193 = vmatmul.mubr.msk.f32.vlgmr.msra.gmra.mrb[0].mxu0 %vm158_vm3, %v12190_v63 }
  0xaf   :  { %v913_v3 = vpop.permute.xlu0 %912  ;;  %1146 = vmatprep.mubr.f32.mxu0 %v13323_v0  ;;  %v1400_v6 = vpop.permute.xlu1 %1399 }
  0xb0   :  { %v922_v4 = vsel %vm918_vm6, %v911_v61, %v913_v3  ;;  %v923_v9 = vsel %vm918_vm6, %v913_v3, %v915_v2  ;;  %v12160_v61 = vld [vmem:[%s16717_s0 + $0x4] ss:$8 sm:$0x30] }
  0xb1   :  { %12194 = vmatprep.subr.msk.mxu1 %vm162_vm2, %v922_v4  ;;  %v77_v62 = vor.u32 %v12160_v61, %v12159_v60 }
  0xb2   :  { %12195 = vmatpush1.msk.msra.mxu1 %vm162_vm2, %v921_v5 }
  0xb3   :  { %v917_v7 = vpop.permute.xlu0 %916  ;;  %12196 = vmatmul.mubr.msk.f32.vlgmr.msra.gmra.mrb[0].mxu1 %vm158_vm3, %v12190_v63  ;;  %12204 = vmatprep.subr.msk.mxu1 %vm162_vm2, %v13485_v18  ;;  %v1398_v10 = vpop.permute.xlu1 %1397 }
  0xb4   :  { %v924_v8 = vsel %vm918_vm6, %v915_v2, %v917_v7  ;;  %12205 = vmatpush1.msk.msra.mxu1 %vm162_vm2, %v13478_v15  ;;  %1311 = vmatprep.mubr.f32.mxu1 %v13323_v0  ;;  %v1410_v20 = vsel %vm1409_vm7, %v1398_v10, %v1400_v6  ;;  %v13736_v2 = vsub.s32 1, %v2431_v59  ;;  %v13748_v10 = vsub.s32 4, %v2431_v59 }
  0xb5   :  { %12197 = vmatprep.subr.msk.mxu0 %vm162_vm2, %v924_v8 }
  0xb6   :  { %12198 = vmatpush1.msk.msra.mxu0 %vm162_vm2, %v923_v9  ;;  %v13744_v8 = vrot.slane %v77_v62, %v13736_v2  ;;  %v13746_v9 = vsub.s32 3, %v2431_v59 }
  0xb7   :  { %12199 = vmatmul.mubr.msk.f32.vlgmr.msra.gmra.mrb[2].mxu0 %vm158_vm3, %v12190_v63  ;;  %v1402_v11 = vpop.permute.xlu0 %1401  ;;  %12201 = vmatprep.subr.msk.mxu0 %vm162_vm2, %v13470_v13  ;;  %v1406_v15 = vpop.permute.xlu1 %1405  ;;  %v13734_v63 = vsub.s32 0, %v2431_v59 }
  0xb8   :  { %12202 = vmatpush1.msk.msra.mxu0 %vm162_vm2, %v13472_v14  ;;  %1240 = vmatprep.mubr.f32.mxu0 %v13323_v0  ;;  %v1411_v14 = vsel %vm1409_vm7, %v1400_v6, %v1402_v11  ;;  %v13741_v6 = vsub.s32 2, %v2431_v59  ;;  %16791 = vst [vmem:[#allocation4_spill] sm:$0xff] %v13744_v8 }
  0xb9   :  { %12207 = vmatprep.subr.msk.mxu0 %vm162_vm2, %v13491_v19 }
  0xbb   :  { %12203 = vmatmul.mubr.msk.f32.vlgmr.msra.gmra.mrb[0].mxu0 %vm158_vm3, %v12200_v12  ;;  %v1404_v16 = vpop.permute.xlu0 %1403  ;;  %12206 = vmatmul.mubr.msk.f32.vlgmr.msra.gmra.mrb[0].mxu1 %vm158_vm3, %v12200_v12  ;;  %v1654_v19 = vpop.permute.xlu1 %1653 }
  0xbc   :  { %12208 = vmatpush1.msk.msra.mxu0 %vm162_vm2, %v13483_v17  ;;  %v1412_v13 = vsel %vm1409_vm7, %v1402_v11, %v1404_v16  ;;  %v1413_v18 = vsel %vm1409_vm7, %v1404_v16, %v1406_v15  ;;  %1382 = vmatprep.mubr.f32.mxu0 %v13323_v0 }
  0xbd   :  { %12211 = vmatprep.subr.msk.mxu0 %vm162_vm2, %v1411_v14  ;;  %12214 = vmatprep.subr.msk.mxu1 %vm162_vm2, %v1413_v18  ;;  %v13759_v18 = vrot.slane %v77_v62, %v13741_v6 }
  0xbe   :  { %12215 = vmatpush1.msk.msra.mxu1 %vm162_vm2, %v1412_v13  ;;  %1565 = vmatprep.mubr.f32.mxu1 %v13323_v0 }
  0xbf   :  { %12209 = vmatmul.mubr.msk.f32.vlgmr.msra.gmra.mrb[2].mxu0 %vm158_vm3, %v12200_v12  ;;  %v1408_v17 = vpop.permute.xlu0 %1407  ;;  %v1652_v22 = vpop.permute.xlu1 %1651  ;;  %v13752_v12 = vsub.s32 5, %v2431_v59  ;;  %16792 = vst [vmem:[#allocation5_spill] sm:$0xff] %v13759_v18 }
  0xc0   :  { %12212 = vmatpush1.msk.msra.mxu0 %vm162_vm2, %v1410_v20  ;;  %1494 = vmatprep.mubr.f32.mxu0 %v13323_v0  ;;  %v1414_v23 = vsel %vm1409_vm7, %v1406_v15, %v1408_v17  ;;  %v1664_v27 = vsel %vm1663_vm8, %v1652_v22, %v1654_v19  ;;  %v13767_v22 = vrot.slane %v77_v62, %v13748_v10 }
  0xc1   :  { %12217 = vmatprep.subr.msk.mxu0 %vm162_vm2, %v1408_v17 }
  0xc3   :  { %12213 = vmatmul.mubr.msk.f32.vlgmr.msra.gmra.mrb[0].mxu0 %vm158_vm3, %v12210_v21  ;;  %v1656_v24 = vpop.permute.xlu0 %1655  ;;  %12216 = vmatmul.mubr.msk.f32.vlgmr.msra.gmra.mrb[0].mxu1 %vm158_vm3, %v12210_v21  ;;  %v1660_v26 = vpop.permute.xlu1 %1659 }
  0xc4   :  { %12218 = vmatpush1.msk.msra.mxu0 %vm162_vm2, %v1414_v23  ;;  %v1665_v25 = vsel %vm1663_vm8, %v1654_v19, %v1656_v24  ;;  %1636 = vmatprep.mubr.f32.mxu0 %v13323_v0 }
  0xc5   :  { %12221 = vmatprep.subr.msk.mxu0 %vm162_vm2, %v1665_v25  ;;  %1819 = vmatprep.mubr.f32.mxu1 %v13323_v0 }
  0xc7   :  { %12219 = vmatmul.mubr.msk.f32.vlgmr.msra.gmra.mrb[2].mxu0 %vm158_vm3, %v12210_v21  ;;  %v1658_v28 = vpop.permute.xlu0 %1657  ;;  %v1908_v32 = vpop.permute.xlu1 %1907  ;;  %v13764_v21 = vrot.slane %v77_v62, %v13746_v9 }
  0xc8   :  { %12222 = vmatpush1.msk.msra.mxu0 %vm162_vm2, %v1664_v27  ;;  %v1666_v29 = vsel %vm1663_vm8, %v1656_v24, %v1658_v28  ;;  %v1667_v30 = vsel %vm1663_vm8, %v1658_v28, %v1660_v26  ;;  %1748 = vmatprep.mubr.f32.mxu0 %v13323_v0  ;;  %v13774_v27 = vrot.slane %v77_v62, %v13752_v12 }
  0xc9   :  { %12224 = vmatprep.subr.msk.mxu1 %vm162_vm2, %v1667_v30  ;;  %16793 = vst [vmem:[#allocation6_spill] sm:$0xff] %v13764_v21 }
  0xca   :  { %12225 = vmatpush1.msk.msra.mxu1 %vm162_vm2, %v1666_v29  ;;  %16794 = vst [vmem:[#allocation7_spill] sm:$0xff] %v13774_v27 }
  0xcb   :  { %v1662_v33 = vpop.permute.xlu0 %1661  ;;  %12223 = vmatmul.mubr.msk.f32.vlgmr.msra.gmra.mrb[0].mxu0 %vm158_vm3, %v12220_v31  ;;  %12226 = vmatmul.mubr.msk.f32.vlgmr.msra.gmra.mrb[0].mxu1 %vm158_vm3, %v12220_v31  ;;  %v1906_v35 = vpop.permute.xlu1 %1905 }
  0xcc   :  { %v1668_v34 = vsel %vm1663_vm8, %v1660_v26, %v1662_v33  ;;  %12227 = vmatprep.subr.msk.mxu0 %vm162_vm2, %v1662_v33  ;;  %1890 = vmatprep.mubr.f32.mxu0 %v13323_v0  ;;  %v1918_v39 = vsel %vm1917_vm9, %v1906_v35, %v1908_v32 }
  0xcd   :  { %12228 = vmatpush1.msk.msra.mxu0 %vm162_vm2, %v1668_v34  ;;  %2073 = vmatprep.mubr.f32.mxu1 %v13323_v0 }
  0xcf   :  { %v1910_v36 = vpop.permute.xlu0 %1909  ;;  %12229 = vmatmul.mubr.msk.f32.vlgmr.msra.gmra.mrb[2].mxu0 %vm158_vm3, %v12220_v31  ;;  %v1914_v40 = vpop.permute.xlu1 %1913 }
  0xd0   :  { %v1919_v37 = vsel %vm1917_vm9, %v1908_v32, %v1910_v36  ;;  %2002 = vmatprep.mubr.f32.mxu0 %v13323_v0 }
  0xd1   :  { %12231 = vmatprep.subr.msk.mxu0 %vm162_vm2, %v1919_v37 }
  0xd2   :  { %12232 = vmatpush1.msk.msra.mxu0 %vm162_vm2, %v1918_v39 }
  0xd3   :  { %v1912_v41 = vpop.permute.xlu0 %1911  ;;  %12233 = vmatmul.mubr.msk.f32.vlgmr.msra.gmra.mrb[0].mxu0 %vm158_vm3, %v12230_v38  ;;  %v2162_v44 = vpop.permute.xlu1 %2161 }
  0xd4   :  { %v1920_v42 = vsel %vm1917_vm9, %v1910_v36, %v1912_v41  ;;  %v1921_v43 = vsel %vm1917_vm9, %v1912_v41, %v1914_v40  ;;  %2144 = vmatprep.mubr.f32.mxu0 %v13323_v0 }
  0xd5   :  { %12234 = vmatprep.subr.msk.mxu1 %vm162_vm2, %v1921_v43 }
  0xd6   :  { %12235 = vmatpush1.msk.msra.mxu1 %vm162_vm2, %v1920_v42 }
  0xd7   :  { %v1916_v45 = vpop.permute.xlu0 %1915  ;;  %12236 = vmatmul.mubr.msk.f32.vlgmr.msra.gmra.mrb[0].mxu1 %vm158_vm3, %v12230_v38  ;;  %v2160_v47 = vpop.permute.xlu1 %2159 }
  0xd8   :  { %v1922_v46 = vsel %vm1917_vm9, %v1914_v40, %v1916_v45  ;;  %12237 = vmatprep.subr.msk.mxu0 %vm162_vm2, %v1916_v45  ;;  %2327 = vmatprep.mubr.f32.mxu1 %v13323_v0  ;;  %v2172_v51 = vsel %vm2171_vm10, %v2160_v47, %v2162_v44 }
  0xd9   :  { %12238 = vmatpush1.msk.msra.mxu0 %vm162_vm2, %v1922_v46 }
  0xda   :  { %12239 = vmatmul.mubr.msk.f32.vlgmr.msra.gmra.mrb[2].mxu0 %vm158_vm3, %v12230_v38 }
  0xdb   :  { %v2164_v48 = vpop.permute.xlu0 %2163  ;;  %2256 = vmatprep.mubr.f32.mxu0 %v13323_v0  ;;  %v2168_v52 = vpop.permute.xlu1 %2167 }
  0xdc   :  { %v2173_v49 = vsel %vm2171_vm10, %v2162_v44, %v2164_v48 }
  0xdd   :  { %12241 = vmatprep.subr.msk.mxu0 %vm162_vm2, %v2173_v49 }
  0xde   :  { %12242 = vmatpush1.msk.msra.mxu0 %vm162_vm2, %v2172_v51 }
  0xdf   :  { %12243 = vmatmul.mubr.msk.f32.vlgmr.msra.gmra.mrb[0].mxu0 %vm158_vm3, %v12240_v50  ;;  %v2166_v53 = vpop.permute.xlu0 %2165 }
  0xe0   :  { %v2174_v54 = vsel %vm2171_vm10, %v2164_v48, %v2166_v53  ;;  %v2175_v55 = vsel %vm2171_vm10, %v2166_v53, %v2168_v52  ;;  %2398 = vmatprep.mubr.f32.mxu0 %v13323_v0 }
  0xe1   :  { %12244 = vmatprep.subr.msk.mxu1 %vm162_vm2, %v2175_v55 }
  0xe2   :  { %12245 = vmatpush1.msk.msra.mxu1 %vm162_vm2, %v2174_v54 }
  0xe3   :  { %12246 = vmatmul.mubr.msk.f32.vlgmr.msra.gmra.mrb[0].mxu1 %vm158_vm3, %v12240_v50  ;;  %v2170_v56 = vpop.permute.xlu0 %2169 }
  0xe4   :  { %v2176_v57 = vsel %vm2171_vm10, %v2168_v52, %v2170_v56  ;;  %12247 = vmatprep.subr.msk.mxu0 %vm162_vm2, %v2170_v56  ;;  %3126 = vmatprep.mubr.f32.mxu1 %v13323_v0 }
  0xe5   :  { %12248 = vmatpush1.msk.msra.mxu0 %vm162_vm2, %v2176_v57  ;;  %vm3046_vm2 = vcmask 31744  }
  0xe6   :  { %12249 = vmatmul.mubr.msk.f32.vlgmr.msra.gmra.mrb[2].mxu0 %vm158_vm3, %v12240_v50  ;;  %vm5319_vm3 = vcmask 64512  }
  0xe7   :  { %5699 = vmatprep.mubr.f32.mxu0 %v13323_v0  ;;  %v13739_v0 = vrot.slane %v77_v62, %v13734_v63 }
  0xe9   :  { %16790 = vst [vmem:[#allocation3_spill] sm:$0xff] %v13739_v0 }
  0xec   :  { %v2415_v1 = vpop.permute.xlu1 %2414 }
 0x1b2   :  { %v2258_v3 = vpop.f32.mrb[0].mxu0 }
 0x1b3   :  { %v2417_v4 = vadd.f32 %v2415_v1, %v2258_v3  ;;  %v2260_v5 = vpop.f32.mrb[1].mxu0  ;;  %v2526_v3 = vld [vmem:[%s16718_s5] sm:$0xf] }
 0x1b4   :  { %v2418_v7 = vadd.f32 %v2415_v1, %v2260_v5  ;;  %v60_v5 = vld [vmem:[%s16717_s0] ss:$8 sm:$0x30] }
 0x1b5   :  { %v13750_v11 = vmax.f32 %v2417_v4, 0.0  ;;  %v59_v4 = vld [vmem:[%s16717_s0] ss:$8 sm:$0xf] }
 0x1b6   :  { %v13754_v15 = vmax.f32 %v2418_v7, 0.0  ;;  %v2329_v16 = vpop.f32.mrb[0].mxu1  ;;  %v13815_v7 = vor.u32 %v60_v5, %v59_v4 }
 0x1b7   :  { %v2460_v13 = vmul.f32 %v13739_v0, %v13750_v11  ;;  %v2419_v14 = vadd.f32 %v2415_v1, %v2329_v16  ;;  %v2331_v19 = vpop.f32.mrb[1].mxu1 }
 0x1b8   :  { %v2461_v20 = vmul.f32 %v13744_v8, %v13754_v15  ;;  %v2420_v17 = vadd.f32 %v2415_v1, %v2331_v19  ;;  %v2594_v16 = vrot.slane %v13815_v7, %v13734_v63  ;;  %v12153_v19 = vld [vmem:[%s16717_s0 + $0x1] ss:$8 sm:$0xf] }
 0x1b9   :  { %v2467_v23 = vsel %vm2466_vm11, %v2460_v13, 0.0  ;;  %v2481_v24 = vmul.f32 %v2460_v13, %v13750_v11  ;;  %v13771_v25 = vmax.f32 %v2419_v14, 0.0  ;;  %v2400_v26 = vpop.f32.mrb[2].mxu0  ;;  %v2598_v13 = vrot.slane %v13815_v7, %v13736_v2 }
 0x1ba   :  { %v2468_v28 = vsel %vm2466_vm11, %v2461_v20, 0.0  ;;  %v2482_v29 = vmul.f32 %v2461_v20, %v13754_v15  ;;  %v13778_v30 = vmax.f32 %v2420_v17, 0.0  ;;  %v2421_v31 = vadd.f32 %v2415_v1, %v2400_v26  ;;  %v2402_v32 = vpop.f32.mrb[3].mxu0  ;;  %v12154_v20 = vld [vmem:[%s16717_s0 + $0x1] ss:$8 sm:$0x30] }
 0x1bb   :  { %v2487_v33 = vsel %vm2466_vm11, %v2481_v24, 0.0  ;;  %v2469_v34 = vadd.f32 %v2468_v28, %v2467_v23  ;;  %v2462_v35 = vmul.f32 %v13759_v18, %v13771_v25  ;;  %v2422_v36 = vadd.f32 %v2415_v1, %v2402_v32 }
 0x1bc   :  { %v2488_v37 = vsel %vm2466_vm11, %v2482_v29, 0.0  ;;  %v2463_v38 = vmul.f32 %v13764_v21, %v13778_v30  ;;  %v13786_v39 = vmax.f32 %v2421_v31, 0.0  ;;  %v2602_v14 = vrot.slane %v13815_v7, %v13741_v6 }
 0x1bd   :  { %v2489_v40 = vadd.f32 %v2488_v37, %v2487_v33  ;;  %v2470_v41 = vsel %vm2466_vm11, %v2462_v35, 0.0  ;;  %v2483_v42 = vmul.f32 %v2462_v35, %v13771_v25  ;;  %v13790_v43 = vmax.f32 %v2422_v36, 0.0 }
 0x1be   :  { %v2484_v44 = vmul.f32 %v2463_v38, %v13778_v30  ;;  %v2464_v45 = vmul.f32 %v13767_v22, %v13786_v39  ;;  %v2471_v46 = vadd.f32 %v2470_v41, %v2469_v34  ;;  %v2472_v47 = vsel %vm2466_vm11, %v2463_v38, 0.0 }
 0x1bf   :  { %v2490_v48 = vsel %vm2466_vm11, %v2483_v42, 0.0  ;;  %v2465_v49 = vmul.f32 %v13774_v27, %v13790_v43  ;;  %v2606_v17 = vrot.slane %v13815_v7, %v13746_v9  ;;  %v13834_v23 = vor.u32 %v12154_v20, %v12153_v19 }
 0x1c0   :  { %v2485_v50 = vmul.f32 %v2464_v45, %v13786_v39  ;;  %v2473_v51 = vadd.f32 %v2472_v47, %v2471_v46  ;;  %v2474_v52 = vsel %vm2466_vm11, %v2464_v45, 0.0  ;;  %v2491_v53 = vadd.f32 %v2490_v48, %v2489_v40  ;;  %v2507_v45 = vld [vmem:[%s16719_s4] sm:$0xf] }
 0x1c1   :  { %v2486_v54 = vmul.f32 %v2465_v49, %v13790_v43  ;;  %v2492_v55 = vsel %vm2466_vm11, %v2484_v44, 0.0  ;;  %v2477_v59 = vsel %vm2476_vm12, %v2465_v49, 0.0  ;;  %v2685_v24 = vrot.slane %v13834_v23, %v13734_v63 }
 0x1c2   :  { %v2475_v56 = vadd.f32 %v2474_v52, %v2473_v51  ;;  %v2493_v57 = vadd.f32 %v2492_v55, %v2491_v53  ;;  %v2494_v58 = vsel %vm2466_vm11, %v2485_v50, 0.0  ;;  %v2689_v26 = vrot.slane %v13834_v23, %v13736_v2  ;;  %v12155_v50 = vld [vmem:[%s16717_s0 + $0x2] ss:$8 sm:$0xf] }
 0x1c3   :  { %v2496_v62 = vsel %vm2476_vm12, %v2486_v54, 0.0  ;;  %v2697_v28 = vrot.slane %v13834_v23, %v13746_v9  ;;  %v2614_v29 = vrot.slane %v13815_v7, %v13752_v12  ;;  %v2705_v31 = vrot.slane %v13834_v23, %v13752_v12  ;;  %v12156_v51 = vld [vmem:[%s16717_s0 + $0x2] ss:$8 sm:$0x30] }
 0x1c4   :  { %v2478_v60 = vadd.f32 %v2477_v59, %v2475_v56  ;;  %v2495_v61 = vadd.f32 %v2494_v58, %v2493_v57  ;;  %v2693_v49 = vrot.slane %v13834_v23, %v13741_v6  ;;  %v13871_v53 = vor.u32 %v12156_v51, %v12155_v50  ;;  %v12157_v56 = vld [vmem:[%s16717_s0 + $0x3] ss:$8 sm:$0xf] }
 0x1c5   :  { %v2610_v54 = vrot.slane %v13815_v7, %v13748_v10  ;;  %v12158_v57 = vld [vmem:[%s16717_s0 + $0x3] ss:$8 sm:$0x30]  ;;  %v2701_v59 = vrot.slane %v13834_v23, %v13748_v10 }
 0x1c6   :  { %2479 = vadd.xlane.f32.xlu0 %v2478_v60  ;;  %v2497_v1 = vadd.f32 %v2496_v62, %v2495_v61  ;;  %v2830_v55 = vrot.slane %v13871_v53, %v13736_v2  ;;  %v13885_v58 = vor.u32 %v12158_v57, %v12157_v56  ;;  %v2550_v61 = vld [vmem:[#allocation2] sm:$0xf]  ;;  %v2834_v4 = vrot.slane %v13871_v53, %v13741_v6 }
 0x1c8   :  { %2498 = vadd.xlane.f32.xlu1 %v2497_v1  ;;  %v2917_v62 = vrot.slane %v13885_v58, %v13734_v63 }
 0x1d9   :  { %2529 = vperm.xlu1 %13055, %v2526_v3   ;;  %v2826_v3 = vrot.slane %v13871_v53, %v13734_v63 }
 0x1dd   :  { %2615 = vrot.lane.b32.xlu1 %v2594_v16, %s13333_s3 }
 0x1e1   :  { %2617 = vrot.lane.b32.xlu1 %v2598_v13, %s13333_s3 }
 0x1e5   :  { %2619 = vrot.lane.b32.xlu1 %v2602_v14, %s13333_s3 }
 0x1e9   :  { %2621 = vrot.lane.b32.xlu1 %v2606_v17, %s13333_s3 }
 0x1ed   :  { %2706 = vrot.lane.b32.xlu1 %v2685_v24, %s13334_s19 }
 0x1f1   :  { %2708 = vrot.lane.b32.xlu1 %v2689_v26, %s13334_s19 }
 0x1f5   :  { %2712 = vrot.lane.b32.xlu1 %v2697_v28, %s13334_s19 }
 0x1f9   :  { %2625 = vrot.lane.b32.xlu1 %v2614_v29, %s13333_s3 }
 0x1fd   :  { %2716 = vrot.lane.b32.xlu1 %v2705_v31, %s13334_s19 }
 0x201   :  { %2849 = vrot.lane.b32.xlu1 %v2830_v55, %s13335_s27 }
 0x205   :  { %2938 = vrot.lane.b32.xlu1 %v2917_v62, %s13336_s28 }
 0x253   :  { %v2480_v32 = vpop.xlane.xlu0 %2479 }
 0x254   :  { %v2500_v33 = vmul.f32 0.001953125, %v2480_v32 }
 0x255   :  { %v2499_v34 = vpop.xlane.xlu1 %2498 }
 0x256   :  { %v2501_v35 = vmul.f32 0.001953125, %v2499_v34  ;;  %v2502_v36 = vmul.f32 %v2500_v33, %v2500_v33  ;;  %v2509_v5 = vsub.f32 %v13750_v11, %v2500_v33  ;;  %v2510_v16 = vsub.f32 %v13754_v15, %v2500_v33 }
 0x257   :  { %v2511_v13 = vsub.f32 %v13771_v25, %v2500_v33  ;;  %v2512_v14 = vsub.f32 %v13778_v30, %v2500_v33  ;;  %v2513_v19 = vsub.f32 %v13786_v39, %v2500_v33  ;;  %v2514_v20 = vsub.f32 %v13790_v43, %v2500_v33 }
 0x258   :  { %v2503_v37 = vsub.f32 %v2501_v35, %v2502_v36 }
 0x259   :  { %v2530_v38 = vpop.permute.xlu1 %2529 }
 0x25a   :  { %v2504_v40 = vmax.f32 %v2503_v37, 0.0 }
 0x25c   :  { %v2505_v41 = vadd.f32 1e-05, %v2504_v40 }
 0x25d   :  { %v13852_v42 = vpop.permute.xlu1 %2615 }
 0x25e   :  { %13303 = vrsqrt.f32 %v2505_v41 }
 0x261   :  { %v13854_v44 = vpop.permute.xlu1 %2617 }
 0x262   :  { %v13932_v35 = vsel %vm2627_vm13, %v13852_v42, %v13854_v44 }
 0x265   :  { %v13859_v47 = vpop.permute.xlu1 %2619 }
 0x268   :  { %v13304_v46 = vpop.eup %13303 }
 0x269   :  { %v2508_v48 = vmul.f32 %v13304_v46, %v2507_v45  ;;  %v13869_v52 = vpop.permute.xlu1 %2621 }
 0x26b   :  { %2517 = vperm.xlu0 %13056, %v2508_v48   ;;  %v13941_v48 = vsel %vm2627_vm13, %v13854_v44, %v13859_v47 }
 0x26d   :  { %v13890_v60 = vpop.permute.xlu1 %2706 }
 0x26e   :  { %v2729_v1 = vmul.f32 %v13890_v60, %v2550_v61 }
 0x26f   :  { %2710 = vrot.lane.b32.xlu0 %v2693_v49, %s13334_s19  ;;  %v13946_v49 = vsel %vm2627_vm13, %v13859_v47, %v13869_v52 }
 0x271   :  { %v2709_v43 = vpop.permute.xlu1 %2708 }
 0x272   :  { %v13957_v44 = vsel %vm2663_vm14, %v13890_v60, %v2709_v43 }
 0x273   :  { %2623 = vrot.lane.b32.xlu0 %v2610_v54, %s13333_s3 }
 0x275   :  { %v2713_v46 = vpop.permute.xlu1 %2712 }
 0x277   :  { %2714 = vrot.lane.b32.xlu0 %v2701_v59, %s13334_s19 }
 0x279   :  { %v2626_v56 = vpop.permute.xlu1 %2625 }
 0x27b   :  { %2741 = vrot.lane.b32.xlu0 %v2729_v1, %s13333_s3 }
 0x27f   :  { %2847 = vrot.lane.b32.xlu0 %v2826_v3, %s13335_s27 }
 0x283   :  { %2851 = vrot.lane.b32.xlu0 %v2834_v4, %s13335_s27 }
 0x2ea   :  { %v2518_v17 = vpop.permute.xlu0 %2517 }
 0x2eb   :  { %v2520_v24 = vmul.f32 %v2518_v17, %v2509_v5  ;;  %v2521_v26 = vmul.f32 %v2518_v17, %v2510_v16  ;;  %v2522_v28 = vmul.f32 %v2518_v17, %v2511_v13  ;;  %v2523_v29 = vmul.f32 %v2518_v17, %v2512_v14  ;;  %v2717_v14 = vpop.permute.xlu1 %2716 }
 0x2ec   :  { %v2524_v31 = vmul.f32 %v2518_v17, %v2513_v19  ;;  %v2525_v32 = vmul.f32 %v2518_v17, %v2514_v20  ;;  %v2921_v17 = vrot.slane %v13885_v58, %v13736_v2 }
 0x2ed   :  { %v13910_v34 = vadd.f32 %v2530_v38, %v2520_v24  ;;  %v13912_v11 = vadd.f32 %v2530_v38, %v2521_v26  ;;  %v13914_v15 = vadd.f32 %v2530_v38, %v2522_v28  ;;  %v13916_v25 = vadd.f32 %v2530_v38, %v2523_v29 }
 0x2ee   :  { %v13918_v30 = vadd.f32 %v2530_v38, %v2524_v31  ;;  %v13920_v39 = vadd.f32 %v2530_v38, %v2525_v32  ;;  %v2711_v33 = vpop.permute.xlu0 %2710  ;;  %v2838_v26 = vrot.slane %v13871_v53, %v13746_v9  ;;  %v2925_v28 = vrot.slane %v13885_v58, %v13741_v6 }
 0x2ef   :  { %2538 = vst [vmem:[#allocation2 + $0x8] sm:$0xf] %v13910_v34  ;;  %2539 = vst [vmem:[#allocation2 + $0x10] sm:$0xf] %v13912_v11  ;;  %v13951_v55 = vsel %vm2663_vm14, %v2709_v43, %v2711_v33  ;;  %v13962_v59 = vsel %vm2663_vm14, %v2711_v33, %v2713_v46  ;;  %v2929_v29 = vrot.slane %v13885_v58, %v13746_v9  ;;  %v14002_v32 = vpop.permute.xlu1 %2849 }
 0x2f0   :  { %2540 = vst [vmem:[#allocation2 + $0x18] sm:$0xf] %v13914_v15  ;;  %2541 = vst [vmem:[#allocation2 + $0x20] sm:$0xf] %v13916_v25  ;;  %v2842_v31 = vrot.slane %v13871_v53, %v13748_v10  ;;  %v2846_v43 = vrot.slane %v13871_v53, %v13752_v12  ;;  %v2933_v33 = vrot.slane %v13885_v58, %v13748_v10 }
 0x2f1   :  { %2542 = vst [vmem:[#allocation2 + $0x28] sm:$0xf] %v13918_v30  ;;  %2543 = vst.msk [vmem:[#allocation2 + $0x30] sm:$0xf] %vm2476_vm12, %v13920_v39 }
 0x2f2   :  { %v2624_v50 = vpop.permute.xlu0 %2623 }
 0x2f3   :  { %v13968_v1 = vsel %vm2627_vm13, %v13869_v52, %v2624_v50  ;;  %v13973_v5 = vsel %vm2627_vm13, %v2624_v50, %v2626_v56 }
 0x2f6   :  { %v2545_v36 = vld [vmem:[#allocation2 + $0x10] sm:$0xf]  ;;  %v2544_v37 = vld [vmem:[#allocation2 + $0x8] sm:$0xf]  ;;  %v2715_v62 = vpop.permute.xlu0 %2714 }
 0x2f7   :  { %v2640_v38 = vmul.f32 %v13932_v35, %v2545_v36  ;;  %v2639_v40 = vmul.f32 %v13852_v42, %v2544_v37  ;;  %v2547_v41 = vld [vmem:[#allocation2 + $0x20] sm:$0xf]  ;;  %v2546_v45 = vld [vmem:[#allocation2 + $0x18] sm:$0xf]  ;;  %v2731_v47 = vmul.f32 %v13951_v55, %v2545_v36  ;;  %v2730_v57 = vmul.f32 %v13957_v44, %v2544_v37  ;;  %v14014_v37 = vpop.permute.xlu1 %2938 }
 0x2f8   :  { %v2642_v51 = vmul.f32 %v13946_v49, %v2547_v41  ;;  %v2641_v54 = vmul.f32 %v13941_v48, %v2546_v45  ;;  %v2548_v61 = vld [vmem:[#allocation2 + $0x28] sm:$0xf]  ;;  %v2732_v4 = vmul.f32 %v13962_v59, %v2546_v45  ;;  %v13976_v16 = vsel %vm2663_vm14, %v2713_v46, %v2715_v62  ;;  %v2549_v13 = vld [vmem:[#allocation2 + $0x30] sm:$0xf] }
 0x2f9   :  { %2653 = vrot.lane.b32.xlu1 %v2640_v38, %s13334_s19  ;;  %2651 = vrot.lane.b32.xlu0 %v2639_v40, %s13334_s19  ;;  %v2643_v3 = vmul.f32 %v13968_v1, %v2548_v61  ;;  %v2733_v19 = vmul.f32 %v13976_v16, %v2547_v41  ;;  %v2644_v52 = vmul.f32 %v13973_v5, %v2549_v13  ;;  %v2782_v38 = vld [vmem:[#allocation2] sm:$0xf]  ;;  %v2551_v46 = vsub.f32 1.0, %v13815_v7 }
 0x2fa   :  { %v13983_v20 = vsel %vm2663_vm14, %v2715_v62, %v2717_v14  ;;  %v2937_v36 = vrot.slane %v13885_v58, %v13752_v12  ;;  %v2962_v40 = vmul.f32 %v14014_v37, %v2782_v38  ;;  %v2742_v41 = vpop.permute.xlu0 %2741 }
 0x2fb   :  { %v2734_v24 = vmul.f32 %v13983_v20, %v2548_v61 }
 0x2fd   :  { %2657 = vrot.lane.b32.xlu1 %v2642_v51, %s13334_s19  ;;  %2655 = vrot.lane.b32.xlu0 %v2641_v54, %s13334_s19  ;;  %v2552_v51 = vsub.f32 %v2551_v46, %v13834_v23 }
 0x2fe   :  { %v14019_v45 = vpop.permute.xlu0 %2847 }
 0x2ff   :  { %v14038_v13 = vrot.slane %v2552_v51, %v13741_v6 }
 0x301   :  { %2745 = vrot.lane.b32.xlu0 %v2731_v47, %s13333_s3  ;;  %2743 = vrot.lane.b32.xlu1 %v2730_v57, %s13333_s3  ;;  %v14026_v47 = vrot.slane %v2552_v51, %v13734_v63  ;;  %v14029_v57 = vrot.slane %v2552_v51, %v13736_v2 }
 0x302   :  { %v14022_v50 = vpop.permute.xlu0 %2851 }
 0x303   :  { %v2584_v7 = vmul.f32 %v14026_v47, %v13910_v34  ;;  %v2585_v23 = vmul.f32 %v14029_v57, %v13912_v11  ;;  %v14050_v11 = vrot.slane %v2552_v51, %v13746_v9 }
 0x305   :  { %2659 = vrot.lane.b32.xlu0 %v2643_v3, %s13334_s19  ;;  %2747 = vrot.lane.b32.xlu1 %v2732_v4, %s13333_s3 }
 0x309   :  { %2749 = vrot.lane.b32.xlu0 %v2733_v19, %s13333_s3  ;;  %2661 = vrot.lane.b32.xlu1 %v2644_v52, %s13334_s19 }
 0x30d   :  { %2940 = vrot.lane.b32.xlu0 %v2921_v17, %s13336_s28  ;;  %2751 = vrot.lane.b32.xlu1 %v2734_v24, %s13333_s3 }
 0x311   :  { %2853 = vrot.lane.b32.xlu0 %v2838_v26, %s13335_s27  ;;  %2942 = vrot.lane.b32.xlu1 %v2925_v28, %s13336_s28 }
 0x315   :  { %2944 = vrot.lane.b32.xlu0 %v2929_v29, %s13336_s28  ;;  %2855 = vrot.lane.b32.xlu1 %v2842_v31, %s13335_s27  ;;  %v2586_v29 = vmul.f32 %v14038_v13, %v13914_v15  ;;  %v14057_v15 = vrot.slane %v2552_v51, %v13752_v12 }
 0x319   :  { %2857 = vrot.lane.b32.xlu0 %v2846_v43, %s13335_s27  ;;  %2946 = vrot.lane.b32.xlu1 %v2933_v33, %s13336_s28 }
 0x31d   :  { %2948 = vrot.lane.b32.xlu1 %v2937_v36, %s13336_s28 }
 0x321   :  { %2976 = vrot.lane.b32.xlu1 %v2962_v40, %s13335_s27 }
 0x36b   :  { %v2652_v54 = vpop.permute.xlu0 %2651  ;;  %v2654_v56 = vpop.permute.xlu1 %2653 }
 0x36c   :  { %v2664_v3 = vsel %vm2663_vm14, %v2652_v54, %v2654_v56  ;;  %v14064_v54 = vrot.slane %v2552_v51, %v13748_v10  ;;  %v14078_v51 = vsel %vm2859_vm15, %v14019_v45, %v14002_v32 }
 0x36d   :  { %v2675_v14 = vadd.f32 %v2664_v3, %v2584_v7 }
 0x36f   :  { %v2656_v61 = vpop.permute.xlu0 %2655  ;;  %v2658_v62 = vpop.permute.xlu1 %2657 }
 0x370   :  { %v2665_v4 = vsel %vm2663_vm14, %v2654_v56, %v2656_v61  ;;  %v2666_v24 = vsel %vm2663_vm14, %v2656_v61, %v2658_v62 }
 0x371   :  { %v2676_v19 = vadd.f32 %v2665_v4, %v2585_v23  ;;  %v2677_v43 = vadd.f32 %v2666_v24, %v2586_v29  ;;  %v2589_v4 = vmul.f32 %v14057_v15, %v13920_v39 }
 0x373   :  { %v2746_v52 = vpop.permute.xlu0 %2745  ;;  %v2744_v17 = vpop.permute.xlu1 %2743 }
 0x374   :  { %v2753_v26 = vsel %vm2627_vm13, %v2742_v41, %v2744_v17  ;;  %v2754_v28 = vsel %vm2627_vm13, %v2744_v17, %v2746_v52  ;;  %v2587_v41 = vmul.f32 %v14050_v11, %v13916_v25  ;;  %v2588_v25 = vmul.f32 %v14064_v54, %v13918_v30 }
 0x375   :  { %v14045_v34 = vadd.f32 %v2753_v26, %v2675_v14  ;;  %v14047_v31 = vadd.f32 %v2754_v28, %v2676_v19 }
 0x377   :  { %2770 = vst [vmem:[#allocation2 + $0x8] sm:$0xf] %v14045_v34  ;;  %2771 = vst [vmem:[#allocation2 + $0x10] sm:$0xf] %v14047_v31  ;;  %v2660_v33 = vpop.permute.xlu0 %2659  ;;  %v2748_v36 = vpop.permute.xlu1 %2747 }
 0x378   :  { %v2667_v38 = vsel %vm2663_vm14, %v2658_v62, %v2660_v33  ;;  %v2755_v40 = vsel %vm2627_vm13, %v2746_v52, %v2748_v36 }
 0x379   :  { %v14061_v46 = vadd.f32 %v2755_v40, %v2677_v43  ;;  %v2678_v56 = vadd.f32 %v2667_v38, %v2587_v41 }
 0x37b   :  { %2772 = vst [vmem:[#allocation2 + $0x18] sm:$0xf] %v14061_v46  ;;  %v2750_v61 = vpop.permute.xlu0 %2749  ;;  %v2662_v3 = vpop.permute.xlu1 %2661 }
 0x37c   :  { %v2756_v62 = vsel %vm2627_vm13, %v2748_v36, %v2750_v61  ;;  %v2668_v7 = vsel %vm2663_vm14, %v2660_v33, %v2662_v3  ;;  %v2680_v14 = vadd.f32 %v2662_v3, %v2589_v4  ;;  %v14093_v33 = vsel %vm2859_vm15, %v14002_v32, %v14022_v50 }
 0x37d   :  { %v14071_v23 = vadd.f32 %v2756_v62, %v2678_v56  ;;  %v2679_v17 = vadd.f32 %v2668_v7, %v2588_v25 }
 0x37e   :  { %v2777_v19 = vld [vmem:[#allocation2 + $0x10] sm:$0xf]  ;;  %v2776_v52 = vld [vmem:[#allocation2 + $0x8] sm:$0xf] }
 0x37f   :  { %2773 = vst [vmem:[#allocation2 + $0x20] sm:$0xf] %v14071_v23  ;;  %v2941_v24 = vpop.permute.xlu0 %2940  ;;  %v2752_v39 = vpop.permute.xlu1 %2751  ;;  %v2872_v26 = vmul.f32 %v14078_v51, %v2777_v19  ;;  %v2871_v28 = vmul.f32 %v14019_v45, %v2776_v52 }
 0x380   :  { %v2757_v29 = vsel %vm2627_vm13, %v2750_v61, %v2752_v39  ;;  %v14084_v30 = vadd.f32 %v2752_v39, %v2680_v14  ;;  %v14101_v56 = vsel %vm2895_vm0, %v14014_v37, %v2941_v24 }
 0x381   :  { %v14086_v43 = vadd.f32 %v2757_v29, %v2679_v17  ;;  %2885 = vrot.lane.b32.xlu1 %v2872_v26, %s13336_s28  ;;  %2883 = vrot.lane.b32.xlu0 %v2871_v28, %s13336_s28  ;;  %v2963_v4 = vmul.f32 %v14101_v56, %v2776_v52 }
 0x382   :  { %2775 = vst.msk [vmem:[#allocation2 + $0x30] sm:$0xf] %vm2476_vm12, %v14084_v30  ;;  %v2778_v36 = vld [vmem:[#allocation2 + $0x18] sm:$0xf] }
 0x383   :  { %2774 = vst [vmem:[#allocation2 + $0x28] sm:$0xf] %v14086_v43  ;;  %v2854_v38 = vpop.permute.xlu0 %2853  ;;  %v2943_v40 = vpop.permute.xlu1 %2942  ;;  %v2873_v41 = vmul.f32 %v14093_v33, %v2778_v36 }
 0x384   :  { %v14104_v61 = vsel %vm2895_vm0, %v2941_v24, %v2943_v40  ;;  %v14116_v14 = vsel %vm2859_vm15, %v14022_v50, %v2854_v38 }
 0x385   :  { %2887 = vrot.lane.b32.xlu0 %v2873_v41, %s13336_s28  ;;  %v2964_v32 = vmul.f32 %v14104_v61, %v2777_v19 }
 0x386   :  { %v2779_v25 = vld [vmem:[#allocation2 + $0x20] sm:$0xf] }
 0x387   :  { %v2945_v3 = vpop.permute.xlu0 %2944  ;;  %v2856_v62 = vpop.permute.xlu1 %2855  ;;  %2980 = vrot.lane.b32.xlu1 %v2964_v32, %s13335_s27  ;;  %v2874_v39 = vmul.f32 %v14116_v14, %v2779_v25 }
 0x388   :  { %v14111_v7 = vsel %vm2859_vm15, %v2854_v38, %v2856_v62  ;;  %v14121_v26 = vsel %vm2895_vm0, %v2943_v40, %v2945_v3 }
 0x389   :  { %16795 = vst [vmem:[#allocation8_spill] sm:$0xff] %v14111_v7  ;;  %2978 = vrot.lane.b32.xlu0 %v2963_v4, %s13335_s27  ;;  %16796 = vst [vmem:[#allocation9_spill] sm:$0xff] %v14121_v26  ;;  %v2965_v38 = vmul.f32 %v14121_v26, %v2778_v36  ;;  %v2781_v32 = vld [vmem:[#allocation2 + $0x30] sm:$0xf]  ;;  %v14145_v36 = vld [vmem:[#allocation2] sm:$0xf] }
 0x38a   :  { %v2780_v17 = vld [vmem:[#allocation2 + $0x28] sm:$0xf] }
 0x38b   :  { %v2947_v24 = vpop.permute.xlu1 %2946  ;;  %v2875_v19 = vmul.f32 %v14111_v7, %v2780_v17  ;;  %v2858_v28 = vpop.permute.xlu0 %2857 }
 0x38c   :  { %v14124_v52 = vsel %vm2895_vm0, %v2945_v3, %v2947_v24  ;;  %v14133_v41 = vsel %vm2859_vm15, %v2856_v62, %v2858_v28 }
 0x38d   :  { %16797 = vst [vmem:[#allocation10_spill] sm:$0xff] %v14124_v52  ;;  %2891 = vrot.lane.b32.xlu1 %v2875_v19, %s13336_s28  ;;  %2889 = vrot.lane.b32.xlu0 %v2874_v39, %s13336_s28  ;;  %v2966_v50 = vmul.f32 %v14124_v52, %v2779_v25  ;;  %16799 = vst [vmem:[#allocation12_spill] sm:$0xff] %v14133_v41  ;;  %v2876_v4 = vmul.f32 %v14133_v41, %v2781_v32  ;;  %v2783_v25 = vsub.f32 1.0, %v13871_v53 }
 0x38f   :  { %v14128_v29 = vpop.permute.xlu1 %2948 }
 0x390   :  { %16798 = vst [vmem:[#allocation11_spill] sm:$0xff] %v14128_v29  ;;  %v14137_v40 = vsel %vm2895_vm0, %v2947_v24, %v14128_v29  ;;  %v2968_v62 = vmul.f32 %v14128_v29, %v2781_v32 }
 0x391   :  { %16800 = vst [vmem:[#allocation13_spill] sm:$0xff] %v14137_v40  ;;  %2984 = vrot.lane.b32.xlu1 %v2966_v50, %s13335_s27  ;;  %2982 = vrot.lane.b32.xlu0 %v2965_v38, %s13335_s27  ;;  %v2967_v3 = vmul.f32 %v14137_v40, %v2780_v17  ;;  %v2784_v17 = vsub.f32 %v2783_v25, %v13885_v58 }
 0x393   :  { %v2977_v24 = vpop.permute.xlu1 %2976  ;;  %v14154_v28 = vrot.slane %v2784_v17, %v13734_v63  ;;  %v14157_v50 = vrot.slane %v2784_v17, %v13736_v2 }
 0x395   :  { %2986 = vrot.lane.b32.xlu1 %v2967_v3, %s13335_s27  ;;  %2893 = vrot.lane.b32.xlu0 %v2876_v4, %s13336_s28  ;;  %16801 = vst [vmem:[#allocation14_spill] sm:$0xff] %v14154_v28  ;;  %16802 = vst [vmem:[#allocation15_spill] sm:$0xff] %v14157_v50  ;;  %v2816_v4 = vmul.f32 %v14154_v28, %v14045_v34  ;;  %v2817_v53 = vmul.f32 %v14157_v50, %v14047_v31 }
 0x399   :  { %2988 = vrot.lane.b32.xlu0 %v2968_v62, %s13335_s27  ;;  %3029 = vrot.lane.b32.xlu1 %v14145_v36, %s13324_s20 }
 0x3f3   :  { %v2884_v19 = vpop.permute.xlu0 %2883  ;;  %v2886_v39 = vpop.permute.xlu1 %2885 }
 0x3f4   :  { %v2896_v32 = vsel %vm2895_vm0, %v2884_v19, %v2886_v39  ;;  %v14168_v19 = vrot.slane %v2784_v17, %v13741_v6 }
 0x3f5   :  { %v2907_v58 = vadd.f32 %v2896_v32, %v2816_v4 }
 0x3f6   :  { %16803 = vst [vmem:[#allocation16_spill] sm:$0xff] %v14168_v19 }
 0x3f7   :  { %v2888_v38 = vpop.permute.xlu0 %2887 }
 0x3f8   :  { %v2897_v3 = vsel %vm2895_vm0, %v2886_v39, %v2888_v38  ;;  %v14171_v39 = vrot.slane %v2784_v17, %v13746_v9  ;;  %v14180_v9 = vrot.slane %v2784_v17, %v13748_v10 }
 0x3f9   :  { %v2908_v62 = vadd.f32 %v2897_v3, %v2817_v53  ;;  %v2981_v25 = vpop.permute.xlu1 %2980 }
 0x3fa   :  { %16804 = vst [vmem:[#allocation17_spill] sm:$0xff] %v14171_v39  ;;  %16805 = vst [vmem:[#allocation18_spill] sm:$0xff] %v14180_v9  ;;  %v2820_v10 = vmul.f32 %v14180_v9, %v14086_v43  ;;  %v3773_v43 = vld [vmem:[#allocation2] sm:$0xf] }
 0x3fb   :  { %v2979_v29 = vpop.permute.xlu0 %2978 }
 0x3fc   :  { %v2990_v63 = vsel %vm2859_vm15, %v2977_v24, %v2979_v29  ;;  %v2991_v2 = vsel %vm2859_vm15, %v2979_v29, %v2981_v25  ;;  %v2818_v24 = vmul.f32 %v14168_v19, %v14061_v46  ;;  %v2819_v29 = vmul.f32 %v14171_v39, %v14071_v23 }
 0x3fd   :  { %v3002_v40 = vadd.f32 %v2990_v63, %v2907_v58  ;;  %v3003_v41 = vadd.f32 %v2991_v2, %v2908_v62  ;;  %v14185_v63 = vrot.slane %v2784_v17, %v13752_v12 }
 0x3ff   :  { %3008 = vst [vmem:[#allocation2 + $0x8] sm:$0xf] %v3002_v40  ;;  %3009 = vst [vmem:[#allocation2 + $0x10] sm:$0xf] %v3003_v41  ;;  %v2892_v34 = vpop.permute.xlu1 %2891  ;;  %v2890_v31 = vpop.permute.xlu0 %2889 }
 0x400   :  { %v2898_v32 = vsel %vm2895_vm0, %v2888_v38, %v2890_v31  ;;  %v2899_v3 = vsel %vm2895_vm0, %v2890_v31, %v2892_v34  ;;  %16806 = vst [vmem:[#allocation19_spill] sm:$0xff] %v14185_v63 }
 0x401   :  { %v2909_v4 = vadd.f32 %v2898_v32, %v2818_v24  ;;  %v2910_v6 = vadd.f32 %v2899_v3, %v2819_v29  ;;  %v2821_v32 = vmul.f32 %v14185_v63, %v14084_v30 }
 0x403   :  { %v2985_v53 = vpop.permute.xlu1 %2984  ;;  %v2983_v58 = vpop.permute.xlu0 %2982 }
 0x404   :  { %v2992_v41 = vsel %vm2859_vm15, %v2981_v25, %v2983_v58  ;;  %v2993_v40 = vsel %vm2859_vm15, %v2983_v58, %v2985_v53 }
 0x405   :  { %v3004_v38 = vadd.f32 %v2992_v41, %v2909_v4  ;;  %v3005_v62 = vadd.f32 %v2993_v40, %v2910_v6 }
 0x406   :  { %v3016_v46 = vld [vmem:[#allocation2 + $0x10] sm:$0xf]  ;;  %v3015_v2 = vld [vmem:[#allocation2 + $0x8] sm:$0xf] }
 0x407   :  { %3010 = vst [vmem:[#allocation2 + $0x18] sm:$0xf] %v3004_v38  ;;  %3011 = vst [vmem:[#allocation2 + $0x20] sm:$0xf] %v3005_v62  ;;  %v2987_v23 = vpop.permute.xlu1 %2986  ;;  %3033 = vrot.lane.b32.xlu0 %v3016_v46, %s13324_s20  ;;  %3031 = vrot.lane.b32.xlu1 %v3015_v2, %s13324_s20  ;;  %v2894_v25 = vpop.permute.xlu0 %2893 }
 0x408   :  { %v2900_v31 = vsel %vm2895_vm0, %v2892_v34, %v2894_v25  ;;  %v2994_v17 = vsel %vm2859_vm15, %v2985_v53, %v2987_v23  ;;  %v2912_v3 = vadd.f32 %v2894_v25, %v2821_v32  ;;  %v14215_v34 = vld [vmem:[#allocation2 + $0x8] sm:$0xf] }
 0x409   :  { %v2911_v12 = vadd.f32 %v2900_v31, %v2820_v10  ;;  %v12250_v32 = vld [vmem:[%s16721_s6 + $0x8] sm:$0xff] }
 0x40b   :  { %v3006_v24 = vadd.f32 %v2994_v17, %v2911_v12  ;;  %v2989_v29 = vpop.permute.xlu0 %2988  ;;  %v14298_v12 = vld [vmem:[#allocation2] sm:$0xff] }
 0x40c   :  { %v2995_v4 = vsel %vm2859_vm15, %v2987_v23, %v2989_v29 }
 0x40d   :  { %3012 = vst [vmem:[#allocation2 + $0x28] sm:$0xf] %v3006_v24  ;;  %v3007_v6 = vadd.f32 %v2995_v4, %v2912_v3 }
 0x40e   :  { %v3018_v58 = vld [vmem:[#allocation2 + $0x20] sm:$0xf]  ;;  %v3017_v41 = vld [vmem:[#allocation2 + $0x18] sm:$0xf] }
 0x40f   :  { %3013 = vst.msk [vmem:[#allocation2 + $0x30] sm:$0xf] %vm2476_vm12, %v3007_v6  ;;  %3037 = vrot.lane.b32.xlu1 %v3018_v58, %s13324_s20  ;;  %3035 = vrot.lane.b32.xlu0 %v3017_v41, %s13324_s20  ;;  %v14223_v53 = vld [vmem:[#allocation2 + $0x20] sm:$0xf]  ;;  %v14227_v40 = vld [vmem:[#allocation2 + $0x18] sm:$0xf] }
 0x413   :  { %3275 = vrot.lane.b32.xlu1 %v14145_v36, %s13325_s21 }
 0x414   :  { %v3019_v30 = vld [vmem:[#allocation2 + $0x28] sm:$0xf] }
 0x415   :  { %3039 = vrot.lane.b32.xlu0 %v3019_v30, %s13324_s20  ;;  %v14235_v62 = vld [vmem:[#allocation2 + $0x28] sm:$0xf] }
 0x416   :  { %v14231_v38 = vld [vmem:[#allocation2 + $0x30] sm:$0xf] }
 0x417   :  { %3277 = vrot.lane.b32.xlu1 %v3015_v2, %s13325_s21 }
 0x419   :  { %3279 = vrot.lane.b32.xlu0 %v3016_v46, %s13325_s21 }
 0x41b   :  { %3283 = vrot.lane.b32.xlu1 %v3018_v58, %s13325_s21 }
 0x41d   :  { %3281 = vrot.lane.b32.xlu0 %v3017_v41, %s13325_s21 }
 0x41f   :  { %3522 = vrot.lane.b32.xlu1 %v14145_v36, %s13326_s22  ;;  %v14219_v36 = vld [vmem:[#allocation2 + $0x10] sm:$0xf] }
 0x421   :  { %3285 = vrot.lane.b32.xlu0 %v3019_v30, %s13325_s21 }
 0x423   :  { %3524 = vrot.lane.b32.xlu1 %v3015_v2, %s13326_s22  ;;  %v3030_v2 = vpop.permute.xlu1 %3029 }
 0x425   :  { %3526 = vrot.lane.b32.xlu0 %v3016_v46, %s13326_s22  ;;  %v5291_v46 = vld [vmem:[%s16720_s7] sm:$0xff] }
 0x427   :  { %3530 = vrot.lane.b32.xlu1 %v3018_v58, %s13326_s22 }
 0x429   :  { %3528 = vrot.lane.b32.xlu0 %v3017_v41, %s13326_s22 }
 0x42b   :  { %3789 = vrot.lane.b32.xlu1 %v3773_v43, %s13327_s2 }
 0x42d   :  { %3532 = vrot.lane.b32.xlu0 %v3019_v30, %s13326_s22 }
 0x42f   :  { %3791 = vrot.lane.b32.xlu1 %v14215_v34, %s13327_s2 }
 0x431   :  { %3793 = vrot.lane.b32.xlu0 %v14219_v36, %s13327_s2 }
 0x433   :  { %3797 = vrot.lane.b32.xlu1 %v14223_v53, %s13327_s2 }
 0x435   :  { %3795 = vrot.lane.b32.xlu0 %v14227_v40, %s13327_s2 }
 0x437   :  { %3801 = vrot.lane.b32.xlu1 %v14231_v38, %s13327_s2 }
 0x439   :  { %3799 = vrot.lane.b32.xlu0 %v14235_v62, %s13327_s2 }
 0x43b   :  { %4285 = vrot.lane.b32.xlu1 %v14227_v40, %s13328_s23 }
 0x43d   :  { %4283 = vrot.lane.b32.xlu0 %v14219_v36, %s13328_s23 }
 0x43f   :  { %4287 = vrot.lane.b32.xlu1 %v14223_v53, %s13328_s23 }
 0x441   :  { %4281 = vrot.lane.b32.xlu0 %v14215_v34, %s13328_s23 }
 0x443   :  { %4291 = vrot.lane.b32.xlu1 %v14231_v38, %s13328_s23 }
 0x445   :  { %4289 = vrot.lane.b32.xlu0 %v14235_v62, %s13328_s23 }
 0x447   :  { %4538 = vrot.lane.b32.xlu1 %v14227_v40, %s13329_s24 }
 0x449   :  { %4536 = vrot.lane.b32.xlu0 %v14219_v36, %s13329_s24 }
 0x44b   :  { %4540 = vrot.lane.b32.xlu1 %v14223_v53, %s13329_s24 }
 0x44d   :  { %4534 = vrot.lane.b32.xlu0 %v14215_v34, %s13329_s24 }
 0x44f   :  { %4544 = vrot.lane.b32.xlu1 %v14231_v38, %s13329_s24 }
 0x451   :  { %4542 = vrot.lane.b32.xlu0 %v14235_v62, %s13329_s24 }
 0x453   :  { %4791 = vrot.lane.b32.xlu1 %v14227_v40, %s13330_s25 }
 0x455   :  { %4789 = vrot.lane.b32.xlu0 %v14219_v36, %s13330_s25 }
 0x457   :  { %4793 = vrot.lane.b32.xlu1 %v14223_v53, %s13330_s25 }
 0x459   :  { %4787 = vrot.lane.b32.xlu0 %v14215_v34, %s13330_s25 }
 0x45b   :  { %4797 = vrot.lane.b32.xlu1 %v14231_v38, %s13330_s25 }
 0x45d   :  { %4795 = vrot.lane.b32.xlu0 %v14235_v62, %s13330_s25 }
 0x45f   :  { %5044 = vrot.lane.b32.xlu1 %v14227_v40, %s13331_s26 }
 0x461   :  { %5042 = vrot.lane.b32.xlu0 %v14219_v36, %s13331_s26 }
 0x463   :  { %5046 = vrot.lane.b32.xlu1 %v14223_v53, %s13331_s26 }
 0x465   :  { %5040 = vrot.lane.b32.xlu0 %v14215_v34, %s13331_s26 }
 0x467   :  { %5050 = vrot.lane.b32.xlu1 %v14231_v38, %s13331_s26 }
 0x469   :  { %5048 = vrot.lane.b32.xlu0 %v14235_v62, %s13331_s26 }
 0x46d   :  { %5294 = vperm.xlu0 %13056, %v5291_v46   ;;  %v3020_v46 = vld [vmem:[%s16721_s6] sm:$0xff] }
 0x479   :  { %v3032_v23 = vpop.permute.xlu1 %3031  ;;  %v3034_v10 = vpop.permute.xlu0 %3033 }
 0x47a   :  { %v3041_v25 = vsel %vm152_vm1, %v3030_v2, %v3032_v23  ;;  %v3042_v31 = vsel %vm152_vm1, %v3032_v23, %v3034_v10 }
 0x47b   :  { %12251 = vmatprep.subr.msk.mxu1 %vm2466_vm11, %v3042_v31 }
 0x47c   :  { %12252 = vmatpush1.msk.msra.mxu1 %vm2466_vm11, %v3041_v25 }
 0x47d   :  { %12253 = vmatmul.mubr.msk.f32.vlgmr.msra.gmra.mrb[2].mxu1 %vm3046_vm2, %v12250_v32 }
 0x47e   :  { %3197 = vmatprep.mubr.f32.mxu1 %v14298_v12 }
 0x481   :  { %v3038_v17 = vpop.permute.xlu1 %3037  ;;  %v3036_v3 = vpop.permute.xlu0 %3035 }
 0x482   :  { %v3043_v24 = vsel %vm152_vm1, %v3034_v10, %v3036_v3  ;;  %v3044_v29 = vsel %vm152_vm1, %v3036_v3, %v3038_v17 }
 0x483   :  { %12254 = vmatprep.subr.msk.mxu1 %vm2466_vm11, %v3044_v29 }
 0x484   :  { %12255 = vmatpush1.msk.msra.mxu1 %vm2466_vm11, %v3043_v24 }
 0x485   :  { %v3276_v4 = vpop.permute.xlu1 %3275  ;;  %12256 = vmatmul.mubr.msk.f32.vlgmr.msra.gmra.mrb[4].mxu1 %vm3046_vm2, %v12250_v32 }
 0x486   :  { %3268 = vmatprep.mubr.f32.mxu1 %v14298_v12 }
 0x487   :  { %v3040_v6 = vpop.permute.xlu0 %3039 }
 0x488   :  { %v3045_v58 = vsel %vm152_vm1, %v3038_v17, %v3040_v6  ;;  %12257 = vmatprep.subr.msk.mxu1 %vm2466_vm11, %v3040_v6  ;;  %v12269_v6 = vld [vmem:[%s16721_s6 + $0x10] sm:$0xff] }
 0x489   :  { %v3278_v41 = vpop.permute.xlu1 %3277  ;;  %12258 = vmatpush1.msk.msra.mxu1 %vm2466_vm11, %v3045_v58 }
 0x48a   :  { %12259 = vmatmul.mubr.msk.f32.vlgmr.msra.gmra.mrb[6].mxu1 %vm3046_vm2, %v12250_v32  ;;  %v3287_v2 = vsel %vm400_vm4, %v3276_v4, %v3278_v41 }
 0x48b   :  { %v3280_v30 = vpop.permute.xlu0 %3279  ;;  %3371 = vmatprep.mubr.f32.mxu1 %v14298_v12 }
 0x48c   :  { %v3288_v43 = vsel %vm400_vm4, %v3278_v41, %v3280_v30 }
 0x48d   :  { %v3284_v23 = vpop.permute.xlu1 %3283  ;;  %12260 = vmatprep.subr.msk.mxu1 %vm2466_vm11, %v3288_v43 }
 0x48e   :  { %12261 = vmatpush1.msk.msra.mxu1 %vm2466_vm11, %v3287_v2 }
 0x48f   :  { %12262 = vmatmul.mubr.msk.f32.vlgmr.msra.gmra.mrb[2].mxu1 %vm3046_vm2, %v3020_v46  ;;  %v3282_v10 = vpop.permute.xlu0 %3281 }
 0x490   :  { %v3289_v25 = vsel %vm400_vm4, %v3280_v30, %v3282_v10  ;;  %v3290_v31 = vsel %vm400_vm4, %v3282_v10, %v3284_v23  ;;  %3442 = vmatprep.mubr.f32.mxu1 %v14298_v12 }
 0x491   :  { %v3523_v32 = vpop.permute.xlu1 %3522  ;;  %12263 = vmatprep.subr.msk.mxu1 %vm2466_vm11, %v3290_v31 }
 0x492   :  { %12264 = vmatpush1.msk.msra.mxu1 %vm2466_vm11, %v3289_v25 }
 0x493   :  { %12265 = vmatmul.mubr.msk.f32.vlgmr.msra.gmra.mrb[4].mxu1 %vm3046_vm2, %v3020_v46  ;;  %v3286_v17 = vpop.permute.xlu0 %3285 }
 0x494   :  { %v3291_v3 = vsel %vm400_vm4, %v3284_v23, %v3286_v17  ;;  %12266 = vmatprep.subr.msk.mxu1 %vm2466_vm11, %v3286_v17  ;;  %3513 = vmatprep.mubr.f32.mxu1 %v14298_v12  ;;  %v12279_v17 = vld [vmem:[%s16721_s6 + $0x18] sm:$0xff] }
 0x495   :  { %v3525_v24 = vpop.permute.xlu1 %3524  ;;  %12267 = vmatpush1.msk.msra.mxu1 %vm2466_vm11, %v3291_v3 }
 0x496   :  { %v3534_v58 = vsel %vm648_vm5, %v3523_v32, %v3525_v24 }
 0x497   :  { %12268 = vmatmul.mubr.msk.f32.vlgmr.msra.gmra.mrb[6].mxu1 %vm3046_vm2, %v3020_v46  ;;  %v3527_v29 = vpop.permute.xlu0 %3526 }
 0x498   :  { %v3535_v4 = vsel %vm648_vm5, %v3525_v24, %v3527_v29  ;;  %3618 = vmatprep.mubr.f32.mxu1 %v14298_v12 }
 0x499   :  { %v3531_v41 = vpop.permute.xlu1 %3530  ;;  %12270 = vmatprep.subr.msk.mxu1 %vm2466_vm11, %v3535_v4 }
 0x49a   :  { %12271 = vmatpush1.msk.msra.mxu1 %vm2466_vm11, %v3534_v58 }
 0x49b   :  { %12272 = vmatmul.mubr.msk.f32.vlgmr.msra.gmra.mrb[2].mxu1 %vm3046_vm2, %v12269_v6  ;;  %v3529_v30 = vpop.permute.xlu0 %3528 }
 0x49c   :  { %v3536_v43 = vsel %vm648_vm5, %v3527_v29, %v3529_v30  ;;  %v3537_v46 = vsel %vm648_vm5, %v3529_v30, %v3531_v41  ;;  %3689 = vmatprep.mubr.f32.mxu1 %v14298_v12 }
 0x49d   :  { %v3790_v2 = vpop.permute.xlu1 %3789  ;;  %12273 = vmatprep.subr.msk.mxu1 %vm2466_vm11, %v3537_v46 }
 0x49e   :  { %12274 = vmatpush1.msk.msra.mxu1 %vm2466_vm11, %v3536_v43 }
 0x49f   :  { %12275 = vmatmul.mubr.msk.f32.vlgmr.msra.gmra.mrb[4].mxu1 %vm3046_vm2, %v12269_v6  ;;  %v3533_v23 = vpop.permute.xlu0 %3532 }
 0x4a0   :  { %v3538_v10 = vsel %vm648_vm5, %v3531_v41, %v3533_v23  ;;  %12276 = vmatprep.subr.msk.mxu1 %vm2466_vm11, %v3533_v23  ;;  %3760 = vmatprep.mubr.f32.mxu1 %v14298_v12  ;;  %v12289_v23 = vld [vmem:[%s16721_s6 + $0x20] sm:$0xff] }
 0x4a1   :  { %v3792_v25 = vpop.permute.xlu1 %3791  ;;  %12277 = vmatpush1.msk.msra.mxu1 %vm2466_vm11, %v3538_v10 }
 0x4a2   :  { %v3803_v3 = vsel %vm918_vm6, %v3790_v2, %v3792_v25 }
 0x4a3   :  { %12278 = vmatmul.mubr.msk.f32.vlgmr.msra.gmra.mrb[6].mxu1 %vm3046_vm2, %v12269_v6  ;;  %v3794_v31 = vpop.permute.xlu0 %3793 }
 0x4a4   :  { %v3804_v32 = vsel %vm918_vm6, %v3792_v25, %v3794_v31  ;;  %3888 = vmatprep.mubr.f32.mxu1 %v14298_v12 }
 0x4a5   :  { %v3798_v24 = vpop.permute.xlu1 %3797  ;;  %12280 = vmatprep.subr.msk.mxu1 %vm2466_vm11, %v3804_v32 }
 0x4a6   :  { %12281 = vmatpush1.msk.msra.mxu1 %vm2466_vm11, %v3803_v3 }
 0x4a7   :  { %12282 = vmatmul.mubr.msk.f32.vlgmr.msra.gmra.mrb[2].mxu1 %vm3046_vm2, %v12279_v17  ;;  %v3796_v29 = vpop.permute.xlu0 %3795 }
 0x4a8   :  { %v3805_v4 = vsel %vm918_vm6, %v3794_v31, %v3796_v29  ;;  %v3806_v6 = vsel %vm918_vm6, %v3796_v29, %v3798_v24  ;;  %3959 = vmatprep.mubr.f32.mxu1 %v14298_v12 }
 0x4a9   :  { %v3802_v58 = vpop.permute.xlu1 %3801  ;;  %12283 = vmatprep.subr.msk.mxu1 %vm2466_vm11, %v3806_v6 }
 0x4aa   :  { %12284 = vmatpush1.msk.msra.mxu1 %vm2466_vm11, %v3805_v4 }
 0x4ab   :  { %12285 = vmatmul.mubr.msk.f32.vlgmr.msra.gmra.mrb[4].mxu1 %vm3046_vm2, %v12279_v17  ;;  %v3800_v41 = vpop.permute.xlu0 %3799 }
 0x4ac   :  { %v3807_v30 = vsel %vm918_vm6, %v3798_v24, %v3800_v41  ;;  %v3808_v43 = vsel %vm918_vm6, %v3800_v41, %v3802_v58  ;;  %4030 = vmatprep.mubr.f32.mxu1 %v14298_v12 }
 0x4ad   :  { %v4286_v46 = vpop.permute.xlu1 %4285  ;;  %12286 = vmatprep.subr.msk.mxu1 %vm2466_vm11, %v3808_v43 }
 0x4ae   :  { %12287 = vmatpush1.msk.msra.mxu1 %vm2466_vm11, %v3807_v30 }
 0x4af   :  { %12288 = vmatmul.mubr.msk.f32.vlgmr.msra.gmra.mrb[6].mxu1 %vm3046_vm2, %v12279_v17  ;;  %12290 = vmatprep.subr.msk.mxu1 %vm2466_vm11, %v14219_v36  ;;  %v4284_v2 = vpop.permute.xlu0 %4283 }
 0x4b0   :  { %12291 = vmatpush1.msk.msra.mxu1 %vm2466_vm11, %v14215_v34  ;;  %4124 = vmatprep.mubr.f32.mxu1 %v14298_v12 }
 0x4b1   :  { %v4288_v10 = vpop.permute.xlu1 %4287  ;;  %12293 = vmatprep.subr.msk.mxu1 %vm2466_vm11, %v14223_v53  ;;  %v4294_v53 = vsel %vm1409_vm7, %v4284_v2, %v4286_v46 }
 0x4b2   :  { %v4295_v3 = vsel %vm1409_vm7, %v4286_v46, %v4288_v10 }
 0x4b3   :  { %12292 = vmatmul.mubr.msk.f32.vlgmr.msra.gmra.mrb[2].mxu1 %vm3046_vm2, %v12289_v23  ;;  %v4282_v25 = vpop.permute.xlu0 %4281 }
 0x4b4   :  { %12294 = vmatpush1.msk.msra.mxu1 %vm2466_vm11, %v14227_v40  ;;  %4195 = vmatprep.mubr.f32.mxu1 %v14298_v12  ;;  %v4293_v40 = vsel %vm1409_vm7, %v4282_v25, %v4284_v2  ;;  %v12309_v2 = vld [vmem:[%s16721_s6 + $0x30] sm:$0xff] }
 0x4b5   :  { %12296 = vmatprep.subr.msk.mxu1 %vm2466_vm11, %v14231_v38  ;;  %v4292_v34 = vpop.permute.xlu1 %4291 }
 0x4b7   :  { %12295 = vmatmul.mubr.msk.f32.vlgmr.msra.gmra.mrb[4].mxu1 %vm3046_vm2, %v12289_v23  ;;  %v4290_v36 = vpop.permute.xlu0 %4289 }
 0x4b8   :  { %12297 = vmatpush1.msk.msra.mxu1 %vm2466_vm11, %v14235_v62  ;;  %4266 = vmatprep.mubr.f32.mxu1 %v14298_v12  ;;  %v4296_v38 = vsel %vm1409_vm7, %v4288_v10, %v4290_v36  ;;  %v12299_v62 = vld [vmem:[%s16721_s6 + $0x28] sm:$0xff]  ;;  %v4297_v4 = vsel %vm1409_vm7, %v4290_v36, %v4292_v34 }
 0x4b9   :  { %12300 = vmatprep.subr.msk.mxu1 %vm2466_vm11, %v4294_v53  ;;  %v4539_v31 = vpop.permute.xlu1 %4538 }
 0x4bb   :  { %12298 = vmatmul.mubr.msk.f32.vlgmr.msra.gmra.mrb[6].mxu1 %vm3046_vm2, %v12289_v23  ;;  %v4537_v32 = vpop.permute.xlu0 %4536 }
 0x4bc   :  { %12301 = vmatpush1.msk.msra.mxu1 %vm2466_vm11, %v4293_v40  ;;  %4377 = vmatprep.mubr.f32.mxu1 %v14298_v12  ;;  %v4547_v58 = vsel %vm1663_vm8, %v4537_v32, %v4539_v31 }
 0x4bd   :  { %12303 = vmatprep.subr.msk.mxu1 %vm2466_vm11, %v4296_v38  ;;  %v4541_v17 = vpop.permute.xlu1 %4540 }
 0x4be   :  { %v4548_v23 = vsel %vm1663_vm8, %v4539_v31, %v4541_v17 }
 0x4bf   :  { %12302 = vmatmul.mubr.msk.f32.vlgmr.msra.gmra.mrb[2].mxu1 %vm3046_vm2, %v12299_v62  ;;  %v4535_v24 = vpop.permute.xlu0 %4534 }
 0x4c0   :  { %12304 = vmatpush1.msk.msra.mxu1 %vm2466_vm11, %v4295_v3  ;;  %4448 = vmatprep.mubr.f32.mxu1 %v14298_v12  ;;  %v4546_v30 = vsel %vm1663_vm8, %v4535_v24, %v4537_v32 }
 0x4c1   :  { %12306 = vmatprep.subr.msk.mxu1 %vm2466_vm11, %v4292_v34  ;;  %v4545_v29 = vpop.permute.xlu1 %4544 }
 0x4c3   :  { %12305 = vmatmul.mubr.msk.f32.vlgmr.msra.gmra.mrb[4].mxu1 %vm3046_vm2, %v12299_v62  ;;  %v4543_v6 = vpop.permute.xlu0 %4542 }
 0x4c4   :  { %12307 = vmatpush1.msk.msra.mxu1 %vm2466_vm11, %v4297_v4  ;;  %4519 = vmatprep.mubr.f32.mxu1 %v14298_v12  ;;  %v4549_v46 = vsel %vm1663_vm8, %v4541_v17, %v4543_v6  ;;  %v4550_v34 = vsel %vm1663_vm8, %v4543_v6, %v4545_v29 }
 0x4c5   :  { %12310 = vmatprep.subr.msk.mxu1 %vm2466_vm11, %v4547_v58  ;;  %v4792_v41 = vpop.permute.xlu1 %4791 }
 0x4c7   :  { %12308 = vmatmul.mubr.msk.f32.vlgmr.msra.gmra.mrb[6].mxu1 %vm3046_vm2, %v12299_v62  ;;  %v4790_v43 = vpop.permute.xlu0 %4789  ;;  %v12319_v62 = vld [vmem:[%s16721_s6 + $0x38] sm:$0xff] }
 0x4c8   :  { %12311 = vmatpush1.msk.msra.mxu1 %vm2466_vm11, %v4546_v30  ;;  %4630 = vmatprep.mubr.f32.mxu1 %v14298_v12  ;;  %v4800_v53 = vsel %vm1917_vm9, %v4790_v43, %v4792_v41 }
 0x4c9   :  { %12313 = vmatprep.subr.msk.mxu1 %vm2466_vm11, %v4549_v46  ;;  %v4794_v25 = vpop.permute.xlu1 %4793 }
 0x4ca   :  { %v4801_v17 = vsel %vm1917_vm9, %v4792_v41, %v4794_v25 }
 0x4cb   :  { %12312 = vmatmul.mubr.msk.f32.vlgmr.msra.gmra.mrb[2].mxu1 %vm3046_vm2, %v12309_v2  ;;  %v4788_v10 = vpop.permute.xlu0 %4787 }
 0x4cc   :  { %12314 = vmatpush1.msk.msra.mxu1 %vm2466_vm11, %v4548_v23  ;;  %4701 = vmatprep.mubr.f32.mxu1 %v14298_v12  ;;  %v4799_v40 = vsel %vm1917_vm9, %v4788_v10, %v4790_v43  ;;  %v12329_v43 = vld [vmem:[%s16721_s6 + $0x40] sm:$0xff] }
 0x4cd   :  { %12316 = vmatprep.subr.msk.mxu1 %vm2466_vm11, %v4545_v29  ;;  %v4798_v31 = vpop.permute.xlu1 %4797 }
 0x4cf   :  { %12315 = vmatmul.mubr.msk.f32.vlgmr.msra.gmra.mrb[4].mxu1 %vm3046_vm2, %v12309_v2  ;;  %v4796_v36 = vpop.permute.xlu0 %4795 }
 0x4d0   :  { %12317 = vmatpush1.msk.msra.mxu1 %vm2466_vm11, %v4550_v34  ;;  %4772 = vmatprep.mubr.f32.mxu1 %v14298_v12  ;;  %v4802_v38 = vsel %vm1917_vm9, %v4794_v25, %v4796_v36  ;;  %v4803_v29 = vsel %vm1917_vm9, %v4796_v36, %v4798_v31 }
 0x4d1   :  { %12320 = vmatprep.subr.msk.mxu1 %vm2466_vm11, %v4800_v53  ;;  %v5045_v24 = vpop.permute.xlu1 %5044 }
 0x4d3   :  { %12318 = vmatmul.mubr.msk.f32.vlgmr.msra.gmra.mrb[6].mxu1 %vm3046_vm2, %v12309_v2  ;;  %v5043_v32 = vpop.permute.xlu0 %5042 }
 0x4d4   :  { %12321 = vmatpush1.msk.msra.mxu1 %vm2466_vm11, %v4799_v40  ;;  %4883 = vmatprep.mubr.f32.mxu1 %v14298_v12  ;;  %v5053_v4 = vsel %vm2171_vm10, %v5043_v32, %v5045_v24 }
 0x4d5   :  { %12323 = vmatprep.subr.msk.mxu1 %vm2466_vm11, %v4802_v38  ;;  %v5047_v58 = vpop.permute.xlu1 %5046 }
 0x4d6   :  { %v5054_v46 = vsel %vm2171_vm10, %v5045_v24, %v5047_v58 }
 0x4d7   :  { %12322 = vmatmul.mubr.msk.f32.vlgmr.msra.gmra.mrb[2].mxu1 %vm3046_vm2, %v12319_v62  ;;  %v5041_v3 = vpop.permute.xlu0 %5040 }
 0x4d8   :  { %12324 = vmatpush1.msk.msra.mxu1 %vm2466_vm11, %v4801_v17  ;;  %4954 = vmatprep.mubr.f32.mxu1 %v14298_v12  ;;  %v5052_v41 = vsel %vm2171_vm10, %v5041_v3, %v5043_v32 }
 0x4d9   :  { %12326 = vmatprep.subr.msk.mxu1 %vm2466_vm11, %v4798_v31  ;;  %v5051_v2 = vpop.permute.xlu1 %5050 }
 0x4db   :  { %12325 = vmatmul.mubr.msk.f32.vlgmr.msra.gmra.mrb[4].mxu1 %vm3046_vm2, %v12319_v62  ;;  %v5049_v6 = vpop.permute.xlu0 %5048 }
 0x4dc   :  { %12327 = vmatpush1.msk.msra.mxu1 %vm2466_vm11, %v4803_v29  ;;  %5025 = vmatprep.mubr.f32.mxu1 %v14298_v12  ;;  %v5055_v30 = vsel %vm2171_vm10, %v5047_v58, %v5049_v6  ;;  %v5056_v23 = vsel %vm2171_vm10, %v5049_v6, %v5051_v2 }
 0x4dd   :  { %12330 = vmatprep.subr.msk.mxu1 %vm2466_vm11, %v5053_v4 }
 0x4df   :  { %12328 = vmatmul.mubr.msk.f32.vlgmr.msra.gmra.mrb[6].mxu1 %vm3046_vm2, %v12319_v62 }
 0x4e0   :  { %12331 = vmatpush1.msk.msra.mxu1 %vm2466_vm11, %v5052_v41  ;;  %5136 = vmatprep.mubr.f32.mxu1 %v14298_v12 }
 0x4e1   :  { %12333 = vmatprep.subr.msk.mxu1 %vm2466_vm11, %v5055_v30 }
 0x4e3   :  { %12332 = vmatmul.mubr.msk.f32.vlgmr.msra.gmra.mrb[2].mxu1 %vm3046_vm2, %v12329_v43 }
 0x4e4   :  { %12334 = vmatpush1.msk.msra.mxu1 %vm2466_vm11, %v5054_v46  ;;  %5207 = vmatprep.mubr.f32.mxu1 %v14298_v12 }
 0x4e5   :  { %12336 = vmatprep.subr.msk.mxu1 %vm2466_vm11, %v5051_v2 }
 0x4e7   :  { %12335 = vmatmul.mubr.msk.f32.vlgmr.msra.gmra.mrb[4].mxu1 %vm3046_vm2, %v12329_v43 }
 0x4e8   :  { %12337 = vmatpush1.msk.msra.mxu1 %vm2466_vm11, %v5056_v23  ;;  %5278 = vmatprep.mubr.f32.mxu1 %v14298_v12  ;;  %vm8718_vm11 = vcmask 130048  }
 0x4eb   :  { %12338 = vmatmul.mubr.msk.f32.vlgmr.msra.gmra.mrb[6].mxu1 %vm3046_vm2, %v12329_v43 }
 0x4ec   :  { %9838 = vmatprep.mubr.f32.mxu1 %v14298_v12  ;;  %v5295_v10 = vpop.permute.xlu0 %5294 }
 0x5b6   :  { %v5138_v25 = vpop.f32.mrb[2].mxu1 }
 0x5b7   :  { %v5297_v34 = vadd.f32 %v5295_v10, %v5138_v25  ;;  %v5140_v36 = vpop.f32.mrb[3].mxu1 }
 0x5b8   :  { %v5298_v53 = vadd.f32 %v5295_v10, %v5140_v36 }
 0x5b9   :  { %v14474_v31 = vmax.f32 %v5297_v34, 0.0 }
 0x5ba   :  { %v14476_v40 = vmax.f32 %v5298_v53, 0.0  ;;  %v5209_v32 = vpop.f32.mrb[4].mxu1 }
 0x5bb   :  { %v5309_v38 = vmul.f32 %v14474_v31, %v13739_v0  ;;  %v5299_v62 = vadd.f32 %v5295_v10, %v5209_v32  ;;  %v5211_v17 = vpop.f32.mrb[5].mxu1 }
 0x5bc   :  { %v5310_v3 = vmul.f32 %v14476_v40, %v13744_v8  ;;  %v5300_v24 = vadd.f32 %v5295_v10, %v5211_v17 }
 0x5bd   :  { %v5324_v29 = vmul.f32 %v5309_v38, %v14474_v31  ;;  %v5305_v4 = vmax.f32 %v5299_v62, 0.0 }
 0x5be   :  { %v5315_v6 = vadd.f32 %v5310_v3, %v5309_v38  ;;  %v5325_v58 = vmul.f32 %v5310_v3, %v14476_v40  ;;  %v5306_v41 = vmax.f32 %v5300_v24, 0.0  ;;  %v5280_v30 = vpop.f32.mrb[6].mxu1 }
 0x5bf   :  { %v5311_v43 = vmul.f32 %v5305_v4, %v13759_v18  ;;  %v5301_v46 = vadd.f32 %v5295_v10, %v5280_v30  ;;  %v5282_v2 = vpop.f32.mrb[7].mxu1 }
 0x5c0   :  { %v5330_v23 = vadd.f32 %v5325_v58, %v5324_v29  ;;  %v5312_v25 = vmul.f32 %v5306_v41, %v13764_v21  ;;  %v5302_v34 = vadd.f32 %v5295_v10, %v5282_v2 }
 0x5c1   :  { %v5316_v36 = vadd.f32 %v5315_v6, %v5311_v43  ;;  %v5326_v53 = vmul.f32 %v5311_v43, %v5305_v4  ;;  %v5307_v32 = vmax.f32 %v5301_v46, 0.0  ;;  %v5364_v46 = vld [vmem:[%s16722_s9] sm:$0xff] }
 0x5c2   :  { %v5327_v17 = vmul.f32 %v5312_v25, %v5306_v41  ;;  %v5308_v8 = vmax.f32 %v5302_v34, 0.0 }
 0x5c3   :  { %v5331_v0 = vadd.f32 %v5330_v23, %v5326_v53  ;;  %v5317_v62 = vadd.f32 %v5316_v36, %v5312_v25  ;;  %v5313_v38 = vmul.f32 %v5307_v32, %v13767_v22 }
 0x5c4   :  { %v5314_v3 = vmul.f32 %v5308_v8, %v13774_v27 }
 0x5c5   :  { %v5332_v24 = vadd.f32 %v5331_v0, %v5327_v17  ;;  %v5328_v18 = vmul.f32 %v5313_v38, %v5307_v32  ;;  %v5318_v30 = vadd.f32 %v5317_v62, %v5313_v38  ;;  %v5436_v0 = vmul.f32 %v14298_v12, %v13890_v60  ;;  %v5345_v17 = vld [vmem:[%s16723_s8] sm:$0xff] }
 0x5c6   :  { %v5329_v63 = vmul.f32 %v5314_v3, %v5308_v8  ;;  %v5320_v29 = vsel %vm5319_vm3, %v5314_v3, 0.0 }
 0x5c7   :  { %v5321_v58 = vadd.f32 %v5320_v29, %v5318_v30  ;;  %v5333_v10 = vadd.f32 %v5332_v24, %v5328_v18 }
 0x5c8   :  { %v5334_v6 = vsel %vm5319_vm3, %v5329_v63, 0.0 }
 0x5c9   :  { %5322 = vadd.xlane.f32.xlu1 %v5321_v58  ;;  %v5335_v43 = vadd.f32 %v5334_v6, %v5333_v10 }
 0x5cb   :  { %5336 = vadd.xlane.f32.xlu0 %v5335_v43 }
 0x5da   :  { %5367 = vperm.xlu1 %13055, %v5364_v46  }
 0x5de   :  { %5448 = vrot.lane.b32.xlu1 %v5436_v0, %s13333_s3 }
 0x656   :  { %v5323_v2 = vpop.xlane.xlu1 %5322 }
 0x657   :  { %v5338_v23 = vmul.f32 0.001953125, %v5323_v2 }
 0x658   :  { %v5337_v25 = vpop.xlane.xlu0 %5336 }
 0x659   :  { %v5339_v34 = vmul.f32 0.001953125, %v5337_v25  ;;  %v5340_v18 = vmul.f32 %v5338_v23, %v5338_v23  ;;  %v5347_v3 = vsub.f32 %v14474_v31, %v5338_v23  ;;  %v5348_v24 = vsub.f32 %v14476_v40, %v5338_v23 }
 0x65a   :  { %v5349_v30 = vsub.f32 %v5305_v4, %v5338_v23  ;;  %v5350_v29 = vsub.f32 %v5306_v41, %v5338_v23  ;;  %v5352_v58 = vsub.f32 %v5308_v8, %v5338_v23  ;;  %v5368_v2 = vpop.permute.xlu1 %5367  ;;  %v5351_v8 = vsub.f32 %v5307_v32, %v5338_v23 }
 0x65b   :  { %v5341_v36 = vsub.f32 %v5339_v34, %v5340_v18 }
 0x65d   :  { %v5342_v63 = vmax.f32 %v5341_v36, 0.0 }
 0x65f   :  { %v5343_v53 = vadd.f32 1e-05, %v5342_v63 }
 0x661   :  { %13305 = vrsqrt.f32 %v5343_v53 }
 0x66b   :  { %v13306_v62 = vpop.eup %13305 }
 0x66c   :  { %v5346_v38 = vmul.f32 %v13306_v62, %v5345_v17 }
 0x66e   :  { %5355 = vperm.xlu0 %13056, %v5346_v38  }
 0x6ed   :  { %v5356_v10 = vpop.permute.xlu0 %5355 }
 0x6ee   :  { %v5358_v6 = vmul.f32 %v5356_v10, %v5347_v3  ;;  %v5359_v43 = vmul.f32 %v5356_v10, %v5348_v24  ;;  %v5360_v46 = vmul.f32 %v5356_v10, %v5349_v30  ;;  %v5361_v0 = vmul.f32 %v5356_v10, %v5350_v29 }
 0x6ef   :  { %v5363_v25 = vmul.f32 %v5356_v10, %v5352_v58  ;;  %v5362_v4 = vmul.f32 %v5356_v10, %v5351_v8  ;;  %v5537_v10 = vmul.f32 %v14298_v12, %v14014_v37 }
 0x6f0   :  { %v5370_v34 = vadd.f32 %v5368_v2, %v5358_v6  ;;  %v5371_v18 = vadd.f32 %v5368_v2, %v5359_v43  ;;  %v5372_v63 = vadd.f32 %v5368_v2, %v5360_v46  ;;  %v5373_v53 = vadd.f32 %v5368_v2, %v5361_v0  ;;  %v5449_v6 = vpop.permute.xlu1 %5448 }
 0x6f1   :  { %v14501_v36 = vadd.f32 %v5368_v2, %v5363_v25  ;;  %v5374_v62 = vadd.f32 %v5368_v2, %v5362_v4 }
 0x6f2   :  { %v5396_v31 = vmul.f32 %v5371_v18, %v13932_v35  ;;  %v5395_v40 = vmul.f32 %v5370_v34, %v13852_v42  ;;  %v5398_v41 = vmul.f32 %v5373_v53, %v13946_v49  ;;  %v5397_v17 = vmul.f32 %v5372_v63, %v13941_v48 }
 0x6f3   :  { %5381 = vst.msk [vmem:[#allocation2 + $0x30] sm:$0xff] %vm5319_vm3, %v14501_v36  ;;  %v5437_v38 = vmul.f32 %v5370_v34, %v13957_v44  ;;  %v5438_v3 = vmul.f32 %v5371_v18, %v13951_v55  ;;  %v5439_v32 = vmul.f32 %v5372_v63, %v13962_v59  ;;  %v5399_v23 = vmul.f32 %v5374_v62, %v13968_v1 }
 0x6f4   :  { %5409 = vrot.lane.b32.xlu0 %v5396_v31, %s13334_s19  ;;  %5407 = vrot.lane.b32.xlu1 %v5395_v40, %s13334_s19  ;;  %v5440_v29 = vmul.f32 %v5373_v53, %v13976_v16  ;;  %v5441_v58 = vmul.f32 %v5374_v62, %v13983_v20  ;;  %v5389_v40 = vmul.f32 %v5370_v34, %v14026_v47 }
 0x6f5   :  { %v5390_v8 = vmul.f32 %v5371_v18, %v14029_v57 }
 0x6f8   :  { %5413 = vrot.lane.b32.xlu0 %v5398_v41, %s13334_s19  ;;  %5411 = vrot.lane.b32.xlu1 %v5397_v17, %s13334_s19 }
 0x6fa   :  { %v5387_v24 = vld [vmem:[#allocation2 + $0x30] sm:$0xff] }
 0x6fb   :  { %v5400_v30 = vmul.f32 %v5387_v24, %v13973_v5  ;;  %v5391_v24 = vmul.f32 %v5372_v63, %v14038_v13  ;;  %v5392_v63 = vmul.f32 %v5373_v53, %v14050_v11 }
 0x6fc   :  { %5450 = vrot.lane.b32.xlu0 %v5437_v38, %s13333_s3  ;;  %5452 = vrot.lane.b32.xlu1 %v5438_v3, %s13333_s3 }
 0x700   :  { %5454 = vrot.lane.b32.xlu0 %v5439_v32, %s13333_s3  ;;  %5415 = vrot.lane.b32.xlu1 %v5399_v23, %s13334_s19 }
 0x704   :  { %5417 = vrot.lane.b32.xlu0 %v5400_v30, %s13334_s19  ;;  %5456 = vrot.lane.b32.xlu1 %v5440_v29, %s13333_s3 }
 0x708   :  { %5458 = vrot.lane.b32.xlu0 %v5441_v58, %s13333_s3 }
 0x70c   :  { %5551 = vrot.lane.b32.xlu0 %v5537_v10, %s13335_s27 }
 0x766   :  { %v5410_v43 = vpop.permute.xlu0 %5409  ;;  %v5408_v46 = vpop.permute.xlu1 %5407 }
 0x767   :  { %v5419_v25 = vsel %vm2663_vm14, %v5408_v46, %v5410_v43 }
 0x768   :  { %v5430_v4 = vadd.f32 %v5419_v25, %v5389_v40 }
 0x76a   :  { %v5414_v0 = vpop.permute.xlu0 %5413  ;;  %v5412_v2 = vpop.permute.xlu1 %5411 }
 0x76b   :  { %v5420_v31 = vsel %vm2663_vm14, %v5410_v43, %v5412_v2  ;;  %v5421_v3 = vsel %vm2663_vm14, %v5412_v2, %v5414_v0 }
 0x76c   :  { %v5431_v41 = vadd.f32 %v5420_v31, %v5390_v8  ;;  %v5432_v58 = vadd.f32 %v5421_v3, %v5391_v24  ;;  %v5393_v3 = vmul.f32 %v5374_v62, %v14064_v54 }
 0x76e   :  { %v5451_v17 = vpop.permute.xlu0 %5450  ;;  %v5453_v38 = vpop.permute.xlu1 %5452 }
 0x76f   :  { %v5460_v32 = vsel %vm2627_vm13, %v5449_v6, %v5451_v17  ;;  %v5461_v23 = vsel %vm2627_vm13, %v5451_v17, %v5453_v38 }
 0x770   :  { %v5471_v30 = vadd.f32 %v5460_v32, %v5430_v4  ;;  %v5472_v29 = vadd.f32 %v5461_v23, %v5431_v41  ;;  %v5394_v4 = vmul.f32 %v14501_v36, %v14057_v15 }
 0x772   :  { %v5455_v10 = vpop.permute.xlu0 %5454  ;;  %v5416_v43 = vpop.permute.xlu1 %5415  ;;  %v5496_v34 = vmul.f32 %v5471_v30, %v14019_v45  ;;  %v5497_v18 = vmul.f32 %v5472_v29, %v14078_v51  ;;  %v5539_v8 = vmul.f32 %v5472_v29, %v14104_v61  ;;  %v5538_v24 = vmul.f32 %v5471_v30, %v14101_v56 }
 0x773   :  { %v5462_v46 = vsel %vm2627_vm13, %v5453_v38, %v5455_v10  ;;  %v5422_v6 = vsel %vm2663_vm14, %v5414_v0, %v5416_v43 }
 0x774   :  { %v5473_v25 = vadd.f32 %v5462_v46, %v5432_v58  ;;  %5508 = vrot.lane.b32.xlu1 %v5496_v34, %s13336_s28  ;;  %5510 = vrot.lane.b32.xlu0 %v5497_v18, %s13336_s28  ;;  %v5433_v38 = vadd.f32 %v5422_v6, %v5392_v63  ;;  %v16807_v6 = vld [vmem:[#allocation12_spill] sm:$0xff] }
 0x776   :  { %v5418_v2 = vpop.permute.xlu0 %5417  ;;  %v5457_v31 = vpop.permute.xlu1 %5456  ;;  %v5498_v40 = vmul.f32 %v5473_v25, %v14093_v33  ;;  %v5540_v18 = vmul.f32 %v5473_v25, %v14121_v26 }
 0x777   :  { %v5423_v41 = vsel %vm2663_vm14, %v5416_v43, %v5418_v2  ;;  %v5463_v17 = vsel %vm2627_vm13, %v5455_v10, %v5457_v31  ;;  %v5435_v53 = vadd.f32 %v5418_v2, %v5394_v4  ;;  %v16808_v2 = vld [vmem:[#allocation13_spill] sm:$0xff] }
 0x778   :  { %5512 = vrot.lane.b32.xlu1 %v5498_v40, %s13336_s28  ;;  %5555 = vrot.lane.b32.xlu0 %v5539_v8, %s13335_s27  ;;  %v5434_v0 = vadd.f32 %v5423_v41, %v5393_v3  ;;  %v5474_v32 = vadd.f32 %v5463_v17, %v5433_v38  ;;  %v5490_v3 = vmul.f32 %v5471_v30, %v14154_v28 }
 0x77a   :  { %v5459_v23 = vpop.permute.xlu0 %5458  ;;  %v5499_v10 = vmul.f32 %v5474_v32, %v14116_v14  ;;  %v5541_v34 = vmul.f32 %v5474_v32, %v14124_v52 }
 0x77b   :  { %v5464_v58 = vsel %vm2627_vm13, %v5457_v31, %v5459_v23  ;;  %v14556_v36 = vadd.f32 %v5459_v23, %v5435_v53  ;;  %v5491_v53 = vmul.f32 %v5472_v29, %v14157_v50 }
 0x77c   :  { %v5475_v43 = vadd.f32 %v5464_v58, %v5434_v0  ;;  %5553 = vrot.lane.b32.xlu1 %v5538_v24, %s13335_s27 }
 0x77d   :  { %5482 = vst.msk [vmem:[#allocation2 + $0x30] sm:$0xff] %vm5319_vm3, %v14556_v36 }
 0x77e   :  { %v5500_v62 = vmul.f32 %v5475_v43, %v14111_v7  ;;  %v5542_v31 = vmul.f32 %v5475_v43, %v16808_v2  ;;  %v5552_v40 = vpop.permute.xlu0 %5551 }
 0x780   :  { %5516 = vrot.lane.b32.xlu0 %v5500_v62, %s13336_s28  ;;  %5514 = vrot.lane.b32.xlu1 %v5499_v10, %s13336_s28 }
 0x784   :  { %5559 = vrot.lane.b32.xlu0 %v5541_v34, %s13335_s27  ;;  %5557 = vrot.lane.b32.xlu1 %v5540_v18, %s13335_s27  ;;  %v5488_v46 = vld [vmem:[#allocation2 + $0x30] sm:$0xff] }
 0x785   :  { %v5501_v63 = vmul.f32 %v5488_v46, %v16807_v6 }
 0x788   :  { %5561 = vrot.lane.b32.xlu0 %v5542_v31, %s13335_s27  ;;  %5518 = vrot.lane.b32.xlu1 %v5501_v63, %s13336_s28 }
 0x7e6   :  { %v5509_v8 = vpop.permute.xlu1 %5508  ;;  %v5511_v4 = vpop.permute.xlu0 %5510 }
 0x7e7   :  { %v5520_v17 = vsel %vm2895_vm0, %v5509_v8, %v5511_v4  ;;  %v5493_v8 = vmul.f32 %v5474_v32, %v14171_v39 }
 0x7e8   :  { %v5531_v0 = vadd.f32 %v5520_v17, %v5490_v3 }
 0x7ea   :  { %v5513_v41 = vpop.permute.xlu1 %5512  ;;  %v5556_v23 = vpop.permute.xlu0 %5555 }
 0x7eb   :  { %v5521_v38 = vsel %vm2895_vm0, %v5511_v4, %v5513_v41 }
 0x7ec   :  { %v5532_v24 = vadd.f32 %v5521_v38, %v5491_v53 }
 0x7ee   :  { %v5554_v58 = vpop.permute.xlu1 %5553 }
 0x7ef   :  { %v5565_v62 = vsel %vm2859_vm15, %v5552_v40, %v5554_v58  ;;  %v5566_v10 = vsel %vm2859_vm15, %v5554_v58, %v5556_v23  ;;  %v5492_v40 = vmul.f32 %v5473_v25, %v14168_v19  ;;  %v5494_v25 = vmul.f32 %v5475_v43, %v14180_v9  ;;  %v8045_v43 = vld [vmem:[%s16724_s11] sm:$0xff] }
 0x7f0   :  { %v14579_v34 = vadd.f32 %v5565_v62, %v5531_v0  ;;  %v14581_v18 = vadd.f32 %v5566_v10, %v5532_v24  ;;  %v16809_v10 = vld [vmem:[#allocation11_spill] sm:$0xff] }
 0x7f2   :  { %v5517_v63 = vpop.permute.xlu0 %5516  ;;  %v5515_v31 = vpop.permute.xlu1 %5514  ;;  %5610 = vrot.lane.b32.xlu0 %v14581_v18, %s13324_s20  ;;  %5608 = vrot.lane.b32.xlu1 %v14579_v34, %s13324_s20 }
 0x7f3   :  { %v5522_v30 = vsel %vm2895_vm0, %v5513_v41, %v5515_v31  ;;  %v5523_v29 = vsel %vm2895_vm0, %v5515_v31, %v5517_v63  ;;  %v5543_v31 = vmul.f32 %v5488_v46, %v16809_v10 }
 0x7f4   :  { %v5533_v4 = vadd.f32 %v5522_v30, %v5492_v40  ;;  %v5534_v17 = vadd.f32 %v5523_v29, %v5493_v8 }
 0x7f6   :  { %v5560_v38 = vpop.permute.xlu0 %5559  ;;  %v5558_v3 = vpop.permute.xlu1 %5557  ;;  %5606 = vrot.lane.b32.xlu1 %v14298_v12, %s13324_s20 }
 0x7f7   :  { %v5567_v53 = vsel %vm2859_vm15, %v5556_v23, %v5558_v3  ;;  %v5568_v0 = vsel %vm2859_vm15, %v5558_v3, %v5560_v38 }
 0x7f8   :  { %v14595_v24 = vadd.f32 %v5567_v53, %v5533_v4  ;;  %v14597_v41 = vadd.f32 %v5568_v0, %v5534_v17  ;;  %v12339_v4 = vld [vmem:[%s16725_s10 + $0x10] sm:$0xff]  ;;  %v12340_v53 = vld [vmem:[%s16725_s10 + $0x18] sm:$0xff] }
 0x7fa   :  { %v14599_v58 = vpop.permute.xlu0 %5561  ;;  %v5519_v32 = vpop.permute.xlu1 %5518  ;;  %5614 = vrot.lane.b32.xlu1 %v14597_v41, %s13324_s20  ;;  %5612 = vrot.lane.b32.xlu0 %v14595_v24, %s13324_s20 }
 0x7fb   :  { %v5524_v62 = vsel %vm2895_vm0, %v5517_v63, %v5519_v32  ;;  %v5569_v30 = vsel %vm2859_vm15, %v5560_v38, %v14599_v58 }
 0x7fc   :  { %v5535_v23 = vadd.f32 %v5524_v62, %v5494_v25  ;;  %v16810_v62 = vld [vmem:[#allocation19_spill] sm:$0xff] }
 0x7fe   :  { %v14610_v29 = vadd.f32 %v5569_v30, %v5535_v23  ;;  %5563 = vrot.lane.b32.xlu1 %v5543_v31, %s13335_s27  ;;  %v5495_v23 = vmul.f32 %v14556_v36, %v16810_v62 }
 0x800   :  { %5616 = vrot.lane.b32.xlu0 %v14610_v29, %s13324_s20  ;;  %v5536_v31 = vadd.f32 %v5519_v32, %v5495_v23 }
 0x802   :  { %5870 = vrot.lane.b32.xlu1 %v14581_v18, %s13325_s21 }
 0x804   :  { %5868 = vrot.lane.b32.xlu0 %v14579_v34, %s13325_s21 }
 0x806   :  { %5872 = vrot.lane.b32.xlu1 %v14595_v24, %s13325_s21 }
 0x808   :  { %5866 = vrot.lane.b32.xlu0 %v14298_v12, %s13325_s21 }
 0x80a   :  { %5876 = vrot.lane.b32.xlu1 %v14610_v29, %s13325_s21 }
 0x80c   :  { %5874 = vrot.lane.b32.xlu0 %v14597_v41, %s13325_s21 }
 0x80e   :  { %6133 = vrot.lane.b32.xlu1 %v14581_v18, %s13326_s22 }
 0x810   :  { %6131 = vrot.lane.b32.xlu0 %v14579_v34, %s13326_s22 }
 0x812   :  { %6135 = vrot.lane.b32.xlu1 %v14595_v24, %s13326_s22 }
 0x814   :  { %6129 = vrot.lane.b32.xlu0 %v14298_v12, %s13326_s22 }
 0x816   :  { %6139 = vrot.lane.b32.xlu1 %v14610_v29, %s13326_s22 }
 0x818   :  { %6137 = vrot.lane.b32.xlu0 %v14597_v41, %s13326_s22 }
 0x81a   :  { %6422 = vrot.lane.b32.xlu1 %v14581_v18, %s13327_s2 }
 0x81c   :  { %6420 = vrot.lane.b32.xlu0 %v14579_v34, %s13327_s2 }
 0x81e   :  { %6424 = vrot.lane.b32.xlu1 %v14595_v24, %s13327_s2 }
 0x820   :  { %6418 = vrot.lane.b32.xlu0 %v14298_v12, %s13327_s2 }
 0x822   :  { %6428 = vrot.lane.b32.xlu1 %v14610_v29, %s13327_s2 }
 0x824   :  { %6426 = vrot.lane.b32.xlu0 %v14597_v41, %s13327_s2 }
 0x826   :  { %6950 = vrot.lane.b32.xlu1 %v14581_v18, %s13328_s23 }
 0x82a   :  { %6948 = vrot.lane.b32.xlu1 %v14579_v34, %s13328_s23 }
 0x82e   :  { %6956 = vrot.lane.b32.xlu1 %v14610_v29, %s13328_s23 }
 0x832   :  { %7225 = vrot.lane.b32.xlu1 %v14581_v18, %s13329_s24 }
 0x836   :  { %7223 = vrot.lane.b32.xlu1 %v14579_v34, %s13329_s24 }
 0x83a   :  { %7231 = vrot.lane.b32.xlu1 %v14610_v29, %s13329_s24 }
 0x83e   :  { %7500 = vrot.lane.b32.xlu1 %v14581_v18, %s13330_s25 }
 0x842   :  { %7498 = vrot.lane.b32.xlu1 %v14579_v34, %s13330_s25 }
 0x846   :  { %7506 = vrot.lane.b32.xlu1 %v14610_v29, %s13330_s25 }
 0x84a   :  { %7775 = vrot.lane.b32.xlu1 %v14581_v18, %s13331_s26 }
 0x84e   :  { %7773 = vrot.lane.b32.xlu1 %v14579_v34, %s13331_s26 }
 0x852   :  { %7781 = vrot.lane.b32.xlu1 %v14610_v29, %s13331_s26 }
 0x856   :  { %8049 = vperm.xlu1 %13055, %v8045_v43  }
 0x864   :  { %v5611_v46 = vpop.permute.xlu0 %5610  ;;  %v5609_v63 = vpop.permute.xlu1 %5608 }
 0x865   :  { %v5619_v40 = vsel %vm152_vm1, %v5609_v63, %v5611_v46 }
 0x866   :  { %5635 = vmatprep.subr.mxu0 %v5619_v40 }
 0x868   :  { %v5607_v8 = vpop.permute.xlu1 %5606 }
 0x869   :  { %v5618_v17 = vsel %vm152_vm1, %v5607_v8, %v5609_v63 }
 0x86a   :  { %5636 = vmatpush1.msra.mxu0 %v5618_v17 }
 0x86b   :  { %12341 = vmatmul.mubr.msk.f32.vlgmr.msra.gmra.mrb[4].mxu0 %vm5319_vm3, %v12339_v4 }
 0x86c   :  { %v5613_v38 = vpop.permute.xlu0 %5612  ;;  %v5615_v3 = vpop.permute.xlu1 %5614  ;;  %5705 = vmatprep.mubr.f32.mxu0 %v14298_v12 }
 0x86d   :  { %v5621_v0 = vsel %vm152_vm1, %v5613_v38, %v5615_v3  ;;  %v5620_v25 = vsel %vm152_vm1, %v5611_v46, %v5613_v38 }
 0x86e   :  { %5712 = vmatprep.subr.mxu0 %v5621_v0 }
 0x86f   :  { %12342 = vmatmul.mubr.msk.f32.gmra.mrb[6].mxu0 %vm5319_vm3, %v12340_v53 }
 0x870   :  { %5713 = vmatpush1.msra.mxu0 %v5620_v25  ;;  %v5564_v30 = vpop.permute.xlu1 %5563  ;;  %5776 = vmatprep.mubr.f32.mxu0 %v14298_v12 }
 0x871   :  { %v5570_v43 = vsel %vm2859_vm15, %v14599_v58, %v5564_v30 }
 0x872   :  { %v5582_v63 = vadd.f32 %v5570_v43, %v5536_v31  ;;  %v5617_v40 = vpop.permute.xlu0 %5616  ;;  %v14725_v43 = vld [vmem:[#allocation2] sm:$0xff] }
 0x873   :  { %12343 = vmatmul.mubr.msk.f32.vlgmr.msra.gmra.mrb[8].mxu0 %vm5319_vm3, %v12339_v4  ;;  %5789 = vmatprep.subr.mxu0 %v5617_v40  ;;  %v5622_v46 = vsel %vm152_vm1, %v5615_v3, %v5617_v40 }
 0x874   :  { %5588 = vst.msk [vmem:[#allocation2 + $0x30] sm:$0xff] %vm5319_vm3, %v5582_v63  ;;  %5790 = vmatpush1.msra.mxu0 %v5622_v46  ;;  %5782 = vmatprep.mubr.f32.mxu0 %v14298_v12  ;;  %v5871_v36 = vpop.permute.xlu1 %5870 }
 0x876   :  { %v5869_v32 = vpop.permute.xlu0 %5868 }
 0x877   :  { %12344 = vmatmul.mubr.msk.f32.gmra.mrb[10].mxu0 %vm5319_vm3, %v12340_v53  ;;  %v5879_v8 = vsel %vm400_vm4, %v5869_v32, %v5871_v36 }
 0x878   :  { %5895 = vmatprep.subr.mxu0 %v5879_v8  ;;  %5853 = vmatprep.mubr.f32.mxu0 %v14298_v12  ;;  %v5873_v3 = vpop.permute.xlu1 %5872 }
 0x879   :  { %v5880_v23 = vsel %vm400_vm4, %v5871_v36, %v5873_v3 }
 0x87a   :  { %v5867_v58 = vpop.permute.xlu0 %5866 }
 0x87b   :  { %v5878_v17 = vsel %vm400_vm4, %v5867_v58, %v5869_v32  ;;  %12345 = vmatmul.mubr.msk.f32.vlgmr.msra.gmra.mrb[12].mxu0 %vm5319_vm3, %v12339_v4  ;;  %v14705_v38 = vld [vmem:[#allocation2 + $0x30] sm:$0xff]  ;;  %v5595_v4 = vld [vmem:[%s16725_s10] sm:$0xff] }
 0x87c   :  { %6430 = vrot.lane.b32.xlu0 %v14705_v38, %s13327_s2  ;;  %5896 = vmatpush1.msra.mxu0 %v5878_v17  ;;  %v5877_v31 = vpop.permute.xlu1 %5876  ;;  %v12353_v17 = vld [vmem:[%s16725_s10 + $0x20] sm:$0xff] }
 0x87d   :  { %5859 = vmatprep.mubr.f32.mxu0 %v14298_v12 }
 0x87e   :  { %v5875_v0 = vpop.permute.xlu0 %5874 }
 0x87f   :  { %12346 = vmatmul.mubr.msk.f32.gmra.mrb[14].mxu0 %vm5319_vm3, %v12340_v53  ;;  %v5881_v25 = vsel %vm400_vm4, %v5873_v3, %v5875_v0  ;;  %v5596_v53 = vld [vmem:[%s16725_s10 + $0x8] sm:$0xff]  ;;  %v5882_v40 = vsel %vm400_vm4, %v5875_v0, %v5877_v31 }
 0x880   :  { %6952 = vrot.lane.b32.xlu0 %v14595_v24, %s13328_s23  ;;  %5972 = vmatprep.subr.mxu0 %v5881_v25  ;;  %v12354_v25 = vld [vmem:[%s16725_s10 + $0x28] sm:$0xff] }
 0x881   :  { %5959 = vmatprep.mubr.f32.mxu0 %v14298_v12  ;;  %v6134_v12 = vpop.permute.xlu1 %6133 }
 0x882   :  { %v6132_v30 = vpop.permute.xlu0 %6131 }
 0x883   :  { %12347 = vmatmul.mubr.msk.f32.vlgmr.msra.gmra.mrb[4].mxu0 %vm5319_vm3, %v5595_v4  ;;  %v6142_v46 = vsel %vm648_vm5, %v6132_v30, %v6134_v12 }
 0x884   :  { %5973 = vmatpush1.msra.mxu0 %v5880_v23  ;;  %6954 = vrot.lane.b32.xlu0 %v14597_v41, %s13328_s23 }
 0x885   :  { %6049 = vmatprep.subr.mxu0 %v5877_v31  ;;  %5965 = vmatprep.mubr.f32.mxu0 %v14725_v43  ;;  %v6136_v32 = vpop.permute.xlu1 %6135 }
 0x886   :  { %v6130_v63 = vpop.permute.xlu0 %6129  ;;  %v6143_v3 = vsel %vm648_vm5, %v6134_v12, %v6136_v32 }
 0x887   :  { %12348 = vmatmul.mubr.msk.f32.gmra.mrb[6].mxu0 %vm5319_vm3, %v5596_v53  ;;  %v6141_v8 = vsel %vm648_vm5, %v6130_v63, %v6132_v30 }
 0x888   :  { %6958 = vrot.lane.b32.xlu0 %v14705_v38, %s13328_s23  ;;  %6036 = vmatprep.mubr.f32.mxu0 %v14725_v43 }
 0x889   :  { %v6140_v0 = vpop.permute.xlu1 %6139 }
 0x88a   :  { %v6138_v36 = vpop.permute.xlu0 %6137 }
 0x88b   :  { %12349 = vmatmul.mubr.msk.f32.vlgmr.msra.gmra.mrb[8].mxu0 %vm5319_vm3, %v5595_v4  ;;  %v6144_v58 = vsel %vm648_vm5, %v6136_v32, %v6138_v36  ;;  %v12361_v32 = vld [vmem:[%s16725_s10 + $0x30] sm:$0xff] }
 0x88c   :  { %6050 = vmatpush1.msra.mxu0 %v5882_v40  ;;  %7227 = vrot.lane.b32.xlu0 %v14595_v24, %s13329_s24 }
 0x88d   :  { %6158 = vmatprep.subr.mxu0 %v6142_v46  ;;  %6042 = vmatprep.mubr.f32.mxu0 %v14725_v43  ;;  %v6423_v23 = vpop.permute.xlu1 %6422 }
 0x88f   :  { %12350 = vmatmul.mubr.msk.f32.gmra.mrb[10].mxu0 %vm5319_vm3, %v5596_v53 }
 0x890   :  { %7229 = vrot.lane.b32.xlu0 %v14597_v41, %s13329_s24  ;;  %6113 = vmatprep.mubr.f32.mxu0 %v14725_v43 }
 0x891   :  { %v6425_v63 = vpop.permute.xlu1 %6424 }
 0x893   :  { %12351 = vmatmul.mubr.msk.f32.vlgmr.msra.gmra.mrb[12].mxu0 %vm5319_vm3, %v5595_v4  ;;  %v6421_v4 = vpop.permute.xlu0 %6420 }
 0x894   :  { %6159 = vmatpush1.msra.mxu0 %v6141_v8  ;;  %7233 = vrot.lane.b32.xlu0 %v14705_v38, %s13329_s24  ;;  %v6433_v30 = vsel %vm918_vm6, %v6421_v4, %v6423_v23  ;;  %v6434_v8 = vsel %vm918_vm6, %v6423_v23, %v6425_v63 }
 0x895   :  { %6235 = vmatprep.subr.mxu0 %v6144_v58  ;;  %6119 = vmatprep.mubr.f32.mxu0 %v14725_v43  ;;  %v12362_v58 = vld [vmem:[%s16725_s10 + $0x38] sm:$0xff] }
 0x897   :  { %12352 = vmatmul.mubr.msk.f32.gmra.mrb[14].mxu0 %vm5319_vm3, %v5596_v53  ;;  %v6419_v31 = vpop.permute.xlu0 %6418  ;;  %v6145_v53 = vsel %vm648_vm5, %v6138_v36, %v6140_v0  ;;  %v8046_v36 = vld [vmem:[%s16724_s11 + $0x8] sm:$0xff] }
 0x898   :  { %7502 = vrot.lane.b32.xlu0 %v14595_v24, %s13330_s25  ;;  %6222 = vmatprep.mubr.f32.mxu0 %v14725_v43  ;;  %v6432_v40 = vsel %vm918_vm6, %v6419_v31, %v6421_v4  ;;  %v12369_v4 = vld [vmem:[%s16725_s10 + $0x40] sm:$0xff] }
 0x89b   :  { %12355 = vmatmul.mubr.msk.f32.vlgmr.msra.gmra.mrb[4].mxu0 %vm5319_vm3, %v12353_v17  ;;  %v6427_v12 = vpop.permute.xlu0 %6426 }
 0x89c   :  { %6236 = vmatpush1.msra.mxu0 %v6143_v3  ;;  %7504 = vrot.lane.b32.xlu0 %v14597_v41, %s13330_s25  ;;  %v6435_v46 = vsel %vm918_vm6, %v6425_v63, %v6427_v12 }
 0x89d   :  { %6312 = vmatprep.subr.mxu0 %v6140_v0  ;;  %6228 = vmatprep.mubr.f32.mxu0 %v14725_v43 }
 0x89f   :  { %12356 = vmatmul.mubr.msk.f32.gmra.mrb[6].mxu0 %vm5319_vm3, %v12354_v25 }
 0x8a0   :  { %7508 = vrot.lane.b32.xlu0 %v14705_v38, %s13330_s25  ;;  %6299 = vmatprep.mubr.f32.mxu0 %v14725_v43 }
 0x8a3   :  { %12357 = vmatmul.mubr.msk.f32.vlgmr.msra.gmra.mrb[8].mxu0 %vm5319_vm3, %v12353_v17 }
 0x8a4   :  { %6313 = vmatpush1.msra.mxu0 %v6145_v53  ;;  %7777 = vrot.lane.b32.xlu0 %v14595_v24, %s13331_s26 }
 0x8a5   :  { %6450 = vmatprep.subr.mxu0 %v6433_v30  ;;  %6305 = vmatprep.mubr.f32.mxu0 %v14725_v43 }
 0x8a7   :  { %12358 = vmatmul.mubr.msk.f32.gmra.mrb[10].mxu0 %vm5319_vm3, %v12354_v25 }
 0x8a8   :  { %7779 = vrot.lane.b32.xlu0 %v14597_v41, %s13331_s26  ;;  %6376 = vmatprep.mubr.f32.mxu0 %v14725_v43 }
 0x8ab   :  { %12359 = vmatmul.mubr.msk.f32.vlgmr.msra.gmra.mrb[12].mxu0 %vm5319_vm3, %v12353_v17  ;;  %v6429_v17 = vpop.permute.xlu1 %6428 }
 0x8ac   :  { %6451 = vmatpush1.msra.mxu0 %v6432_v40  ;;  %7783 = vrot.lane.b32.xlu0 %v14705_v38, %s13331_s26  ;;  %v12378_v40 = vld [vmem:[%s16725_s10 + $0x58] sm:$0xff] }
 0x8ad   :  { %6527 = vmatprep.subr.mxu0 %v6435_v46  ;;  %6382 = vmatprep.mubr.f32.mxu0 %v14725_v43 }
 0x8af   :  { %12360 = vmatmul.mubr.msk.f32.gmra.mrb[14].mxu0 %vm5319_vm3, %v12354_v25  ;;  %v6436_v25 = vsel %vm918_vm6, %v6427_v12, %v6429_v17 }
 0x8b0   :  { %8054 = vperm.xlu0 %13056, %v8046_v36   ;;  %6514 = vmatprep.mubr.f32.mxu0 %v14725_v43 }
 0x8b3   :  { %12363 = vmatmul.mubr.msk.f32.vlgmr.msra.gmra.mrb[4].mxu0 %vm5319_vm3, %v12361_v32 }
 0x8b4   :  { %6528 = vmatpush1.msra.mxu0 %v6434_v8  ;;  %6520 = vmatprep.mubr.f32.mxu0 %v14725_v43 }
 0x8b7   :  { %12364 = vmatmul.mubr.msk.f32.gmra.mrb[6].mxu0 %vm5319_vm3, %v12362_v58 }
 0x8b8   :  { %6591 = vmatprep.mubr.f32.mxu0 %v14725_v43 }
 0x8bb   :  { %12365 = vmatmul.mubr.msk.f32.vlgmr.msra.gmra.mrb[8].mxu0 %vm5319_vm3, %v12361_v32 }
 0x8bc   :  { %6597 = vmatprep.mubr.f32.mxu0 %v14725_v43 }
 0x8bf   :  { %12366 = vmatmul.mubr.msk.f32.gmra.mrb[10].mxu0 %vm5319_vm3, %v12362_v58 }
 0x8c0   :  { %6668 = vmatprep.mubr.f32.mxu0 %v14725_v43 }
 0x8ee   :  { %v6431_v3 = vpop.permute.xlu0 %6430 }
 0x8ef   :  { %v6437_v0 = vsel %vm918_vm6, %v6429_v17, %v6431_v3 }
 0x8f0   :  { %6604 = vmatprep.subr.mxu0 %v6437_v0 }
 0x8f1   :  { %6605 = vmatpush1.msra.mxu0 %v6436_v25 }
 0x8f2   :  { %12367 = vmatmul.mubr.msk.f32.vlgmr.msra.gmra.mrb[12].mxu0 %vm5319_vm3, %v12361_v32  ;;  %6702 = vmatprep.subr.mxu0 %v14581_v18  ;;  %v6951_v18 = vpop.permute.xlu1 %6950 }
 0x8f3   :  { %6703 = vmatpush1.msra.mxu0 %v14579_v34  ;;  %6674 = vmatprep.mubr.f32.mxu0 %v14725_v43  ;;  %v12370_v34 = vld [vmem:[%s16725_s10 + $0x48] sm:$0xff] }
 0x8f4   :  { %6779 = vmatprep.subr.mxu0 %v14597_v41  ;;  %v6953_v41 = vpop.permute.xlu0 %6952 }
 0x8f6   :  { %12368 = vmatmul.mubr.msk.f32.gmra.mrb[14].mxu0 %vm5319_vm3, %v12362_v58  ;;  %v6949_v23 = vpop.permute.xlu1 %6948 }
 0x8f7   :  { %6766 = vmatprep.mubr.f32.mxu0 %v14725_v43  ;;  %v6960_v31 = vsel %vm1409_vm7, %v6949_v23, %v6951_v18 }
 0x8fa   :  { %12371 = vmatmul.mubr.msk.f32.vlgmr.msra.gmra.mrb[4].mxu0 %vm5319_vm3, %v12369_v4  ;;  %v6957_v53 = vpop.permute.xlu1 %6956 }
 0x8fb   :  { %6780 = vmatpush1.msra.mxu0 %v14595_v24  ;;  %6772 = vmatprep.mubr.f32.mxu0 %v14725_v43  ;;  %v6961_v24 = vsel %vm1409_vm7, %v6951_v18, %v6953_v41 }
 0x8fc   :  { %6856 = vmatprep.subr.mxu0 %v14705_v38  ;;  %v6955_v38 = vpop.permute.xlu0 %6954 }
 0x8fd   :  { %v6963_v30 = vsel %vm1409_vm7, %v6955_v38, %v6957_v53  ;;  %v6962_v63 = vsel %vm1409_vm7, %v6953_v41, %v6955_v38  ;;  %v12386_v41 = vld [vmem:[%s16725_s10 + $0x68] sm:$0xff] }
 0x8fe   :  { %12372 = vmatmul.mubr.msk.f32.gmra.mrb[6].mxu0 %vm5319_vm3, %v12370_v34  ;;  %v7226_v46 = vpop.permute.xlu1 %7225 }
 0x8ff   :  { %6843 = vmatprep.mubr.f32.mxu0 %v14725_v43 }
 0x900   :  { %v6959_v12 = vpop.permute.xlu0 %6958 }
 0x901   :  { %v6964_v32 = vsel %vm1409_vm7, %v6957_v53, %v6959_v12 }
 0x902   :  { %12373 = vmatmul.mubr.msk.f32.vlgmr.msra.gmra.mrb[8].mxu0 %vm5319_vm3, %v12369_v4  ;;  %v7224_v58 = vpop.permute.xlu1 %7223 }
 0x903   :  { %6857 = vmatpush1.msra.mxu0 %v14610_v29  ;;  %6849 = vmatprep.mubr.f32.mxu0 %v14725_v43  ;;  %v12377_v29 = vld [vmem:[%s16725_s10 + $0x50] sm:$0xff]  ;;  %v7235_v3 = vsel %vm1663_vm8, %v7224_v58, %v7226_v46 }
 0x904   :  { %6977 = vmatprep.subr.mxu0 %v6961_v24  ;;  %v7228_v36 = vpop.permute.xlu0 %7227 }
 0x905   :  { %v7236_v8 = vsel %vm1663_vm8, %v7226_v46, %v7228_v36 }
 0x906   :  { %12374 = vmatmul.mubr.msk.f32.gmra.mrb[10].mxu0 %vm5319_vm3, %v12370_v34  ;;  %v7232_v0 = vpop.permute.xlu1 %7231 }
 0x907   :  { %6920 = vmatprep.mubr.f32.mxu0 %v14725_v43 }
 0x908   :  { %v7230_v17 = vpop.permute.xlu0 %7229 }
 0x909   :  { %v7238_v25 = vsel %vm1663_vm8, %v7230_v17, %v7232_v0  ;;  %v7237_v18 = vsel %vm1663_vm8, %v7228_v36, %v7230_v17 }
 0x90a   :  { %12375 = vmatmul.mubr.msk.f32.vlgmr.msra.gmra.mrb[12].mxu0 %vm5319_vm3, %v12369_v4  ;;  %v12385_v4 = vld [vmem:[%s16725_s10 + $0x60] sm:$0xff]  ;;  %v7501_v24 = vpop.permute.xlu1 %7500 }
 0x90b   :  { %6978 = vmatpush1.msra.mxu0 %v6960_v31  ;;  %6926 = vmatprep.mubr.f32.mxu0 %v14725_v43 }
 0x90c   :  { %7054 = vmatprep.subr.mxu0 %v6963_v30 }
 0x90e   :  { %12376 = vmatmul.mubr.msk.f32.gmra.mrb[14].mxu0 %vm5319_vm3, %v12370_v34  ;;  %v7234_v34 = vpop.permute.xlu0 %7233  ;;  %v7499_v53 = vpop.permute.xlu1 %7498 }
 0x90f   :  { %7041 = vmatprep.mubr.f32.mxu0 %v14725_v43  ;;  %v7239_v38 = vsel %vm1663_vm8, %v7232_v0, %v7234_v34 }
 0x912   :  { %12379 = vmatmul.mubr.msk.f32.vlgmr.msra.gmra.mrb[4].mxu0 %vm5319_vm3, %v12377_v29  ;;  %v7503_v23 = vpop.permute.xlu0 %7502 }
 0x913   :  { %7055 = vmatpush1.msra.mxu0 %v6962_v63  ;;  %7047 = vmatprep.mubr.f32.mxu0 %v14725_v43  ;;  %v7511_v31 = vsel %vm1917_vm9, %v7501_v24, %v7503_v23 }
 0x914   :  { %7131 = vmatprep.subr.mxu0 %v6959_v12  ;;  %v7507_v12 = vpop.permute.xlu1 %7506 }
 0x916   :  { %12380 = vmatmul.mubr.msk.f32.gmra.mrb[6].mxu0 %vm5319_vm3, %v12378_v40  ;;  %v7505_v30 = vpop.permute.xlu0 %7504 }
 0x917   :  { %7118 = vmatprep.mubr.f32.mxu0 %v14725_v43  ;;  %v7513_v63 = vsel %vm1917_vm9, %v7505_v30, %v7507_v12  ;;  %v7512_v36 = vsel %vm1917_vm9, %v7503_v23, %v7505_v30 }
 0x91a   :  { %12381 = vmatmul.mubr.msk.f32.vlgmr.msra.gmra.mrb[8].mxu0 %vm5319_vm3, %v12377_v29  ;;  %v7509_v46 = vpop.permute.xlu0 %7508 }
 0x91b   :  { %7132 = vmatpush1.msra.mxu0 %v6964_v32  ;;  %7124 = vmatprep.mubr.f32.mxu0 %v14725_v43  ;;  %v12394_v32 = vld [vmem:[%s16725_s10 + $0x78] sm:$0xff]  ;;  %v7514_v17 = vsel %vm1917_vm9, %v7507_v12, %v7509_v46 }
 0x91c   :  { %7252 = vmatprep.subr.mxu0 %v7236_v8  ;;  %v7776_v8 = vpop.permute.xlu1 %7775 }
 0x91e   :  { %12382 = vmatmul.mubr.msk.f32.gmra.mrb[10].mxu0 %vm5319_vm3, %v12378_v40  ;;  %v7778_v58 = vpop.permute.xlu0 %7777 }
 0x91f   :  { %7195 = vmatprep.mubr.f32.mxu0 %v14725_v43 }
 0x920   :  { %v7774_v0 = vpop.permute.xlu1 %7773 }
 0x922   :  { %12383 = vmatmul.mubr.msk.f32.vlgmr.msra.gmra.mrb[12].mxu0 %vm5319_vm3, %v12377_v29  ;;  %v7510_v29 = vsel %vm1917_vm9, %v7499_v53, %v7501_v24 }
 0x923   :  { %7253 = vmatpush1.msra.mxu0 %v7235_v3  ;;  %7201 = vmatprep.mubr.f32.mxu0 %v14725_v43  ;;  %v7786_v3 = vsel %vm2171_vm10, %v7776_v8, %v7778_v58 }
 0x924   :  { %7329 = vmatprep.subr.mxu0 %v7238_v25  ;;  %v7780_v25 = vpop.permute.xlu0 %7779 }
 0x925   :  { %v7787_v24 = vsel %vm2171_vm10, %v7778_v58, %v7780_v25 }
 0x926   :  { %12384 = vmatmul.mubr.msk.f32.gmra.mrb[14].mxu0 %vm5319_vm3, %v12378_v40  ;;  %v12393_v40 = vld [vmem:[%s16725_s10 + $0x70] sm:$0xff] }
 0x927   :  { %7316 = vmatprep.mubr.f32.mxu0 %v14725_v43 }
 0x928   :  { %v7784_v23 = vpop.permute.xlu0 %7783 }
 0x92a   :  { %12387 = vmatmul.mubr.msk.f32.vlgmr.msra.gmra.mrb[4].mxu0 %vm5319_vm3, %v12385_v4 }
 0x92b   :  { %7330 = vmatpush1.msra.mxu0 %v7237_v18  ;;  %7322 = vmatprep.mubr.f32.mxu0 %v14725_v43 }
 0x92c   :  { %7406 = vmatprep.subr.mxu0 %v7234_v34  ;;  %v7782_v34 = vpop.permute.xlu1 %7781 }
 0x92d   :  { %v7788_v18 = vsel %vm2171_vm10, %v7780_v25, %v7782_v34 }
 0x92e   :  { %12388 = vmatmul.mubr.msk.f32.gmra.mrb[6].mxu0 %vm5319_vm3, %v12386_v41 }
 0x92f   :  { %7393 = vmatprep.mubr.f32.mxu0 %v14725_v43 }
 0x932   :  { %12389 = vmatmul.mubr.msk.f32.vlgmr.msra.gmra.mrb[8].mxu0 %vm5319_vm3, %v12385_v4 }
 0x933   :  { %7407 = vmatpush1.msra.mxu0 %v7239_v38  ;;  %7399 = vmatprep.mubr.f32.mxu0 %v14725_v43  ;;  %v12402_v38 = vld [vmem:[%s16725_s10 + $0x88] sm:$0xff] }
 0x934   :  { %7527 = vmatprep.subr.mxu0 %v7511_v31  ;;  %v7789_v31 = vsel %vm2171_vm10, %v7782_v34, %v7784_v23 }
 0x936   :  { %12390 = vmatmul.mubr.msk.f32.gmra.mrb[10].mxu0 %vm5319_vm3, %v12386_v41 }
 0x937   :  { %7470 = vmatprep.mubr.f32.mxu0 %v14725_v43 }
 0x93a   :  { %12391 = vmatmul.mubr.msk.f32.vlgmr.msra.gmra.mrb[12].mxu0 %vm5319_vm3, %v12385_v4  ;;  %v7785_v4 = vsel %vm2171_vm10, %v7774_v0, %v7776_v8 }
 0x93b   :  { %7528 = vmatpush1.msra.mxu0 %v7510_v29  ;;  %7476 = vmatprep.mubr.f32.mxu0 %v14725_v43  ;;  %v8050_v29 = vpop.permute.xlu1 %8049 }
 0x93c   :  { %7604 = vmatprep.subr.mxu0 %v7513_v63 }
 0x93e   :  { %12392 = vmatmul.mubr.msk.f32.gmra.mrb[14].mxu0 %vm5319_vm3, %v12386_v41  ;;  %v12401_v41 = vld [vmem:[%s16725_s10 + $0x80] sm:$0xff] }
 0x93f   :  { %7591 = vmatprep.mubr.f32.mxu0 %v14725_v43 }
 0x942   :  { %12395 = vmatmul.mubr.msk.f32.vlgmr.msra.gmra.mrb[4].mxu0 %vm5319_vm3, %v12393_v40 }
 0x943   :  { %7605 = vmatpush1.msra.mxu0 %v7512_v36  ;;  %7597 = vmatprep.mubr.f32.mxu0 %v14725_v43 }
 0x944   :  { %7681 = vmatprep.subr.mxu0 %v7509_v46 }
 0x946   :  { %12396 = vmatmul.mubr.msk.f32.gmra.mrb[6].mxu0 %vm5319_vm3, %v12394_v32 }
 0x947   :  { %7668 = vmatprep.mubr.f32.mxu0 %v14725_v43 }
 0x94a   :  { %12397 = vmatmul.mubr.msk.f32.vlgmr.msra.gmra.mrb[8].mxu0 %vm5319_vm3, %v12393_v40 }
 0x94b   :  { %7682 = vmatpush1.msra.mxu0 %v7514_v17  ;;  %7674 = vmatprep.mubr.f32.mxu0 %v14725_v43 }
 0x94c   :  { %7802 = vmatprep.subr.mxu0 %v7786_v3 }
 0x94e   :  { %12398 = vmatmul.mubr.msk.f32.gmra.mrb[10].mxu0 %vm5319_vm3, %v12394_v32 }
 0x94f   :  { %7745 = vmatprep.mubr.f32.mxu0 %v14725_v43 }
 0x952   :  { %12399 = vmatmul.mubr.msk.f32.vlgmr.msra.gmra.mrb[12].mxu0 %vm5319_vm3, %v12393_v40  ;;  %v8055_v40 = vpop.permute.xlu0 %8054 }
 0x953   :  { %7803 = vmatpush1.msra.mxu0 %v7785_v4  ;;  %7751 = vmatprep.mubr.f32.mxu0 %v14725_v43 }
 0x954   :  { %7879 = vmatprep.subr.mxu0 %v7788_v18 }
 0x956   :  { %12400 = vmatmul.mubr.msk.f32.gmra.mrb[14].mxu0 %vm5319_vm3, %v12394_v32 }
 0x957   :  { %7866 = vmatprep.mubr.f32.mxu0 %v14725_v43 }
 0x95a   :  { %12403 = vmatmul.mubr.msk.f32.vlgmr.msra.gmra.mrb[4].mxu0 %vm5319_vm3, %v12401_v41 }
 0x95b   :  { %7880 = vmatpush1.msra.mxu0 %v7787_v24  ;;  %7872 = vmatprep.mubr.f32.mxu0 %v14725_v43 }
 0x95c   :  { %7956 = vmatprep.subr.mxu0 %v7784_v23  ;;  %v16812_v23 = vld [vmem:[#allocation4_spill] sm:$0xff] }
 0x95e   :  { %12404 = vmatmul.mubr.msk.f32.gmra.mrb[6].mxu0 %vm5319_vm3, %v12402_v38 }
 0x95f   :  { %7943 = vmatprep.mubr.f32.mxu0 %v14725_v43 }
 0x962   :  { %12405 = vmatmul.mubr.msk.f32.vlgmr.msra.gmra.mrb[8].mxu0 %vm5319_vm3, %v12401_v41 }
 0x963   :  { %7957 = vmatpush1.msra.mxu0 %v7789_v31  ;;  %7949 = vmatprep.mubr.f32.mxu0 %v14725_v43 }
 0x966   :  { %12406 = vmatmul.mubr.msk.f32.gmra.mrb[10].mxu0 %vm5319_vm3, %v12402_v38 }
 0x967   :  { %8020 = vmatprep.mubr.f32.mxu0 %v14725_v43 }
 0x96a   :  { %12407 = vmatmul.mubr.msk.f32.vlgmr.msra.gmra.mrb[12].mxu0 %vm5319_vm3, %v12401_v41  ;;  %v16811_v41 = vld [vmem:[#allocation3_spill] sm:$0xff] }
 0x96b   :  { %8026 = vmatprep.mubr.f32.mxu0 %v14725_v43 }
 0x96e   :  { %12408 = vmatmul.mubr.msk.f32.gmra.mrb[14].mxu0 %vm5319_vm3, %v12402_v38 }
 0x96f   :  { %8795 = vmatprep.mubr.f32.mxu0 %v14725_v43 }
 0xa2d   :  { %v7868_v53 = vpop.f32.mrb[4].mxu0 }
 0xa2e   :  { %v7870_v30 = vpop.f32.mrb[5].mxu0  ;;  %v8057_v12 = vadd.f32 %v8050_v29, %v7868_v53 }
 0xa2f   :  { %v8058_v63 = vadd.f32 %v8050_v29, %v7870_v30 }
 0xa30   :  { %v14925_v58 = vmax.f32 %v8057_v12, 0.0 }
 0xa31   :  { %v7874_v46 = vpop.f32.mrb[6].mxu0  ;;  %v14927_v17 = vmax.f32 %v8058_v63, 0.0  ;;  %v16813_v63 = vld [vmem:[#allocation5_spill] sm:$0xff] }
 0xa32   :  { %v8063_v36 = vadd.f32 %v8055_v40, %v7874_v46  ;;  %v7876_v32 = vpop.f32.mrb[7].mxu0  ;;  %v8081_v24 = vmul.f32 %v14925_v58, %v16811_v41 }
 0xa33   :  { %v8064_v8 = vadd.f32 %v8055_v40, %v7876_v32  ;;  %v8082_v38 = vmul.f32 %v14927_v17, %v16812_v23 }
 0xa34   :  { %v14929_v3 = vmax.f32 %v8063_v36, 0.0 }
 0xa35   :  { %v14931_v0 = vmax.f32 %v8064_v8, 0.0  ;;  %v7945_v25 = vpop.f32.mrb[8].mxu0  ;;  %v8093_v62 = vadd.f32 %v8082_v38, %v8081_v24  ;;  %v8110_v9 = vmul.f32 %v8082_v38, %v14927_v17 }
 0xa36   :  { %v8059_v4 = vadd.f32 %v8050_v29, %v7945_v25  ;;  %v7947_v34 = vpop.f32.mrb[9].mxu0  ;;  %v8087_v53 = vmul.f32 %v14929_v3, %v16811_v41 }
 0xa37   :  { %v8060_v18 = vadd.f32 %v8050_v29, %v7947_v34  ;;  %v8088_v30 = vmul.f32 %v14931_v0, %v16812_v23  ;;  %v8109_v34 = vmul.f32 %v8081_v24, %v14925_v58 }
 0xa38   :  { %v14937_v31 = vmax.f32 %v8059_v4, 0.0  ;;  %v8115_v41 = vmul.f32 %v8087_v53, %v14929_v3 }
 0xa39   :  { %v7951_v12 = vpop.f32.mrb[10].mxu0  ;;  %v14945_v36 = vmax.f32 %v8060_v18, 0.0  ;;  %v8116_v23 = vmul.f32 %v8088_v30, %v14931_v0  ;;  %v8101_v38 = vadd.f32 %v8088_v30, %v8087_v53 }
 0xa3a   :  { %v8083_v46 = vmul.f32 %v14937_v31, %v16813_v63  ;;  %v8065_v32 = vadd.f32 %v8055_v40, %v7951_v12  ;;  %v7953_v8 = vpop.f32.mrb[11].mxu0 }
 0xa3b   :  { %v8066_v25 = vadd.f32 %v8055_v40, %v7953_v8  ;;  %v8084_v18 = vmul.f32 %v14945_v36, %v13764_v21  ;;  %v8129_v6 = vadd.f32 %v8116_v23, %v8115_v41 }
 0xa3c   :  { %v14948_v4 = vmax.f32 %v8065_v32, 0.0  ;;  %v8094_v50 = vadd.f32 %v8093_v62, %v8083_v46  ;;  %v8111_v32 = vmul.f32 %v8083_v46, %v14937_v31  ;;  %v8121_v62 = vadd.f32 %v8110_v9, %v8109_v34 }
 0xa3d   :  { %v14953_v39 = vmax.f32 %v8066_v25, 0.0  ;;  %v8022_v19 = vpop.f32.mrb[12].mxu0  ;;  %v8112_v30 = vmul.f32 %v8084_v18, %v14945_v36 }
 0xa3e   :  { %v8089_v12 = vmul.f32 %v14948_v4, %v16813_v63  ;;  %v8061_v8 = vadd.f32 %v8050_v29, %v8022_v19  ;;  %v8024_v24 = vpop.f32.mrb[13].mxu0  ;;  %v8095_v7 = vadd.f32 %v8094_v50, %v8084_v18  ;;  %v8122_v53 = vadd.f32 %v8121_v62, %v8111_v32 }
 0xa3f   :  { %v8062_v28 = vadd.f32 %v8050_v29, %v8024_v24  ;;  %v8090_v25 = vmul.f32 %v14953_v39, %v13764_v21 }
 0xa40   :  { %v8117_v10 = vmul.f32 %v8089_v12, %v14948_v4  ;;  %v14963_v2 = vmax.f32 %v8061_v8, 0.0  ;;  %v8102_v63 = vadd.f32 %v8101_v38, %v8089_v12 }
 0xa41   :  { %v14965_v52 = vmax.f32 %v8062_v28, 0.0  ;;  %v8028_v26 = vpop.f32.mrb[14].mxu0  ;;  %v8118_v9 = vmul.f32 %v8090_v25, %v14953_v39 }
 0xa42   :  { %v8085_v19 = vmul.f32 %v14963_v2, %v13767_v22  ;;  %v8067_v46 = vadd.f32 %v8055_v40, %v8028_v26  ;;  %v8030_v29 = vpop.f32.mrb[15].mxu0  ;;  %v8130_v21 = vadd.f32 %v8129_v6, %v8117_v10  ;;  %v8103_v34 = vadd.f32 %v8102_v63, %v8090_v25 }
 0xa43   :  { %v8086_v24 = vmul.f32 %v14965_v52, %v13774_v27  ;;  %v8068_v8 = vadd.f32 %v8055_v40, %v8030_v29  ;;  %v8123_v10 = vadd.f32 %v8122_v53, %v8112_v30 }
 0xa44   :  { %v14973_v28 = vmax.f32 %v8067_v46, 0.0  ;;  %v8096_v41 = vadd.f32 %v8095_v7, %v8085_v19  ;;  %v8113_v26 = vmul.f32 %v8085_v19, %v14963_v2  ;;  %v8131_v40 = vadd.f32 %v8130_v21, %v8118_v9 }
 0xa45   :  { %v14975_v50 = vmax.f32 %v8068_v8, 0.0  ;;  %v8097_v23 = vsel %vm5319_vm3, %v8086_v24, 0.0  ;;  %v8114_v32 = vmul.f32 %v8086_v24, %v14965_v52 }
 0xa46   :  { %v8091_v18 = vmul.f32 %v14973_v28, %v13767_v22  ;;  %v8098_v12 = vadd.f32 %v8097_v23, %v8096_v41  ;;  %v8124_v46 = vadd.f32 %v8123_v10, %v8113_v26 }
 0xa47   :  { %v8092_v6 = vmul.f32 %v14975_v50, %v13774_v27  ;;  %v8125_v24 = vsel %vm5319_vm3, %v8114_v32, 0.0 }
 0xa48   :  { %v8119_v7 = vmul.f32 %v8091_v18, %v14973_v28  ;;  %8099 = vadd.xlane.f32.xlu1 %v8098_v12  ;;  %v8104_v38 = vadd.f32 %v8103_v34, %v8091_v18  ;;  %v8126_v53 = vadd.f32 %v8125_v24, %v8124_v46 }
 0xa49   :  { %v8120_v62 = vmul.f32 %v8092_v6, %v14975_v50  ;;  %v8105_v63 = vsel %vm5319_vm3, %v8092_v6, 0.0 }
 0xa4a   :  { %v8106_v25 = vadd.f32 %v8105_v63, %v8104_v38  ;;  %v8132_v19 = vadd.f32 %v8131_v40, %v8119_v7  ;;  %v8152_v63 = vld [vmem:[%s16726_s12 + $0x8] sm:$0xff] }
 0xa4b   :  { %v8133_v29 = vsel %vm5319_vm3, %v8120_v62, 0.0 }
 0xa4c   :  { %8107 = vadd.xlane.f32.xlu0 %v8106_v25  ;;  %v8134_v8 = vadd.f32 %v8133_v29, %v8132_v19  ;;  %v8151_v19 = vld [vmem:[%s16726_s12] sm:$0xff] }
 0xa4e   :  { %8135 = vadd.xlane.f32.xlu1 %v8134_v8  ;;  %v8189_v8 = vld [vmem:[%s16727_s13] sm:$0xff] }
 0xa50   :  { %8127 = vadd.xlane.f32.xlu0 %v8126_v53  ;;  %v8190_v53 = vld [vmem:[%s16727_s13 + $0x8] sm:$0xff] }
 0xad5   :  { %v8100_v21 = vpop.xlane.xlu1 %8099 }
 0xad6   :  { %v14989_v9 = vmul.f32 0.001953125, %v8100_v21  ;;  %v8333_v21 = vmul.f32 %v14725_v43, %v13890_v60 }
 0xad8   :  { %v8141_v32 = vmul.f32 %v14989_v9, %v14989_v9  ;;  %v8160_v60 = vsub.f32 %v14965_v52, %v14989_v9 }
 0xad9   :  { %v8108_v30 = vpop.xlane.xlu0 %8107 }
 0xada   :  { %v14991_v41 = vmul.f32 0.001953125, %v8108_v30 }
 0xadb   :  { %v8136_v23 = vpop.xlane.xlu1 %8135 }
 0xadc   :  { %v8142_v34 = vmul.f32 %v14991_v41, %v14991_v41  ;;  %v8140_v26 = vmul.f32 0.001953125, %v8136_v23  ;;  %v8155_v23 = vsub.f32 %v14925_v58, %v14989_v9 }
 0xadd   :  { %v8128_v18 = vpop.xlane.xlu0 %8127 }
 0xade   :  { %v8144_v12 = vsub.f32 %v8140_v26, %v8142_v34  ;;  %v8139_v6 = vmul.f32 0.001953125, %v8128_v18  ;;  %v8156_v34 = vsub.f32 %v14927_v17, %v14989_v9  ;;  %v8157_v26 = vsub.f32 %v14937_v31, %v14989_v9 }
 0xadf   :  { %v8158_v18 = vsub.f32 %v14945_v36, %v14989_v9 }
 0xae0   :  { %v8146_v10 = vmax.f32 %v8144_v12, 0.0  ;;  %v8143_v40 = vsub.f32 %v8139_v6, %v8141_v32 }
 0xae2   :  { %v8148_v7 = vadd.f32 1e-05, %v8146_v10  ;;  %v8145_v38 = vmax.f32 %v8143_v40, 0.0  ;;  %v8166_v40 = vsub.f32 %v14975_v50, %v14991_v41 }
 0xae4   :  { %13307 = vrsqrt.f32 %v8148_v7  ;;  %v8147_v62 = vadd.f32 1e-05, %v8145_v38 }
 0xae6   :  { %13309 = vrsqrt.f32 %v8147_v62 }
 0xaee   :  { %v13308_v25 = vpop.eup %13307 }
 0xaef   :  { %v8154_v46 = vmul.f32 %v13308_v25, %v8152_v63 }
 0xaf0   :  { %v13310_v29 = vpop.eup %13309 }
 0xaf1   :  { %8174 = vperm.xlu1 %13055, %v8154_v46   ;;  %v8153_v24 = vmul.f32 %v13310_v29, %v8151_v19  ;;  %v8161_v29 = vsub.f32 %v14929_v3, %v14991_v41 }
 0xaf3   :  { %8169 = vperm.xlu0 %13056, %v8153_v24  }
 0xaf5   :  { %8193 = vperm.xlu1 %13055, %v8189_v8  }
 0xaf7   :  { %8198 = vperm.xlu0 %13056, %v8190_v53  }
 0xaf9   :  { %8357 = vrot.lane.b32.xlu1 %v8333_v21, %s13333_s3 }
 0xafd   :  { %8369 = vrot.lane.b32.xlu1 %v8333_v21, %s13333_s3  ;;  %v8162_v21 = vsub.f32 %v14931_v0, %v14991_v41  ;;  %v8164_v0 = vsub.f32 %v14953_v39, %v14991_v41 }
 0xb70   :  { %v15013_v30 = vpop.permute.xlu1 %8174 }
 0xb71   :  { %v8188_v31 = vmul.f32 %v15013_v30, %v8166_v40  ;;  %v8183_v53 = vmul.f32 %v15013_v30, %v8161_v29  ;;  %v8186_v40 = vmul.f32 %v15013_v30, %v8164_v0 }
 0xb72   :  { %v8170_v12 = vpop.permute.xlu0 %8169 }
 0xb73   :  { %v8177_v6 = vmul.f32 %v8170_v12, %v8155_v23  ;;  %v8178_v32 = vmul.f32 %v8170_v12, %v8156_v34  ;;  %v8179_v10 = vmul.f32 %v8170_v12, %v8157_v26  ;;  %v8180_v58 = vmul.f32 %v8170_v12, %v8158_v18 }
 0xb74   :  { %v8182_v7 = vmul.f32 %v8170_v12, %v8160_v60  ;;  %v8194_v38 = vpop.permute.xlu1 %8193  ;;  %v8163_v23 = vsub.f32 %v14948_v4, %v14991_v41  ;;  %v8184_v18 = vmul.f32 %v15013_v30, %v8162_v21 }
 0xb75   :  { %v15027_v17 = vadd.f32 %v8194_v38, %v8177_v6  ;;  %v15029_v62 = vadd.f32 %v8194_v38, %v8178_v32  ;;  %v15034_v52 = vadd.f32 %v8194_v38, %v8179_v10  ;;  %v15036_v25 = vadd.f32 %v8194_v38, %v8180_v58 }
 0xb76   :  { %v15032_v36 = vadd.f32 %v8194_v38, %v8182_v7  ;;  %v8199_v63 = vpop.permute.xlu0 %8198  ;;  %v8185_v60 = vmul.f32 %v15013_v30, %v8163_v23  ;;  %v8159_v58 = vsub.f32 %v14963_v2, %v14989_v9 }
 0xb77   :  { %v15040_v50 = vadd.f32 %v8199_v63, %v8188_v31  ;;  %v8252_v19 = vmul.f32 %v15029_v62, %v13932_v35  ;;  %v8251_v46 = vmul.f32 %v15027_v17, %v13852_v42  ;;  %v8254_v24 = vmul.f32 %v15036_v25, %v13946_v49 }
 0xb78   :  { %8218 = vst.msk [vmem:[#allocation2 + $0x30] sm:$0xff] %vm5319_vm3, %v15032_v36  ;;  %v8253_v8 = vmul.f32 %v15034_v52, %v13941_v48  ;;  %v15063_v34 = vadd.f32 %v8199_v63, %v8183_v53  ;;  %v8334_v3 = vmul.f32 %v15027_v17, %v13957_v44  ;;  %v8335_v26 = vmul.f32 %v15029_v62, %v13951_v55 }
 0xb79   :  { %8224 = vst.msk [vmem:[#allocation2 + $0x68] sm:$0xff] %vm5319_vm3, %v15040_v50  ;;  %8277 = vrot.lane.b32.xlu0 %v8252_v19, %s13334_s19  ;;  %8275 = vrot.lane.b32.xlu1 %v8251_v46, %s13334_s19  ;;  %v15075_v4 = vadd.f32 %v8199_v63, %v8184_v18  ;;  %v15077_v6 = vadd.f32 %v8199_v63, %v8185_v60 }
 0xb7a   :  { %v8336_v32 = vmul.f32 %v15034_v52, %v13962_v59  ;;  %v8257_v10 = vmul.f32 %v15063_v34, %v13852_v42  ;;  %v8181_v39 = vmul.f32 %v8170_v12, %v8159_v58  ;;  %v15088_v7 = vadd.f32 %v8199_v63, %v8186_v40 }
 0xb7b   :  { %v8258_v31 = vmul.f32 %v15075_v4, %v13932_v35  ;;  %v8259_v19 = vmul.f32 %v15077_v6, %v13941_v48  ;;  %v8341_v9 = vmul.f32 %v15075_v4, %v13951_v55  ;;  %v8165_v35 = vsub.f32 %v14973_v28, %v14991_v41 }
 0xb7c   :  { %v15096_v42 = vadd.f32 %v8194_v38, %v8181_v39  ;;  %v8260_v2 = vmul.f32 %v15088_v7, %v13946_v49  ;;  %v8340_v48 = vmul.f32 %v15063_v34, %v13957_v44  ;;  %v8342_v55 = vmul.f32 %v15077_v6, %v13962_v59 }
 0xb7d   :  { %8281 = vrot.lane.b32.xlu0 %v8254_v24, %s13334_s19  ;;  %8279 = vrot.lane.b32.xlu1 %v8253_v8, %s13334_s19  ;;  %v8187_v38 = vmul.f32 %v15013_v30, %v8165_v35  ;;  %v8337_v28 = vmul.f32 %v15036_v25, %v13976_v16  ;;  %v8241_v58 = vmul.f32 %v15034_v52, %v14038_v13 }
 0xb7e   :  { %v8255_v12 = vmul.f32 %v15096_v42, %v13968_v1  ;;  %v8338_v59 = vmul.f32 %v15096_v42, %v13983_v20 }
 0xb7f   :  { %v15113_v49 = vadd.f32 %v8199_v63, %v8187_v38  ;;  %v8230_v41 = vld [vmem:[#allocation2 + $0x30] sm:$0xff]  ;;  %v8343_v63 = vmul.f32 %v15088_v7, %v13976_v16  ;;  %v8358_v16 = vpop.permute.xlu1 %8357 }
 0xb80   :  { %v8256_v44 = vmul.f32 %v8230_v41, %v13973_v5  ;;  %v8236_v46 = vld [vmem:[#allocation2 + $0x68] sm:$0xff] }
 0xb81   :  { %8359 = vrot.lane.b32.xlu0 %v8334_v3, %s13333_s3  ;;  %8361 = vrot.lane.b32.xlu1 %v8335_v26, %s13333_s3  ;;  %v8261_v30 = vmul.f32 %v15113_v49, %v13968_v1  ;;  %v8262_v29 = vmul.f32 %v8236_v46, %v13973_v5  ;;  %v8535_v1 = vmul.f32 %v14725_v43, %v14014_v37 }
 0xb82   :  { %v8344_v24 = vmul.f32 %v15113_v49, %v13983_v20  ;;  %v8239_v43 = vmul.f32 %v15027_v17, %v14026_v47  ;;  %v8240_v20 = vmul.f32 %v15029_v62, %v14029_v57  ;;  %v8246_v46 = vmul.f32 %v15075_v4, %v14029_v57 }
 0xb83   :  { %v8370_v8 = vpop.permute.xlu1 %8369  ;;  %v8242_v4 = vmul.f32 %v15036_v25, %v14050_v11 }
 0xb85   :  { %8363 = vrot.lane.b32.xlu0 %v8336_v32, %s13333_s3  ;;  %8287 = vrot.lane.b32.xlu1 %v8257_v10, %s13334_s19 }
 0xb89   :  { %8289 = vrot.lane.b32.xlu0 %v8258_v31, %s13334_s19  ;;  %8291 = vrot.lane.b32.xlu1 %v8259_v19, %s13334_s19 }
 0xb8d   :  { %8293 = vrot.lane.b32.xlu0 %v8260_v2, %s13334_s19  ;;  %8373 = vrot.lane.b32.xlu1 %v8341_v9, %s13333_s3 }
 0xb91   :  { %8371 = vrot.lane.b32.xlu0 %v8340_v48, %s13333_s3  ;;  %8283 = vrot.lane.b32.xlu1 %v8255_v12, %s13334_s19 }
 0xb95   :  { %8375 = vrot.lane.b32.xlu0 %v8342_v55, %s13333_s3  ;;  %8365 = vrot.lane.b32.xlu1 %v8337_v28, %s13333_s3 }
 0xb99   :  { %8285 = vrot.lane.b32.xlu0 %v8256_v44, %s13334_s19  ;;  %8295 = vrot.lane.b32.xlu1 %v8261_v30, %s13334_s19 }
 0xb9d   :  { %8367 = vrot.lane.b32.xlu0 %v8338_v59, %s13333_s3  ;;  %8377 = vrot.lane.b32.xlu1 %v8343_v63, %s13333_s3  ;;  %v8245_v63 = vmul.f32 %v15063_v34, %v14026_v47 }
 0xba1   :  { %8297 = vrot.lane.b32.xlu0 %v8262_v29, %s13334_s19  ;;  %8563 = vrot.lane.b32.xlu1 %v8535_v1, %s13335_s27 }
 0xba5   :  { %8379 = vrot.lane.b32.xlu0 %v8344_v24, %s13333_s3 }
 0xba9   :  { %8577 = vrot.lane.b32.xlu0 %v8535_v1, %s13335_s27 }
 0xbeb   :  { %v8278_v53 = vpop.permute.xlu0 %8277  ;;  %v8276_v21 = vpop.permute.xlu1 %8275 }
 0xbec   :  { %v8299_v3 = vsel %vm2663_vm14, %v8276_v21, %v8278_v53 }
 0xbed   :  { %v8321_v26 = vadd.f32 %v8299_v3, %v8239_v43  ;;  %v8247_v3 = vmul.f32 %v15077_v6, %v14038_v13 }
 0xbef   :  { %v8282_v23 = vpop.permute.xlu0 %8281  ;;  %v8280_v5 = vpop.permute.xlu1 %8279 }
 0xbf0   :  { %v8300_v37 = vsel %vm2663_vm14, %v8278_v53, %v8280_v5  ;;  %v8301_v32 = vsel %vm2663_vm14, %v8280_v5, %v8282_v23 }
 0xbf1   :  { %v8322_v18 = vadd.f32 %v8300_v37, %v8240_v20  ;;  %v8323_v17 = vadd.f32 %v8301_v32, %v8241_v58  ;;  %v8244_v32 = vmul.f32 %v15032_v36, %v14057_v15 }
 0xbf3   :  { %v8360_v60 = vpop.permute.xlu0 %8359  ;;  %v8362_v0 = vpop.permute.xlu1 %8361 }
 0xbf4   :  { %v8381_v10 = vsel %vm2627_vm13, %v8358_v16, %v8360_v60  ;;  %v8382_v40 = vsel %vm2627_vm13, %v8360_v60, %v8362_v0 }
 0xbf5   :  { %v15152_v39 = vadd.f32 %v8381_v10, %v8321_v26  ;;  %v15154_v31 = vadd.f32 %v8382_v40, %v8322_v18  ;;  %v8243_v40 = vmul.f32 %v15096_v42, %v14064_v54 }
 0xbf7   :  { %v8364_v19 = vpop.permute.xlu0 %8363  ;;  %v8288_v62 = vpop.permute.xlu1 %8287  ;;  %v8453_v2 = vmul.f32 %v15152_v39, %v14019_v45  ;;  %v8454_v9 = vmul.f32 %v15154_v31, %v14078_v51  ;;  %v8536_v55 = vmul.f32 %v15152_v39, %v14101_v56  ;;  %v8537_v44 = vmul.f32 %v15154_v31, %v14104_v61 }
 0xbf8   :  { %v8383_v35 = vsel %vm2627_vm13, %v8362_v0, %v8364_v19 }
 0xbf9   :  { %v15161_v48 = vadd.f32 %v8383_v35, %v8323_v17  ;;  %8477 = vrot.lane.b32.xlu1 %v8453_v2, %s13336_s28  ;;  %8479 = vrot.lane.b32.xlu0 %v8454_v9, %s13336_s28 }
 0xbfb   :  { %v8290_v52 = vpop.permute.xlu0 %8289  ;;  %v8292_v12 = vpop.permute.xlu1 %8291  ;;  %v8455_v38 = vmul.f32 %v15161_v48, %v14093_v33 }
 0xbfc   :  { %v8304_v30 = vsel %vm2663_vm14, %v8288_v62, %v8290_v52  ;;  %v8305_v59 = vsel %vm2663_vm14, %v8290_v52, %v8292_v12 }
 0xbfd   :  { %8481 = vrot.lane.b32.xlu1 %v8455_v38, %s13336_s28  ;;  %8565 = vrot.lane.b32.xlu0 %v8536_v55, %s13335_s27  ;;  %v8327_v29 = vadd.f32 %v8304_v30, %v8245_v63  ;;  %v8328_v1 = vadd.f32 %v8305_v59, %v8246_v46  ;;  %v16815_v55 = vld [vmem:[#allocation9_spill] sm:$0xff]  ;;  %v8249_v30 = vmul.f32 %v15113_v49, %v14064_v54 }
 0xbff   :  { %v8294_v28 = vpop.permute.xlu0 %8293  ;;  %v8374_v41 = vpop.permute.xlu1 %8373 }
 0xc00   :  { %v8306_v53 = vsel %vm2663_vm14, %v8292_v12, %v8294_v28 }
 0xc01   :  { %8567 = vrot.lane.b32.xlu1 %v8537_v44, %s13335_s27  ;;  %v8329_v34 = vadd.f32 %v8306_v53, %v8247_v3 }
 0xc03   :  { %v8372_v24 = vpop.permute.xlu0 %8371  ;;  %v8284_v16 = vpop.permute.xlu1 %8283 }
 0xc04   :  { %v8386_v21 = vsel %vm2627_vm13, %v8370_v8, %v8372_v24  ;;  %v8387_v5 = vsel %vm2627_vm13, %v8372_v24, %v8374_v41  ;;  %v8302_v57 = vsel %vm2663_vm14, %v8282_v23, %v8284_v16 }
 0xc05   :  { %v15185_v37 = vadd.f32 %v8386_v21, %v8327_v29  ;;  %v15187_v47 = vadd.f32 %v8387_v5, %v8328_v1  ;;  %v8324_v18 = vadd.f32 %v8302_v57, %v8242_v4  ;;  %v16816_v29 = vld [vmem:[#allocation10_spill] sm:$0xff]  ;;  %v16817_v21 = vld [vmem:[#allocation12_spill] sm:$0xff] }
 0xc07   :  { %v8376_v43 = vpop.permute.xlu0 %8375  ;;  %v8366_v20 = vpop.permute.xlu1 %8365  ;;  %v8459_v8 = vmul.f32 %v15185_v37, %v14019_v45  ;;  %v8460_v26 = vmul.f32 %v15187_v47, %v14078_v51  ;;  %v8543_v51 = vmul.f32 %v15185_v37, %v14101_v56  ;;  %v8544_v36 = vmul.f32 %v15187_v47, %v14104_v61 }
 0xc08   :  { %v8388_v13 = vsel %vm2627_vm13, %v8374_v41, %v8376_v43  ;;  %v8384_v6 = vsel %vm2627_vm13, %v8364_v19, %v8366_v20  ;;  %v8250_v41 = vmul.f32 %v15040_v50, %v14057_v15 }
 0xc09   :  { %v15198_v60 = vadd.f32 %v8388_v13, %v8329_v34  ;;  %8489 = vrot.lane.b32.xlu0 %v8459_v8, %s13336_s28  ;;  %8491 = vrot.lane.b32.xlu1 %v8460_v26, %s13336_s28  ;;  %v15202_v25 = vadd.f32 %v8384_v6, %v8324_v18  ;;  %v16818_v34 = vld [vmem:[#allocation13_spill] sm:$0xff] }
 0xc0b   :  { %v8286_v23 = vpop.permute.xlu0 %8285  ;;  %v8296_v0 = vpop.permute.xlu1 %8295  ;;  %v8461_v45 = vmul.f32 %v15198_v60, %v14093_v33  ;;  %v8248_v33 = vmul.f32 %v15088_v7, %v14050_v11  ;;  %v8456_v2 = vmul.f32 %v15202_v25, %v14116_v14  ;;  %v16814_v7 = vld [vmem:[#allocation8_spill] sm:$0xff]  ;;  %v8539_v1 = vmul.f32 %v15202_v25, %v16816_v29 }
 0xc0c   :  { %v8303_v10 = vsel %vm2663_vm14, %v8284_v16, %v8286_v23  ;;  %v8326_v58 = vadd.f32 %v8286_v23, %v8244_v32  ;;  %v8307_v17 = vsel %vm2663_vm14, %v8294_v28, %v8296_v0  ;;  %v8538_v28 = vmul.f32 %v15161_v48, %v16815_v55 }
 0xc0d   :  { %8493 = vrot.lane.b32.xlu0 %v8461_v45, %s13336_s28  ;;  %8579 = vrot.lane.b32.xlu1 %v8543_v51, %s13335_s27  ;;  %v8325_v19 = vadd.f32 %v8303_v10, %v8243_v40  ;;  %v8330_v52 = vadd.f32 %v8307_v17, %v8248_v33  ;;  %v8545_v49 = vmul.f32 %v15198_v60, %v16815_v55  ;;  %v16820_v45 = vld [vmem:[#allocation14_spill] sm:$0xff]  ;;  %v16821_v33 = vld [vmem:[#allocation15_spill] sm:$0xff] }
 0xc0e   :  { %v8441_v51 = vmul.f32 %v15152_v39, %v16820_v45 }
 0xc0f   :  { %v8368_v56 = vpop.permute.xlu0 %8367  ;;  %v8378_v62 = vpop.permute.xlu1 %8377 }
 0xc10   :  { %v8385_v42 = vsel %vm2627_vm13, %v8366_v20, %v8368_v56  ;;  %v15223_v9 = vadd.f32 %v8368_v56, %v8326_v58  ;;  %v8389_v35 = vsel %vm2627_vm13, %v8376_v43, %v8378_v62  ;;  %v16819_v43 = vld [vmem:[#allocation11_spill] sm:$0xff]  ;;  %v8442_v56 = vmul.f32 %v15154_v31, %v16821_v33 }
 0xc11   :  { %v15226_v12 = vadd.f32 %v8385_v42, %v8325_v19  ;;  %8581 = vrot.lane.b32.xlu0 %v8544_v36, %s13335_s27  ;;  %8483 = vrot.lane.b32.xlu1 %v8456_v2, %s13336_s28  ;;  %v15232_v11 = vadd.f32 %v8389_v35, %v8330_v52  ;;  %v15301_v35 = vld [vmem:[#allocation2] sm:$0xff] }
 0xc12   :  { %8420 = vst.msk [vmem:[#allocation2 + $0x30] sm:$0xff] %vm5319_vm3, %v15223_v9  ;;  %v15305_v31 = vpack.i.bf16 %v15301_v35, %v15301_v35 }
 0xc13   :  { %v8298_v61 = vpop.permute.xlu0 %8297  ;;  %v8457_v38 = vmul.f32 %v15226_v12, %v16814_v7  ;;  %v8462_v24 = vmul.f32 %v15232_v11, %v14116_v14  ;;  %v8546_v53 = vmul.f32 %v15232_v11, %v16816_v29  ;;  %v8540_v4 = vmul.f32 %v15226_v12, %v16818_v34  ;;  %v8564_v13 = vpop.permute.xlu1 %8563 }
 0xc14   :  { %v8308_v44 = vsel %vm2663_vm14, %v8296_v0, %v8298_v61  ;;  %v8332_v59 = vadd.f32 %v8298_v61, %v8250_v41 }
 0xc15   :  { %8485 = vrot.lane.b32.xlu0 %v8457_v38, %s13336_s28  ;;  %8569 = vrot.lane.b32.xlu1 %v8538_v28, %s13335_s27  ;;  %v8331_v63 = vadd.f32 %v8308_v44, %v8249_v30  ;;  %v8447_v38 = vmul.f32 %v15185_v37, %v16820_v45 }
 0xc17   :  { %v8380_v46 = vpop.permute.xlu0 %8379 }
 0xc18   :  { %v8390_v15 = vsel %vm2627_vm13, %v8378_v62, %v8380_v46  ;;  %v15250_v50 = vadd.f32 %v8380_v46, %v8332_v59  ;;  %v8448_v59 = vmul.f32 %v15187_v47, %v16821_v33 }
 0xc19   :  { %v15252_v16 = vadd.f32 %v8390_v15, %v8331_v63  ;;  %8571 = vrot.lane.b32.xlu0 %v8539_v1, %s13335_s27  ;;  %8495 = vrot.lane.b32.xlu1 %v8462_v24, %s13336_s28  ;;  %v8432_v14 = vld [vmem:[#allocation2 + $0x30] sm:$0xff] }
 0xc1a   :  { %8426 = vst.msk [vmem:[#allocation2 + $0x68] sm:$0xff] %vm5319_vm3, %v15250_v50  ;;  %v8458_v5 = vmul.f32 %v8432_v14, %v16817_v21  ;;  %v8541_v20 = vmul.f32 %v8432_v14, %v16819_v43  ;;  %v16822_v14 = vld [vmem:[#allocation16_spill] sm:$0xff] }
 0xc1b   :  { %v8463_v54 = vmul.f32 %v15252_v16, %v16814_v7  ;;  %v8547_v8 = vmul.f32 %v15252_v16, %v16818_v34  ;;  %v8578_v6 = vpop.permute.xlu0 %8577  ;;  %v8443_v47 = vmul.f32 %v15161_v48, %v16822_v14 }
 0xc1d   :  { %8497 = vrot.lane.b32.xlu0 %v8463_v54, %s13336_s28  ;;  %8583 = vrot.lane.b32.xlu1 %v8545_v49, %s13335_s27 }
 0xc21   :  { %8585 = vrot.lane.b32.xlu0 %v8546_v53, %s13335_s27  ;;  %8487 = vrot.lane.b32.xlu1 %v8458_v5, %s13336_s28  ;;  %v8438_v3 = vld [vmem:[#allocation2 + $0x68] sm:$0xff] }
 0xc22   :  { %v8464_v57 = vmul.f32 %v8438_v3, %v16817_v21  ;;  %v8548_v26 = vmul.f32 %v8438_v3, %v16819_v43  ;;  %v16823_v43 = vld [vmem:[#allocation17_spill] sm:$0xff] }
 0xc25   :  { %8499 = vrot.lane.b32.xlu0 %v8464_v57, %s13336_s28  ;;  %8573 = vrot.lane.b32.xlu1 %v8540_v4, %s13335_s27 }
 0xc29   :  { %8575 = vrot.lane.b32.xlu0 %v8541_v20, %s13335_s27  ;;  %8587 = vrot.lane.b32.xlu1 %v8547_v8, %s13335_s27  ;;  %v8444_v20 = vmul.f32 %v15202_v25, %v16823_v43  ;;  %v8449_v25 = vmul.f32 %v15198_v60, %v16822_v14 }
 0xc2d   :  { %8589 = vrot.lane.b32.xlu0 %v8548_v26, %s13335_s27 }
 0xc6b   :  { %v8480_v18 = vpop.permute.xlu0 %8479  ;;  %v8478_v23 = vpop.permute.xlu1 %8477 }
 0xc6c   :  { %v8501_v0 = vsel %vm2895_vm0, %v8478_v23, %v8480_v18 }
 0xc6d   :  { %v8523_v32 = vadd.f32 %v8501_v0, %v8441_v51 }
 0xc6f   :  { %v8566_v10 = vpop.permute.xlu0 %8565  ;;  %v8482_v40 = vpop.permute.xlu1 %8481 }
 0xc70   :  { %v8591_v58 = vsel %vm2859_vm15, %v8564_v13, %v8566_v10  ;;  %v8502_v17 = vsel %vm2895_vm0, %v8480_v18, %v8482_v40 }
 0xc71   :  { %v15286_v19 = vadd.f32 %v8591_v58, %v8523_v32  ;;  %v8524_v62 = vadd.f32 %v8502_v17, %v8442_v56  ;;  %v8450_v17 = vmul.f32 %v15232_v11, %v16823_v43 }
 0xc73   :  { %8627 = vst [vmem:[#allocation2 + $0x8] sm:$0xff] %v15286_v19  ;;  %v8568_v36 = vpop.permute.xlu1 %8567 }
 0xc74   :  { %v8592_v2 = vsel %vm2859_vm15, %v8566_v10, %v8568_v36 }
 0xc75   :  { %v15292_v42 = vadd.f32 %v8592_v2, %v8524_v62 }
 0xc77   :  { %8628 = vst [vmem:[#allocation2 + $0x10] sm:$0xff] %v15292_v42  ;;  %v15297_v39 = vpack.i.bf16 %v15292_v42, %v15286_v19 }
 0xc79   :  { %13058 = vrot.lane.b32.xlu1 %v15297_v39, %s13327_s2 }
 0xc7b   :  { %v8490_v52 = vpop.permute.xlu0 %8489  ;;  %v8492_v61 = vpop.permute.xlu1 %8491 }
 0xc7c   :  { %v8506_v7 = vsel %vm2895_vm0, %v8490_v52, %v8492_v61 }
 0xc7d   :  { %13068 = vrot.lane.b32.xlu1 %v15305_v31, %s13327_s2  ;;  %v8529_v55 = vadd.f32 %v8506_v7, %v8447_v38  ;;  %v16824_v7 = vld [vmem:[#allocation18_spill] sm:$0xff] }
 0xc7e   :  { %v8445_v38 = vmul.f32 %v15226_v12, %v16824_v7  ;;  %v8451_v12 = vmul.f32 %v15252_v16, %v16824_v7 }
 0xc7f   :  { %v8494_v28 = vpop.permute.xlu0 %8493  ;;  %v8580_v41 = vpop.permute.xlu1 %8579 }
 0xc80   :  { %v8507_v44 = vsel %vm2895_vm0, %v8492_v61, %v8494_v28  ;;  %v8597_v30 = vsel %vm2859_vm15, %v8578_v6, %v8580_v41 }
 0xc81   :  { %v15316_v63 = vadd.f32 %v8597_v30, %v8529_v55  ;;  %v8530_v46 = vadd.f32 %v8507_v44, %v8448_v59 }
 0xc83   :  { %v8582_v29 = vpop.permute.xlu0 %8581  ;;  %v8484_v1 = vpop.permute.xlu1 %8483  ;;  %v15320_v37 = vpack.i.bf16 %v15316_v63, %v15286_v19  ;;  %v12599_v24 = vpack.c.bf16 %v15316_v63, %v15286_v19 }
 0xc84   :  { %v8598_v15 = vsel %vm2859_vm15, %v8580_v41, %v8582_v29  ;;  %v8503_v54 = vsel %vm2895_vm0, %v8482_v40, %v8484_v1 }
 0xc85   :  { %v15326_v49 = vadd.f32 %v8598_v15, %v8530_v46  ;;  %v8525_v53 = vadd.f32 %v8503_v54, %v8443_v47 }
 0xc87   :  { %v8486_v21 = vpop.permute.xlu0 %8485  ;;  %v8570_v5 = vpop.permute.xlu1 %8569  ;;  %v15332_v3 = vpack.i.bf16 %v15326_v49, %v15316_v63  ;;  %v12597_v57 = vpack.c.bf16 %v15326_v49, %v15292_v42 }
 0xc88   :  { %v8504_v34 = vsel %vm2895_vm0, %v8484_v1, %v8486_v21  ;;  %v8593_v4 = vsel %vm2859_vm15, %v8568_v36, %v8570_v5 }
 0xc89   :  { %v15340_v8 = vadd.f32 %v8593_v4, %v8525_v53  ;;  %13063 = vrot.lane.b32.xlu0 %v15332_v3, %s13327_s2  ;;  %v8526_v48 = vadd.f32 %v8504_v34, %v8444_v20 }
 0xc8b   :  { %8629 = vst [vmem:[#allocation2 + $0x18] sm:$0xff] %v15340_v8  ;;  %v8572_v26 = vpop.permute.xlu0 %8571  ;;  %v8496_v13 = vpop.permute.xlu1 %8495  ;;  %v15347_v6 = vpack.i.bf16 %v15340_v8, %v15292_v42 }
 0xc8c   :  { %v8594_v18 = vsel %vm2859_vm15, %v8570_v5, %v8572_v26  ;;  %v8508_v23 = vsel %vm2895_vm0, %v8494_v28, %v8496_v13 }
 0xc8d   :  { %v15351_v0 = vadd.f32 %v8594_v18, %v8526_v48  ;;  %v8531_v45 = vadd.f32 %v8508_v23, %v8449_v25 }
 0xc8f   :  { %8630 = vst [vmem:[#allocation2 + $0x20] sm:$0xff] %v15351_v0  ;;  %v8498_v51 = vpop.permute.xlu0 %8497  ;;  %v8584_v32 = vpop.permute.xlu1 %8583  ;;  %v15358_v10 = vpack.i.bf16 %v15351_v0, %v15340_v8 }
 0xc90   :  { %v8509_v40 = vsel %vm2895_vm0, %v8496_v13, %v8498_v51  ;;  %v8599_v58 = vsel %vm2859_vm15, %v8582_v29, %v8584_v32  ;;  %v16825_v29 = vld [vmem:[#allocation19_spill] sm:$0xff] }
 0xc91   :  { %v15364_v33 = vadd.f32 %v8599_v58, %v8531_v45  ;;  %13073 = vrot.lane.b32.xlu0 %v15358_v10, %s13327_s2  ;;  %v8532_v60 = vadd.f32 %v8509_v40, %v8450_v17  ;;  %v8446_v1 = vmul.f32 %v15223_v9, %v16825_v29  ;;  %v8452_v16 = vmul.f32 %v15250_v50, %v16825_v29 }
 0xc93   :  { %v8586_v56 = vpop.permute.xlu0 %8585  ;;  %v8488_v62 = vpop.permute.xlu1 %8487  ;;  %v15370_v36 = vpack.i.bf16 %v15364_v33, %v15326_v49  ;;  %v12603_v2 = vpack.c.bf16 %v15364_v33, %v15340_v8 }
 0xc94   :  { %v8600_v52 = vsel %vm2859_vm15, %v8584_v32, %v8586_v56  ;;  %v8505_v61 = vsel %vm2895_vm0, %v8486_v21, %v8488_v62  ;;  %v8528_v54 = vadd.f32 %v8488_v62, %v8446_v1 }
 0xc95   :  { %v15376_v11 = vadd.f32 %v8600_v52, %v8532_v60  ;;  %v8527_v55 = vadd.f32 %v8505_v61, %v8445_v38 }
 0xc97   :  { %v8500_v28 = vpop.permute.xlu0 %8499  ;;  %v8574_v41 = vpop.permute.xlu1 %8573  ;;  %v15382_v44 = vpack.i.bf16 %v15376_v11, %v15364_v33  ;;  %v12601_v30 = vpack.c.bf16 %v15376_v11, %v15351_v0 }
 0xc98   :  { %v8510_v59 = vsel %vm2895_vm0, %v8498_v51, %v8500_v28  ;;  %v8595_v46 = vsel %vm2859_vm15, %v8572_v26, %v8574_v41  ;;  %v8534_v43 = vadd.f32 %v8500_v28, %v8452_v16  ;;  %v11791_v28 = vld [vmem:[%s16728_s15 + $0x10] sm:$0xff] }
 0xc99   :  { %v15392_v15 = vadd.f32 %v8595_v46, %v8527_v55  ;;  %13078 = vrot.lane.b32.xlu1 %v15382_v44, %s13327_s2  ;;  %v8533_v14 = vadd.f32 %v8510_v59, %v8451_v12  ;;  %v11790_v55 = vld [vmem:[%s16728_s15 + $0x8] sm:$0xff] }
 0xc9a   :  { %v12454_v46 = vld [vmem:[%s16729_s14 + $0x68] sm:$0xff] }
 0xc9b   :  { %8631 = vst [vmem:[#allocation2 + $0x28] sm:$0xff] %v15392_v15  ;;  %v8576_v47 = vpop.permute.xlu0 %8575  ;;  %v8588_v53 = vpop.permute.xlu1 %8587  ;;  %v13107_v21 = vpack.i.bf16 %v15392_v15, %v15351_v0 }
 0xc9c   :  { %v8596_v5 = vsel %vm2859_vm15, %v8574_v41, %v8576_v47  ;;  %v8601_v9 = vsel %vm2859_vm15, %v8586_v56, %v8588_v53  ;;  %v12453_v41 = vld [vmem:[%s16729_s14 + $0x60] sm:$0xff] }
 0xc9d   :  { %v8620_v34 = vadd.f32 %v8596_v5, %v8528_v54  ;;  %v15403_v4 = vadd.f32 %v8601_v9, %v8533_v14  ;;  %v12455_v54 = vld [vmem:[%s16729_s14 + $0x70] sm:$0xff] }
 0xc9f   :  { %8632 = vst.msk [vmem:[#allocation2 + $0x30] sm:$0xff] %vm5319_vm3, %v8620_v34  ;;  %v8590_v20 = vpop.permute.xlu0 %8589  ;;  %v13112_v48 = vpack.i.bf16 %v15403_v4, %v15376_v11  ;;  %v13172_v26 = vpack.i.bf16 %v15403_v4, %v15392_v15  ;;  %v12607_v13 = vpack.c.bf16 %v15403_v4, %v15392_v15  ;;  %v12456_v34 = vld [vmem:[%s16729_s14 + $0x78] sm:$0xff] }
 0xca0   :  { %v8602_v18 = vsel %vm2859_vm15, %v8588_v53, %v8590_v20 }
 0xca1   :  { %v8626_v23 = vadd.f32 %v8602_v18, %v8534_v43 }
 0xca3   :  { %8638 = vst.msk [vmem:[#allocation2 + $0x68] sm:$0xff] %vm5319_vm3, %v8626_v23 }
 0xca6   :  { %v15414_v50 = vld [vmem:[#allocation2 + $0x30] sm:$0xff] }
 0xca7   :  { %v13082_v25 = vpack.i.bf16 %v15414_v50, %v15392_v15 }
 0xca9   :  { %13083 = vrot.lane.b32.xlu0 %v13082_v25, %s13327_s2 }
 0xcaa   :  { %v15419_v45 = vld [vmem:[#allocation2 + $0x68] sm:$0xff] }
 0xcab   :  { %v13087_v51 = vpack.i.bf16 %v15419_v45, %v15403_v4  ;;  %v13297_v32 = vpack.i.bf16 %v15419_v45, %v15414_v50  ;;  %v12605_v40 = vpack.c.bf16 %v15419_v45, %v15414_v50 }
 0xcad   :  { %13093 = vrot.lane.b32.xlu0 %v15347_v6, %s13328_s23  ;;  %13088 = vrot.lane.b32.xlu1 %v13087_v51, %s13327_s2 }
 0xcb1   :  { %13103 = vrot.lane.b32.xlu0 %v15320_v37, %s13328_s23  ;;  %13098 = vrot.lane.b32.xlu1 %v15370_v36, %s13328_s23 }
 0xcb5   :  { %13113 = vrot.lane.b32.xlu0 %v13112_v48, %s13328_s23  ;;  %13108 = vrot.lane.b32.xlu1 %v13107_v21, %s13328_s23 }
 0xcb9   :  { %13123 = vrot.lane.b32.xlu0 %v15297_v39, %s13324_s20  ;;  %13118 = vrot.lane.b32.xlu1 %v13297_v32, %s13328_s23 }
 0xcbd   :  { %13128 = vrot.lane.b32.xlu0 %v15347_v6, %s13329_s24  ;;  %13138 = vrot.lane.b32.xlu1 %v15332_v3, %s13324_s20 }
 0xcc1   :  { %13133 = vrot.lane.b32.xlu0 %v15305_v31, %s13324_s20  ;;  %13143 = vrot.lane.b32.xlu1 %v15370_v36, %s13329_s24 }
 0xcc5   :  { %13153 = vrot.lane.b32.xlu0 %v15358_v10, %s13324_s20  ;;  %13148 = vrot.lane.b32.xlu1 %v15320_v37, %s13329_s24 }
 0xcc9   :  { %13158 = vrot.lane.b32.xlu0 %v13107_v21, %s13329_s24  ;;  %13163 = vrot.lane.b32.xlu1 %v15382_v44, %s13324_s20 }
 0xccd   :  { %13168 = vrot.lane.b32.xlu1 %v13112_v48, %s13329_s24  ;;  %13173 = vrot.lane.b32.xlu0 %v13172_v26, %s13324_s20 }
 0xcd1   :  { %13178 = vrot.lane.b32.xlu1 %v13297_v32, %s13329_s24  ;;  %13183 = vrot.lane.b32.xlu0 %v15297_v39, %s13325_s21 }
 0xcd5   :  { %13198 = vrot.lane.b32.xlu1 %v15332_v3, %s13325_s21  ;;  %13188 = vrot.lane.b32.xlu0 %v15347_v6, %s13330_s25 }
 0xcd9   :  { %13203 = vrot.lane.b32.xlu1 %v15370_v36, %s13330_s25  ;;  %13193 = vrot.lane.b32.xlu0 %v15305_v31, %s13325_s21 }
 0xcdd   :  { %13208 = vrot.lane.b32.xlu1 %v15320_v37, %s13330_s25  ;;  %13213 = vrot.lane.b32.xlu0 %v15358_v10, %s13325_s21 }
 0xce1   :  { %13223 = vrot.lane.b32.xlu1 %v15382_v44, %s13325_s21  ;;  %13218 = vrot.lane.b32.xlu0 %v13107_v21, %s13330_s25 }
 0xce5   :  { %13228 = vrot.lane.b32.xlu1 %v13112_v48, %s13330_s25  ;;  %13233 = vrot.lane.b32.xlu0 %v13172_v26, %s13325_s21 }
 0xce9   :  { %13238 = vrot.lane.b32.xlu1 %v13297_v32, %s13330_s25  ;;  %13243 = vrot.lane.b32.xlu0 %v15297_v39, %s13326_s22 }
 0xceb   :  { %v13059_v58 = vpop.permute.xlu1 %13058 }
 0xced   :  { %13258 = vrot.lane.b32.xlu1 %v15332_v3, %s13326_s22  ;;  %13248 = vrot.lane.b32.xlu0 %v15347_v6, %s13331_s26  ;;  %v13061_v3 = vunpack.i.h.bf16 %v13059_v58  ;;  %v13060_v6 = vunpack.i.l.bf16 %v13059_v58 }
 0xcef   :  { %v13069_v39 = vpop.permute.xlu1 %13068  ;;  %v9739_v52 = vsel %vm918_vm6, %v13060_v6, %v13061_v3 }
 0xcf0   :  { %v13071_v17 = vunpack.i.h.bf16 %v13069_v39  ;;  %v13070_v60 = vunpack.i.l.bf16 %v13069_v39 }
 0xcf1   :  { %13263 = vrot.lane.b32.xlu1 %v15370_v36, %s13331_s26  ;;  %13253 = vrot.lane.b32.xlu0 %v15305_v31, %s13326_s22 }
 0xcf5   :  { %13268 = vrot.lane.b32.xlu1 %v15320_v37, %s13331_s26  ;;  %13273 = vrot.lane.b32.xlu0 %v15358_v10, %s13326_s22  ;;  %v9738_v37 = vsel %vm918_vm6, %v13070_v60, %v13060_v6  ;;  %v11789_v10 = vld [vmem:[%s16728_s15] sm:$0xff] }
 0xcf9   :  { %13283 = vrot.lane.b32.xlu1 %v15382_v44, %s13326_s22  ;;  %13278 = vrot.lane.b32.xlu0 %v13107_v21, %s13331_s26  ;;  %v11792_v44 = vld [vmem:[%s16728_s15 + $0x18] sm:$0xff] }
 0xcfb   :  { %v13064_v56 = vpop.permute.xlu0 %13063 }
 0xcfc   :  { %v13066_v62 = vunpack.i.h.bf16 %v13064_v56  ;;  %v13065_v31 = vunpack.i.l.bf16 %v13064_v56 }
 0xcfd   :  { %13288 = vrot.lane.b32.xlu1 %v13112_v48, %s13331_s26  ;;  %13293 = vrot.lane.b32.xlu0 %v13172_v26, %s13326_s22 }
 0xcfe   :  { %v9744_v36 = vsel %vm918_vm6, %v13071_v17, %v13065_v31  ;;  %v9745_v61 = vsel %vm918_vm6, %v13065_v31, %v13066_v62 }
 0xcff   :  { %v12587_v7 = vpack.c.bf16 %v9744_v36, %v9738_v37  ;;  %v12585_v38 = vpack.c.bf16 %v9745_v61, %v9739_v52 }
 0xd01   :  { %13298 = vrot.lane.b32.xlu1 %v13297_v32, %s13331_s26  ;;  %11795 = vperm.xlu0 %13056, %v11789_v10  }
 0xd02   :  { %12586 = vmatprep.subr.bf16.mxu1 %v12585_v38 }
 0xd03   :  { %12588 = vmatpush1.bf16.msra.mxu1 %v12587_v7  ;;  %v13074_v59 = vpop.permute.xlu0 %13073 }
 0xd04   :  { %v13076_v29 = vunpack.i.h.bf16 %v13074_v59  ;;  %v13075_v1 = vunpack.i.l.bf16 %v13074_v59 }
 0xd05   :  { %11800 = vperm.xlu1 %13055, %v11790_v55   ;;  %11805 = vperm.xlu0 %13056, %v11791_v28  }
 0xd06   :  { %12457 = vmatmul.mubr.msk.f32.vlgmr.msra.gmra.mrb[8].mxu1 %vm8718_vm11, %v12453_v41  ;;  %v9740_v53 = vsel %vm918_vm6, %v13061_v3, %v13075_v1  ;;  %v9741_v5 = vsel %vm918_vm6, %v13075_v1, %v13076_v29 }
 0xd07   :  { %9844 = vmatprep.mubr.f32.mxu1 %v15301_v35 }
 0xd09   :  { %11810 = vperm.xlu1 %13055, %v11792_v44  }
 0xd0a   :  { %12458 = vmatmul.mubr.msk.f32.gmra.mrb[10].mxu1 %vm8718_vm11, %v12454_v46 }
 0xd0b   :  { %v13079_v12 = vpop.permute.xlu1 %13078  ;;  %9850 = vmatprep.mubr.f32.mxu1 %v15301_v35 }
 0xd0c   :  { %v13081_v14 = vunpack.i.h.bf16 %v13079_v12  ;;  %v13080_v47 = vunpack.i.l.bf16 %v13079_v12 }
 0xd0e   :  { %v9746_v21 = vsel %vm918_vm6, %v13066_v62, %v13080_v47  ;;  %12459 = vmatmul.mubr.msk.f32.gmra.mrb[12].mxu1 %vm8718_vm11, %v12455_v54  ;;  %v9747_v9 = vsel %vm918_vm6, %v13080_v47, %v13081_v14 }
 0xd0f   :  { %v12591_v16 = vpack.c.bf16 %v9746_v21, %v9740_v53  ;;  %9856 = vmatprep.mubr.f32.mxu1 %v15301_v35  ;;  %v12589_v43 = vpack.c.bf16 %v9747_v9, %v9741_v5  ;;  %v15605_v9 = vld [vmem:[%s16729_s14 + $0x20] sm:$0xff] }
 0xd11   :  { %12590 = vmatprep.subr.bf16.mxu1 %v12589_v43 }
 0xd12   :  { %12460 = vmatmul.mubr.msk.f32.gmra.mrb[14].mxu1 %vm8718_vm11, %v12456_v34 }
 0xd13   :  { %12592 = vmatpush1.bf16.msra.mxu1 %v12591_v16  ;;  %9927 = vmatprep.mubr.f32.mxu1 %v15301_v35 }
 0xd16   :  { %12461 = vmatmul.mubr.msk.f32.vlgmr.msra.gmra.mrb[16].mxu1 %vm8718_vm11, %v12453_v41 }
 0xd17   :  { %9933 = vmatprep.mubr.f32.mxu1 %v15301_v35 }
 0xd1a   :  { %12462 = vmatmul.mubr.msk.f32.gmra.mrb[18].mxu1 %vm8718_vm11, %v12454_v46 }
 0xd1b   :  { %v13084_v20 = vpop.permute.xlu0 %13083  ;;  %9939 = vmatprep.mubr.f32.mxu1 %v15301_v35 }
 0xd1c   :  { %v13086_v48 = vunpack.i.h.bf16 %v13084_v20  ;;  %v13085_v26 = vunpack.i.l.bf16 %v13084_v20  ;;  %v15623_v20 = vld [vmem:[%s16729_s14 + $0x88] sm:$0xff] }
 0xd1e   :  { %12463 = vmatmul.mubr.msk.f32.gmra.mrb[20].mxu1 %vm8718_vm11, %v12455_v54  ;;  %v9742_v32 = vsel %vm918_vm6, %v13076_v29, %v13085_v26  ;;  %v9743_v39 = vsel %vm918_vm6, %v13085_v26, %v13086_v48 }
 0xd1f   :  { %v15542_v18 = vpop.permute.xlu0 %13093  ;;  %v13089_v23 = vpop.permute.xlu1 %13088  ;;  %9945 = vmatprep.mubr.f32.mxu1 %v15301_v35 }
 0xd20   :  { %v13091_v25 = vunpack.i.h.bf16 %v13089_v23  ;;  %v13090_v51 = vunpack.i.l.bf16 %v13089_v23 }
 0xd22   :  { %v9748_v58 = vsel %vm918_vm6, %v13081_v14, %v13090_v51  ;;  %v9749_v3 = vsel %vm918_vm6, %v13090_v51, %v13091_v25  ;;  %12464 = vmatmul.mubr.msk.f32.gmra.mrb[22].mxu1 %vm8718_vm11, %v12456_v34  ;;  %v15641_v51 = vld [vmem:[%s16729_s14 + $0x28] sm:$0xff] }
 0xd23   :  { %v12595_v6 = vpack.c.bf16 %v9748_v58, %v9742_v32  ;;  %v15550_v17 = vpop.permute.xlu0 %13103  ;;  %v15552_v60 = vpop.permute.xlu1 %13098  ;;  %v12593_v56 = vpack.c.bf16 %v9749_v3, %v9743_v39  ;;  %10016 = vmatprep.mubr.f32.mxu1 %v15301_v35 }
 0xd25   :  { %12594 = vmatprep.subr.bf16.mxu1 %v12593_v56 }
 0xd26   :  { %12596 = vmatpush1.bf16.msra.mxu1 %v12595_v6 }
 0xd27   :  { %v15555_v62 = vpop.permute.xlu0 %13113  ;;  %v15557_v31 = vpop.permute.xlu1 %13108  ;;  %12598 = vmatprep.subr.bf16.mxu1 %v12597_v57 }
 0xd29   :  { %12465 = vmatmul.mubr.msk.f32.vlgmr.msra.gmra.mrb[24].mxu1 %vm8718_vm11, %v12453_v41 }
 0xd2a   :  { %12600 = vmatpush1.bf16.msra.mxu1 %v12599_v24  ;;  %10022 = vmatprep.mubr.f32.mxu1 %v15301_v35 }
 0xd2b   :  { %v13124_v37 = vpop.permute.xlu0 %13123  ;;  %v15567_v10 = vpop.permute.xlu1 %13118  ;;  %12602 = vmatprep.subr.bf16.mxu1 %v12601_v30 }
 0xd2c   :  { %v13126_v36 = vunpack.i.h.bf16 %v13124_v37  ;;  %v13125_v42 = vunpack.i.l.bf16 %v13124_v37 }
 0xd2d   :  { %12466 = vmatmul.mubr.msk.f32.gmra.mrb[26].mxu1 %vm8718_vm11, %v12454_v46  ;;  %v15589_v46 = vld [vmem:[%s16729_s14 + $0x80] sm:$0xff] }
 0xd2e   :  { %10028 = vmatprep.mubr.f32.mxu1 %v15301_v35  ;;  %v8697_v61 = vsel %vm152_vm1, %v13125_v42, %v13126_v36 }
 0xd2f   :  { %v13129_v49 = vpop.permute.xlu0 %13128  ;;  %v13139_v57 = vpop.permute.xlu1 %13138 }
 0xd30   :  { %v13141_v52 = vunpack.i.h.bf16 %v13139_v57  ;;  %v13140_v19 = vunpack.i.l.bf16 %v13139_v57  ;;  %v13131_v63 = vunpack.i.h.bf16 %v13129_v49  ;;  %v13130_v24 = vunpack.i.l.bf16 %v13129_v49  ;;  %v15659_v57 = vld [vmem:[%s16729_s14 + $0x90] sm:$0xff] }
 0xd31   :  { %12467 = vmatmul.mubr.msk.f32.gmra.mrb[28].mxu1 %vm8718_vm11, %v12455_v54 }
 0xd32   :  { %v8702_v7 = vsel %vm152_vm1, %v13140_v19, %v13141_v52  ;;  %10034 = vmatprep.mubr.f32.mxu1 %v15301_v35  ;;  %v15592_v29 = vsel %vm1663_vm8, %v13130_v24, %v13131_v63 }
 0xd33   :  { %v13134_v0 = vpop.permute.xlu0 %13133  ;;  %v15578_v11 = vpop.permute.xlu1 %13143  ;;  %v12549_v30 = vpack.c.bf16 %v8702_v7, %v8697_v61  ;;  %v13100_v61 = vunpack.i.l.bf16 %v15552_v60 }
 0xd34   :  { %v13136_v38 = vunpack.i.h.bf16 %v13134_v0  ;;  %v13135_v55 = vunpack.i.l.bf16 %v13134_v0  ;;  %v13146_v28 = vunpack.i.h.bf16 %v15578_v11  ;;  %v13145_v41 = vunpack.i.l.bf16 %v15578_v11 }
 0xd35   :  { %12550 = vmatprep.subr.bf16.mxu0 %v12549_v30  ;;  %12468 = vmatmul.mubr.msk.f32.gmra.mrb[30].mxu1 %vm8718_vm11, %v12456_v34 }
 0xd36   :  { %v8696_v44 = vsel %vm152_vm1, %v13135_v55, %v13125_v42  ;;  %v8701_v59 = vsel %vm152_vm1, %v13136_v38, %v13140_v19  ;;  %10146 = vmatprep.mubr.f32.mxu1 %v15301_v35  ;;  %v15595_v1 = vsel %vm1663_vm8, %v13145_v41, %v13146_v28 }
 0xd37   :  { %v12551_v12 = vpack.c.bf16 %v8701_v59, %v8696_v44  ;;  %v15597_v54 = vpop.permute.xlu0 %13153  ;;  %v13149_v14 = vpop.permute.xlu1 %13148  ;;  %v16776_v44 = vunpack.i.h.bf16 %v15542_v18  ;;  %v13095_v59 = vunpack.i.l.bf16 %v15542_v18 }
 0xd38   :  { %v13151_v53 = vunpack.i.h.bf16 %v13149_v14  ;;  %v13150_v21 = vunpack.i.l.bf16 %v13149_v14  ;;  %v13155_v5 = vunpack.i.l.bf16 %v15597_v54  ;;  %v13156_v16 = vunpack.i.h.bf16 %v15597_v54 }
 0xd39   :  { %12552 = vmatpush1.bf16.msra.mxu0 %v12551_v12  ;;  %12473 = vmatmul.mubr.msk.f32.vlgmr.msra.gmra.mrb[8].mxu1 %vm8718_vm11, %v15589_v46  ;;  %v15701_v12 = vld [vmem:[%s16729_s14 + $0x38] sm:$0xff]  ;;  %v10403_v54 = vsel %vm1409_vm7, %v13095_v59, %v16776_v44 }
 0xd3a   :  { %v15611_v34 = vsel %vm1663_vm8, %v13150_v21, %v13130_v24  ;;  %v15614_v43 = vsel %vm1663_vm8, %v13151_v53, %v13145_v41  ;;  %12604 = vmatpush1.bf16.msra.mxu1 %v12603_v2  ;;  %10152 = vmatprep.mubr.f32.mxu1 %v15301_v35  ;;  %v8698_v2 = vsel %vm152_vm1, %v13126_v36, %v13155_v5  ;;  %v13101_v24 = vunpack.i.h.bf16 %v15552_v60 }
 0xd3b   :  { %v13159_v26 = vpop.permute.xlu0 %13158  ;;  %v15627_v23 = vpop.permute.xlu1 %13163  ;;  %12606 = vmatprep.subr.bf16.mxu1 %v12605_v40  ;;  %v8699_v40 = vsel %vm152_vm1, %v13155_v5, %v13156_v16 }
 0xd3c   :  { %v13160_v25 = vunpack.i.l.bf16 %v13159_v26  ;;  %v13166_v8 = vunpack.i.h.bf16 %v15627_v23  ;;  %v13165_v33 = vunpack.i.l.bf16 %v15627_v23  ;;  %12413 = vmatmul.mubr.msk.f32.vlgmr.msra.gmra.mrb[16].mxu0 %vm8718_vm11, %v15605_v9  ;;  %v13161_v58 = vunpack.i.h.bf16 %v13159_v26 }
 0xd3d   :  { %8801 = vmatprep.mubr.f32.mxu0 %v15301_v35  ;;  %12474 = vmatmul.mubr.msk.f32.gmra.mrb[10].mxu1 %vm8718_vm11, %v15623_v20 }
 0xd3e   :  { %v15646_v50 = vsel %vm1663_vm8, %v13131_v63, %v13160_v25  ;;  %v8703_v45 = vsel %vm152_vm1, %v13141_v52, %v13165_v33  ;;  %v8704_v32 = vsel %vm152_vm1, %v13165_v33, %v13166_v8  ;;  %10158 = vmatprep.mubr.f32.mxu1 %v15301_v35  ;;  %v15665_v52 = vld [vmem:[%s16729_s14 + $0x30] sm:$0xff]  ;;  %v15693_v41 = vsel %vm1663_vm8, %v13160_v25, %v13161_v58 }
 0xd3f   :  { %v12555_v39 = vpack.c.bf16 %v8703_v45, %v8698_v2  ;;  %v13174_v3 = vpop.permute.xlu0 %13173  ;;  %v13169_v6 = vpop.permute.xlu1 %13168  ;;  %v12553_v56 = vpack.c.bf16 %v8704_v32, %v8699_v40  ;;  %v10408_v2 = vsel %vm1409_vm7, %v13100_v61, %v13101_v24 }
 0xd40   :  { %v13176_v37 = vunpack.i.h.bf16 %v13174_v3  ;;  %v13175_v36 = vunpack.i.l.bf16 %v13174_v3  ;;  %v13171_v42 = vunpack.i.h.bf16 %v13169_v6  ;;  %v13170_v49 = vunpack.i.l.bf16 %v13169_v6  ;;  %12414 = vmatmul.mubr.msk.f32.gmra.mrb[18].mxu0 %vm8718_vm11, %v15641_v51 }
 0xd41   :  { %12554 = vmatprep.subr.bf16.mxu0 %v12553_v56  ;;  %8807 = vmatprep.mubr.f32.mxu0 %v15301_v35 }
 0xd42   :  { %v12557_v19 = vpack.c.bf16 %v13176_v37, %v13175_v36  ;;  %v15668_v63 = vsel %vm1663_vm8, %v13146_v28, %v13170_v49  ;;  %12556 = vmatpush1.bf16.msra.mxu0 %v12555_v39  ;;  %12475 = vmatmul.mubr.msk.f32.gmra.mrb[12].mxu1 %vm8718_vm11, %v15659_v57  ;;  %v15681_v30 = vsel %vm1663_vm8, %v13170_v49, %v13171_v42  ;;  %v15690_v28 = vld [vmem:[%s16729_s14 + $0x98] sm:$0xff] }
 0xd43   :  { %v15674_v0 = vpop.permute.xlu0 %13183  ;;  %v15676_v11 = vpop.permute.xlu1 %13178  ;;  %10164 = vmatprep.mubr.f32.mxu1 %v15301_v35  ;;  %v8700_v45 = vsel %vm152_vm1, %v13156_v16, %v13175_v36  ;;  %v8705_v40 = vsel %vm152_vm1, %v13166_v8, %v13176_v37 }
 0xd44   :  { %v16770_v38 = vunpack.i.h.bf16 %v15676_v11  ;;  %v16771_v55 = vunpack.i.l.bf16 %v15676_v11  ;;  %12415 = vmatmul.mubr.msk.f32.gmra.mrb[20].mxu0 %vm8718_vm11, %v15665_v52  ;;  %12558 = vmatprep.subr.bf16.mxu0 %v12557_v19  ;;  %v16774_v53 = vunpack.i.h.bf16 %v15674_v0  ;;  %v13185_v21 = vunpack.i.l.bf16 %v15674_v0 }
 0xd45   :  { %8813 = vmatprep.mubr.f32.mxu0 %v15301_v35  ;;  %v12559_v6 = vpack.c.bf16 %v8705_v40, %v8700_v45 }
 0xd46   :  { %v15711_v5 = vsel %vm1663_vm8, %v13161_v58, %v16771_v55  ;;  %v15716_v26 = vsel %vm1663_vm8, %v13171_v42, %v16770_v38  ;;  %12476 = vmatmul.mubr.msk.f32.gmra.mrb[14].mxu1 %vm8718_vm11, %v15690_v28  ;;  %v9023_v39 = vsel %vm400_vm4, %v13185_v21, %v16774_v53  ;;  %v12609_v42 = vpack.c.bf16 %v10408_v2, %v10403_v54 }
 0xd47   :  { %v15720_v25 = vpop.permute.xlu0 %13188  ;;  %v15722_v33 = vpop.permute.xlu1 %13198  ;;  %10235 = vmatprep.mubr.f32.mxu1 %v15301_v35  ;;  %v13106_v54 = vunpack.i.h.bf16 %v15550_v17 }
 0xd48   :  { %v16775_v32 = vunpack.i.h.bf16 %v15722_v33  ;;  %v13200_v58 = vunpack.i.l.bf16 %v15722_v33  ;;  %12416 = vmatmul.mubr.msk.f32.gmra.mrb[22].mxu0 %vm8718_vm11, %v15701_v12  ;;  %v13191_v16 = vunpack.i.h.bf16 %v15720_v25  ;;  %v13190_v8 = vunpack.i.l.bf16 %v15720_v25 }
 0xd49   :  { %8884 = vmatprep.mubr.f32.mxu0 %v15301_v35  ;;  %v16827_v60 = vunpack.i.h.bf16 %v15722_v33  ;;  %v15952_v33 = vld [vmem:[%s16729_s14 + $0xa0] sm:$0xff] }
 0xd4a   :  { %v9028_v3 = vsel %vm400_vm4, %v13200_v58, %v16775_v32  ;;  %12477 = vmatmul.mubr.msk.f32.vlgmr.msra.gmra.mrb[16].mxu1 %vm8718_vm11, %v15589_v46  ;;  %v15771_v25 = vsel %vm1917_vm9, %v13190_v8, %v13191_v16 }
 0xd4b   :  { %v13194_v56 = vpop.permute.xlu0 %13193  ;;  %v15758_v37 = vpop.permute.xlu1 %13203  ;;  %v12561_v36 = vpack.c.bf16 %v9028_v3, %v9023_v39  ;;  %12608 = vmatpush1.bf16.msra.mxu1 %v12607_v13  ;;  %10241 = vmatprep.mubr.f32.mxu1 %v15301_v35  ;;  %v13105_v39 = vunpack.i.l.bf16 %v15550_v17  ;;  %v16772_v3 = vunpack.i.h.bf16 %v15557_v31 }
 0xd4c   :  { %v13206_v49 = vunpack.i.h.bf16 %v15758_v37  ;;  %v13205_v19 = vunpack.i.l.bf16 %v15758_v37  ;;  %12417 = vmatmul.mubr.msk.f32.vlgmr.msra.gmra.mrb[24].mxu0 %vm8718_vm11, %v15605_v9  ;;  %12610 = vmatprep.subr.bf16.mxu1 %v12609_v42  ;;  %v16773_v42 = vunpack.i.h.bf16 %v15555_v62  ;;  %v13195_v15 = vunpack.i.l.bf16 %v13194_v56 }
 0xd4d   :  { %12560 = vmatpush1.bf16.msra.mxu0 %v12559_v6  ;;  %8890 = vmatprep.mubr.f32.mxu0 %v15301_v35  ;;  %v13110_v6 = vunpack.i.l.bf16 %v15557_v31  ;;  %v13196_v38 = vunpack.i.h.bf16 %v13194_v56  ;;  %v10407_v56 = vsel %vm1409_vm7, %v13106_v54, %v13100_v61 }
 0xd4e   :  { %12562 = vmatprep.subr.bf16.mxu0 %v12561_v36  ;;  %v15774_v2 = vsel %vm1917_vm9, %v13205_v19, %v13206_v49  ;;  %12478 = vmatmul.mubr.msk.f32.gmra.mrb[18].mxu1 %vm8718_vm11, %v15623_v20  ;;  %v9022_v14 = vsel %vm400_vm4, %v13195_v15, %v13185_v21 }
 0xd4f   :  { %v15776_v45 = vpop.permute.xlu0 %13213  ;;  %v13209_v40 = vpop.permute.xlu1 %13208  ;;  %10247 = vmatprep.mubr.f32.mxu1 %v15301_v35  ;;  %v10405_v17 = vsel %vm1409_vm7, %v13110_v6, %v16772_v3  ;;  %v9027_v54 = vsel %vm400_vm4, %v13196_v38, %v13200_v58 }
 0xd50   :  { %v13211_v4 = vunpack.i.h.bf16 %v13209_v40  ;;  %v13210_v13 = vunpack.i.l.bf16 %v13209_v40  ;;  %12418 = vmatmul.mubr.msk.f32.gmra.mrb[26].mxu0 %vm8718_vm11, %v15641_v51  ;;  %v13115_v40 = vunpack.i.l.bf16 %v15555_v62  ;;  %v13216_v48 = vunpack.i.h.bf16 %v15776_v45 }
 0xd51   :  { %8896 = vmatprep.mubr.f32.mxu0 %v15301_v35 }
 0xd52   :  { %v15792_v37 = vsel %vm1917_vm9, %v13210_v13, %v13190_v8  ;;  %v15795_v36 = vsel %vm1917_vm9, %v13211_v4, %v13205_v19  ;;  %12479 = vmatmul.mubr.msk.f32.gmra.mrb[20].mxu1 %vm8718_vm11, %v15659_v57  ;;  %v10402_v4 = vsel %vm1409_vm7, %v13105_v39, %v13095_v59  ;;  %v13215_v59 = vunpack.i.l.bf16 %v15776_v45 }
 0xd53   :  { %v13219_v23 = vpop.permute.xlu0 %13218  ;;  %v15801_v7 = vpop.permute.xlu1 %13223  ;;  %10253 = vmatprep.mubr.f32.mxu1 %v15301_v35  ;;  %v12611_v38 = vpack.c.bf16 %v10407_v56, %v10402_v4 }
 0xd54   :  { %v13220_v55 = vunpack.i.l.bf16 %v13219_v23  ;;  %12419 = vmatmul.mubr.msk.f32.gmra.mrb[28].mxu0 %vm8718_vm11, %v15665_v52  ;;  %v16779_v8 = vunpack.i.h.bf16 %v15801_v7  ;;  %v13225_v19 = vunpack.i.l.bf16 %v15801_v7  ;;  %v13221_v47 = vunpack.i.h.bf16 %v13219_v23 }
 0xd55   :  { %8902 = vmatprep.mubr.f32.mxu0 %v15301_v35  ;;  %v9025_v44 = vsel %vm400_vm4, %v13215_v59, %v13216_v48 }
 0xd56   :  { %v15818_v13 = vsel %vm1917_vm9, %v13191_v16, %v13220_v55  ;;  %v10410_v16 = vsel %vm1409_vm7, %v13115_v40, %v16773_v42  ;;  %12480 = vmatmul.mubr.msk.f32.gmra.mrb[22].mxu1 %vm8718_vm11, %v15690_v28  ;;  %v9030_v15 = vsel %vm400_vm4, %v13225_v19, %v16779_v8  ;;  %v15875_v56 = vsel %vm1917_vm9, %v13220_v55, %v13221_v47 }
 0xd57   :  { %v15830_v39 = vpop.permute.xlu0 %13233  ;;  %v13229_v61 = vpop.permute.xlu1 %13228  ;;  %10324 = vmatprep.mubr.f32.mxu1 %v15301_v35  ;;  %v12613_v58 = vpack.c.bf16 %v10410_v16, %v10405_v17  ;;  %v12565_v17 = vpack.c.bf16 %v9030_v15, %v9025_v44 }
 0xd58   :  { %v13231_v3 = vunpack.i.h.bf16 %v13229_v61  ;;  %v13230_v21 = vunpack.i.l.bf16 %v13229_v61  ;;  %12420 = vmatmul.mubr.msk.f32.gmra.mrb[30].mxu0 %vm8718_vm11, %v15701_v12  ;;  %v12563_v61 = vpack.c.bf16 %v9027_v54, %v9022_v14 }
 0xd59   :  { %8973 = vmatprep.mubr.f32.mxu0 %v15301_v35 }
 0xd5a   :  { %v15852_v23 = vsel %vm1917_vm9, %v13206_v49, %v13230_v21  ;;  %v15866_v4 = vsel %vm1917_vm9, %v13230_v21, %v13231_v3  ;;  %12481 = vmatmul.mubr.msk.f32.vlgmr.msra.gmra.mrb[24].mxu1 %vm8718_vm11, %v15589_v46 }
 0xd5b   :  { %v15856_v53 = vpop.permute.xlu0 %13243  ;;  %v15858_v32 = vpop.permute.xlu1 %13238  ;;  %12612 = vmatpush1.bf16.msra.mxu1 %v12611_v38  ;;  %10330 = vmatprep.mubr.f32.mxu1 %v15301_v35 }
 0xd5c   :  { %v16777_v49 = vunpack.i.h.bf16 %v15858_v32  ;;  %v16778_v14 = vunpack.i.l.bf16 %v15858_v32  ;;  %12421 = vmatmul.mubr.msk.f32.vlgmr.msra.gmra.mrb[32].mxu0 %vm8718_vm11, %v15605_v9  ;;  %12614 = vmatprep.subr.bf16.mxu1 %v12613_v58 }
 0xd5d   :  { %12564 = vmatpush1.bf16.msra.mxu0 %v12563_v61  ;;  %8979 = vmatprep.mubr.f32.mxu0 %v15301_v35 }
 0xd5e   :  { %v15882_v54 = vsel %vm1917_vm9, %v13221_v47, %v16778_v14  ;;  %v15887_v9 = vsel %vm1917_vm9, %v13231_v3, %v16777_v49  ;;  %12566 = vmatprep.subr.bf16.mxu0 %v12565_v17  ;;  %12482 = vmatmul.mubr.msk.f32.gmra.mrb[26].mxu1 %vm8718_vm11, %v15623_v20  ;;  %v10409_v20 = vsel %vm1409_vm7, %v13101_v24, %v13115_v40  ;;  %v13121_v17 = vunpack.i.h.bf16 %v15567_v10 }
 0xd5f   :  { %v13249_v55 = vpop.permute.xlu0 %13248  ;;  %v15891_v44 = vpop.permute.xlu1 %13258  ;;  %10336 = vmatprep.mubr.f32.mxu1 %v15301_v35  ;;  %v9029_v24 = vsel %vm400_vm4, %v16827_v60, %v13225_v19 }
 0xd60   :  { %12422 = vmatmul.mubr.msk.f32.gmra.mrb[34].mxu0 %vm8718_vm11, %v15641_v51  ;;  %v13251_v47 = vunpack.i.h.bf16 %v13249_v55  ;;  %v13250_v3 = vunpack.i.l.bf16 %v13249_v55  ;;  %v16826_v51 = vunpack.i.h.bf16 %v15542_v18  ;;  %v13120_v55 = vunpack.i.l.bf16 %v15567_v10  ;;  %v15946_v10 = vld [vmem:[%s16729_s14] sm:$0xff] }
 0xd61   :  { %8985 = vmatprep.mubr.f32.mxu0 %v15301_v35 }
 0xd62   :  { %12483 = vmatmul.mubr.msk.f32.gmra.mrb[28].mxu1 %vm8718_vm11, %v15659_v57  ;;  %v10404_v61 = vsel %vm1409_vm7, %v16826_v51, %v13110_v6  ;;  %v13235_v51 = vunpack.i.l.bf16 %v15830_v39  ;;  %v12617_v16 = vpack.c.bf16 %v13121_v17, %v13120_v55  ;;  %v16830_v6 = vunpack.i.h.bf16 %v15557_v31 }
 0xd63   :  { %v15901_v21 = vpop.permute.xlu0 %13253  ;;  %v13264_v15 = vpop.permute.xlu1 %13263  ;;  %10342 = vmatprep.mubr.f32.mxu1 %v15301_v35  ;;  %v12615_v60 = vpack.c.bf16 %v10409_v20, %v10404_v61  ;;  %v13260_v61 = vunpack.i.l.bf16 %v15891_v44  ;;  %v13245_v20 = vunpack.i.l.bf16 %v15856_v53 }
 0xd64   :  { %v13266_v38 = vunpack.i.h.bf16 %v13264_v15  ;;  %v13265_v58 = vunpack.i.l.bf16 %v13264_v15  ;;  %12423 = vmatmul.mubr.msk.f32.gmra.mrb[36].mxu0 %vm8718_vm11, %v15665_v52  ;;  %v15920_v52 = vsel %vm2171_vm10, %v13250_v3, %v13251_v47  ;;  %v13236_v15 = vunpack.i.h.bf16 %v15830_v39 }
 0xd65   :  { %8991 = vmatprep.mubr.f32.mxu0 %v15301_v35 }
 0xd66   :  { %v15923_v57 = vsel %vm2171_vm10, %v13265_v58, %v13266_v38  ;;  %12484 = vmatmul.mubr.msk.f32.gmra.mrb[30].mxu1 %vm8718_vm11, %v15690_v28  ;;  %v12569_v8 = vpack.c.bf16 %v13236_v15, %v13235_v51 }
 0xd67   :  { %v15932_v40 = vpop.permute.xlu0 %13273  ;;  %v13269_v18 = vpop.permute.xlu1 %13268  ;;  %10500 = vmatprep.mubr.f32.mxu1 %v15301_v35 }
 0xd68   :  { %v13271_v46 = vunpack.i.h.bf16 %v13269_v18  ;;  %v13270_v42 = vunpack.i.l.bf16 %v13269_v18  ;;  %12424 = vmatmul.mubr.msk.f32.gmra.mrb[38].mxu0 %vm8718_vm11, %v15701_v12  ;;  %v16828_v12 = vunpack.i.h.bf16 %v15674_v0 }
 0xd69   :  { %9120 = vmatprep.mubr.f32.mxu0 %v15301_v35 }
 0xd6a   :  { %v9024_v28 = vsel %vm400_vm4, %v16828_v12, %v13215_v59  ;;  %v15960_v19 = vsel %vm2171_vm10, %v13270_v42, %v13250_v3  ;;  %v15963_v39 = vsel %vm2171_vm10, %v13271_v46, %v13265_v58  ;;  %12489 = vmatmul.mubr.msk.f32.vlgmr.msra.gmra.mrb[8].mxu1 %vm8718_vm11, %v15952_v33  ;;  %v15979_v42 = vld [vmem:[%s16729_s14 + $0x8] sm:$0xff]  ;;  %v16037_v12 = vld [vmem:[%s16729_s14 + $0xb8] sm:$0xff] }
 0xd6b   :  { %v12567_v18 = vpack.c.bf16 %v9029_v24, %v9024_v28  ;;  %v15967_v49 = vpop.permute.xlu0 %13278  ;;  %v15969_v14 = vpop.permute.xlu1 %13283  ;;  %12616 = vmatpush1.bf16.msra.mxu1 %v12615_v60  ;;  %v15984_v59 = vld [vmem:[%s16729_s14 + $0xa8] sm:$0xff]  ;;  %10506 = vmatprep.mubr.f32.mxu1 %v15301_v35  ;;  %v16025_v24 = vld [vmem:[#allocation2] sm:$0xff]  ;;  %v16829_v28 = vunpack.i.h.bf16 %v15555_v62  ;;  %v16832_v62 = vunpack.i.h.bf16 %v15891_v44 }
 0xd6c   :  { %v16780_v0 = vunpack.i.l.bf16 %v15967_v49  ;;  %12425 = vmatmul.mubr.msk.f32.vlgmr.msra.gmra.mrb[16].mxu0 %vm8718_vm11, %v15946_v10  ;;  %12618 = vmatprep.subr.bf16.mxu1 %v12617_v16  ;;  %v16010_v16 = vld [vmem:[%s16729_s14 + $0xb0] sm:$0xff]  ;;  %v12501_v44 = vld [vmem:[%s16729_s14 + $0xc0] sm:$0xff] }
 0xd6d   :  { %12568 = vmatpush1.bf16.msra.mxu0 %v12567_v18  ;;  %9126 = vmatprep.mubr.f32.mxu0 %v15301_v35  ;;  %v10411_v60 = vsel %vm1409_vm7, %v16829_v28, %v13121_v17  ;;  %v13246_v18 = vunpack.i.h.bf16 %v15856_v53  ;;  %v9358_v31 = vsel %vm648_vm5, %v13260_v61, %v16832_v62  ;;  %v16834_v28 = vpack.c.bf16 %v15614_v43, %v15611_v34  ;;  %v12438_v53 = vld [vmem:[%s16729_s14 + $0x48] sm:$0xff] }
 0xd6e   :  { %v15989_v46 = vsel %vm2171_vm10, %v13251_v47, %v16780_v0  ;;  %12570 = vmatprep.subr.bf16.mxu0 %v12569_v8  ;;  %12490 = vmatmul.mubr.msk.f32.gmra.mrb[10].mxu1 %vm8718_vm11, %v15984_v59  ;;  %v16004_v8 = vld [vmem:[%s16729_s14 + $0x10] sm:$0xff]  ;;  %v10406_v0 = vsel %vm1409_vm7, %v16830_v6, %v13120_v55  ;;  %v16833_v55 = vpack.c.bf16 %v15595_v1, %v15592_v29  ;;  %v13255_v6 = vunpack.i.l.bf16 %v15901_v21 }
 0xd6f   :  { %v15991_v3 = vpop.permute.xlu1 %13288  ;;  %10512 = vmatprep.mubr.f32.mxu1 %v15301_v35  ;;  %v12619_v45 = vpack.c.bf16 %v10411_v60, %v10406_v0  ;;  %v13286_v29 = vunpack.i.h.bf16 %v15969_v14  ;;  %v13285_v1 = vunpack.i.l.bf16 %v15969_v14  ;;  %v16835_v60 = vpack.c.bf16 %v15681_v30, %v15693_v41  ;;  %v13294_v34 = vpop.permute.xlu0 %13293 }
 0xd70   :  { %v16781_v58 = vunpack.i.l.bf16 %v15991_v3  ;;  %12426 = vmatmul.mubr.msk.f32.gmra.mrb[18].mxu0 %vm8718_vm11, %v15979_v42  ;;  %v16836_v43 = vmov %v16832_v62  ;;  %v13296_v41 = vunpack.i.h.bf16 %v13294_v34  ;;  %v16839_v62 = vpack.c.bf16 %v15668_v63, %v15646_v50  ;;  %v12439_v50 = vld [vmem:[%s16729_s14 + $0x50] sm:$0xff] }
 0xd71   :  { %9132 = vmatprep.mubr.f32.mxu0 %v15301_v35  ;;  %v16831_v35 = vunpack.i.h.bf16 %v15801_v7  ;;  %v9353_v7 = vsel %vm648_vm5, %v13245_v20, %v13246_v18  ;;  %v9359_v30 = vsel %vm648_vm5, %v16836_v43, %v13285_v1  ;;  %v12503_v63 = vld [vmem:[%s16729_s14 + $0xd0] sm:$0xff]  ;;  %v16841_v14 = vpack.c.bf16 %v15774_v2, %v15771_v25  ;;  %v12517_v25 = vld [vmem:[%s16729_s14 + $0xe0] sm:$0xff] }
 0xd72   :  { %v16015_v47 = vsel %vm2171_vm10, %v13266_v38, %v16781_v58  ;;  %12491 = vmatmul.mubr.msk.f32.gmra.mrb[12].mxu1 %vm8718_vm11, %v16010_v16  ;;  %v16031_v38 = vld [vmem:[%s16729_s14 + $0x18] sm:$0xff]  ;;  %v9026_v58 = vsel %vm400_vm4, %v13216_v48, %v13235_v51  ;;  %v12573_v17 = vpack.c.bf16 %v9358_v31, %v9353_v7  ;;  %v13275_v51 = vunpack.i.l.bf16 %v15932_v40 }
 0xd73   :  { %10518 = vmatprep.mubr.f32.mxu1 %v16025_v24  ;;  %v9031_v27 = vsel %vm400_vm4, %v16831_v35, %v13236_v15  ;;  %v13276_v15 = vunpack.i.h.bf16 %v15932_v40  ;;  %v12504_v31 = vld [vmem:[%s16729_s14 + $0xd8] sm:$0xff]  ;;  %v16840_v40 = vpack.c.bf16 %v15716_v26, %v15711_v5  ;;  %v16842_v5 = vpack.c.bf16 %v15795_v36, %v15792_v37 }
 0xd74   :  { %12427 = vmatmul.mubr.msk.f32.gmra.mrb[20].mxu0 %vm8718_vm11, %v16004_v8  ;;  %v12571_v48 = vpack.c.bf16 %v9031_v27, %v9026_v58  ;;  %v13256_v27 = vunpack.i.h.bf16 %v15901_v21  ;;  %v9352_v21 = vsel %vm648_vm5, %v13255_v6, %v13245_v20  ;;  %v9360_v58 = vsel %vm648_vm5, %v13285_v1, %v13286_v29 }
 0xd75   :  { %9138 = vmatprep.mubr.f32.mxu0 %v16025_v24  ;;  %v9355_v20 = vsel %vm648_vm5, %v13275_v51, %v13276_v15  ;;  %v16843_v26 = vpack.c.bf16 %v15866_v4, %v15875_v56  ;;  %v16844_v2 = vunpack.i.l.bf16 %v15858_v32  ;;  %v16845_v37 = vunpack.i.h.bf16 %v15858_v32  ;;  %v12518_v56 = vld [vmem:[%s16729_s14 + $0xe8] sm:$0xff]  ;;  %v12519_v32 = vld [vmem:[%s16729_s14 + $0xf0] sm:$0xff] }
 0xd76   :  { %12492 = vmatmul.mubr.msk.f32.gmra.mrb[14].mxu1 %vm8718_vm11, %v16037_v12  ;;  %v9357_v0 = vsel %vm648_vm5, %v13256_v27, %v13260_v61  ;;  %v12577_v61 = vpack.c.bf16 %v9360_v58, %v9355_v20  ;;  %v16846_v4 = vpack.c.bf16 %v15852_v23, %v15818_v13  ;;  %v12520_v13 = vld [vmem:[%s16729_s14 + $0xf8] sm:$0xff]  ;;  %v16847_v23 = vpack.c.bf16 %v15887_v9, %v15882_v54 }
 0xd77   :  { %10589 = vmatprep.mubr.f32.mxu1 %v16025_v24  ;;  %v12575_v35 = vpack.c.bf16 %v9357_v0, %v9352_v21  ;;  %v12641_v36 = vpack.c.bf16 %v16845_v37, %v16844_v2  ;;  %v13281_v27 = vunpack.i.h.bf16 %v15967_v49  ;;  %v16849_v54 = vunpack.i.l.bf16 %v15991_v3  ;;  %v12535_v21 = vld [vmem:[%s16729_s14 + $0x110] sm:$0xff] }
 0xd78   :  { %12428 = vmatmul.mubr.msk.f32.gmra.mrb[22].mxu0 %vm8718_vm11, %v16031_v38 }
 0xd79   :  { %9209 = vmatprep.mubr.f32.mxu0 %v16025_v24 }
 0xd7a   :  { %12493 = vmatmul.mubr.msk.f32.vlgmr.msra.gmra.mrb[16].mxu1 %vm8718_vm11, %v15952_v33 }
 0xd7b   :  { %12620 = vmatpush1.bf16.msra.mxu1 %v12619_v45  ;;  %10595 = vmatprep.mubr.f32.mxu1 %v16025_v24 }
 0xd7c   :  { %12429 = vmatmul.mubr.msk.f32.vlgmr.msra.gmra.mrb[24].mxu0 %vm8718_vm11, %v15946_v10  ;;  %12622 = vmatprep.subr.bf16.mxu1 %v16833_v55  ;;  %v13291_v55 = vunpack.i.h.bf16 %v15991_v3  ;;  %v13299_v3 = vpop.permute.xlu1 %13298 }
 0xd7d   :  { %12572 = vmatpush1.bf16.msra.mxu0 %v12571_v48  ;;  %9215 = vmatprep.mubr.f32.mxu0 %v16025_v24  ;;  %v9361_v48 = vsel %vm648_vm5, %v13286_v29, %v13296_v41  ;;  %v16851_v29 = vpack.c.bf16 %v15963_v39, %v15960_v19  ;;  %v13300_v1 = vunpack.i.l.bf16 %v13299_v3  ;;  %v12533_v19 = vld [vmem:[%s16729_s14 + $0x100] sm:$0xff] }
 0xd7e   :  { %12574 = vmatprep.subr.bf16.mxu0 %v12573_v17  ;;  %12494 = vmatmul.mubr.msk.f32.gmra.mrb[18].mxu1 %vm8718_vm11, %v15984_v59  ;;  %v16848_v17 = vpack.c.bf16 %v15923_v57, %v15920_v52  ;;  %v11472_v9 = vsel %vm2171_vm10, %v16849_v54, %v13291_v55  ;;  %v16850_v52 = vunpack.i.l.bf16 %v15967_v49  ;;  %v13301_v49 = vunpack.i.h.bf16 %v13299_v3 }
 0xd7f   :  { %10601 = vmatprep.mubr.f32.mxu1 %v16025_v24 }
 0xd80   :  { %12430 = vmatmul.mubr.msk.f32.gmra.mrb[26].mxu0 %vm8718_vm11, %v15979_v42  ;;  %v11467_v57 = vsel %vm2171_vm10, %v16850_v52, %v13281_v27  ;;  %v12653_v39 = vpack.c.bf16 %v13301_v49, %v13300_v1  ;;  %v11473_v0 = vsel %vm2171_vm10, %v13291_v55, %v13301_v49 }
 0xd81   :  { %9221 = vmatprep.mubr.f32.mxu0 %v16025_v24  ;;  %v12649_v6 = vpack.c.bf16 %v11472_v9, %v11467_v57 }
 0xd82   :  { %12495 = vmatmul.mubr.msk.f32.gmra.mrb[20].mxu1 %vm8718_vm11, %v16010_v16 }
 0xd83   :  { %10607 = vmatprep.mubr.f32.mxu1 %v16025_v24 }
 0xd84   :  { %12431 = vmatmul.mubr.msk.f32.gmra.mrb[28].mxu0 %vm8718_vm11, %v16004_v8 }
 0xd85   :  { %9227 = vmatprep.mubr.f32.mxu0 %v16025_v24 }
 0xd86   :  { %12496 = vmatmul.mubr.msk.f32.gmra.mrb[22].mxu1 %vm8718_vm11, %v16037_v12 }
 0xd87   :  { %10678 = vmatprep.mubr.f32.mxu1 %v16025_v24 }
 0xd88   :  { %12432 = vmatmul.mubr.msk.f32.gmra.mrb[30].mxu0 %vm8718_vm11, %v16031_v38 }
 0xd89   :  { %9298 = vmatprep.mubr.f32.mxu0 %v16025_v24 }
 0xd8a   :  { %12497 = vmatmul.mubr.msk.f32.vlgmr.msra.gmra.mrb[24].mxu1 %vm8718_vm11, %v15952_v33  ;;  %v12437_v33 = vld [vmem:[%s16729_s14 + $0x40] sm:$0xff] }
 0xd8b   :  { %12624 = vmatpush1.bf16.msra.mxu1 %v16834_v28  ;;  %10684 = vmatprep.mubr.f32.mxu1 %v16025_v24 }
 0xd8c   :  { %12433 = vmatmul.mubr.msk.f32.vlgmr.msra.gmra.mrb[32].mxu0 %vm8718_vm11, %v15946_v10  ;;  %12626 = vmatprep.subr.bf16.mxu1 %v16835_v60  ;;  %v13295_v10 = vunpack.i.l.bf16 %v13294_v34 }
 0xd8d   :  { %12576 = vmatpush1.bf16.msra.mxu0 %v12575_v35  ;;  %9304 = vmatprep.mubr.f32.mxu0 %v16025_v24 }
 0xd8e   :  { %12578 = vmatprep.subr.bf16.mxu0 %v12577_v61  ;;  %12498 = vmatmul.mubr.msk.f32.gmra.mrb[26].mxu1 %vm8718_vm11, %v15984_v59  ;;  %v9356_v45 = vsel %vm648_vm5, %v13276_v15, %v13295_v10  ;;  %v16852_v15 = vpack.c.bf16 %v16015_v47, %v15989_v46  ;;  %v12536_v46 = vld [vmem:[%s16729_s14 + $0x118] sm:$0xff]  ;;  %v11468_v47 = vsel %vm2171_vm10, %v13281_v27, %v13300_v1 }
 0xd8f   :  { %10690 = vmatprep.mubr.f32.mxu1 %v16025_v24  ;;  %v12583_v7 = vpack.c.bf16 %v9361_v48, %v9356_v45  ;;  %v12655_v58 = vpack.c.bf16 %v11473_v0, %v11468_v47 }
 0xd90   :  { %12434 = vmatmul.mubr.msk.f32.gmra.mrb[34].mxu0 %vm8718_vm11, %v15979_v42  ;;  %v9354_v42 = vsel %vm648_vm5, %v13246_v18, %v13275_v51  ;;  %v12502_v18 = vld [vmem:[%s16729_s14 + $0xc8] sm:$0xff] }
 0xd91   :  { %9310 = vmatprep.mubr.f32.mxu0 %v16025_v24  ;;  %v12579_v59 = vpack.c.bf16 %v9359_v30, %v9354_v42  ;;  %v12534_v51 = vld [vmem:[%s16729_s14 + $0x108] sm:$0xff] }
 0xd92   :  { %12499 = vmatmul.mubr.msk.f32.gmra.mrb[28].mxu1 %vm8718_vm11, %v16010_v16  ;;  %v16838_v16 = vunpack.i.h.bf16 %v15676_v11 }
 0xd93   :  { %10696 = vmatprep.mubr.f32.mxu1 %v16025_v24 }
 0xd94   :  { %12435 = vmatmul.mubr.msk.f32.gmra.mrb[36].mxu0 %vm8718_vm11, %v16004_v8  ;;  %v16837_v8 = vunpack.i.l.bf16 %v15676_v11  ;;  %v12440_v11 = vld [vmem:[%s16729_s14 + $0x58] sm:$0xff] }
 0xd95   :  { %9316 = vmatprep.mubr.f32.mxu0 %v16025_v24 }
 0xd96   :  { %12500 = vmatmul.mubr.msk.f32.gmra.mrb[30].mxu1 %vm8718_vm11, %v16037_v12  ;;  %v12581_v12 = vpack.c.bf16 %v13296_v41, %v13295_v10 }
 0xd97   :  { %10854 = vmatprep.mubr.f32.mxu1 %v16025_v24 }
 0xd98   :  { %12436 = vmatmul.mubr.msk.f32.gmra.mrb[38].mxu0 %vm8718_vm11, %v16031_v38  ;;  %v12629_v38 = vpack.c.bf16 %v16838_v16, %v16837_v8 }
 0xd99   :  { %9450 = vmatprep.mubr.f32.mxu0 %v16025_v24 }
 0xd9a   :  { %12505 = vmatmul.mubr.msk.f32.vlgmr.msra.gmra.mrb[8].mxu1 %vm8718_vm11, %v12501_v44 }
 0xd9b   :  { %12628 = vmatpush1.bf16.msra.mxu1 %v16839_v62  ;;  %10860 = vmatprep.mubr.f32.mxu1 %v16025_v24 }
 0xd9c   :  { %12441 = vmatmul.mubr.msk.f32.vlgmr.msra.gmra.mrb[16].mxu0 %vm8718_vm11, %v12437_v33  ;;  %12630 = vmatprep.subr.bf16.mxu1 %v12629_v38 }
 0xd9d   :  { %12580 = vmatpush1.bf16.msra.mxu0 %v12579_v59  ;;  %9456 = vmatprep.mubr.f32.mxu0 %v16025_v24 }
 0xd9e   :  { %12582 = vmatprep.subr.bf16.mxu0 %v12581_v12  ;;  %12506 = vmatmul.mubr.msk.f32.gmra.mrb[10].mxu1 %vm8718_vm11, %v12502_v18 }
 0xd9f   :  { %10866 = vmatprep.mubr.f32.mxu1 %v16025_v24 }
 0xda0   :  { %12442 = vmatmul.mubr.msk.f32.gmra.mrb[18].mxu0 %vm8718_vm11, %v12438_v53 }
 0xda1   :  { %9462 = vmatprep.mubr.f32.mxu0 %v16025_v24 }
 0xda2   :  { %12507 = vmatmul.mubr.msk.f32.gmra.mrb[12].mxu1 %vm8718_vm11, %v12503_v63 }
 0xda3   :  { %10872 = vmatprep.mubr.f32.mxu1 %v16025_v24 }
 0xda4   :  { %12443 = vmatmul.mubr.msk.f32.gmra.mrb[20].mxu0 %vm8718_vm11, %v12439_v50 }
 0xda5   :  { %9468 = vmatprep.mubr.f32.mxu0 %v16025_v24 }
 0xda6   :  { %12508 = vmatmul.mubr.msk.f32.gmra.mrb[14].mxu1 %vm8718_vm11, %v12504_v31 }
 0xda7   :  { %10943 = vmatprep.mubr.f32.mxu1 %v16025_v24 }
 0xda8   :  { %12444 = vmatmul.mubr.msk.f32.gmra.mrb[22].mxu0 %vm8718_vm11, %v12440_v11 }
 0xda9   :  { %9539 = vmatprep.mubr.f32.mxu0 %v16025_v24 }
 0xdaa   :  { %12509 = vmatmul.mubr.msk.f32.vlgmr.msra.gmra.mrb[16].mxu1 %vm8718_vm11, %v12501_v44 }
 0xdab   :  { %12632 = vmatpush1.bf16.msra.mxu1 %v16840_v40  ;;  %10949 = vmatprep.mubr.f32.mxu1 %v16025_v24 }
 0xdac   :  { %12445 = vmatmul.mubr.msk.f32.vlgmr.msra.gmra.mrb[24].mxu0 %vm8718_vm11, %v12437_v33  ;;  %12634 = vmatprep.subr.bf16.mxu1 %v16841_v14 }
 0xdad   :  { %12584 = vmatpush1.bf16.msra.mxu0 %v12583_v7  ;;  %9545 = vmatprep.mubr.f32.mxu0 %v16025_v24  ;;  %v16366_v7 = vpop.permute.xlu0 %11795 }
 0xdae   :  { %12510 = vmatmul.mubr.msk.f32.gmra.mrb[18].mxu1 %vm8718_vm11, %v12502_v18 }
 0xdaf   :  { %10955 = vmatprep.mubr.f32.mxu1 %v16025_v24 }
 0xdb0   :  { %12446 = vmatmul.mubr.msk.f32.gmra.mrb[26].mxu0 %vm8718_vm11, %v12438_v53 }
 0xdb1   :  { %9551 = vmatprep.mubr.f32.mxu0 %v16025_v24 }
 0xdb2   :  { %12511 = vmatmul.mubr.msk.f32.gmra.mrb[20].mxu1 %vm8718_vm11, %v12503_v63 }
 0xdb3   :  { %10961 = vmatprep.mubr.f32.mxu1 %v16025_v24 }
 0xdb4   :  { %12447 = vmatmul.mubr.msk.f32.gmra.mrb[28].mxu0 %vm8718_vm11, %v12439_v50 }
 0xdb5   :  { %9557 = vmatprep.mubr.f32.mxu0 %v16025_v24 }
 0xdb6   :  { %12512 = vmatmul.mubr.msk.f32.gmra.mrb[22].mxu1 %vm8718_vm11, %v12504_v31 }
 0xdb7   :  { %11032 = vmatprep.mubr.f32.mxu1 %v16025_v24 }
 0xdb8   :  { %12448 = vmatmul.mubr.msk.f32.gmra.mrb[30].mxu0 %vm8718_vm11, %v12440_v11 }
 0xdb9   :  { %9628 = vmatprep.mubr.f32.mxu0 %v16025_v24 }
 0xdba   :  { %12513 = vmatmul.mubr.msk.f32.vlgmr.msra.gmra.mrb[24].mxu1 %vm8718_vm11, %v12501_v44 }
 0xdbb   :  { %12636 = vmatpush1.bf16.msra.mxu1 %v16842_v5  ;;  %11038 = vmatprep.mubr.f32.mxu1 %v16025_v24 }
 0xdbc   :  { %12449 = vmatmul.mubr.msk.f32.vlgmr.msra.gmra.mrb[32].mxu0 %vm8718_vm11, %v12437_v33  ;;  %12638 = vmatprep.subr.bf16.mxu1 %v16843_v26 }
 0xdbd   :  { %9634 = vmatprep.mubr.f32.mxu0 %v16025_v24 }
 0xdbe   :  { %12514 = vmatmul.mubr.msk.f32.gmra.mrb[26].mxu1 %vm8718_vm11, %v12502_v18 }
 0xdbf   :  { %11044 = vmatprep.mubr.f32.mxu1 %v16025_v24 }
 0xdc0   :  { %12450 = vmatmul.mubr.msk.f32.gmra.mrb[34].mxu0 %vm8718_vm11, %v12438_v53 }
 0xdc1   :  { %9640 = vmatprep.mubr.f32.mxu0 %v16025_v24 }
 0xdc2   :  { %12515 = vmatmul.mubr.msk.f32.gmra.mrb[28].mxu1 %vm8718_vm11, %v12503_v63 }
 0xdc3   :  { %11050 = vmatprep.mubr.f32.mxu1 %v16025_v24 }
 0xdc4   :  { %12451 = vmatmul.mubr.msk.f32.gmra.mrb[36].mxu0 %vm8718_vm11, %v12439_v50 }
 0xdc5   :  { %9646 = vmatprep.mubr.f32.mxu0 %v16025_v24 }
 0xdc6   :  { %12516 = vmatmul.mubr.msk.f32.gmra.mrb[30].mxu1 %vm8718_vm11, %v12504_v31 }
 0xdc7   :  { %11208 = vmatprep.mubr.f32.mxu1 %v16025_v24 }
 0xdc8   :  { %12452 = vmatmul.mubr.msk.f32.gmra.mrb[38].mxu0 %vm8718_vm11, %v12440_v11 }
 0xdca   :  { %12521 = vmatmul.mubr.msk.f32.vlgmr.msra.gmra.mrb[8].mxu1 %vm8718_vm11, %v12517_v25 }
 0xdcb   :  { %12640 = vmatpush1.bf16.msra.mxu1 %v16846_v4  ;;  %11214 = vmatprep.mubr.f32.mxu1 %v16025_v24 }
 0xdcc   :  { %12642 = vmatprep.subr.bf16.mxu1 %v12641_v36 }
 0xdce   :  { %12522 = vmatmul.mubr.msk.f32.gmra.mrb[10].mxu1 %vm8718_vm11, %v12518_v56 }
 0xdcf   :  { %11220 = vmatprep.mubr.f32.mxu1 %v16025_v24 }
 0xdd2   :  { %12523 = vmatmul.mubr.msk.f32.gmra.mrb[12].mxu1 %vm8718_vm11, %v12519_v32 }
 0xdd3   :  { %11226 = vmatprep.mubr.f32.mxu1 %v16025_v24 }
 0xdd6   :  { %12524 = vmatmul.mubr.msk.f32.gmra.mrb[14].mxu1 %vm8718_vm11, %v12520_v13 }
 0xdd7   :  { %11297 = vmatprep.mubr.f32.mxu1 %v16025_v24 }
 0xdda   :  { %12525 = vmatmul.mubr.msk.f32.vlgmr.msra.gmra.mrb[16].mxu1 %vm8718_vm11, %v12517_v25 }
 0xddb   :  { %12644 = vmatpush1.bf16.msra.mxu1 %v16847_v23  ;;  %11303 = vmatprep.mubr.f32.mxu1 %v16025_v24 }
 0xddc   :  { %12646 = vmatprep.subr.bf16.mxu1 %v16848_v17 }
 0xdde   :  { %12526 = vmatmul.mubr.msk.f32.gmra.mrb[18].mxu1 %vm8718_vm11, %v12518_v56 }
 0xddf   :  { %11309 = vmatprep.mubr.f32.mxu1 %v16025_v24 }
 0xde2   :  { %12527 = vmatmul.mubr.msk.f32.gmra.mrb[20].mxu1 %vm8718_vm11, %v12519_v32 }
 0xde3   :  { %11315 = vmatprep.mubr.f32.mxu1 %v16025_v24 }
 0xde6   :  { %12528 = vmatmul.mubr.msk.f32.gmra.mrb[22].mxu1 %vm8718_vm11, %v12520_v13 }
 0xde7   :  { %11386 = vmatprep.mubr.f32.mxu1 %v16025_v24 }
 0xdea   :  { %12529 = vmatmul.mubr.msk.f32.vlgmr.msra.gmra.mrb[24].mxu1 %vm8718_vm11, %v12517_v25 }
 0xdeb   :  { %12648 = vmatpush1.bf16.msra.mxu1 %v16851_v29  ;;  %11392 = vmatprep.mubr.f32.mxu1 %v16025_v24 }
 0xdec   :  { %12650 = vmatprep.subr.bf16.mxu1 %v12649_v6 }
 0xdee   :  { %12530 = vmatmul.mubr.msk.f32.gmra.mrb[26].mxu1 %vm8718_vm11, %v12518_v56  ;;  %v16370_v56 = vpop.permute.xlu0 %11805 }
 0xdef   :  { %11398 = vmatprep.mubr.f32.mxu1 %v16025_v24 }
 0xdf2   :  { %12531 = vmatmul.mubr.msk.f32.gmra.mrb[28].mxu1 %vm8718_vm11, %v12519_v32  ;;  %v16372_v32 = vpop.permute.xlu1 %11800 }
 0xdf3   :  { %11404 = vmatprep.mubr.f32.mxu1 %v16025_v24 }
 0xdf6   :  { %12532 = vmatmul.mubr.msk.f32.gmra.mrb[30].mxu1 %vm8718_vm11, %v12520_v13 }
 0xdf7   :  { %11562 = vmatprep.mubr.f32.mxu1 %v16025_v24 }
 0xdfa   :  { %12537 = vmatmul.mubr.msk.f32.vlgmr.msra.gmra.mrb[8].mxu1 %vm8718_vm11, %v12533_v19 }
 0xdfb   :  { %12652 = vmatpush1.bf16.msra.mxu1 %v16852_v15  ;;  %11568 = vmatprep.mubr.f32.mxu1 %v16025_v24 }
 0xdfc   :  { %12654 = vmatprep.subr.bf16.mxu1 %v12653_v39  ;;  %v16853_v39 = vld [vmem:[#allocation3_spill] sm:$0xff] }
 0xdfe   :  { %12538 = vmatmul.mubr.msk.f32.gmra.mrb[10].mxu1 %vm8718_vm11, %v12534_v51 }
 0xdff   :  { %11574 = vmatprep.mubr.f32.mxu1 %v16025_v24 }
 0xe02   :  { %12539 = vmatmul.mubr.msk.f32.gmra.mrb[12].mxu1 %vm8718_vm11, %v12535_v21 }
 0xe03   :  { %11580 = vmatprep.mubr.f32.mxu1 %v16025_v24 }
 0xe06   :  { %12540 = vmatmul.mubr.msk.f32.gmra.mrb[14].mxu1 %vm8718_vm11, %v12536_v46 }
 0xe07   :  { %11651 = vmatprep.mubr.f32.mxu1 %v16025_v24 }
 0xe0a   :  { %12541 = vmatmul.mubr.msk.f32.vlgmr.msra.gmra.mrb[16].mxu1 %vm8718_vm11, %v12533_v19 }
 0xe0b   :  { %12656 = vmatpush1.bf16.msra.mxu1 %v12655_v58  ;;  %11657 = vmatprep.mubr.f32.mxu1 %v16025_v24 }
 0xe0e   :  { %12542 = vmatmul.mubr.msk.f32.gmra.mrb[18].mxu1 %vm8718_vm11, %v12534_v51 }
 0xe0f   :  { %11663 = vmatprep.mubr.f32.mxu1 %v16025_v24 }
 0xe12   :  { %12543 = vmatmul.mubr.msk.f32.gmra.mrb[20].mxu1 %vm8718_vm11, %v12535_v21 }
 0xe13   :  { %11669 = vmatprep.mubr.f32.mxu1 %v16025_v24 }
 0xe16   :  { %12544 = vmatmul.mubr.msk.f32.gmra.mrb[22].mxu1 %vm8718_vm11, %v12536_v46 }
 0xe17   :  { %11740 = vmatprep.mubr.f32.mxu1 %v16025_v24 }
 0xe1a   :  { %12545 = vmatmul.mubr.msk.f32.vlgmr.msra.gmra.mrb[24].mxu1 %vm8718_vm11, %v12533_v19  ;;  %v16388_v19 = vpop.permute.xlu1 %11810 }
 0xe1b   :  { %11746 = vmatprep.mubr.f32.mxu1 %v16025_v24 }
 0xe1e   :  { %12546 = vmatmul.mubr.msk.f32.gmra.mrb[26].mxu1 %vm8718_vm11, %v12534_v51 }
 0xe1f   :  { %11752 = vmatprep.mubr.f32.mxu1 %v16025_v24 }
 0xe22   :  { %12547 = vmatmul.mubr.msk.f32.gmra.mrb[28].mxu1 %vm8718_vm11, %v12535_v21 }
 0xe23   :  { %11758 = vmatprep.mubr.f32.mxu1 %v16025_v24 }
 0xe26   :  { %12548 = vmatmul.mubr.msk.f32.gmra.mrb[30].mxu1 %vm8718_vm11, %v12536_v46  ;;  %v16854_v46 = vld [vmem:[#allocation4_spill] sm:$0xff] }
 0xe6f   :  { %v9452_v35 = vpop.f32.mrb[16].mxu0 }
 0xe70   :  { %v9454_v20 = vpop.f32.mrb[17].mxu0 }
 0xe73   :  { %v9458_v61 = vpop.f32.mrb[18].mxu0 }
 0xe74   :  { %v9460_v28 = vpop.f32.mrb[19].mxu0 }
 0xe77   :  { %v9464_v60 = vpop.f32.mrb[20].mxu0 }
 0xe78   :  { %v9466_v34 = vpop.f32.mrb[21].mxu0 }
 0xe7b   :  { %v9470_v43 = vpop.f32.mrb[22].mxu0 }
 0xe7c   :  { %v9472_v30 = vpop.f32.mrb[23].mxu0 }
 0xe7f   :  { %v9541_v41 = vpop.f32.mrb[24].mxu0 }
 0xe80   :  { %v9543_v10 = vpop.f32.mrb[25].mxu0 }
 0xe83   :  { %v16338_v33 = vpop.f32.mrb[26].mxu0 }
 0xe84   :  { %v16340_v44 = vpop.f32.mrb[27].mxu0 }
 0xe87   :  { %v16342_v42 = vpop.f32.mrb[28].mxu0 }
 0xe88   :  { %v16344_v59 = vpop.f32.mrb[29].mxu0 }
 0xe8b   :  { %v16346_v24 = vpop.f32.mrb[30].mxu0 }
 0xe8c   :  { %v16348_v8 = vpop.f32.mrb[31].mxu0 }
 0xe8f   :  { %v16350_v16 = vpop.f32.mrb[32].mxu0 }
 0xe90   :  { %v16352_v38 = vpop.f32.mrb[33].mxu0 }
 0xe93   :  { %v16354_v12 = vpop.f32.mrb[34].mxu0 }
 0xe94   :  { %v16356_v62 = vpop.f32.mrb[35].mxu0 }
 0xe97   :  { %v16358_v53 = vpop.f32.mrb[36].mxu0 }
 0xe98   :  { %v16360_v18 = vpop.f32.mrb[37].mxu0 }
 0xe9b   :  { %v16362_v50 = vpop.f32.mrb[38].mxu0 }
 0xe9c   :  { %v16364_v63 = vpop.f32.mrb[39].mxu0 }
 0xecd   :  { %v11564_v11 = vpop.f32.mrb[8].mxu1 }
 0xece   :  { %v12657_v31 = vadd.f32 %v11564_v11, %v9452_v35  ;;  %v11566_v45 = vpop.f32.mrb[9].mxu1 }
 0xecf   :  { %v12658_v48 = vadd.f32 %v11566_v45, %v9454_v20 }
 0xed0   :  { %v11813_v25 = vadd.f32 %v12657_v31, %v16366_v7 }
 0xed1   :  { %v11570_v40 = vpop.f32.mrb[10].mxu1  ;;  %v11814_v37 = vadd.f32 %v12658_v48, %v16366_v7 }
 0xed2   :  { %v12659_v14 = vadd.f32 %v11570_v40, %v9458_v61  ;;  %v11572_v5 = vpop.f32.mrb[11].mxu1  ;;  %v16377_v27 = vmax.f32 %v11813_v25, 0.0 }
 0xed3   :  { %v12660_v26 = vadd.f32 %v11572_v5, %v9460_v28  ;;  %v16380_v52 = vmax.f32 %v11814_v37, 0.0 }
 0xed4   :  { %v11819_v23 = vadd.f32 %v12659_v14, %v16372_v32  ;;  %v11861_v15 = vmul.f32 %v16377_v27, %v16853_v39 }
 0xed5   :  { %v11576_v2 = vpop.f32.mrb[12].mxu1  ;;  %v11820_v17 = vadd.f32 %v12660_v26, %v16372_v32  ;;  %v11862_v47 = vmul.f32 %v16380_v52, %v16854_v46 }
 0xed6   :  { %v12661_v36 = vadd.f32 %v11576_v2, %v9464_v60  ;;  %v11578_v4 = vpop.f32.mrb[13].mxu1  ;;  %v16382_v3 = vmax.f32 %v11819_v23, 0.0  ;;  %v16855_v23 = vld [vmem:[#allocation5_spill] sm:$0xff] }
 0xed7   :  { %v12662_v13 = vadd.f32 %v11578_v4, %v9466_v34  ;;  %v16384_v49 = vmax.f32 %v11820_v17, 0.0  ;;  %v11885_v5 = vadd.f32 %v11862_v47, %v11861_v15 }
 0xed8   :  { %v11825_v55 = vadd.f32 %v12661_v36, %v16370_v56  ;;  %v11867_v28 = vmul.f32 %v16382_v3, %v16853_v39 }
 0xed9   :  { %v11826_v54 = vadd.f32 %v12662_v13, %v16370_v56  ;;  %v11582_v9 = vpop.f32.mrb[14].mxu1  ;;  %v11868_v60 = vmul.f32 %v16384_v49, %v16854_v46 }
 0xeda   :  { %v12663_v57 = vadd.f32 %v11582_v9, %v9470_v43  ;;  %v11584_v6 = vpop.f32.mrb[15].mxu1  ;;  %v16386_v1 = vmax.f32 %v11825_v55, 0.0  ;;  %v11923_v2 = vmul.f32 %v11867_v28, %v16382_v3 }
 0xedb   :  { %v12664_v29 = vadd.f32 %v11584_v6, %v9472_v30  ;;  %v16392_v51 = vmax.f32 %v11826_v54, 0.0  ;;  %v11917_v30 = vmul.f32 %v11861_v15, %v16377_v27  ;;  %v11924_v37 = vmul.f32 %v11868_v60, %v16384_v49 }
 0xedc   :  { %v11831_v0 = vadd.f32 %v12663_v57, %v16388_v19  ;;  %v11873_v34 = vmul.f32 %v16386_v1, %v16853_v39  ;;  %v11893_v15 = vadd.f32 %v11868_v60, %v11867_v28 }
 0xedd   :  { %v11653_v21 = vpop.f32.mrb[16].mxu1  ;;  %v11832_v20 = vadd.f32 %v12664_v29, %v16388_v19 }
 0xede   :  { %v12665_v58 = vadd.f32 %v11653_v21, %v9541_v41  ;;  %v11655_v35 = vpop.f32.mrb[17].mxu1  ;;  %v11874_v41 = vmul.f32 %v16392_v51, %v16854_v46  ;;  %v16410_v45 = vmax.f32 %v11831_v0, 0.0  ;;  %v11929_v36 = vmul.f32 %v11873_v34, %v16386_v1 }
 0xedf   :  { %v12666_v61 = vadd.f32 %v11655_v35, %v9543_v10  ;;  %v11918_v10 = vmul.f32 %v11862_v47, %v16380_v52  ;;  %v16415_v26 = vmax.f32 %v11832_v20, 0.0 }
 0xee0   :  { %v11815_v43 = vadd.f32 %v12665_v58, %v16366_v7  ;;  %v11930_v13 = vmul.f32 %v11874_v41, %v16392_v51  ;;  %v11949_v58 = vadd.f32 %v11924_v37, %v11923_v2  ;;  %v11901_v35 = vadd.f32 %v11874_v41, %v11873_v34 }
 0xee1   :  { %v11816_v11 = vadd.f32 %v12666_v61, %v16366_v7  ;;  %v11659_v31 = vpop.f32.mrb[18].mxu1  ;;  %v11941_v9 = vadd.f32 %v11918_v10, %v11917_v30  ;;  %v11880_v21 = vmul.f32 %v16415_v26, %v16854_v46 }
 0xee2   :  { %v16412_v48 = vmax.f32 %v11815_v43, 0.0  ;;  %v12667_v40 = vadd.f32 %v11659_v31, %v16338_v33  ;;  %v11661_v14 = vpop.f32.mrb[19].mxu1  ;;  %v11957_v61 = vadd.f32 %v11930_v13, %v11929_v36 }
 0xee3   :  { %v12668_v25 = vadd.f32 %v11661_v14, %v16340_v44  ;;  %v16425_v33 = vmax.f32 %v11816_v11, 0.0  ;;  %v11879_v44 = vmul.f32 %v16410_v45, %v16853_v39 }
 0xee4   :  { %v11821_v4 = vadd.f32 %v12667_v40, %v16372_v32  ;;  %v11863_v17 = vmul.f32 %v16412_v48, %v16855_v23 }
 0xee5   :  { %v11822_v55 = vadd.f32 %v12668_v25, %v16372_v32  ;;  %v11665_v54 = vpop.f32.mrb[20].mxu1  ;;  %v11935_v30 = vmul.f32 %v11879_v44, %v16410_v45  ;;  %v11909_v31 = vadd.f32 %v11880_v21, %v11879_v44  ;;  %v11936_v25 = vmul.f32 %v11880_v21, %v16415_v26 }
 0xee6   :  { %v16430_v57 = vmax.f32 %v11821_v4, 0.0  ;;  %v12669_v6 = vadd.f32 %v11665_v54, %v16342_v42  ;;  %v11667_v29 = vpop.f32.mrb[21].mxu1  ;;  %v11919_v43 = vmul.f32 %v11863_v17, %v16412_v48  ;;  %v16856_v42 = vld [vmem:[#allocation6_spill] sm:$0xff]  ;;  %v11886_v2 = vadd.f32 %v11885_v5, %v11863_v17 }
 0xee7   :  { %v16435_v47 = vmax.f32 %v11822_v55, 0.0  ;;  %v12670_v0 = vadd.f32 %v11667_v29, %v16344_v59  ;;  %v11864_v28 = vmul.f32 %v16425_v33, %v16856_v42 }
 0xee8   :  { %v11869_v20 = vmul.f32 %v16430_v57, %v16855_v23  ;;  %v11827_v39 = vadd.f32 %v12669_v6, %v16370_v56  ;;  %v11942_v4 = vadd.f32 %v11941_v9, %v11919_v43 }
 0xee9   :  { %v11828_v60 = vadd.f32 %v12670_v0, %v16370_v56  ;;  %v11671_v46 = vpop.f32.mrb[22].mxu1  ;;  %v11870_v59 = vmul.f32 %v16435_v47, %v16856_v42  ;;  %v11920_v13 = vmul.f32 %v11864_v28, %v16425_v33  ;;  %v16471_v0 = vadd.f32 %v11936_v25, %v11935_v30 }
 0xeea   :  { %v16448_v34 = vmax.f32 %v11827_v39, 0.0  ;;  %v12671_v41 = vadd.f32 %v11671_v46, %v16346_v24  ;;  %v11673_v11 = vpop.f32.mrb[23].mxu1  ;;  %v11925_v10 = vmul.f32 %v11869_v20, %v16430_v57  ;;  %v11894_v24 = vadd.f32 %v11893_v15, %v11869_v20 }
 0xeeb   :  { %v16452_v40 = vmax.f32 %v11828_v60, 0.0  ;;  %v12672_v14 = vadd.f32 %v11673_v11, %v16348_v8  ;;  %v11926_v44 = vmul.f32 %v11870_v59, %v16435_v47  ;;  %v11887_v46 = vadd.f32 %v11886_v2, %v11864_v28 }
 0xeec   :  { %v11875_v37 = vmul.f32 %v16448_v34, %v16855_v23  ;;  %v11833_v36 = vadd.f32 %v12671_v41, %v16388_v19  ;;  %v11950_v29 = vadd.f32 %v11949_v58, %v11925_v10  ;;  %v11943_v41 = vadd.f32 %v11942_v4, %v11920_v13  ;;  %v16857_v4 = vld [vmem:[#allocation7_spill] sm:$0xff] }
 0xeed   :  { %v11834_v55 = vadd.f32 %v12672_v14, %v16388_v19  ;;  %v11742_v54 = vpop.f32.mrb[24].mxu1  ;;  %v11876_v8 = vmul.f32 %v16452_v40, %v16856_v42  ;;  %v11895_v10 = vadd.f32 %v11894_v24, %v11870_v59 }
 0xeee   :  { %v16464_v6 = vmax.f32 %v11833_v36, 0.0  ;;  %v12673_v5 = vadd.f32 %v11742_v54, %v16350_v16  ;;  %v11744_v17 = vpop.f32.mrb[25].mxu1  ;;  %v11931_v21 = vmul.f32 %v11875_v37, %v16448_v34  ;;  %v11902_v20 = vadd.f32 %v11901_v35, %v11875_v37 }
 0xeef   :  { %v16468_v9 = vmax.f32 %v11834_v55, 0.0  ;;  %v12674_v15 = vadd.f32 %v11744_v17, %v16352_v38  ;;  %v11932_v11 = vmul.f32 %v11876_v8, %v16452_v40 }
 0xef0   :  { %v11881_v39 = vmul.f32 %v16464_v6, %v16855_v23  ;;  %v11817_v43 = vadd.f32 %v12673_v5, %v16366_v7  ;;  %v11958_v23 = vadd.f32 %v11957_v61, %v11931_v21  ;;  %v11903_v2 = vadd.f32 %v11902_v20, %v11876_v8 }
 0xef1   :  { %v16478_v60 = vmul.f32 %v16468_v9, %v16856_v42  ;;  %v11818_v16 = vadd.f32 %v12674_v15, %v16366_v7  ;;  %v11748_v58 = vpop.f32.mrb[26].mxu1  ;;  %v11951_v42 = vadd.f32 %v11950_v29, %v11926_v44 }
 0xef2   :  { %v16482_v38 = vmax.f32 %v11817_v43, 0.0  ;;  %v12675_v35 = vadd.f32 %v11748_v58, %v16354_v12  ;;  %v11750_v30 = vpop.f32.mrb[27].mxu1  ;;  %v11910_v37 = vadd.f32 %v11909_v31, %v11881_v39  ;;  %v11937_v36 = vmul.f32 %v11881_v39, %v16464_v6 }
 0xef3   :  { %v16485_v14 = vmax.f32 %v11818_v16, 0.0  ;;  %v12676_v25 = vadd.f32 %v11750_v30, %v16356_v62  ;;  %v16494_v12 = vmul.f32 %v16478_v60, %v16468_v9 }
 0xef4   :  { %v11865_v7 = vmul.f32 %v16482_v38, %v13767_v22  ;;  %v11823_v28 = vadd.f32 %v12675_v35, %v16372_v32 }
 0xef5   :  { %v11824_v61 = vadd.f32 %v12676_v25, %v16372_v32  ;;  %v11754_v59 = vpop.f32.mrb[28].mxu1  ;;  %v11866_v62 = vmul.f32 %v16485_v14, %v16857_v4 }
 0xef6   :  { %v11921_v31 = vmul.f32 %v11865_v7, %v16482_v38  ;;  %v16500_v13 = vmax.f32 %v11823_v28, 0.0  ;;  %v12677_v24 = vadd.f32 %v11754_v59, %v16358_v53  ;;  %v11756_v55 = vpop.f32.mrb[29].mxu1  ;;  %v11888_v54 = vadd.f32 %v11887_v46, %v11865_v7 }
 0xef7   :  { %v16503_v44 = vmax.f32 %v11824_v61, 0.0  ;;  %v12678_v8 = vadd.f32 %v11756_v55, %v16360_v18  ;;  %v11889_v5 = vsel %vm5319_vm3, %v11866_v62, 0.0  ;;  %v11922_v32 = vmul.f32 %v11866_v62, %v16485_v14 }
 0xef8   :  { %v11871_v17 = vmul.f32 %v16500_v13, %v13767_v22  ;;  %v11829_v29 = vadd.f32 %v12677_v24, %v16370_v56  ;;  %v11890_v21 = vadd.f32 %v11889_v5, %v11888_v54  ;;  %v11944_v15 = vadd.f32 %v11943_v41, %v11921_v31 }
 0xef9   :  { %v11872_v53 = vmul.f32 %v16503_v44, %v16857_v4  ;;  %v11830_v20 = vadd.f32 %v12678_v8, %v16370_v56  ;;  %v11760_v39 = vpop.f32.mrb[30].mxu1  ;;  %v11945_v43 = vsel %vm5319_vm3, %v11922_v32, 0.0  ;;  %v11959_v18 = vadd.f32 %v11958_v23, %v11932_v11 }
 0xefa   :  { %v11927_v16 = vmul.f32 %v11871_v17, %v16500_v13  ;;  %v16516_v58 = vmax.f32 %v11829_v29, 0.0  ;;  %v12679_v46 = vadd.f32 %v11760_v39, %v16362_v50  ;;  %11891 = vadd.xlane.f32.xlu0 %v11890_v21  ;;  %v11762_v35 = vpop.f32.mrb[31].mxu1  ;;  %v11946_v30 = vadd.f32 %v11945_v43, %v11944_v15 }
 0xefb   :  { %v16519_v25 = vmax.f32 %v11830_v20, 0.0  ;;  %v12680_v41 = vadd.f32 %v11762_v35, %v16364_v63  ;;  %v11928_v7 = vmul.f32 %v11872_v53, %v16503_v44  ;;  %v11896_v56 = vadd.f32 %v11895_v10, %v11871_v17 }
 0xefc   :  { %v11877_v28 = vmul.f32 %v16516_v58, %v13767_v22  ;;  %v11835_v11 = vadd.f32 %v12679_v46, %v16388_v19  ;;  %11947 = vadd.xlane.f32.xlu1 %v11946_v30  ;;  %v11952_v23 = vadd.f32 %v11951_v42, %v11927_v16  ;;  %v11897_v61 = vsel %vm5319_vm3, %v11872_v53, 0.0 }
 0xefd   :  { %v11878_v50 = vmul.f32 %v16519_v25, %v16857_v4  ;;  %v11836_v59 = vadd.f32 %v12680_v41, %v16388_v19  ;;  %v11953_v62 = vsel %vm5319_vm3, %v11928_v7, 0.0  ;;  %v11898_v63 = vadd.f32 %v11897_v61, %v11896_v56 }
 0xefe   :  { %v11933_v31 = vmul.f32 %v11877_v28, %v16516_v58  ;;  %v16532_v10 = vmax.f32 %v11835_v11, 0.0  ;;  %v11954_v24 = vadd.f32 %v11953_v62, %v11952_v23  ;;  %v11904_v55 = vadd.f32 %v11903_v2, %v11877_v28 }
 0xeff   :  { %v11966_v54 = vadd.f32 %v16471_v0, %v11937_v36  ;;  %v16535_v8 = vmax.f32 %v11836_v59, 0.0  ;;  %v11934_v42 = vmul.f32 %v11878_v50, %v16519_v25  ;;  %v11905_v5 = vsel %vm5319_vm3, %v11878_v50, 0.0 }
 0xf00   :  { %v11883_v19 = vmul.f32 %v16532_v10, %v13767_v22  ;;  %11955 = vadd.xlane.f32.xlu0 %v11954_v24  ;;  %11899 = vadd.xlane.f32.xlu1 %v11898_v63  ;;  %v11960_v32 = vadd.f32 %v11959_v18, %v11933_v31  ;;  %v11911_v17 = vadd.f32 %v11910_v37, %v16478_v60  ;;  %v12077_v18 = vld [vmem:[%s16730_s17] sm:$0xff] }
 0xf01   :  { %v11961_v29 = vsel %vm5319_vm3, %v11934_v42, 0.0  ;;  %v11884_v2 = vmul.f32 %v16535_v8, %v16857_v4  ;;  %v11906_v21 = vadd.f32 %v11905_v5, %v11904_v55  ;;  %v11967_v22 = vadd.f32 %v11966_v54, %v16494_v12  ;;  %v12078_v4 = vld [vmem:[%s16730_s17 + $0x8] sm:$0xff] }
 0xf02   :  { %v11939_v0 = vmul.f32 %v11883_v19, %v16532_v10  ;;  %v11962_v36 = vadd.f32 %v11961_v29, %v11960_v32  ;;  %v11912_v15 = vadd.f32 %v11911_v17, %v11883_v19 }
 0xf03   :  { %v11913_v53 = vsel %vm5319_vm3, %v11884_v2, 0.0  ;;  %v11940_v20 = vmul.f32 %v11884_v2, %v16535_v8 }
 0xf04   :  { %11963 = vadd.xlane.f32.xlu1 %v11962_v36  ;;  %11907 = vadd.xlane.f32.xlu0 %v11906_v21  ;;  %v11914_v39 = vadd.f32 %v11913_v53, %v11912_v15  ;;  %v11968_v60 = vadd.f32 %v11967_v22, %v11939_v0  ;;  %v12001_v36 = vld [vmem:[%s16731_s16] sm:$0xff] }
 0xf05   :  { %v11969_v37 = vsel %vm5319_vm3, %v11940_v20, 0.0 }
 0xf06   :  { %v11970_v43 = vadd.f32 %v11969_v37, %v11968_v60  ;;  %v12002_v60 = vld [vmem:[%s16731_s16 + $0x8] sm:$0xff] }
 0xf08   :  { %11915 = vadd.xlane.f32.xlu0 %v11914_v39 }
 0xf0c   :  { %11971 = vadd.xlane.f32.xlu0 %v11970_v43 }
 0xf15   :  { %12088 = vperm.xlu1 %13055, %v12078_v4   ;;  %v12003_v4 = vld [vmem:[%s16731_s16 + $0x10] sm:$0xff] }
 0xf22   :  { %12083 = vperm.xlu0 %13056, %v12077_v18  }
 0xf87   :  { %v11892_v16 = vpop.xlane.xlu0 %11891 }
 0xf88   :  { %v16556_v46 = vmul.f32 0.001953125, %v11892_v16  ;;  %v12079_v16 = vld [vmem:[%s16730_s17 + $0x10] sm:$0xff] }
 0xf89   :  { %v11948_v12 = vpop.xlane.xlu1 %11947 }
 0xf8a   :  { %v11977_v35 = vmul.f32 0.001953125, %v11948_v12  ;;  %v11981_v30 = vmul.f32 %v16556_v46, %v16556_v46 }
 0xf8c   :  { %v11985_v41 = vsub.f32 %v11977_v35, %v11981_v30  ;;  %v12004_v35 = vld [vmem:[%s16731_s16 + $0x18] sm:$0xff] }
 0xf8d   :  { %v11956_v7 = vpop.xlane.xlu0 %11955  ;;  %v11900_v56 = vpop.xlane.xlu1 %11899 }
 0xf8e   :  { %v11989_v28 = vmax.f32 %v11985_v41, 0.0  ;;  %v16560_v11 = vmul.f32 0.001953125, %v11900_v56  ;;  %v11978_v61 = vmul.f32 0.001953125, %v11956_v7  ;;  %v12080_v7 = vld [vmem:[%s16730_s17 + $0x18] sm:$0xff] }
 0xf90   :  { %v11993_v23 = vadd.f32 1e-05, %v11989_v28  ;;  %v11982_v50 = vmul.f32 %v16560_v11, %v16560_v11  ;;  %v12009_v28 = vsub.f32 %v16377_v27, %v16556_v46 }
 0xf91   :  { %v11964_v59 = vpop.xlane.xlu1 %11963  ;;  %v11908_v62 = vpop.xlane.xlu0 %11907 }
 0xf92   :  { %13311 = vrsqrt.f32 %v11993_v23  ;;  %v16564_v63 = vmul.f32 0.001953125, %v11908_v62  ;;  %v11986_v31 = vsub.f32 %v11978_v61, %v11982_v50  ;;  %v11979_v24 = vmul.f32 0.001953125, %v11964_v59 }
 0xf93   :  { %v12010_v23 = vsub.f32 %v16380_v52, %v16556_v46  ;;  %v12011_v61 = vsub.f32 %v16412_v48, %v16556_v46  ;;  %v12012_v50 = vsub.f32 %v16425_v33, %v16556_v46  ;;  %v12013_v59 = vsub.f32 %v16482_v38, %v16556_v46 }
 0xf94   :  { %v11990_v55 = vmax.f32 %v11986_v31, 0.0  ;;  %v11983_v54 = vmul.f32 %v16564_v63, %v16564_v63  ;;  %v12014_v62 = vsub.f32 %v16485_v14, %v16556_v46  ;;  %v12015_v38 = vsub.f32 %v16382_v3, %v16560_v11 }
 0xf95   :  { %v11916_v42 = vpop.xlane.xlu0 %11915  ;;  %v12089_v56 = vpop.permute.xlu1 %12088  ;;  %v12016_v14 = vsub.f32 %v16384_v49, %v16560_v11  ;;  %v12017_v46 = vsub.f32 %v16430_v57, %v16560_v11  ;;  %v12019_v3 = vsub.f32 %v16500_v13, %v16560_v11  ;;  %v12020_v49 = vsub.f32 %v16503_v44, %v16560_v11 }
 0xf96   :  { %v16568_v5 = vmul.f32 0.001953125, %v11916_v42  ;;  %v11994_v19 = vadd.f32 1e-05, %v11990_v55  ;;  %v11987_v32 = vsub.f32 %v11979_v24, %v11983_v54  ;;  %v12021_v57 = vsub.f32 %v16386_v1, %v16564_v63 }
 0xf97   :  { %v12024_v13 = vsub.f32 %v16452_v40, %v16564_v63 }
 0xf98   :  { %13313 = vrsqrt.f32 %v11994_v19  ;;  %v11991_v17 = vmax.f32 %v11987_v32, 0.0  ;;  %v11984_v2 = vmul.f32 %v16568_v5, %v16568_v5 }
 0xf99   :  { %v11972_v29 = vpop.xlane.xlu0 %11971 }
 0xf9a   :  { %v11980_v0 = vmul.f32 0.001953125, %v11972_v29  ;;  %v11995_v21 = vadd.f32 1e-05, %v11991_v17 }
 0xf9c   :  { %v13312_v15 = vpop.eup %13311  ;;  %v11988_v53 = vsub.f32 %v11980_v0, %v11984_v2  ;;  %13315 = vrsqrt.f32 %v11995_v21  ;;  %v12018_v0 = vsub.f32 %v16435_v47, %v16560_v11  ;;  %v12022_v47 = vsub.f32 %v16392_v51, %v16564_v63 }
 0xf9d   :  { %v12005_v20 = vmul.f32 %v13312_v15, %v12001_v36  ;;  %v12025_v51 = vsub.f32 %v16516_v58, %v16564_v63 }
 0xf9e   :  { %v11992_v22 = vmax.f32 %v11988_v53, 0.0 }
 0xf9f   :  { %12035 = vperm.xlu1 %13055, %v12005_v20  }
 0xfa0   :  { %v11996_v39 = vadd.f32 1e-05, %v11992_v22 }
 0xfa1   :  { %v12084_v42 = vpop.permute.xlu0 %12083 }
 0xfa2   :  { %v13314_v37 = vpop.eup %13313  ;;  %13317 = vrsqrt.f32 %v11996_v39 }
 0xfa3   :  { %v12006_v43 = vmul.f32 %v13314_v37, %v12002_v60  ;;  %v12023_v60 = vsub.f32 %v16448_v34, %v16564_v63 }
 0xfa5   :  { %12040 = vperm.xlu0 %13056, %v12006_v43  }
 0xfa6   :  { %v13316_v18 = vpop.eup %13315 }
 0xfa7   :  { %v12007_v12 = vmul.f32 %v13316_v18, %v12003_v4 }
 0xfa9   :  { %12045 = vperm.xlu1 %13055, %v12007_v12   ;;  %12093 = vperm.xlu0 %13056, %v12079_v16   ;;  %v12026_v16 = vsub.f32 %v16519_v25, %v16564_v63 }
 0xfac   :  { %v13318_v30 = vpop.eup %13317 }
 0xfad   :  { %v12008_v41 = vmul.f32 %v13318_v30, %v12004_v35 }
 0xfaf   :  { %12050 = vperm.xlu1 %13055, %v12008_v41  }
 0xfb3   :  { %12098 = vperm.xlu1 %13055, %v12080_v7  }
0x101e   :  { %v12036_v31 = vpop.permute.xlu1 %12035 }
0x101f   :  { %v12053_v24 = vmul.f32 %v12036_v31, %v12009_v28  ;;  %v12054_v55 = vmul.f32 %v12036_v31, %v12010_v23  ;;  %v12055_v54 = vmul.f32 %v12036_v31, %v12011_v61  ;;  %v12056_v27 = vmul.f32 %v12036_v31, %v12012_v50 }
0x1020   :  { %v12057_v19 = vmul.f32 %v12036_v31, %v12013_v59  ;;  %v12058_v52 = vmul.f32 %v12036_v31, %v12014_v62  ;;  %v12027_v50 = vsub.f32 %v16410_v45, %v16568_v5  ;;  %v12028_v59 = vsub.f32 %v16415_v26, %v16568_v5 }
0x1021   :  { %v12101_v32 = vadd.f32 %v12084_v42, %v12053_v24  ;;  %v12102_v17 = vadd.f32 %v12084_v42, %v12054_v55  ;;  %v12103_v48 = vadd.f32 %v12084_v42, %v12055_v54  ;;  %v12104_v29 = vadd.f32 %v12084_v42, %v12056_v27 }
0x1022   :  { %v12105_v2 = vadd.f32 %v12084_v42, %v12057_v19  ;;  %v12106_v33 = vadd.f32 %v12084_v42, %v12058_v52  ;;  %v12029_v62 = vsub.f32 %v16464_v6, %v16568_v5  ;;  %v12030_v31 = vsub.f32 %v16468_v9, %v16568_v5 }
0x1023   :  { %12125 = vst [vmem:[%s16732_s18] sm:$0xff] %v12101_v32  ;;  %12126 = vst [vmem:[%s16732_s18 + $0x8] sm:$0xff] %v12102_v17  ;;  %v12031_v24 = vsub.f32 %v16532_v10, %v16568_v5  ;;  %v12032_v55 = vsub.f32 %v16535_v8, %v16568_v5 }
0x1024   :  { %12127 = vst [vmem:[%s16732_s18 + $0x10] sm:$0xff] %v12103_v48  ;;  %12128 = vst [vmem:[%s16732_s18 + $0x18] sm:$0xff] %v12104_v29  ;;  %v12041_v36 = vpop.permute.xlu0 %12040 }
0x1025   :  { %12129 = vst [vmem:[%s16732_s18 + $0x20] sm:$0xff] %v12105_v2  ;;  %12130 = vst.msk [vmem:[%s16732_s18 + $0x28] sm:$0xff] %vm5319_vm3, %v12106_v33  ;;  %v12059_v21 = vmul.f32 %v12041_v36, %v12015_v38  ;;  %v12060_v15 = vmul.f32 %v12041_v36, %v12016_v14  ;;  %v12061_v53 = vmul.f32 %v12041_v36, %v12017_v46 }
0x1026   :  { %v12062_v20 = vmul.f32 %v12041_v36, %v12018_v0  ;;  %v12063_v22 = vmul.f32 %v12041_v36, %v12019_v3  ;;  %v12064_v39 = vmul.f32 %v12041_v36, %v12020_v49 }
0x1027   :  { %v12107_v44 = vadd.f32 %v12089_v56, %v12059_v21  ;;  %v12108_v11 = vadd.f32 %v12089_v56, %v12060_v15  ;;  %v12109_v37 = vadd.f32 %v12089_v56, %v12061_v53 }
0x1028   :  { %v12110_v43 = vadd.f32 %v12089_v56, %v12062_v20  ;;  %v12111_v1 = vadd.f32 %v12089_v56, %v12063_v22  ;;  %v12112_v4 = vadd.f32 %v12089_v56, %v12064_v39  ;;  %v12046_v18 = vpop.permute.xlu1 %12045  ;;  %v12094_v35 = vpop.permute.xlu0 %12093 }
0x1029   :  { %12131 = vst [vmem:[%s16732_s18 + $0x30] sm:$0xff] %v12107_v44  ;;  %12132 = vst [vmem:[%s16732_s18 + $0x38] sm:$0xff] %v12108_v11  ;;  %v12065_v34 = vmul.f32 %v12046_v18, %v12021_v57  ;;  %v12066_v40 = vmul.f32 %v12046_v18, %v12022_v47  ;;  %v12067_v58 = vmul.f32 %v12046_v18, %v12023_v60 }
0x102a   :  { %12133 = vst [vmem:[%s16732_s18 + $0x40] sm:$0xff] %v12109_v37  ;;  %12134 = vst [vmem:[%s16732_s18 + $0x48] sm:$0xff] %v12110_v43  ;;  %v12068_v25 = vmul.f32 %v12046_v18, %v12024_v13  ;;  %v12069_v63 = vmul.f32 %v12046_v18, %v12025_v51  ;;  %v12070_v12 = vmul.f32 %v12046_v18, %v12026_v16 }
0x102b   :  { %12135 = vst [vmem:[%s16732_s18 + $0x50] sm:$0xff] %v12111_v1  ;;  %12136 = vst.msk [vmem:[%s16732_s18 + $0x58] sm:$0xff] %vm5319_vm3, %v12112_v4  ;;  %v12113_v30 = vadd.f32 %v12094_v35, %v12065_v34  ;;  %v12114_v41 = vadd.f32 %v12094_v35, %v12066_v40  ;;  %v12115_v7 = vadd.f32 %v12094_v35, %v12067_v58 }
0x102c   :  { %v12116_v56 = vadd.f32 %v12094_v35, %v12068_v25  ;;  %v12117_v28 = vadd.f32 %v12094_v35, %v12069_v63  ;;  %v12118_v23 = vadd.f32 %v12094_v35, %v12070_v12 }
0x102d   :  { %12137 = vst [vmem:[%s16732_s18 + $0x60] sm:$0xff] %v12113_v30  ;;  %12138 = vst [vmem:[%s16732_s18 + $0x68] sm:$0xff] %v12114_v41 }
0x102e   :  { %12139 = vst [vmem:[%s16732_s18 + $0x70] sm:$0xff] %v12115_v7  ;;  %12140 = vst [vmem:[%s16732_s18 + $0x78] sm:$0xff] %v12116_v56  ;;  %v12051_v61 = vpop.permute.xlu1 %12050 }
0x102f   :  { %12141 = vst [vmem:[%s16732_s18 + $0x80] sm:$0xff] %v12117_v28  ;;  %12142 = vst.msk [vmem:[%s16732_s18 + $0x88] sm:$0xff] %vm5319_vm3, %v12118_v23  ;;  %v12071_v54 = vmul.f32 %v12051_v61, %v12027_v50  ;;  %v12072_v27 = vmul.f32 %v12051_v61, %v12028_v59  ;;  %v12073_v42 = vmul.f32 %v12051_v61, %v12029_v62 }
0x1030   :  { %v12074_v19 = vmul.f32 %v12051_v61, %v12030_v31  ;;  %v12075_v45 = vmul.f32 %v12051_v61, %v12031_v24  ;;  %v12076_v52 = vmul.f32 %v12051_v61, %v12032_v55 }
0x1032   :  { %v12099_v32 = vpop.permute.xlu1 %12098 }
0x1033   :  { %v12119_v26 = vadd.f32 %v12099_v32, %v12071_v54  ;;  %v12120_v17 = vadd.f32 %v12099_v32, %v12072_v27  ;;  %v12121_v48 = vadd.f32 %v12099_v32, %v12073_v42  ;;  %v12122_v6 = vadd.f32 %v12099_v32, %v12074_v19 }
0x1034   :  { %v12123_v29 = vadd.f32 %v12099_v32, %v12075_v45  ;;  %v12124_v2 = vadd.f32 %v12099_v32, %v12076_v52 }
0x1035   :  { %12143 = vst [vmem:[%s16732_s18 + $0x90] sm:$0xff] %v12119_v26  ;;  %12144 = vst [vmem:[%s16732_s18 + $0x98] sm:$0xff] %v12120_v17 }
0x1036   :  { %12145 = vst [vmem:[%s16732_s18 + $0xa0] sm:$0xff] %v12121_v48  ;;  %12146 = vst [vmem:[%s16732_s18 + $0xa8] sm:$0xff] %v12122_v6 }
0x1037   :  { %12147 = vst [vmem:[%s16732_s18 + $0xb0] sm:$0xff] %v12123_v29  ;;  %12148 = vst.msk [vmem:[%s16732_s18 + $0xb8] sm:$0xff] %vm5319_vm3, %v12124_v2 }

// kernel: siamese_forward.3
= control target key start
LH: loop header
LB: loop body
LE: loop exit
PB: predicated region body
PF: predicated region fallthrough
CT: control target
= control target key end

     0   :  { %12 = vsyncpa [#allocation4], 0  ;;  %s6925_s24 = smov 0   ;;  %s8570_s0 = inlined_call_operand.vmem [shape: f32[2,8192], index: 0, kind: input, shape index: {}]   ;;  %s8571_s1 = inlined_call_operand.vmem [shape: bf16[8192,500], index: 1, kind: input, shape index: {}]   ;;  %s8572_s2 = inlined_call_operand.vmem [shape: f32[1,500], index: 2, kind: input, shape index: {}]   ;;  %s8573_s3 = inlined_call_operand.vmem [shape: f32[500,500], index: 3, kind: input, shape index: {}]   ;;  %s8574_s4 = inlined_call_operand.vmem [shape: f32[1,500], index: 4, kind: input, shape index: {}]   ;;  %s8575_s5 = inlined_call_operand.vmem [shape: f32[500,5], index: 5, kind: input, shape index: {}]   ;;  %s8576_s6 = inlined_call_operand.vmem [shape: f32[1,5], index: 6, kind: input, shape index: {}]   ;;  %s8577_s7 = inlined_call_operand.hbm [shape: f32[2,5], index: 7, kind: output, shape index: {}]  }
   0x1 LB: > { %s6931_s25 = sadd.s32 4294967295, %s6878_s24   ;;  %p5093_p0 = scmp.ge.s32.totalorder %s6878_s24, 1  ;;  %s6878_s24 = sphi %s6925_s24, %s18_s24  }
   0x2   : > { %p246_p1 = scmp.lt.s32.totalorder %s6878_s24, 5 }
   0x4   : > { %p247_p2 = pnand %p5093_p0, %p246_p1 }
   0x5   : > { %s5094_s26 = sshll.u32 (!%p247_p2), %s6931_s25, 4  ;;  %s5096_s27 = sshll.u32 (!%p247_p2), %s6931_s25, 8 }
   0x6   : > { %250 = sbr.rel (%p247_p2) target bundleno = 1327 (0x52f), region = 48  ;;  %p280_p3 = scmp.lt.s32.totalorder (!%p247_p2), %s5094_s26, 63 }
   0x7   : > { %p286_p4 = scmp.lt.s32.totalorder (!%p247_p2), %s5096_s27, 1023  ;;  %p5099_p5 = scmp.ne.s32.totalorder (!%p247_p2), %s6931_s25, 0 }
   0xd   : > { %s8579_s26 = smov (!%p280_p3, %s5094_s26), 63  ;;  %s8581_s27 = smov (!%p286_p4, %s5096_s27), 1023 }
   0xe   : > { %s5095_s28 = sshll.u32 %s8579_s26, 1  ;;  %s5626_s9 = sshll.u32 %s8581_s27, 4  ;;  %vm296_vm0 = vcmask (!%p5099_p5), 1041408   ;;  %vm297_vm1 = vcmask (!%p5099_p5), 1043458   ;;  %vm299_vm2 = vcmask (!%p5099_p5), 1045508   ;;  %vm301_vm3 = vcmask (!%p5099_p5), 949254  }
   0xf   : > { %s6940_s8 = scalar_lea.vmem %s8570_s0, %s5095_s28  ;;  %s6945_s12 = scalar_lea.vmem %s8571_s1, %s5626_s9  ;;  %vm298_vm4 = vmor (!%p5099_p5), %vm297_vm1, %vm296_vm0  ;;  %v6880_v0 = vmov (!%p5099_p5), 0.0  }
  0x10   : > { %295 = sbr.rel (%p5099_p5) target bundleno = 23 (0x17), region = 52  ;;  %vm300_vm5 = vmor (!%p5099_p5), %vm299_vm2, %vm298_vm4 }
  0x11   : > { %vm302_vm6 = vmor (!%p5099_p5), %vm301_vm3, %vm300_vm5 }
  0x12   : > { %303 = vst.msk [vmem:[#allocation2] sm:$0xff] (!%p5099_p5), %vm302_vm6, %v6880_v0 }
  0x17 PF: > { %v6070_v1 = vld [vmem:[%s6945_s12 + $0x4] ss:$16 sps:$4 sm:$0xff]   ;;  %v6072_v2 = vld [vmem:[%s6945_s12 + $0xc] ss:$16 sps:$4 sm:$0xff]   ;;  %v6074_v3 = vld [vmem:[%s6945_s12] ss:$16 sps:$4 sm:$0xff]   ;;  %v317_v39 = vlaneseq }
  0x18   : > { %3485 = vmatprep.subr.bf16.mxu0 %v6070_v1  ;;  %v6075_v4 = vld [vmem:[%s6945_s12 + $0x8] ss:$16 sps:$4 sm:$0xff]   ;;  %3813 = vmatprep.subr.bf16.mxu1 %v6072_v2  ;;  %v6076_v5 = vld [vmem:[%s6945_s12 + $0x24] ss:$16 sps:$4 sm:$0xff]   ;;  %v6078_v6 = vld [vmem:[%s6945_s12 + $0x2c] ss:$16 sps:$4 sm:$0xff]  }
  0x19   : > { %3486 = vmatpush1.bf16.msra.mxu0 %v6074_v3  ;;  %3814 = vmatpush1.bf16.msra.mxu1 %v6075_v4  ;;  %v6080_v7 = vld [vmem:[%s6945_s12 + $0x20] ss:$16 sps:$4 sm:$0xff]   ;;  %v6081_v8 = vld [vmem:[%s6945_s12 + $0x28] ss:$16 sps:$4 sm:$0xff]   ;;  %v6082_v9 = vld [vmem:[%s6945_s12 + $0x44] ss:$16 sps:$4 sm:$0xff]  }
  0x1a   : > { %3487 = vmatprep.subr.bf16.mxu0 %v6076_v5  ;;  %3815 = vmatprep.subr.bf16.mxu1 %v6078_v6  ;;  %v6084_v10 = vld [vmem:[%s6945_s12 + $0x4c] ss:$16 sps:$4 sm:$0xff]   ;;  %v6086_v11 = vld [vmem:[%s6945_s12 + $0x40] ss:$16 sps:$4 sm:$0xff]   ;;  %v6087_v12 = vld [vmem:[%s6945_s12 + $0x48] ss:$16 sps:$4 sm:$0xff]  }
  0x1b   : > { %v6088_v13 = vld [vmem:[%s6945_s12 + $0x64] ss:$16 sps:$4 sm:$0xff]   ;;  %v6090_v14 = vld [vmem:[%s6945_s12 + $0x6c] ss:$16 sps:$4 sm:$0xff]   ;;  %v6092_v15 = vld [vmem:[%s6945_s12 + $0x60] ss:$16 sps:$4 sm:$0xff]  }
  0x1c   : > { %v6093_v16 = vld [vmem:[%s6945_s12 + $0x68] ss:$16 sps:$4 sm:$0xff]   ;;  %v6094_v17 = vld [vmem:[%s6945_s12 + $0x84] ss:$16 sps:$4 sm:$0xff]   ;;  %v6096_v18 = vld [vmem:[%s6945_s12 + $0x8c] ss:$16 sps:$4 sm:$0xff]  }
  0x1d   : > { %3488 = vmatpush1.bf16.msra.mxu0 %v6080_v7  ;;  %3816 = vmatpush1.bf16.msra.mxu1 %v6081_v8  ;;  %v6098_v19 = vld [vmem:[%s6945_s12 + $0x80] ss:$16 sps:$4 sm:$0xff]   ;;  %v6099_v20 = vld [vmem:[%s6945_s12 + $0x88] ss:$16 sps:$4 sm:$0xff]   ;;  %v6100_v21 = vld [vmem:[%s6945_s12 + $0xa4] ss:$16 sps:$4 sm:$0xff]  }
  0x1e   : > { %3489 = vmatprep.subr.bf16.mxu0 %v6082_v9  ;;  %3817 = vmatprep.subr.bf16.mxu1 %v6084_v10  ;;  %v6102_v22 = vld [vmem:[%s6945_s12 + $0xac] ss:$16 sps:$4 sm:$0xff]   ;;  %v6104_v23 = vld [vmem:[%s6945_s12 + $0xa0] ss:$16 sps:$4 sm:$0xff]   ;;  %v6105_v24 = vld [vmem:[%s6945_s12 + $0xa8] ss:$16 sps:$4 sm:$0xff]  }
  0x1f   : > { %v6106_v25 = vld [vmem:[%s6945_s12 + $0xc4] ss:$16 sps:$4 sm:$0xff]   ;;  %v6108_v26 = vld [vmem:[%s6945_s12 + $0xcc] ss:$16 sps:$4 sm:$0xff]   ;;  %v6110_v27 = vld [vmem:[%s6945_s12 + $0xc0] ss:$16 sps:$4 sm:$0xff]  }
  0x20   : > { %v6111_v28 = vld [vmem:[%s6945_s12 + $0xc8] ss:$16 sps:$4 sm:$0xff]   ;;  %v6112_v29 = vld [vmem:[%s6945_s12 + $0xe4] ss:$16 sps:$4 sm:$0xff]   ;;  %v6114_v30 = vld [vmem:[%s6945_s12 + $0xec] ss:$16 sps:$4 sm:$0xff]  }
  0x21   : > { %3490 = vmatpush1.bf16.msra.mxu0 %v6086_v11  ;;  %3818 = vmatpush1.bf16.msra.mxu1 %v6087_v12  ;;  %v6116_v31 = vld [vmem:[%s6945_s12 + $0xe0] ss:$16 sps:$4 sm:$0xff]   ;;  %v6117_v32 = vld [vmem:[%s6945_s12 + $0xe8] ss:$16 sps:$4 sm:$0xff]   ;;  %v6118_v33 = vld [vmem:[%s6945_s12 + $0x104] ss:$16 sps:$4 sm:$0xff]  }
  0x22   : > { %3491 = vmatprep.subr.bf16.mxu0 %v6088_v13  ;;  %3819 = vmatprep.subr.bf16.mxu1 %v6090_v14  ;;  %v6120_v34 = vld [vmem:[%s6945_s12 + $0x10c] ss:$16 sps:$4 sm:$0xff]   ;;  %v6122_v35 = vld [vmem:[%s6945_s12 + $0x100] ss:$16 sps:$4 sm:$0xff]   ;;  %v6123_v36 = vld [vmem:[%s6945_s12 + $0x108] ss:$16 sps:$4 sm:$0xff]  }
  0x23   : > { %v6881_v37 = vmov 1983009808   ;;  %v6124_v40 = vld [vmem:[%s6945_s12 + $0x124] ss:$16 sps:$4 sm:$0xff]   ;;  %v6126_v41 = vld [vmem:[%s6945_s12 + $0x12c] ss:$16 sps:$4 sm:$0xff]  }
  0x24   : > { %v315_v38 = vunpack.c.l.s4 %v6881_v37  ;;  %v6128_v42 = vld [vmem:[%s6945_s12 + $0x120] ss:$16 sps:$4 sm:$0xff]   ;;  %v6987_v44 = vshrl.u32 %v317_v39, 7  ;;  %v6129_v45 = vld [vmem:[%s6945_s12 + $0x128] ss:$16 sps:$4 sm:$0xff]   ;;  %vm4164_vm7 = vcmask 1041408  }
  0x25   : > { %3492 = vmatpush1.bf16.msra.mxu0 %v6092_v15  ;;  %3820 = vmatpush1.bf16.msra.mxu1 %v6093_v16  ;;  %v6130_v46 = vld [vmem:[%s6945_s12 + $0x144] ss:$16 sps:$4 sm:$0xff]   ;;  %v6132_v47 = vld [vmem:[%s6945_s12 + $0x14c] ss:$16 sps:$4 sm:$0xff]   ;;  %v6134_v48 = vld [vmem:[%s6945_s12 + $0x140] ss:$16 sps:$4 sm:$0xff]  }
  0x26   : > { %3493 = vmatprep.subr.bf16.mxu0 %v6094_v17  ;;  %3821 = vmatprep.subr.bf16.mxu1 %v6096_v18  ;;  %v316_v43 = vunpack.c.0.s8 %v315_v38  ;;  %v6135_v49 = vld [vmem:[%s6945_s12 + $0x148] ss:$16 sps:$4 sm:$0xff]   ;;  %v6136_v51 = vld [vmem:[%s6945_s12 + $0x164] ss:$16 sps:$4 sm:$0xff]   ;;  %v6138_v52 = vld [vmem:[%s6945_s12 + $0x16c] ss:$16 sps:$4 sm:$0xff]  }
  0x27   : > { %v305_v53 = vld [vmem:[%s6940_s8] sm:$0xff]  ;;  %v6141_v56 = vld [vmem:[%s6945_s12 + $0x168] ss:$16 sps:$4 sm:$0xff]   ;;  %v6144_v58 = vld [vmem:[%s6945_s12 + $0x18c] ss:$16 sps:$4 sm:$0xff]   ;;  %vm4165_vm8 = vcmask 1043458  }
  0x28   : > { %v6995_v50 = vsub.s32 %v316_v43, %v6987_v44  ;;  %v6140_v54 = vld [vmem:[%s6945_s12 + $0x160] ss:$16 sps:$4 sm:$0xff]   ;;  %v6142_v57 = vld [vmem:[%s6945_s12 + $0x184] ss:$16 sps:$4 sm:$0xff]   ;;  %v6147_v62 = vld [vmem:[%s6945_s12 + $0x188] ss:$16 sps:$4 sm:$0xff]   ;;  %v313_v5 = vcombine.high %v305_v53, %v305_v53 }
  0x29   : > { %3494 = vmatpush1.bf16.msra.mxu0 %v6098_v19  ;;  %3822 = vmatpush1.bf16.msra.mxu1 %v6099_v20  ;;  %v6146_v60 = vld [vmem:[%s6945_s12 + $0x180] ss:$16 sps:$4 sm:$0xff]   ;;  %v6148_v63 = vld [vmem:[%s6945_s12 + $0x1a4] ss:$16 sps:$4 sm:$0xff]   ;;  %v6150_v0 = vld [vmem:[%s6945_s12 + $0x1ac] ss:$16 sps:$4 sm:$0xff]  }
  0x2a   : > { %3495 = vmatprep.subr.bf16.mxu0 %v6100_v21  ;;  %3823 = vmatprep.subr.bf16.mxu1 %v6102_v22  ;;  %v320_v55 = vrot.slane %v305_v53, %v6995_v50  ;;  %v6152_v1 = vld [vmem:[%s6945_s12 + $0x1a0] ss:$16 sps:$4 sm:$0xff]   ;;  %v6153_v2 = vld [vmem:[%s6945_s12 + $0x1a8] ss:$16 sps:$4 sm:$0xff]   ;;  %v6154_v3 = vld [vmem:[%s6945_s12 + $0x1c4] ss:$16 sps:$4 sm:$0xff]   ;;  %v7018_v10 = vrot.slane %v313_v5, %v6995_v50 }
  0x2b   : > { %v6156_v4 = vld [vmem:[%s6945_s12 + $0x1cc] ss:$16 sps:$4 sm:$0xff]   ;;  %v6158_v6 = vld [vmem:[%s6945_s12 + $0x1c0] ss:$16 sps:$4 sm:$0xff]   ;;  %v6159_v7 = vld [vmem:[%s6945_s12 + $0x1c8] ss:$16 sps:$4 sm:$0xff]  }
  0x2c   : > { %v328_v59 = vcombine.high %v320_v55, %v320_v55  ;;  %v6160_v8 = vld [vmem:[%s6945_s12 + $0x1e4] ss:$16 sps:$4 sm:$0xff]   ;;  %v6162_v9 = vld [vmem:[%s6945_s12 + $0x1ec] ss:$16 sps:$4 sm:$0xff]   ;;  %v6164_v11 = vld [vmem:[%s6945_s12 + $0x1e0] ss:$16 sps:$4 sm:$0xff]   ;;  %v329_v15 = vcombine.high %v7018_v10, %v7018_v10  ;;  %v397_v17 = vpack.c.bf16 %v320_v55, %v320_v55 }
  0x2d   : > { %3496 = vmatpush1.bf16.msra.mxu0 %v6104_v23  ;;  %3824 = vmatpush1.bf16.msra.mxu1 %v6105_v24  ;;  %v6165_v12 = vld [vmem:[%s6945_s12 + $0x1e8] ss:$16 sps:$4 sm:$0xff]   ;;  %v6169_v13 = vld [vmem:[%s6945_s12 + $0x204] ss:$16 sps:$4 sm:$0xff]   ;;  %v6172_v14 = vld [vmem:[%s6945_s12 + $0x20c] ss:$16 sps:$4 sm:$0xff]  }
  0x2e   : > { %3497 = vmatprep.subr.bf16.mxu0 %v6106_v25  ;;  %3825 = vmatprep.subr.bf16.mxu1 %v6108_v26  ;;  %v398_v61 = vpack.c.bf16 %v328_v59, %v328_v59  ;;  %v6167_v16 = vld [vmem:[%s6945_s12 + $0x200] ss:$16 sps:$4 sm:$0xff]   ;;  %v6170_v18 = vld [vmem:[%s6945_s12 + $0x208] ss:$16 sps:$4 sm:$0xff]   ;;  %v6175_v19 = vld [vmem:[%s6945_s12 + $0x224] ss:$16 sps:$4 sm:$0xff]   ;;  %v400_v21 = vpack.c.bf16 %v329_v15, %v329_v15 }
  0x2f   : > { %v6178_v20 = vld [vmem:[%s6945_s12 + $0x22c] ss:$16 sps:$4 sm:$0xff]   ;;  %v6173_v22 = vld [vmem:[%s6945_s12 + $0x220] ss:$16 sps:$4 sm:$0xff]   ;;  %v6176_v23 = vld [vmem:[%s6945_s12 + $0x228] ss:$16 sps:$4 sm:$0xff]  }
  0x30   : > { %3517 = vmatprep.mubr.bf16.mxu0 %v398_v61  ;;  %3845 = vmatprep.mubr.bf16.mxu1 %v398_v61  ;;  %v6181_v24 = vld [vmem:[%s6945_s12 + $0x244] ss:$16 sps:$4 sm:$0xff]   ;;  %v6184_v25 = vld [vmem:[%s6945_s12 + $0x24c] ss:$16 sps:$4 sm:$0xff]   ;;  %v6179_v26 = vld [vmem:[%s6945_s12 + $0x240] ss:$16 sps:$4 sm:$0xff]  }
  0x31   : > { %3498 = vmatpush1.bf16.msra.mxu0 %v6110_v27  ;;  %3826 = vmatpush1.bf16.msra.mxu1 %v6111_v28  ;;  %v6182_v27 = vld [vmem:[%s6945_s12 + $0x248] ss:$16 sps:$4 sm:$0xff]   ;;  %v6187_v28 = vld [vmem:[%s6945_s12 + $0x264] ss:$16 sps:$4 sm:$0xff]   ;;  %v6202_v37 = vld [vmem:[%s6945_s12 + $0x2ac] ss:$16 sps:$4 sm:$0xff]  }
  0x32   : > { %3499 = vmatprep.subr.bf16.mxu0 %v6112_v29  ;;  %3827 = vmatprep.subr.bf16.mxu1 %v6114_v30  ;;  %v6190_v29 = vld [vmem:[%s6945_s12 + $0x26c] ss:$16 sps:$4 sm:$0xff]   ;;  %v6185_v30 = vld [vmem:[%s6945_s12 + $0x260] ss:$16 sps:$4 sm:$0xff]   ;;  %v6200_v39 = vld [vmem:[%s6945_s12 + $0x2a8] ss:$16 sps:$4 sm:$0xff]  }
  0x33   : > { %v6197_v38 = vld [vmem:[%s6945_s12 + $0x2a0] ss:$16 sps:$4 sm:$0xff]   ;;  %v6206_v43 = vld [vmem:[%s6945_s12 + $0x2c8] ss:$16 sps:$4 sm:$0xff]   ;;  %v6226_v55 = vld [vmem:[%s6945_s12 + $0x32c] ss:$16 sps:$4 sm:$0xff]  }
  0x34   : > { %v6218_v53 = vld [vmem:[%s6945_s12 + $0x308] ss:$16 sps:$4 sm:$0xff]   ;;  %v6232_v59 = vld [vmem:[%s6945_s12 + $0x34c] ss:$16 sps:$4 sm:$0xff]   ;;  %v6259_v15 = vld [vmem:[%s6945_s12 + $0x3e4] ss:$16 sps:$4 sm:$0xff]  }
  0x35   : > { %3500 = vmatpush1.bf16.msra.mxu0 %v6116_v31  ;;  %3828 = vmatpush1.bf16.msra.mxu1 %v6117_v32  ;;  %v6188_v31 = vld [vmem:[%s6945_s12 + $0x268] ss:$16 sps:$4 sm:$0xff]   ;;  %v6193_v32 = vld [vmem:[%s6945_s12 + $0x284] ss:$16 sps:$4 sm:$0xff]   ;;  %vm4166_vm9 = vmor %vm4165_vm8, %vm4164_vm7  ;;  %vm4167_vm10 = vcmask 1045508   ;;  %vm4169_vm12 = vcmask 949254  }
  0x36   : > { %3501 = vmatprep.subr.bf16.mxu0 %v6118_v33  ;;  %3829 = vmatprep.subr.bf16.mxu1 %v6120_v34  ;;  %v6196_v33 = vld [vmem:[%s6945_s12 + $0x28c] ss:$16 sps:$4 sm:$0xff]   ;;  %v6191_v34 = vld [vmem:[%s6945_s12 + $0x280] ss:$16 sps:$4 sm:$0xff]   ;;  %v6230_v61 = vld [vmem:[%s6945_s12 + $0x348] ss:$16 sps:$4 sm:$0xff]  }
  0x37   : > { %v6242_v5 = vld [vmem:[%s6945_s12 + $0x388] ss:$16 sps:$4 sm:$0xff]   ;;  %vm4168_vm11 = vmor %vm4167_vm10, %vm4166_vm9  ;;  %p5612_p6 = scmp.ne.s32.totalorder %s6931_s25, 3 }
  0x38   : > { %vm4170_vm13 = vmor %vm4169_vm12, %vm4168_vm11  ;;  %vm4510_vm14 = vcmask (!%p5612_p6), 949248   ;;  %vm4513_vm15 = vcmask (!%p5612_p6), 1043456   ;;  %vm5030_vm0 = vcmask (!%p5612_p6), 33792  }
  0x39   : > { %3502 = vmatpush1.bf16.msra.mxu0 %v6122_v35  ;;  %3830 = vmatpush1.bf16.msra.mxu1 %v6123_v36  ;;  %v6194_v35 = vld [vmem:[%s6945_s12 + $0x288] ss:$16 sps:$4 sm:$0xff]   ;;  %v6199_v36 = vld [vmem:[%s6945_s12 + $0x2a4] ss:$16 sps:$4 sm:$0xff]  }
  0x3a   : > { %3503 = vmatprep.subr.bf16.mxu0 %v6124_v40  ;;  %3831 = vmatprep.subr.bf16.mxu1 %v6126_v41  ;;  %v6205_v40 = vld [vmem:[%s6945_s12 + $0x2c4] ss:$16 sps:$4 sm:$0xff]   ;;  %v6208_v41 = vld [vmem:[%s6945_s12 + $0x2cc] ss:$16 sps:$4 sm:$0xff]  }
  0x3d   : > { %3504 = vmatpush1.bf16.msra.mxu0 %v6128_v42  ;;  %3832 = vmatpush1.bf16.msra.mxu1 %v6129_v45  ;;  %v6203_v42 = vld [vmem:[%s6945_s12 + $0x2c0] ss:$16 sps:$4 sm:$0xff]   ;;  %v6211_v45 = vld [vmem:[%s6945_s12 + $0x2e4] ss:$16 sps:$4 sm:$0xff]  }
  0x3e   : > { %3505 = vmatprep.subr.bf16.mxu0 %v6130_v46  ;;  %3833 = vmatprep.subr.bf16.mxu1 %v6132_v47  ;;  %v6214_v46 = vld [vmem:[%s6945_s12 + $0x2ec] ss:$16 sps:$4 sm:$0xff]   ;;  %v6209_v47 = vld [vmem:[%s6945_s12 + $0x2e0] ss:$16 sps:$4 sm:$0xff]  }
  0x41   : > { %3506 = vmatpush1.bf16.msra.mxu0 %v6134_v48  ;;  %3834 = vmatpush1.bf16.msra.mxu1 %v6135_v49  ;;  %v6212_v48 = vld [vmem:[%s6945_s12 + $0x2e8] ss:$16 sps:$4 sm:$0xff]   ;;  %v6217_v49 = vld [vmem:[%s6945_s12 + $0x304] ss:$16 sps:$4 sm:$0xff]  }
  0x42   : > { %3507 = vmatprep.subr.bf16.mxu0 %v6136_v51  ;;  %3835 = vmatprep.subr.bf16.mxu1 %v6138_v52  ;;  %v6220_v51 = vld [vmem:[%s6945_s12 + $0x30c] ss:$16 sps:$4 sm:$0xff]   ;;  %v6215_v52 = vld [vmem:[%s6945_s12 + $0x300] ss:$16 sps:$4 sm:$0xff]  }
  0x45   : > { %3508 = vmatpush1.bf16.msra.mxu0 %v6140_v54  ;;  %3836 = vmatpush1.bf16.msra.mxu1 %v6141_v56  ;;  %v6223_v54 = vld [vmem:[%s6945_s12 + $0x324] ss:$16 sps:$4 sm:$0xff]   ;;  %v6221_v56 = vld [vmem:[%s6945_s12 + $0x320] ss:$16 sps:$4 sm:$0xff]  }
  0x46   : > { %3509 = vmatprep.subr.bf16.mxu0 %v6142_v57  ;;  %3837 = vmatprep.subr.bf16.mxu1 %v6144_v58  ;;  %v6224_v57 = vld [vmem:[%s6945_s12 + $0x328] ss:$16 sps:$4 sm:$0xff]   ;;  %v6229_v58 = vld [vmem:[%s6945_s12 + $0x344] ss:$16 sps:$4 sm:$0xff]  }
  0x49   : > { %3510 = vmatpush1.bf16.msra.mxu0 %v6146_v60  ;;  %3838 = vmatpush1.bf16.msra.mxu1 %v6147_v62  ;;  %v6227_v60 = vld [vmem:[%s6945_s12 + $0x340] ss:$16 sps:$4 sm:$0xff]   ;;  %v6235_v62 = vld [vmem:[%s6945_s12 + $0x364] ss:$16 sps:$4 sm:$0xff]  }
  0x4a   : > { %3511 = vmatprep.subr.bf16.mxu0 %v6148_v63  ;;  %3839 = vmatprep.subr.bf16.mxu1 %v6150_v0  ;;  %v6238_v63 = vld [vmem:[%s6945_s12 + $0x36c] ss:$16 sps:$4 sm:$0xff]   ;;  %v6233_v0 = vld [vmem:[%s6945_s12 + $0x360] ss:$16 sps:$4 sm:$0xff]  }
  0x4d   : > { %3512 = vmatpush1.bf16.msra.mxu0 %v6152_v1  ;;  %3840 = vmatpush1.bf16.msra.mxu1 %v6153_v2  ;;  %v6236_v1 = vld [vmem:[%s6945_s12 + $0x368] ss:$16 sps:$4 sm:$0xff]   ;;  %v6241_v2 = vld [vmem:[%s6945_s12 + $0x384] ss:$16 sps:$4 sm:$0xff]  }
  0x4e   : > { %3513 = vmatprep.subr.bf16.mxu0 %v6154_v3  ;;  %3841 = vmatprep.subr.bf16.mxu1 %v6156_v4  ;;  %v6244_v3 = vld [vmem:[%s6945_s12 + $0x38c] ss:$16 sps:$4 sm:$0xff]   ;;  %v6239_v4 = vld [vmem:[%s6945_s12 + $0x380] ss:$16 sps:$4 sm:$0xff]  }
  0x51   : > { %3514 = vmatpush1.bf16.msra.mxu0 %v6158_v6  ;;  %3842 = vmatpush1.bf16.msra.mxu1 %v6159_v7  ;;  %v6247_v6 = vld [vmem:[%s6945_s12 + $0x3a4] ss:$16 sps:$4 sm:$0xff]   ;;  %v6250_v7 = vld [vmem:[%s6945_s12 + $0x3ac] ss:$16 sps:$4 sm:$0xff]  }
  0x52   : > { %3515 = vmatprep.subr.bf16.mxu0 %v6160_v8  ;;  %3843 = vmatprep.subr.bf16.mxu1 %v6162_v9  ;;  %v6245_v8 = vld [vmem:[%s6945_s12 + $0x3a0] ss:$16 sps:$4 sm:$0xff]   ;;  %v6248_v9 = vld [vmem:[%s6945_s12 + $0x3a8] ss:$16 sps:$4 sm:$0xff]  }
  0x55   : > { %3516 = vmatpush1.bf16.msra.mxu0 %v6164_v11  ;;  %3844 = vmatpush1.bf16.msra.mxu1 %v6165_v12  ;;  %v6253_v11 = vld [vmem:[%s6945_s12 + $0x3c4] ss:$16 sps:$4 sm:$0xff]   ;;  %v6256_v12 = vld [vmem:[%s6945_s12 + $0x3cc] ss:$16 sps:$4 sm:$0xff]  }
  0x56   : > { %3526 = vmatprep.subr.bf16.mxu0 %v6169_v13  ;;  %3854 = vmatprep.subr.bf16.mxu1 %v6172_v14  ;;  %v6251_v13 = vld [vmem:[%s6945_s12 + $0x3c0] ss:$16 sps:$4 sm:$0xff]   ;;  %v6254_v14 = vld [vmem:[%s6945_s12 + $0x3c8] ss:$16 sps:$4 sm:$0xff]  }
  0x58   : > { %3518 = vmatmul.mubr.bf16.vlgmr.msra.gmra.mrb[0].mxu0 %v397_v17  ;;  %3846 = vmatmul.mubr.bf16.vlgmr.msra.gmra.mrb[0].mxu1 %v397_v17  ;;  %v6257_v17 = vld [vmem:[%s6945_s12 + $0x3e0] ss:$16 sps:$4 sm:$0xff]  }
  0x59   : > { %3527 = vmatpush1.bf16.msra.mxu0 %v6167_v16  ;;  %3855 = vmatpush1.bf16.msra.mxu1 %v6170_v18  ;;  %v6262_v16 = vld [vmem:[%s6945_s12 + $0x3ec] ss:$16 sps:$4 sm:$0xff]   ;;  %v6260_v18 = vld [vmem:[%s6945_s12 + $0x3e8] ss:$16 sps:$4 sm:$0xff]  }
  0x5a   : > { %3528 = vmatprep.subr.bf16.mxu0 %v6175_v19  ;;  %3856 = vmatprep.subr.bf16.mxu1 %v6178_v20  ;;  %v6265_v19 = vld [vmem:[%s6945_s12 + $0x404] ss:$16 sps:$4 sm:$0xff]   ;;  %v6268_v20 = vld [vmem:[%s6945_s12 + $0x40c] ss:$16 sps:$4 sm:$0xff]  }
  0x5b   : > { %3558 = vmatprep.mubr.bf16.mxu0 %v400_v21  ;;  %3886 = vmatprep.mubr.bf16.mxu1 %v400_v21  ;;  %v6263_v21 = vld [vmem:[%s6945_s12 + $0x400] ss:$16 sps:$4 sm:$0xff]  }
  0x5d   : > { %3529 = vmatpush1.bf16.msra.mxu0 %v6173_v22  ;;  %3857 = vmatpush1.bf16.msra.mxu1 %v6176_v23  ;;  %v399_v22 = vpack.c.bf16 %v7018_v10, %v7018_v10  ;;  %v6266_v23 = vld [vmem:[%s6945_s12 + $0x408] ss:$16 sps:$4 sm:$0xff]  }
  0x5e   : > { %3530 = vmatprep.subr.bf16.mxu0 %v6181_v24  ;;  %3858 = vmatprep.subr.bf16.mxu1 %v6184_v25  ;;  %v7095_v24 = vld [vmem:[%s6940_s8 + $0x8] sm:$0xff]  ;;  %v6271_v25 = vld [vmem:[%s6945_s12 + $0x424] ss:$16 sps:$4 sm:$0xff]  }
  0x61   : > { %3531 = vmatpush1.bf16.msra.mxu0 %v6179_v26  ;;  %3859 = vmatpush1.bf16.msra.mxu1 %v6182_v27  ;;  %v6274_v26 = vld [vmem:[%s6945_s12 + $0x42c] ss:$16 sps:$4 sm:$0xff]   ;;  %v7101_v27 = vrot.slane %v7095_v24, %v6995_v50 }
  0x62   : > { %3532 = vmatprep.subr.bf16.mxu0 %v6187_v28  ;;  %3860 = vmatprep.subr.bf16.mxu1 %v6190_v29  ;;  %v6269_v28 = vld [vmem:[%s6945_s12 + $0x420] ss:$16 sps:$4 sm:$0xff]   ;;  %v6272_v29 = vld [vmem:[%s6945_s12 + $0x428] ss:$16 sps:$4 sm:$0xff]  }
  0x63   : > { %v345_v10 = vcombine.high %v7101_v27, %v7101_v27 }
  0x65   : > { %3533 = vmatpush1.bf16.msra.mxu0 %v6185_v30  ;;  %3861 = vmatpush1.bf16.msra.mxu1 %v6188_v31  ;;  %v6277_v30 = vld [vmem:[%s6945_s12 + $0x444] ss:$16 sps:$4 sm:$0xff]   ;;  %v6280_v31 = vld [vmem:[%s6945_s12 + $0x44c] ss:$16 sps:$4 sm:$0xff]  }
  0x66   : > { %3534 = vmatprep.subr.bf16.mxu0 %v6193_v32  ;;  %3862 = vmatprep.subr.bf16.mxu1 %v6196_v33  ;;  %v402_v32 = vpack.c.bf16 %v345_v10, %v345_v10  ;;  %v6275_v33 = vld [vmem:[%s6945_s12 + $0x440] ss:$16 sps:$4 sm:$0xff]   ;;  %v6356_v10 = vld [vmem:[%s6945_s12 + $0x5e8] ss:$16 sps:$4 sm:$0xff]  }
  0x69   : > { %3535 = vmatpush1.bf16.msra.mxu0 %v6191_v34  ;;  %3863 = vmatpush1.bf16.msra.mxu1 %v6194_v35  ;;  %v6278_v34 = vld [vmem:[%s6945_s12 + $0x448] ss:$16 sps:$4 sm:$0xff]   ;;  %v6283_v35 = vld [vmem:[%s6945_s12 + $0x464] ss:$16 sps:$4 sm:$0xff]  }
  0x6a   : > { %3536 = vmatprep.subr.bf16.mxu0 %v6199_v36  ;;  %3864 = vmatprep.subr.bf16.mxu1 %v6202_v37  ;;  %v6286_v36 = vld [vmem:[%s6945_s12 + $0x46c] ss:$16 sps:$4 sm:$0xff]   ;;  %v6281_v37 = vld [vmem:[%s6945_s12 + $0x460] ss:$16 sps:$4 sm:$0xff]  }
  0x6d   : > { %3537 = vmatpush1.bf16.msra.mxu0 %v6197_v38  ;;  %3865 = vmatpush1.bf16.msra.mxu1 %v6200_v39  ;;  %v6284_v38 = vld [vmem:[%s6945_s12 + $0x468] ss:$16 sps:$4 sm:$0xff]   ;;  %v6289_v39 = vld [vmem:[%s6945_s12 + $0x484] ss:$16 sps:$4 sm:$0xff]  }
  0x6e   : > { %3538 = vmatprep.subr.bf16.mxu0 %v6205_v40  ;;  %3866 = vmatprep.subr.bf16.mxu1 %v6208_v41  ;;  %v6292_v40 = vld [vmem:[%s6945_s12 + $0x48c] ss:$16 sps:$4 sm:$0xff]   ;;  %v6287_v41 = vld [vmem:[%s6945_s12 + $0x480] ss:$16 sps:$4 sm:$0xff]  }
  0x71   : > { %3539 = vmatpush1.bf16.msra.mxu0 %v6203_v42  ;;  %3867 = vmatpush1.bf16.msra.mxu1 %v6206_v43  ;;  %v6290_v42 = vld [vmem:[%s6945_s12 + $0x488] ss:$16 sps:$4 sm:$0xff]   ;;  %v6295_v43 = vld [vmem:[%s6945_s12 + $0x4a4] ss:$16 sps:$4 sm:$0xff]  }
  0x72   : > { %3540 = vmatprep.subr.bf16.mxu0 %v6211_v45  ;;  %3868 = vmatprep.subr.bf16.mxu1 %v6214_v46  ;;  %v6298_v45 = vld [vmem:[%s6945_s12 + $0x4ac] ss:$16 sps:$4 sm:$0xff]   ;;  %v6293_v46 = vld [vmem:[%s6945_s12 + $0x4a0] ss:$16 sps:$4 sm:$0xff]  }
  0x75   : > { %3541 = vmatpush1.bf16.msra.mxu0 %v6209_v47  ;;  %3869 = vmatpush1.bf16.msra.mxu1 %v6212_v48  ;;  %v6296_v47 = vld [vmem:[%s6945_s12 + $0x4a8] ss:$16 sps:$4 sm:$0xff]   ;;  %v6301_v48 = vld [vmem:[%s6945_s12 + $0x4c4] ss:$16 sps:$4 sm:$0xff]  }
  0x76   : > { %3542 = vmatprep.subr.bf16.mxu0 %v6217_v49  ;;  %3870 = vmatprep.subr.bf16.mxu1 %v6220_v51  ;;  %v6304_v49 = vld [vmem:[%s6945_s12 + $0x4cc] ss:$16 sps:$4 sm:$0xff]   ;;  %v6299_v51 = vld [vmem:[%s6945_s12 + $0x4c0] ss:$16 sps:$4 sm:$0xff]  }
  0x79   : > { %3543 = vmatpush1.bf16.msra.mxu0 %v6215_v52  ;;  %3871 = vmatpush1.bf16.msra.mxu1 %v6218_v53  ;;  %v6302_v52 = vld [vmem:[%s6945_s12 + $0x4c8] ss:$16 sps:$4 sm:$0xff]   ;;  %v6307_v53 = vld [vmem:[%s6945_s12 + $0x4e4] ss:$16 sps:$4 sm:$0xff]  }
  0x7a   : > { %3544 = vmatprep.subr.bf16.mxu0 %v6223_v54  ;;  %3872 = vmatprep.subr.bf16.mxu1 %v6226_v55  ;;  %v6310_v54 = vld [vmem:[%s6945_s12 + $0x4ec] ss:$16 sps:$4 sm:$0xff]   ;;  %v6305_v55 = vld [vmem:[%s6945_s12 + $0x4e0] ss:$16 sps:$4 sm:$0xff]  }
  0x7d   : > { %3545 = vmatpush1.bf16.msra.mxu0 %v6221_v56  ;;  %3873 = vmatpush1.bf16.msra.mxu1 %v6224_v57  ;;  %v6308_v56 = vld [vmem:[%s6945_s12 + $0x4e8] ss:$16 sps:$4 sm:$0xff]   ;;  %v6313_v57 = vld [vmem:[%s6945_s12 + $0x504] ss:$16 sps:$4 sm:$0xff]  }
  0x7e   : > { %3546 = vmatprep.subr.bf16.mxu0 %v6229_v58  ;;  %3874 = vmatprep.subr.bf16.mxu1 %v6232_v59  ;;  %v6316_v58 = vld [vmem:[%s6945_s12 + $0x50c] ss:$16 sps:$4 sm:$0xff]   ;;  %v6311_v59 = vld [vmem:[%s6945_s12 + $0x500] ss:$16 sps:$4 sm:$0xff]  }
  0x81   : > { %3547 = vmatpush1.bf16.msra.mxu0 %v6227_v60  ;;  %3875 = vmatpush1.bf16.msra.mxu1 %v6230_v61  ;;  %v6314_v60 = vld [vmem:[%s6945_s12 + $0x508] ss:$16 sps:$4 sm:$0xff]   ;;  %v6319_v61 = vld [vmem:[%s6945_s12 + $0x524] ss:$16 sps:$4 sm:$0xff]  }
  0x82   : > { %3548 = vmatprep.subr.bf16.mxu0 %v6235_v62  ;;  %3876 = vmatprep.subr.bf16.mxu1 %v6238_v63  ;;  %v6322_v62 = vld [vmem:[%s6945_s12 + $0x52c] ss:$16 sps:$4 sm:$0xff]   ;;  %v6317_v63 = vld [vmem:[%s6945_s12 + $0x520] ss:$16 sps:$4 sm:$0xff]  }
  0x85   : > { %3549 = vmatpush1.bf16.msra.mxu0 %v6233_v0  ;;  %3877 = vmatpush1.bf16.msra.mxu1 %v6236_v1  ;;  %v6320_v0 = vld [vmem:[%s6945_s12 + $0x528] ss:$16 sps:$4 sm:$0xff]   ;;  %v6325_v1 = vld [vmem:[%s6945_s12 + $0x544] ss:$16 sps:$4 sm:$0xff]  }
  0x86   : > { %3550 = vmatprep.subr.bf16.mxu0 %v6241_v2  ;;  %3878 = vmatprep.subr.bf16.mxu1 %v6244_v3  ;;  %v6328_v2 = vld [vmem:[%s6945_s12 + $0x54c] ss:$16 sps:$4 sm:$0xff]   ;;  %v6323_v3 = vld [vmem:[%s6945_s12 + $0x540] ss:$16 sps:$4 sm:$0xff]  }
  0x89   : > { %3551 = vmatpush1.bf16.msra.mxu0 %v6239_v4  ;;  %3879 = vmatpush1.bf16.msra.mxu1 %v6242_v5  ;;  %v6326_v4 = vld [vmem:[%s6945_s12 + $0x548] ss:$16 sps:$4 sm:$0xff]   ;;  %v6331_v5 = vld [vmem:[%s6945_s12 + $0x564] ss:$16 sps:$4 sm:$0xff]  }
  0x8a   : > { %3552 = vmatprep.subr.bf16.mxu0 %v6247_v6  ;;  %3880 = vmatprep.subr.bf16.mxu1 %v6250_v7  ;;  %v6334_v6 = vld [vmem:[%s6945_s12 + $0x56c] ss:$16 sps:$4 sm:$0xff]   ;;  %v6329_v7 = vld [vmem:[%s6945_s12 + $0x560] ss:$16 sps:$4 sm:$0xff]  }
  0x8d   : > { %3553 = vmatpush1.bf16.msra.mxu0 %v6245_v8  ;;  %3881 = vmatpush1.bf16.msra.mxu1 %v6248_v9  ;;  %v6332_v8 = vld [vmem:[%s6945_s12 + $0x568] ss:$16 sps:$4 sm:$0xff]   ;;  %v6337_v9 = vld [vmem:[%s6945_s12 + $0x584] ss:$16 sps:$4 sm:$0xff]  }
  0x8e   : > { %3554 = vmatprep.subr.bf16.mxu0 %v6253_v11  ;;  %3882 = vmatprep.subr.bf16.mxu1 %v6256_v12  ;;  %v6340_v11 = vld [vmem:[%s6945_s12 + $0x58c] ss:$16 sps:$4 sm:$0xff]   ;;  %v6335_v12 = vld [vmem:[%s6945_s12 + $0x580] ss:$16 sps:$4 sm:$0xff]  }
  0x91   : > { %3555 = vmatpush1.bf16.msra.mxu0 %v6251_v13  ;;  %3883 = vmatpush1.bf16.msra.mxu1 %v6254_v14  ;;  %v6338_v13 = vld [vmem:[%s6945_s12 + $0x588] ss:$16 sps:$4 sm:$0xff]   ;;  %v6343_v14 = vld [vmem:[%s6945_s12 + $0x5a4] ss:$16 sps:$4 sm:$0xff]  }
  0x92   : > { %3556 = vmatprep.subr.bf16.mxu0 %v6259_v15  ;;  %3884 = vmatprep.subr.bf16.mxu1 %v6262_v16  ;;  %v6346_v15 = vld [vmem:[%s6945_s12 + $0x5ac] ss:$16 sps:$4 sm:$0xff]   ;;  %v6341_v16 = vld [vmem:[%s6945_s12 + $0x5a0] ss:$16 sps:$4 sm:$0xff]  }
  0x95   : > { %3557 = vmatpush1.bf16.msra.mxu0 %v6257_v17  ;;  %3885 = vmatpush1.bf16.msra.mxu1 %v6260_v18  ;;  %v6344_v17 = vld [vmem:[%s6945_s12 + $0x5a8] ss:$16 sps:$4 sm:$0xff]   ;;  %v6349_v18 = vld [vmem:[%s6945_s12 + $0x5c4] ss:$16 sps:$4 sm:$0xff]  }
  0x96   : > { %3567 = vmatprep.subr.bf16.mxu0 %v6265_v19  ;;  %3895 = vmatprep.subr.bf16.mxu1 %v6268_v20  ;;  %v6352_v19 = vld [vmem:[%s6945_s12 + $0x5cc] ss:$16 sps:$4 sm:$0xff]   ;;  %v330_v20 = vcombine.high %v7095_v24, %v7095_v24  ;;  %v6353_v24 = vld [vmem:[%s6945_s12 + $0x5e0] ss:$16 sps:$4 sm:$0xff]  }
  0x98   : > { %3559 = vmatmul.mubr.bf16.vlgmr.msra.gmra.mrb[0].mxu0 %v399_v22  ;;  %3887 = vmatmul.mubr.bf16.vlgmr.msra.gmra.mrb[0].mxu1 %v399_v22  ;;  %v6350_v22 = vld [vmem:[%s6945_s12 + $0x5c8] ss:$16 sps:$4 sm:$0xff]  }
  0x99   : > { %3568 = vmatpush1.bf16.msra.mxu0 %v6263_v21  ;;  %3896 = vmatpush1.bf16.msra.mxu1 %v6266_v23  ;;  %v6347_v21 = vld [vmem:[%s6945_s12 + $0x5c0] ss:$16 sps:$4 sm:$0xff]   ;;  %v6355_v23 = vld [vmem:[%s6945_s12 + $0x5e4] ss:$16 sps:$4 sm:$0xff]  }
  0x9a   : > { %3569 = vmatprep.subr.bf16.mxu0 %v6271_v25  ;;  %3897 = vmatprep.subr.bf16.mxu1 %v6274_v26  ;;  %v6358_v25 = vld [vmem:[%s6945_s12 + $0x5ec] ss:$16 sps:$4 sm:$0xff]   ;;  %v7164_v26 = vrot.slane %v330_v20, %v6995_v50  ;;  %v6434_v20 = vld [vmem:[%s6945_s12 + $0x788] ss:$16 sps:$4 sm:$0xff]  }
  0x9b   : > { %3599 = vmatprep.mubr.bf16.mxu0 %v402_v32  ;;  %3927 = vmatprep.mubr.bf16.mxu1 %v402_v32  ;;  %v6359_v32 = vld [vmem:[%s6945_s12 + $0x600] ss:$16 sps:$4 sm:$0xff]  }
  0x9d   : > { %3570 = vmatpush1.bf16.msra.mxu0 %v6269_v28  ;;  %3898 = vmatpush1.bf16.msra.mxu1 %v6272_v29  ;;  %v6361_v28 = vld [vmem:[%s6945_s12 + $0x604] ss:$16 sps:$4 sm:$0xff]   ;;  %v6364_v29 = vld [vmem:[%s6945_s12 + $0x60c] ss:$16 sps:$4 sm:$0xff]  }
  0x9e   : > { %3571 = vmatprep.subr.bf16.mxu0 %v6277_v30  ;;  %3899 = vmatprep.subr.bf16.mxu1 %v6280_v31  ;;  %v346_v30 = vcombine.high %v7164_v26, %v7164_v26  ;;  %v401_v31 = vpack.c.bf16 %v7101_v27, %v7101_v27  ;;  %v6365_v27 = vld [vmem:[%s6945_s12 + $0x620] ss:$16 sps:$4 sm:$0xff]  }
  0xa1   : > { %3572 = vmatpush1.bf16.msra.mxu0 %v6275_v33  ;;  %3900 = vmatpush1.bf16.msra.mxu1 %v6278_v34  ;;  %v6362_v33 = vld [vmem:[%s6945_s12 + $0x608] ss:$16 sps:$4 sm:$0xff]   ;;  %v6367_v34 = vld [vmem:[%s6945_s12 + $0x624] ss:$16 sps:$4 sm:$0xff]  }
  0xa2   : > { %3573 = vmatprep.subr.bf16.mxu0 %v6283_v35  ;;  %3901 = vmatprep.subr.bf16.mxu1 %v6286_v36  ;;  %v6370_v35 = vld [vmem:[%s6945_s12 + $0x62c] ss:$16 sps:$4 sm:$0xff]   ;;  %v404_v36 = vpack.c.bf16 %v346_v30, %v346_v30  ;;  %v6446_v30 = vld [vmem:[%s6945_s12 + $0x7c8] ss:$16 sps:$4 sm:$0xff]  }
  0xa5   : > { %3574 = vmatpush1.bf16.msra.mxu0 %v6281_v37  ;;  %3902 = vmatpush1.bf16.msra.mxu1 %v6284_v38  ;;  %v6368_v37 = vld [vmem:[%s6945_s12 + $0x628] ss:$16 sps:$4 sm:$0xff]   ;;  %v6373_v38 = vld [vmem:[%s6945_s12 + $0x644] ss:$16 sps:$4 sm:$0xff]  }
  0xa6   : > { %3575 = vmatprep.subr.bf16.mxu0 %v6289_v39  ;;  %3903 = vmatprep.subr.bf16.mxu1 %v6292_v40  ;;  %v6376_v39 = vld [vmem:[%s6945_s12 + $0x64c] ss:$16 sps:$4 sm:$0xff]   ;;  %v6371_v40 = vld [vmem:[%s6945_s12 + $0x640] ss:$16 sps:$4 sm:$0xff]  }
  0xa9   : > { %3576 = vmatpush1.bf16.msra.mxu0 %v6287_v41  ;;  %3904 = vmatpush1.bf16.msra.mxu1 %v6290_v42  ;;  %v6374_v41 = vld [vmem:[%s6945_s12 + $0x648] ss:$16 sps:$4 sm:$0xff]   ;;  %v6379_v42 = vld [vmem:[%s6945_s12 + $0x664] ss:$16 sps:$4 sm:$0xff]  }
  0xaa   : > { %3577 = vmatprep.subr.bf16.mxu0 %v6295_v43  ;;  %3905 = vmatprep.subr.bf16.mxu1 %v6298_v45  ;;  %v6382_v43 = vld [vmem:[%s6945_s12 + $0x66c] ss:$16 sps:$4 sm:$0xff]   ;;  %v6377_v45 = vld [vmem:[%s6945_s12 + $0x660] ss:$16 sps:$4 sm:$0xff]  }
  0xad   : > { %3578 = vmatpush1.bf16.msra.mxu0 %v6293_v46  ;;  %3906 = vmatpush1.bf16.msra.mxu1 %v6296_v47  ;;  %v6380_v46 = vld [vmem:[%s6945_s12 + $0x668] ss:$16 sps:$4 sm:$0xff]   ;;  %v6385_v47 = vld [vmem:[%s6945_s12 + $0x684] ss:$16 sps:$4 sm:$0xff]  }
  0xae   : > { %3579 = vmatprep.subr.bf16.mxu0 %v6301_v48  ;;  %3907 = vmatprep.subr.bf16.mxu1 %v6304_v49  ;;  %v6388_v48 = vld [vmem:[%s6945_s12 + $0x68c] ss:$16 sps:$4 sm:$0xff]   ;;  %v6383_v49 = vld [vmem:[%s6945_s12 + $0x680] ss:$16 sps:$4 sm:$0xff]  }
  0xb1   : > { %3580 = vmatpush1.bf16.msra.mxu0 %v6299_v51  ;;  %3908 = vmatpush1.bf16.msra.mxu1 %v6302_v52  ;;  %v6386_v51 = vld [vmem:[%s6945_s12 + $0x688] ss:$16 sps:$4 sm:$0xff]   ;;  %v6391_v52 = vld [vmem:[%s6945_s12 + $0x6a4] ss:$16 sps:$4 sm:$0xff]  }
  0xb2   : > { %3581 = vmatprep.subr.bf16.mxu0 %v6307_v53  ;;  %3909 = vmatprep.subr.bf16.mxu1 %v6310_v54  ;;  %v6394_v53 = vld [vmem:[%s6945_s12 + $0x6ac] ss:$16 sps:$4 sm:$0xff]   ;;  %v6389_v54 = vld [vmem:[%s6945_s12 + $0x6a0] ss:$16 sps:$4 sm:$0xff]  }
  0xb5   : > { %3582 = vmatpush1.bf16.msra.mxu0 %v6305_v55  ;;  %3910 = vmatpush1.bf16.msra.mxu1 %v6308_v56  ;;  %v6392_v55 = vld [vmem:[%s6945_s12 + $0x6a8] ss:$16 sps:$4 sm:$0xff]   ;;  %v6397_v56 = vld [vmem:[%s6945_s12 + $0x6c4] ss:$16 sps:$4 sm:$0xff]  }
  0xb6   : > { %3583 = vmatprep.subr.bf16.mxu0 %v6313_v57  ;;  %3911 = vmatprep.subr.bf16.mxu1 %v6316_v58  ;;  %v6400_v57 = vld [vmem:[%s6945_s12 + $0x6cc] ss:$16 sps:$4 sm:$0xff]   ;;  %v6395_v58 = vld [vmem:[%s6945_s12 + $0x6c0] ss:$16 sps:$4 sm:$0xff]  }
  0xb9   : > { %3584 = vmatpush1.bf16.msra.mxu0 %v6311_v59  ;;  %3912 = vmatpush1.bf16.msra.mxu1 %v6314_v60  ;;  %v6398_v59 = vld [vmem:[%s6945_s12 + $0x6c8] ss:$16 sps:$4 sm:$0xff]   ;;  %v6403_v60 = vld [vmem:[%s6945_s12 + $0x6e4] ss:$16 sps:$4 sm:$0xff]  }
  0xba   : > { %3585 = vmatprep.subr.bf16.mxu0 %v6319_v61  ;;  %3913 = vmatprep.subr.bf16.mxu1 %v6322_v62  ;;  %v6406_v61 = vld [vmem:[%s6945_s12 + $0x6ec] ss:$16 sps:$4 sm:$0xff]   ;;  %v6401_v62 = vld [vmem:[%s6945_s12 + $0x6e0] ss:$16 sps:$4 sm:$0xff]  }
  0xbd   : > { %3586 = vmatpush1.bf16.msra.mxu0 %v6317_v63  ;;  %3914 = vmatpush1.bf16.msra.mxu1 %v6320_v0  ;;  %v6404_v63 = vld [vmem:[%s6945_s12 + $0x6e8] ss:$16 sps:$4 sm:$0xff]   ;;  %v6409_v0 = vld [vmem:[%s6945_s12 + $0x704] ss:$16 sps:$4 sm:$0xff]  }
  0xbe   : > { %3587 = vmatprep.subr.bf16.mxu0 %v6325_v1  ;;  %3915 = vmatprep.subr.bf16.mxu1 %v6328_v2  ;;  %v6412_v1 = vld [vmem:[%s6945_s12 + $0x70c] ss:$16 sps:$4 sm:$0xff]   ;;  %v6407_v2 = vld [vmem:[%s6945_s12 + $0x700] ss:$16 sps:$4 sm:$0xff]  }
  0xc1   : > { %3588 = vmatpush1.bf16.msra.mxu0 %v6323_v3  ;;  %3916 = vmatpush1.bf16.msra.mxu1 %v6326_v4  ;;  %v6410_v3 = vld [vmem:[%s6945_s12 + $0x708] ss:$16 sps:$4 sm:$0xff]   ;;  %v6415_v4 = vld [vmem:[%s6945_s12 + $0x724] ss:$16 sps:$4 sm:$0xff]  }
  0xc2   : > { %3589 = vmatprep.subr.bf16.mxu0 %v6331_v5  ;;  %3917 = vmatprep.subr.bf16.mxu1 %v6334_v6  ;;  %v6418_v5 = vld [vmem:[%s6945_s12 + $0x72c] ss:$16 sps:$4 sm:$0xff]   ;;  %v6413_v6 = vld [vmem:[%s6945_s12 + $0x720] ss:$16 sps:$4 sm:$0xff]  }
  0xc5   : > { %3590 = vmatpush1.bf16.msra.mxu0 %v6329_v7  ;;  %3918 = vmatpush1.bf16.msra.mxu1 %v6332_v8  ;;  %v6416_v7 = vld [vmem:[%s6945_s12 + $0x728] ss:$16 sps:$4 sm:$0xff]   ;;  %v6421_v8 = vld [vmem:[%s6945_s12 + $0x744] ss:$16 sps:$4 sm:$0xff]  }
  0xc6   : > { %3591 = vmatprep.subr.bf16.mxu0 %v6337_v9  ;;  %3919 = vmatprep.subr.bf16.mxu1 %v6340_v11  ;;  %v6424_v9 = vld [vmem:[%s6945_s12 + $0x74c] ss:$16 sps:$4 sm:$0xff]   ;;  %v6419_v11 = vld [vmem:[%s6945_s12 + $0x740] ss:$16 sps:$4 sm:$0xff]  }
  0xc9   : > { %3592 = vmatpush1.bf16.msra.mxu0 %v6335_v12  ;;  %3920 = vmatpush1.bf16.msra.mxu1 %v6338_v13  ;;  %v6422_v12 = vld [vmem:[%s6945_s12 + $0x748] ss:$16 sps:$4 sm:$0xff]   ;;  %v6427_v13 = vld [vmem:[%s6945_s12 + $0x764] ss:$16 sps:$4 sm:$0xff]  }
  0xca   : > { %3593 = vmatprep.subr.bf16.mxu0 %v6343_v14  ;;  %3921 = vmatprep.subr.bf16.mxu1 %v6346_v15  ;;  %v6430_v14 = vld [vmem:[%s6945_s12 + $0x76c] ss:$16 sps:$4 sm:$0xff]   ;;  %v6425_v15 = vld [vmem:[%s6945_s12 + $0x760] ss:$16 sps:$4 sm:$0xff]  }
  0xcd   : > { %3594 = vmatpush1.bf16.msra.mxu0 %v6341_v16  ;;  %3922 = vmatpush1.bf16.msra.mxu1 %v6344_v17  ;;  %v6428_v16 = vld [vmem:[%s6945_s12 + $0x768] ss:$16 sps:$4 sm:$0xff]   ;;  %v6433_v17 = vld [vmem:[%s6945_s12 + $0x784] ss:$16 sps:$4 sm:$0xff]  }
  0xce   : > { %3595 = vmatprep.subr.bf16.mxu0 %v6349_v18  ;;  %3923 = vmatprep.subr.bf16.mxu1 %v6352_v19  ;;  %v6436_v18 = vld [vmem:[%s6945_s12 + $0x78c] ss:$16 sps:$4 sm:$0xff]   ;;  %v6431_v19 = vld [vmem:[%s6945_s12 + $0x780] ss:$16 sps:$4 sm:$0xff]  }
  0xd1   : > { %3596 = vmatpush1.bf16.msra.mxu0 %v6347_v21  ;;  %3924 = vmatpush1.bf16.msra.mxu1 %v6350_v22  ;;  %v6439_v21 = vld [vmem:[%s6945_s12 + $0x7a4] ss:$16 sps:$4 sm:$0xff]   ;;  %v6442_v22 = vld [vmem:[%s6945_s12 + $0x7ac] ss:$16 sps:$4 sm:$0xff]  }
  0xd2   : > { %3597 = vmatprep.subr.bf16.mxu0 %v6355_v23  ;;  %3925 = vmatprep.subr.bf16.mxu1 %v6358_v25  ;;  %v6437_v23 = vld [vmem:[%s6945_s12 + $0x7a0] ss:$16 sps:$4 sm:$0xff]   ;;  %v6440_v25 = vld [vmem:[%s6945_s12 + $0x7a8] ss:$16 sps:$4 sm:$0xff]  }
  0xd5   : > { %3598 = vmatpush1.bf16.msra.mxu0 %v6353_v24  ;;  %3926 = vmatpush1.bf16.msra.mxu1 %v6356_v10  ;;  %v6445_v24 = vld [vmem:[%s6945_s12 + $0x7c4] ss:$16 sps:$4 sm:$0xff]   ;;  %v6448_v10 = vld [vmem:[%s6945_s12 + $0x7cc] ss:$16 sps:$4 sm:$0xff]  }
  0xd6   : > { %3608 = vmatprep.subr.bf16.mxu0 %v6361_v28  ;;  %3936 = vmatprep.subr.bf16.mxu1 %v6364_v29  ;;  %v6443_v28 = vld [vmem:[%s6945_s12 + $0x7c0] ss:$16 sps:$4 sm:$0xff]  }
  0xd7   : > { %v7232_v29 = vld [vmem:[%s6940_s8 + $0x10] sm:$0xff] }
  0xd8   : > { %3600 = vmatmul.mubr.bf16.vlgmr.msra.gmra.mrb[0].mxu0 %v401_v31  ;;  %3928 = vmatmul.mubr.bf16.vlgmr.msra.gmra.mrb[0].mxu1 %v401_v31  ;;  %v6451_v31 = vld [vmem:[%s6945_s12 + $0x7e4] ss:$16 sps:$4 sm:$0xff]  }
  0xd9   : > { %3609 = vmatpush1.bf16.msra.mxu0 %v6359_v32  ;;  %3937 = vmatpush1.bf16.msra.mxu1 %v6362_v33  ;;  %v6454_v32 = vld [vmem:[%s6945_s12 + $0x7ec] ss:$16 sps:$4 sm:$0xff]   ;;  %v7239_v33 = vrot.slane %v7232_v29, %v6995_v50 }
  0xda   : > { %3610 = vmatprep.subr.bf16.mxu0 %v6367_v34  ;;  %3938 = vmatprep.subr.bf16.mxu1 %v6370_v35  ;;  %v6449_v34 = vld [vmem:[%s6945_s12 + $0x7e0] ss:$16 sps:$4 sm:$0xff]   ;;  %v6452_v35 = vld [vmem:[%s6945_s12 + $0x7e8] ss:$16 sps:$4 sm:$0xff]  }
  0xdb   : > { %3640 = vmatprep.mubr.bf16.mxu0 %v404_v36  ;;  %3968 = vmatprep.mubr.bf16.mxu1 %v404_v36  ;;  %v6458_v36 = vld [vmem:[%s6945_s12 + $0x804] ss:$16 sps:$4 sm:$0xff]  }
  0xdd   : > { %3611 = vmatpush1.bf16.msra.mxu0 %v6365_v27  ;;  %3939 = vmatpush1.bf16.msra.mxu1 %v6368_v37  ;;  %v6461_v27 = vld [vmem:[%s6945_s12 + $0x80c] ss:$16 sps:$4 sm:$0xff]   ;;  %v362_v37 = vcombine.high %v7239_v33, %v7239_v33 }
  0xde   : > { %3612 = vmatprep.subr.bf16.mxu0 %v6373_v38  ;;  %3940 = vmatprep.subr.bf16.mxu1 %v6376_v39  ;;  %v6456_v38 = vld [vmem:[%s6945_s12 + $0x800] ss:$16 sps:$4 sm:$0xff]   ;;  %v403_v39 = vpack.c.bf16 %v7164_v26, %v7164_v26  ;;  %v6470_v26 = vld [vmem:[%s6945_s12 + $0x844] ss:$16 sps:$4 sm:$0xff]  }
  0xe1   : > { %3613 = vmatpush1.bf16.msra.mxu0 %v6371_v40  ;;  %3941 = vmatpush1.bf16.msra.mxu1 %v6374_v41  ;;  %v6459_v40 = vld [vmem:[%s6945_s12 + $0x808] ss:$16 sps:$4 sm:$0xff]   ;;  %v6464_v41 = vld [vmem:[%s6945_s12 + $0x824] ss:$16 sps:$4 sm:$0xff]  }
  0xe2   : > { %3614 = vmatprep.subr.bf16.mxu0 %v6379_v42  ;;  %3942 = vmatprep.subr.bf16.mxu1 %v6382_v43  ;;  %v6467_v42 = vld [vmem:[%s6945_s12 + $0x82c] ss:$16 sps:$4 sm:$0xff]   ;;  %v406_v43 = vpack.c.bf16 %v362_v37, %v362_v37  ;;  %v6540_v37 = vld [vmem:[%s6945_s12 + $0x9c0] ss:$16 sps:$4 sm:$0xff]  }
  0xe5   : > { %3615 = vmatpush1.bf16.msra.mxu0 %v6377_v45  ;;  %3943 = vmatpush1.bf16.msra.mxu1 %v6380_v46  ;;  %v6462_v45 = vld [vmem:[%s6945_s12 + $0x820] ss:$16 sps:$4 sm:$0xff]   ;;  %v6465_v46 = vld [vmem:[%s6945_s12 + $0x828] ss:$16 sps:$4 sm:$0xff]  }
  0xe6   : > { %3616 = vmatprep.subr.bf16.mxu0 %v6385_v47  ;;  %3944 = vmatprep.subr.bf16.mxu1 %v6388_v48  ;;  %v6473_v47 = vld [vmem:[%s6945_s12 + $0x84c] ss:$16 sps:$4 sm:$0xff]   ;;  %v6468_v48 = vld [vmem:[%s6945_s12 + $0x840] ss:$16 sps:$4 sm:$0xff]  }
  0xe9   : > { %3617 = vmatpush1.bf16.msra.mxu0 %v6383_v49  ;;  %3945 = vmatpush1.bf16.msra.mxu1 %v6386_v51  ;;  %v6471_v49 = vld [vmem:[%s6945_s12 + $0x848] ss:$16 sps:$4 sm:$0xff]   ;;  %v6476_v51 = vld [vmem:[%s6945_s12 + $0x864] ss:$16 sps:$4 sm:$0xff]  }
  0xea   : > { %3618 = vmatprep.subr.bf16.mxu0 %v6391_v52  ;;  %3946 = vmatprep.subr.bf16.mxu1 %v6394_v53  ;;  %v6479_v52 = vld [vmem:[%s6945_s12 + $0x86c] ss:$16 sps:$4 sm:$0xff]   ;;  %v6474_v53 = vld [vmem:[%s6945_s12 + $0x860] ss:$16 sps:$4 sm:$0xff]  }
  0xed   : > { %3619 = vmatpush1.bf16.msra.mxu0 %v6389_v54  ;;  %3947 = vmatpush1.bf16.msra.mxu1 %v6392_v55  ;;  %v6477_v54 = vld [vmem:[%s6945_s12 + $0x868] ss:$16 sps:$4 sm:$0xff]   ;;  %v6482_v55 = vld [vmem:[%s6945_s12 + $0x884] ss:$16 sps:$4 sm:$0xff]  }
  0xee   : > { %3620 = vmatprep.subr.bf16.mxu0 %v6397_v56  ;;  %3948 = vmatprep.subr.bf16.mxu1 %v6400_v57  ;;  %v6485_v56 = vld [vmem:[%s6945_s12 + $0x88c] ss:$16 sps:$4 sm:$0xff]   ;;  %v6480_v57 = vld [vmem:[%s6945_s12 + $0x880] ss:$16 sps:$4 sm:$0xff]  }
  0xf1   : > { %3621 = vmatpush1.bf16.msra.mxu0 %v6395_v58  ;;  %3949 = vmatpush1.bf16.msra.mxu1 %v6398_v59  ;;  %v6483_v58 = vld [vmem:[%s6945_s12 + $0x888] ss:$16 sps:$4 sm:$0xff]   ;;  %v6488_v59 = vld [vmem:[%s6945_s12 + $0x8a4] ss:$16 sps:$4 sm:$0xff]  }
  0xf2   : > { %3622 = vmatprep.subr.bf16.mxu0 %v6403_v60  ;;  %3950 = vmatprep.subr.bf16.mxu1 %v6406_v61  ;;  %v6491_v60 = vld [vmem:[%s6945_s12 + $0x8ac] ss:$16 sps:$4 sm:$0xff]   ;;  %v6486_v61 = vld [vmem:[%s6945_s12 + $0x8a0] ss:$16 sps:$4 sm:$0xff]  }
  0xf5   : > { %3623 = vmatpush1.bf16.msra.mxu0 %v6401_v62  ;;  %3951 = vmatpush1.bf16.msra.mxu1 %v6404_v63  ;;  %v6489_v62 = vld [vmem:[%s6945_s12 + $0x8a8] ss:$16 sps:$4 sm:$0xff]   ;;  %v6494_v63 = vld [vmem:[%s6945_s12 + $0x8c4] ss:$16 sps:$4 sm:$0xff]  }
  0xf6   : > { %3624 = vmatprep.subr.bf16.mxu0 %v6409_v0  ;;  %3952 = vmatprep.subr.bf16.mxu1 %v6412_v1  ;;  %v6497_v0 = vld [vmem:[%s6945_s12 + $0x8cc] ss:$16 sps:$4 sm:$0xff]   ;;  %v6492_v1 = vld [vmem:[%s6945_s12 + $0x8c0] ss:$16 sps:$4 sm:$0xff]  }
  0xf9   : > { %3625 = vmatpush1.bf16.msra.mxu0 %v6407_v2  ;;  %3953 = vmatpush1.bf16.msra.mxu1 %v6410_v3  ;;  %v6495_v2 = vld [vmem:[%s6945_s12 + $0x8c8] ss:$16 sps:$4 sm:$0xff]   ;;  %v6500_v3 = vld [vmem:[%s6945_s12 + $0x8e4] ss:$16 sps:$4 sm:$0xff]  }
  0xfa   : > { %3626 = vmatprep.subr.bf16.mxu0 %v6415_v4  ;;  %3954 = vmatprep.subr.bf16.mxu1 %v6418_v5  ;;  %v6503_v4 = vld [vmem:[%s6945_s12 + $0x8ec] ss:$16 sps:$4 sm:$0xff]   ;;  %v6498_v5 = vld [vmem:[%s6945_s12 + $0x8e0] ss:$16 sps:$4 sm:$0xff]  }
  0xfd   : > { %3627 = vmatpush1.bf16.msra.mxu0 %v6413_v6  ;;  %3955 = vmatpush1.bf16.msra.mxu1 %v6416_v7  ;;  %v6501_v6 = vld [vmem:[%s6945_s12 + $0x8e8] ss:$16 sps:$4 sm:$0xff]   ;;  %v6506_v7 = vld [vmem:[%s6945_s12 + $0x904] ss:$16 sps:$4 sm:$0xff]  }
  0xfe   : > { %3628 = vmatprep.subr.bf16.mxu0 %v6421_v8  ;;  %3956 = vmatprep.subr.bf16.mxu1 %v6424_v9  ;;  %v6509_v8 = vld [vmem:[%s6945_s12 + $0x90c] ss:$16 sps:$4 sm:$0xff]   ;;  %v6504_v9 = vld [vmem:[%s6945_s12 + $0x900] ss:$16 sps:$4 sm:$0xff]  }
 0x101   : > { %3629 = vmatpush1.bf16.msra.mxu0 %v6419_v11  ;;  %3957 = vmatpush1.bf16.msra.mxu1 %v6422_v12  ;;  %v6507_v11 = vld [vmem:[%s6945_s12 + $0x908] ss:$16 sps:$4 sm:$0xff]   ;;  %v6512_v12 = vld [vmem:[%s6945_s12 + $0x924] ss:$16 sps:$4 sm:$0xff]  }
 0x102   : > { %3630 = vmatprep.subr.bf16.mxu0 %v6427_v13  ;;  %3958 = vmatprep.subr.bf16.mxu1 %v6430_v14  ;;  %v6515_v13 = vld [vmem:[%s6945_s12 + $0x92c] ss:$16 sps:$4 sm:$0xff]   ;;  %v6510_v14 = vld [vmem:[%s6945_s12 + $0x920] ss:$16 sps:$4 sm:$0xff]  }
 0x105   : > { %3631 = vmatpush1.bf16.msra.mxu0 %v6425_v15  ;;  %3959 = vmatpush1.bf16.msra.mxu1 %v6428_v16  ;;  %v6513_v15 = vld [vmem:[%s6945_s12 + $0x928] ss:$16 sps:$4 sm:$0xff]   ;;  %v6518_v16 = vld [vmem:[%s6945_s12 + $0x944] ss:$16 sps:$4 sm:$0xff]  }
 0x106   : > { %3632 = vmatprep.subr.bf16.mxu0 %v6433_v17  ;;  %3960 = vmatprep.subr.bf16.mxu1 %v6436_v18  ;;  %v6521_v17 = vld [vmem:[%s6945_s12 + $0x94c] ss:$16 sps:$4 sm:$0xff]   ;;  %v6516_v18 = vld [vmem:[%s6945_s12 + $0x940] ss:$16 sps:$4 sm:$0xff]  }
 0x109   : > { %3633 = vmatpush1.bf16.msra.mxu0 %v6431_v19  ;;  %3961 = vmatpush1.bf16.msra.mxu1 %v6434_v20  ;;  %v6519_v19 = vld [vmem:[%s6945_s12 + $0x948] ss:$16 sps:$4 sm:$0xff]   ;;  %v6524_v20 = vld [vmem:[%s6945_s12 + $0x964] ss:$16 sps:$4 sm:$0xff]  }
 0x10a   : > { %3634 = vmatprep.subr.bf16.mxu0 %v6439_v21  ;;  %3962 = vmatprep.subr.bf16.mxu1 %v6442_v22  ;;  %v6527_v21 = vld [vmem:[%s6945_s12 + $0x96c] ss:$16 sps:$4 sm:$0xff]   ;;  %v6522_v22 = vld [vmem:[%s6945_s12 + $0x960] ss:$16 sps:$4 sm:$0xff]  }
 0x10d   : > { %3635 = vmatpush1.bf16.msra.mxu0 %v6437_v23  ;;  %3963 = vmatpush1.bf16.msra.mxu1 %v6440_v25  ;;  %v6525_v23 = vld [vmem:[%s6945_s12 + $0x968] ss:$16 sps:$4 sm:$0xff]   ;;  %v6530_v25 = vld [vmem:[%s6945_s12 + $0x984] ss:$16 sps:$4 sm:$0xff]  }
 0x10e   : > { %3636 = vmatprep.subr.bf16.mxu0 %v6445_v24  ;;  %3964 = vmatprep.subr.bf16.mxu1 %v6448_v10  ;;  %v6533_v24 = vld [vmem:[%s6945_s12 + $0x98c] ss:$16 sps:$4 sm:$0xff]   ;;  %v6528_v10 = vld [vmem:[%s6945_s12 + $0x980] ss:$16 sps:$4 sm:$0xff]  }
 0x111   : > { %3637 = vmatpush1.bf16.msra.mxu0 %v6443_v28  ;;  %3965 = vmatpush1.bf16.msra.mxu1 %v6446_v30  ;;  %v6531_v28 = vld [vmem:[%s6945_s12 + $0x988] ss:$16 sps:$4 sm:$0xff]   ;;  %v6536_v30 = vld [vmem:[%s6945_s12 + $0x9a4] ss:$16 sps:$4 sm:$0xff]  }
 0x112   : > { %3638 = vmatprep.subr.bf16.mxu0 %v6451_v31  ;;  %3966 = vmatprep.subr.bf16.mxu1 %v6454_v32  ;;  %v6539_v31 = vld [vmem:[%s6945_s12 + $0x9ac] ss:$16 sps:$4 sm:$0xff]   ;;  %v6534_v32 = vld [vmem:[%s6945_s12 + $0x9a0] ss:$16 sps:$4 sm:$0xff]  }
 0x115   : > { %3639 = vmatpush1.bf16.msra.mxu0 %v6449_v34  ;;  %3967 = vmatpush1.bf16.msra.mxu1 %v6452_v35  ;;  %v6537_v34 = vld [vmem:[%s6945_s12 + $0x9a8] ss:$16 sps:$4 sm:$0xff]   ;;  %v6542_v35 = vld [vmem:[%s6945_s12 + $0x9c4] ss:$16 sps:$4 sm:$0xff]  }
 0x116   : > { %3649 = vmatprep.subr.bf16.mxu0 %v6458_v36  ;;  %3977 = vmatprep.subr.bf16.mxu1 %v6461_v27  ;;  %v6545_v36 = vld [vmem:[%s6945_s12 + $0x9cc] ss:$16 sps:$4 sm:$0xff]   ;;  %v347_v27 = vcombine.high %v7232_v29, %v7232_v29  ;;  %v6546_v29 = vld [vmem:[%s6945_s12 + $0x9e0] ss:$16 sps:$4 sm:$0xff]  }
 0x118   : > { %3641 = vmatmul.mubr.bf16.vlgmr.msra.gmra.mrb[0].mxu0 %v403_v39  ;;  %3969 = vmatmul.mubr.bf16.vlgmr.msra.gmra.mrb[0].mxu1 %v403_v39  ;;  %v6548_v39 = vld [vmem:[%s6945_s12 + $0x9e4] ss:$16 sps:$4 sm:$0xff]  }
 0x119   : > { %3650 = vmatpush1.bf16.msra.mxu0 %v6456_v38  ;;  %3978 = vmatpush1.bf16.msra.mxu1 %v6459_v40  ;;  %v6543_v38 = vld [vmem:[%s6945_s12 + $0x9c8] ss:$16 sps:$4 sm:$0xff]   ;;  %v6551_v40 = vld [vmem:[%s6945_s12 + $0x9ec] ss:$16 sps:$4 sm:$0xff]  }
 0x11a   : > { %3651 = vmatprep.subr.bf16.mxu0 %v6464_v41  ;;  %3979 = vmatprep.subr.bf16.mxu1 %v6467_v42  ;;  %v7312_v41 = vrot.slane %v347_v27, %v6995_v50  ;;  %v6549_v42 = vld [vmem:[%s6945_s12 + $0x9e8] ss:$16 sps:$4 sm:$0xff]  }
 0x11b   : > { %3681 = vmatprep.mubr.bf16.mxu0 %v406_v43  ;;  %4009 = vmatprep.mubr.bf16.mxu1 %v406_v43  ;;  %v6554_v43 = vld [vmem:[%s6945_s12 + $0xa04] ss:$16 sps:$4 sm:$0xff]   ;;  %v6627_v27 = vld [vmem:[%s6945_s12 + $0xb88] ss:$16 sps:$4 sm:$0xff]  }
 0x11d   : > { %3652 = vmatpush1.bf16.msra.mxu0 %v6462_v45  ;;  %3980 = vmatpush1.bf16.msra.mxu1 %v6465_v46  ;;  %v6557_v45 = vld [vmem:[%s6945_s12 + $0xa0c] ss:$16 sps:$4 sm:$0xff]   ;;  %v363_v46 = vcombine.high %v7312_v41, %v7312_v41 }
 0x11e   : > { %3653 = vmatprep.subr.bf16.mxu0 %v6470_v26  ;;  %3981 = vmatprep.subr.bf16.mxu1 %v6473_v47  ;;  %v405_v26 = vpack.c.bf16 %v7239_v33, %v7239_v33  ;;  %v6552_v47 = vld [vmem:[%s6945_s12 + $0xa00] ss:$16 sps:$4 sm:$0xff]  }
 0x11f   : > { %v6558_v33 = vld [vmem:[%s6945_s12 + $0xa20] ss:$16 sps:$4 sm:$0xff]  }
 0x121   : > { %3654 = vmatpush1.bf16.msra.mxu0 %v6468_v48  ;;  %3982 = vmatpush1.bf16.msra.mxu1 %v6471_v49  ;;  %v6555_v48 = vld [vmem:[%s6945_s12 + $0xa08] ss:$16 sps:$4 sm:$0xff]   ;;  %v6560_v49 = vld [vmem:[%s6945_s12 + $0xa24] ss:$16 sps:$4 sm:$0xff]  }
 0x122   : > { %3655 = vmatprep.subr.bf16.mxu0 %v6476_v51  ;;  %3983 = vmatprep.subr.bf16.mxu1 %v6479_v52  ;;  %v6563_v51 = vld [vmem:[%s6945_s12 + $0xa2c] ss:$16 sps:$4 sm:$0xff]   ;;  %v408_v52 = vpack.c.bf16 %v363_v46, %v363_v46  ;;  %v6639_v46 = vld [vmem:[%s6945_s12 + $0xbc8] ss:$16 sps:$4 sm:$0xff]  }
 0x125   : > { %3656 = vmatpush1.bf16.msra.mxu0 %v6474_v53  ;;  %3984 = vmatpush1.bf16.msra.mxu1 %v6477_v54  ;;  %v6561_v53 = vld [vmem:[%s6945_s12 + $0xa28] ss:$16 sps:$4 sm:$0xff]   ;;  %v6566_v54 = vld [vmem:[%s6945_s12 + $0xa44] ss:$16 sps:$4 sm:$0xff]  }
 0x126   : > { %3657 = vmatprep.subr.bf16.mxu0 %v6482_v55  ;;  %3985 = vmatprep.subr.bf16.mxu1 %v6485_v56  ;;  %v6569_v55 = vld [vmem:[%s6945_s12 + $0xa4c] ss:$16 sps:$4 sm:$0xff]   ;;  %v6564_v56 = vld [vmem:[%s6945_s12 + $0xa40] ss:$16 sps:$4 sm:$0xff]  }
 0x129   : > { %3658 = vmatpush1.bf16.msra.mxu0 %v6480_v57  ;;  %3986 = vmatpush1.bf16.msra.mxu1 %v6483_v58  ;;  %v6567_v57 = vld [vmem:[%s6945_s12 + $0xa48] ss:$16 sps:$4 sm:$0xff]   ;;  %v6572_v58 = vld [vmem:[%s6945_s12 + $0xa64] ss:$16 sps:$4 sm:$0xff]  }
 0x12a   : > { %3659 = vmatprep.subr.bf16.mxu0 %v6488_v59  ;;  %3987 = vmatprep.subr.bf16.mxu1 %v6491_v60  ;;  %v6575_v59 = vld [vmem:[%s6945_s12 + $0xa6c] ss:$16 sps:$4 sm:$0xff]   ;;  %v6570_v60 = vld [vmem:[%s6945_s12 + $0xa60] ss:$16 sps:$4 sm:$0xff]  }
 0x12d   : > { %3660 = vmatpush1.bf16.msra.mxu0 %v6486_v61  ;;  %3988 = vmatpush1.bf16.msra.mxu1 %v6489_v62  ;;  %v6573_v61 = vld [vmem:[%s6945_s12 + $0xa68] ss:$16 sps:$4 sm:$0xff]   ;;  %v6578_v62 = vld [vmem:[%s6945_s12 + $0xa84] ss:$16 sps:$4 sm:$0xff]  }
 0x12e   : > { %3661 = vmatprep.subr.bf16.mxu0 %v6494_v63  ;;  %3989 = vmatprep.subr.bf16.mxu1 %v6497_v0  ;;  %v6581_v63 = vld [vmem:[%s6945_s12 + $0xa8c] ss:$16 sps:$4 sm:$0xff]   ;;  %v6576_v0 = vld [vmem:[%s6945_s12 + $0xa80] ss:$16 sps:$4 sm:$0xff]  }
 0x131   : > { %3662 = vmatpush1.bf16.msra.mxu0 %v6492_v1  ;;  %3990 = vmatpush1.bf16.msra.mxu1 %v6495_v2  ;;  %v6579_v1 = vld [vmem:[%s6945_s12 + $0xa88] ss:$16 sps:$4 sm:$0xff]   ;;  %v6584_v2 = vld [vmem:[%s6945_s12 + $0xaa4] ss:$16 sps:$4 sm:$0xff]  }
 0x132   : > { %3663 = vmatprep.subr.bf16.mxu0 %v6500_v3  ;;  %3991 = vmatprep.subr.bf16.mxu1 %v6503_v4  ;;  %v6587_v3 = vld [vmem:[%s6945_s12 + $0xaac] ss:$16 sps:$4 sm:$0xff]   ;;  %v6582_v4 = vld [vmem:[%s6945_s12 + $0xaa0] ss:$16 sps:$4 sm:$0xff]  }
 0x135   : > { %3664 = vmatpush1.bf16.msra.mxu0 %v6498_v5  ;;  %3992 = vmatpush1.bf16.msra.mxu1 %v6501_v6  ;;  %v6585_v5 = vld [vmem:[%s6945_s12 + $0xaa8] ss:$16 sps:$4 sm:$0xff]   ;;  %v6590_v6 = vld [vmem:[%s6945_s12 + $0xac4] ss:$16 sps:$4 sm:$0xff]  }
 0x136   : > { %3665 = vmatprep.subr.bf16.mxu0 %v6506_v7  ;;  %3993 = vmatprep.subr.bf16.mxu1 %v6509_v8  ;;  %v6593_v7 = vld [vmem:[%s6945_s12 + $0xacc] ss:$16 sps:$4 sm:$0xff]   ;;  %v6588_v8 = vld [vmem:[%s6945_s12 + $0xac0] ss:$16 sps:$4 sm:$0xff]  }
 0x139   : > { %3666 = vmatpush1.bf16.msra.mxu0 %v6504_v9  ;;  %3994 = vmatpush1.bf16.msra.mxu1 %v6507_v11  ;;  %v6591_v9 = vld [vmem:[%s6945_s12 + $0xac8] ss:$16 sps:$4 sm:$0xff]   ;;  %v6596_v11 = vld [vmem:[%s6945_s12 + $0xae4] ss:$16 sps:$4 sm:$0xff]  }
 0x13a   : > { %3667 = vmatprep.subr.bf16.mxu0 %v6512_v12  ;;  %3995 = vmatprep.subr.bf16.mxu1 %v6515_v13  ;;  %v6599_v12 = vld [vmem:[%s6945_s12 + $0xaec] ss:$16 sps:$4 sm:$0xff]   ;;  %v6594_v13 = vld [vmem:[%s6945_s12 + $0xae0] ss:$16 sps:$4 sm:$0xff]  }
 0x13d   : > { %3668 = vmatpush1.bf16.msra.mxu0 %v6510_v14  ;;  %3996 = vmatpush1.bf16.msra.mxu1 %v6513_v15  ;;  %v6597_v14 = vld [vmem:[%s6945_s12 + $0xae8] ss:$16 sps:$4 sm:$0xff]   ;;  %v6602_v15 = vld [vmem:[%s6945_s12 + $0xb04] ss:$16 sps:$4 sm:$0xff]  }
 0x13e   : > { %3669 = vmatprep.subr.bf16.mxu0 %v6518_v16  ;;  %3997 = vmatprep.subr.bf16.mxu1 %v6521_v17  ;;  %v6605_v16 = vld [vmem:[%s6945_s12 + $0xb0c] ss:$16 sps:$4 sm:$0xff]   ;;  %v6600_v17 = vld [vmem:[%s6945_s12 + $0xb00] ss:$16 sps:$4 sm:$0xff]  }
 0x141   : > { %3670 = vmatpush1.bf16.msra.mxu0 %v6516_v18  ;;  %3998 = vmatpush1.bf16.msra.mxu1 %v6519_v19  ;;  %v6603_v18 = vld [vmem:[%s6945_s12 + $0xb08] ss:$16 sps:$4 sm:$0xff]   ;;  %v6608_v19 = vld [vmem:[%s6945_s12 + $0xb24] ss:$16 sps:$4 sm:$0xff]  }
 0x142   : > { %3671 = vmatprep.subr.bf16.mxu0 %v6524_v20  ;;  %3999 = vmatprep.subr.bf16.mxu1 %v6527_v21  ;;  %v6611_v20 = vld [vmem:[%s6945_s12 + $0xb2c] ss:$16 sps:$4 sm:$0xff]   ;;  %v6606_v21 = vld [vmem:[%s6945_s12 + $0xb20] ss:$16 sps:$4 sm:$0xff]  }
 0x145   : > { %3672 = vmatpush1.bf16.msra.mxu0 %v6522_v22  ;;  %4000 = vmatpush1.bf16.msra.mxu1 %v6525_v23  ;;  %v6609_v22 = vld [vmem:[%s6945_s12 + $0xb28] ss:$16 sps:$4 sm:$0xff]   ;;  %v6614_v23 = vld [vmem:[%s6945_s12 + $0xb44] ss:$16 sps:$4 sm:$0xff]  }
 0x146   : > { %3673 = vmatprep.subr.bf16.mxu0 %v6530_v25  ;;  %4001 = vmatprep.subr.bf16.mxu1 %v6533_v24  ;;  %v6617_v25 = vld [vmem:[%s6945_s12 + $0xb4c] ss:$16 sps:$4 sm:$0xff]   ;;  %v6612_v24 = vld [vmem:[%s6945_s12 + $0xb40] ss:$16 sps:$4 sm:$0xff]  }
 0x149   : > { %3674 = vmatpush1.bf16.msra.mxu0 %v6528_v10  ;;  %4002 = vmatpush1.bf16.msra.mxu1 %v6531_v28  ;;  %v6615_v10 = vld [vmem:[%s6945_s12 + $0xb48] ss:$16 sps:$4 sm:$0xff]   ;;  %v6620_v28 = vld [vmem:[%s6945_s12 + $0xb64] ss:$16 sps:$4 sm:$0xff]  }
 0x14a   : > { %3675 = vmatprep.subr.bf16.mxu0 %v6536_v30  ;;  %4003 = vmatprep.subr.bf16.mxu1 %v6539_v31  ;;  %v6623_v30 = vld [vmem:[%s6945_s12 + $0xb6c] ss:$16 sps:$4 sm:$0xff]   ;;  %v6618_v31 = vld [vmem:[%s6945_s12 + $0xb60] ss:$16 sps:$4 sm:$0xff]  }
 0x14d   : > { %3676 = vmatpush1.bf16.msra.mxu0 %v6534_v32  ;;  %4004 = vmatpush1.bf16.msra.mxu1 %v6537_v34  ;;  %v6621_v32 = vld [vmem:[%s6945_s12 + $0xb68] ss:$16 sps:$4 sm:$0xff]   ;;  %v6626_v34 = vld [vmem:[%s6945_s12 + $0xb84] ss:$16 sps:$4 sm:$0xff]  }
 0x14e   : > { %3677 = vmatprep.subr.bf16.mxu0 %v6542_v35  ;;  %4005 = vmatprep.subr.bf16.mxu1 %v6545_v36  ;;  %v6629_v35 = vld [vmem:[%s6945_s12 + $0xb8c] ss:$16 sps:$4 sm:$0xff]   ;;  %v6624_v36 = vld [vmem:[%s6945_s12 + $0xb80] ss:$16 sps:$4 sm:$0xff]  }
 0x151   : > { %3678 = vmatpush1.bf16.msra.mxu0 %v6540_v37  ;;  %4006 = vmatpush1.bf16.msra.mxu1 %v6543_v38  ;;  %v6632_v37 = vld [vmem:[%s6945_s12 + $0xba4] ss:$16 sps:$4 sm:$0xff]   ;;  %v6635_v38 = vld [vmem:[%s6945_s12 + $0xbac] ss:$16 sps:$4 sm:$0xff]  }
 0x152   : > { %3679 = vmatprep.subr.bf16.mxu0 %v6548_v39  ;;  %4007 = vmatprep.subr.bf16.mxu1 %v6551_v40  ;;  %v6630_v39 = vld [vmem:[%s6945_s12 + $0xba0] ss:$16 sps:$4 sm:$0xff]   ;;  %v6633_v40 = vld [vmem:[%s6945_s12 + $0xba8] ss:$16 sps:$4 sm:$0xff]  }
 0x155   : > { %3680 = vmatpush1.bf16.msra.mxu0 %v6546_v29  ;;  %4008 = vmatpush1.bf16.msra.mxu1 %v6549_v42  ;;  %v6638_v29 = vld [vmem:[%s6945_s12 + $0xbc4] ss:$16 sps:$4 sm:$0xff]   ;;  %v6641_v42 = vld [vmem:[%s6945_s12 + $0xbcc] ss:$16 sps:$4 sm:$0xff]  }
 0x156   : > { %3690 = vmatprep.subr.bf16.mxu0 %v6554_v43  ;;  %4018 = vmatprep.subr.bf16.mxu1 %v6557_v45  ;;  %v7379_v43 = vld [vmem:[%s6940_s8 + $0x18] sm:$0xff]  ;;  %v6636_v45 = vld [vmem:[%s6945_s12 + $0xbc0] ss:$16 sps:$4 sm:$0xff]  }
 0x158   : > { %3682 = vmatmul.mubr.bf16.vlgmr.msra.gmra.mrb[0].mxu0 %v405_v26  ;;  %4010 = vmatmul.mubr.bf16.vlgmr.msra.gmra.mrb[0].mxu1 %v405_v26  ;;  %v6644_v26 = vld [vmem:[%s6945_s12 + $0xbe4] ss:$16 sps:$4 sm:$0xff]  }
 0x159   : > { %3691 = vmatpush1.bf16.msra.mxu0 %v6552_v47  ;;  %4019 = vmatpush1.bf16.msra.mxu1 %v6555_v48  ;;  %v6647_v47 = vld [vmem:[%s6945_s12 + $0xbec] ss:$16 sps:$4 sm:$0xff]   ;;  %v7387_v48 = vrot.slane %v7379_v43, %v6995_v50 }
 0x15a   : > { %3692 = vmatprep.subr.bf16.mxu0 %v6560_v49  ;;  %4020 = vmatprep.subr.bf16.mxu1 %v6563_v51  ;;  %v6642_v49 = vld [vmem:[%s6945_s12 + $0xbe0] ss:$16 sps:$4 sm:$0xff]   ;;  %v6645_v51 = vld [vmem:[%s6945_s12 + $0xbe8] ss:$16 sps:$4 sm:$0xff]  }
 0x15b   : > { %3722 = vmatprep.mubr.bf16.mxu0 %v408_v52  ;;  %4050 = vmatprep.mubr.bf16.mxu1 %v408_v52  ;;  %v6651_v52 = vld [vmem:[%s6945_s12 + $0xc04] ss:$16 sps:$4 sm:$0xff]  }
 0x15d   : > { %3693 = vmatpush1.bf16.msra.mxu0 %v6558_v33  ;;  %4021 = vmatpush1.bf16.msra.mxu1 %v6561_v53  ;;  %v6654_v33 = vld [vmem:[%s6945_s12 + $0xc0c] ss:$16 sps:$4 sm:$0xff]   ;;  %v379_v53 = vcombine.high %v7387_v48, %v7387_v48 }
 0x15e   : > { %3694 = vmatprep.subr.bf16.mxu0 %v6566_v54  ;;  %4022 = vmatprep.subr.bf16.mxu1 %v6569_v55  ;;  %v407_v54 = vpack.c.bf16 %v7312_v41, %v7312_v41  ;;  %v6649_v55 = vld [vmem:[%s6945_s12 + $0xc00] ss:$16 sps:$4 sm:$0xff]  }
 0x15f   : > { %v6655_v41 = vld [vmem:[%s6945_s12 + $0xc20] ss:$16 sps:$4 sm:$0xff]  }
 0x161   : > { %3695 = vmatpush1.bf16.msra.mxu0 %v6564_v56  ;;  %4023 = vmatpush1.bf16.msra.mxu1 %v6567_v57  ;;  %v6652_v56 = vld [vmem:[%s6945_s12 + $0xc08] ss:$16 sps:$4 sm:$0xff]   ;;  %v6657_v57 = vld [vmem:[%s6945_s12 + $0xc24] ss:$16 sps:$4 sm:$0xff]  }
 0x162   : > { %3696 = vmatprep.subr.bf16.mxu0 %v6572_v58  ;;  %4024 = vmatprep.subr.bf16.mxu1 %v6575_v59  ;;  %v6660_v58 = vld [vmem:[%s6945_s12 + $0xc2c] ss:$16 sps:$4 sm:$0xff]   ;;  %v410_v59 = vpack.c.bf16 %v379_v53, %v379_v53  ;;  %v6733_v53 = vld [vmem:[%s6945_s12 + $0xdc0] ss:$16 sps:$4 sm:$0xff]  }
 0x165   : > { %3697 = vmatpush1.bf16.msra.mxu0 %v6570_v60  ;;  %4025 = vmatpush1.bf16.msra.mxu1 %v6573_v61  ;;  %v6658_v60 = vld [vmem:[%s6945_s12 + $0xc28] ss:$16 sps:$4 sm:$0xff]   ;;  %v6663_v61 = vld [vmem:[%s6945_s12 + $0xc44] ss:$16 sps:$4 sm:$0xff]  }
 0x166   : > { %3698 = vmatprep.subr.bf16.mxu0 %v6578_v62  ;;  %4026 = vmatprep.subr.bf16.mxu1 %v6581_v63  ;;  %v6666_v62 = vld [vmem:[%s6945_s12 + $0xc4c] ss:$16 sps:$4 sm:$0xff]   ;;  %v6661_v63 = vld [vmem:[%s6945_s12 + $0xc40] ss:$16 sps:$4 sm:$0xff]  }
 0x169   : > { %3699 = vmatpush1.bf16.msra.mxu0 %v6576_v0  ;;  %4027 = vmatpush1.bf16.msra.mxu1 %v6579_v1  ;;  %v6664_v0 = vld [vmem:[%s6945_s12 + $0xc48] ss:$16 sps:$4 sm:$0xff]   ;;  %v6669_v1 = vld [vmem:[%s6945_s12 + $0xc64] ss:$16 sps:$4 sm:$0xff]  }
 0x16a   : > { %3700 = vmatprep.subr.bf16.mxu0 %v6584_v2  ;;  %4028 = vmatprep.subr.bf16.mxu1 %v6587_v3  ;;  %v6672_v2 = vld [vmem:[%s6945_s12 + $0xc6c] ss:$16 sps:$4 sm:$0xff]   ;;  %v6667_v3 = vld [vmem:[%s6945_s12 + $0xc60] ss:$16 sps:$4 sm:$0xff]  }
 0x16d   : > { %3701 = vmatpush1.bf16.msra.mxu0 %v6582_v4  ;;  %4029 = vmatpush1.bf16.msra.mxu1 %v6585_v5  ;;  %v6670_v4 = vld [vmem:[%s6945_s12 + $0xc68] ss:$16 sps:$4 sm:$0xff]   ;;  %v6675_v5 = vld [vmem:[%s6945_s12 + $0xc84] ss:$16 sps:$4 sm:$0xff]  }
 0x16e   : > { %3702 = vmatprep.subr.bf16.mxu0 %v6590_v6  ;;  %4030 = vmatprep.subr.bf16.mxu1 %v6593_v7  ;;  %v6678_v6 = vld [vmem:[%s6945_s12 + $0xc8c] ss:$16 sps:$4 sm:$0xff]   ;;  %v6673_v7 = vld [vmem:[%s6945_s12 + $0xc80] ss:$16 sps:$4 sm:$0xff]  }
 0x171   : > { %3703 = vmatpush1.bf16.msra.mxu0 %v6588_v8  ;;  %4031 = vmatpush1.bf16.msra.mxu1 %v6591_v9  ;;  %v6676_v8 = vld [vmem:[%s6945_s12 + $0xc88] ss:$16 sps:$4 sm:$0xff]   ;;  %v6681_v9 = vld [vmem:[%s6945_s12 + $0xca4] ss:$16 sps:$4 sm:$0xff]  }
 0x172   : > { %3704 = vmatprep.subr.bf16.mxu0 %v6596_v11  ;;  %4032 = vmatprep.subr.bf16.mxu1 %v6599_v12  ;;  %v6684_v11 = vld [vmem:[%s6945_s12 + $0xcac] ss:$16 sps:$4 sm:$0xff]   ;;  %v6679_v12 = vld [vmem:[%s6945_s12 + $0xca0] ss:$16 sps:$4 sm:$0xff]  }
 0x175   : > { %3705 = vmatpush1.bf16.msra.mxu0 %v6594_v13  ;;  %4033 = vmatpush1.bf16.msra.mxu1 %v6597_v14  ;;  %v6682_v13 = vld [vmem:[%s6945_s12 + $0xca8] ss:$16 sps:$4 sm:$0xff]   ;;  %v6687_v14 = vld [vmem:[%s6945_s12 + $0xcc4] ss:$16 sps:$4 sm:$0xff]  }
 0x176   : > { %3706 = vmatprep.subr.bf16.mxu0 %v6602_v15  ;;  %4034 = vmatprep.subr.bf16.mxu1 %v6605_v16  ;;  %v6690_v15 = vld [vmem:[%s6945_s12 + $0xccc] ss:$16 sps:$4 sm:$0xff]   ;;  %v6685_v16 = vld [vmem:[%s6945_s12 + $0xcc0] ss:$16 sps:$4 sm:$0xff]  }
 0x179   : > { %3707 = vmatpush1.bf16.msra.mxu0 %v6600_v17  ;;  %4035 = vmatpush1.bf16.msra.mxu1 %v6603_v18  ;;  %v6688_v17 = vld [vmem:[%s6945_s12 + $0xcc8] ss:$16 sps:$4 sm:$0xff]   ;;  %v6693_v18 = vld [vmem:[%s6945_s12 + $0xce4] ss:$16 sps:$4 sm:$0xff]  }
 0x17a   : > { %3708 = vmatprep.subr.bf16.mxu0 %v6608_v19  ;;  %4036 = vmatprep.subr.bf16.mxu1 %v6611_v20  ;;  %v6696_v19 = vld [vmem:[%s6945_s12 + $0xcec] ss:$16 sps:$4 sm:$0xff]   ;;  %v6691_v20 = vld [vmem:[%s6945_s12 + $0xce0] ss:$16 sps:$4 sm:$0xff]  }
 0x17d   : > { %3709 = vmatpush1.bf16.msra.mxu0 %v6606_v21  ;;  %4037 = vmatpush1.bf16.msra.mxu1 %v6609_v22  ;;  %v6694_v21 = vld [vmem:[%s6945_s12 + $0xce8] ss:$16 sps:$4 sm:$0xff]   ;;  %v6699_v22 = vld [vmem:[%s6945_s12 + $0xd04] ss:$16 sps:$4 sm:$0xff]  }
 0x17e   : > { %3710 = vmatprep.subr.bf16.mxu0 %v6614_v23  ;;  %4038 = vmatprep.subr.bf16.mxu1 %v6617_v25  ;;  %v6702_v23 = vld [vmem:[%s6945_s12 + $0xd0c] ss:$16 sps:$4 sm:$0xff]   ;;  %v6697_v25 = vld [vmem:[%s6945_s12 + $0xd00] ss:$16 sps:$4 sm:$0xff]  }
 0x181   : > { %3711 = vmatpush1.bf16.msra.mxu0 %v6612_v24  ;;  %4039 = vmatpush1.bf16.msra.mxu1 %v6615_v10  ;;  %v6700_v24 = vld [vmem:[%s6945_s12 + $0xd08] ss:$16 sps:$4 sm:$0xff]   ;;  %v6705_v10 = vld [vmem:[%s6945_s12 + $0xd24] ss:$16 sps:$4 sm:$0xff]  }
 0x182   : > { %3712 = vmatprep.subr.bf16.mxu0 %v6620_v28  ;;  %4040 = vmatprep.subr.bf16.mxu1 %v6623_v30  ;;  %v6708_v28 = vld [vmem:[%s6945_s12 + $0xd2c] ss:$16 sps:$4 sm:$0xff]   ;;  %v6703_v30 = vld [vmem:[%s6945_s12 + $0xd20] ss:$16 sps:$4 sm:$0xff]  }
 0x185   : > { %3713 = vmatpush1.bf16.msra.mxu0 %v6618_v31  ;;  %4041 = vmatpush1.bf16.msra.mxu1 %v6621_v32  ;;  %v6706_v31 = vld [vmem:[%s6945_s12 + $0xd28] ss:$16 sps:$4 sm:$0xff]   ;;  %v6711_v32 = vld [vmem:[%s6945_s12 + $0xd44] ss:$16 sps:$4 sm:$0xff]  }
 0x186   : > { %3714 = vmatprep.subr.bf16.mxu0 %v6626_v34  ;;  %4042 = vmatprep.subr.bf16.mxu1 %v6629_v35  ;;  %v6714_v34 = vld [vmem:[%s6945_s12 + $0xd4c] ss:$16 sps:$4 sm:$0xff]   ;;  %v6709_v35 = vld [vmem:[%s6945_s12 + $0xd40] ss:$16 sps:$4 sm:$0xff]  }
 0x189   : > { %3715 = vmatpush1.bf16.msra.mxu0 %v6624_v36  ;;  %4043 = vmatpush1.bf16.msra.mxu1 %v6627_v27  ;;  %v6712_v36 = vld [vmem:[%s6945_s12 + $0xd48] ss:$16 sps:$4 sm:$0xff]   ;;  %v6717_v27 = vld [vmem:[%s6945_s12 + $0xd64] ss:$16 sps:$4 sm:$0xff]  }
 0x18a   : > { %3716 = vmatprep.subr.bf16.mxu0 %v6632_v37  ;;  %4044 = vmatprep.subr.bf16.mxu1 %v6635_v38  ;;  %v6720_v37 = vld [vmem:[%s6945_s12 + $0xd6c] ss:$16 sps:$4 sm:$0xff]   ;;  %v6715_v38 = vld [vmem:[%s6945_s12 + $0xd60] ss:$16 sps:$4 sm:$0xff]  }
 0x18d   : > { %3717 = vmatpush1.bf16.msra.mxu0 %v6630_v39  ;;  %4045 = vmatpush1.bf16.msra.mxu1 %v6633_v40  ;;  %v6718_v39 = vld [vmem:[%s6945_s12 + $0xd68] ss:$16 sps:$4 sm:$0xff]   ;;  %v6723_v40 = vld [vmem:[%s6945_s12 + $0xd84] ss:$16 sps:$4 sm:$0xff]  }
 0x18e   : > { %3718 = vmatprep.subr.bf16.mxu0 %v6638_v29  ;;  %4046 = vmatprep.subr.bf16.mxu1 %v6641_v42  ;;  %v6726_v29 = vld [vmem:[%s6945_s12 + $0xd8c] ss:$16 sps:$4 sm:$0xff]   ;;  %v6721_v42 = vld [vmem:[%s6945_s12 + $0xd80] ss:$16 sps:$4 sm:$0xff]  }
 0x191   : > { %3719 = vmatpush1.bf16.msra.mxu0 %v6636_v45  ;;  %4047 = vmatpush1.bf16.msra.mxu1 %v6639_v46  ;;  %v6724_v45 = vld [vmem:[%s6945_s12 + $0xd88] ss:$16 sps:$4 sm:$0xff]   ;;  %v6729_v46 = vld [vmem:[%s6945_s12 + $0xda4] ss:$16 sps:$4 sm:$0xff]  }
 0x192   : > { %3720 = vmatprep.subr.bf16.mxu0 %v6644_v26  ;;  %4048 = vmatprep.subr.bf16.mxu1 %v6647_v47  ;;  %v6732_v26 = vld [vmem:[%s6945_s12 + $0xdac] ss:$16 sps:$4 sm:$0xff]   ;;  %v6727_v47 = vld [vmem:[%s6945_s12 + $0xda0] ss:$16 sps:$4 sm:$0xff]  }
 0x195   : > { %3721 = vmatpush1.bf16.msra.mxu0 %v6642_v49  ;;  %4049 = vmatpush1.bf16.msra.mxu1 %v6645_v51  ;;  %v6730_v49 = vld [vmem:[%s6945_s12 + $0xda8] ss:$16 sps:$4 sm:$0xff]   ;;  %v6735_v51 = vld [vmem:[%s6945_s12 + $0xdc4] ss:$16 sps:$4 sm:$0xff]  }
 0x196   : > { %3731 = vmatprep.subr.bf16.mxu0 %v6651_v52  ;;  %4059 = vmatprep.subr.bf16.mxu1 %v6654_v33  ;;  %v6738_v52 = vld [vmem:[%s6945_s12 + $0xdcc] ss:$16 sps:$4 sm:$0xff]   ;;  %v364_v33 = vcombine.high %v7379_v43, %v7379_v43  ;;  %v6739_v43 = vld [vmem:[%s6945_s12 + $0xde0] ss:$16 sps:$4 sm:$0xff]  }
 0x198   : > { %3723 = vmatmul.mubr.bf16.vlgmr.msra.gmra.mrb[0].mxu0 %v407_v54  ;;  %4051 = vmatmul.mubr.bf16.vlgmr.msra.gmra.mrb[0].mxu1 %v407_v54  ;;  %v6736_v54 = vld [vmem:[%s6945_s12 + $0xdc8] ss:$16 sps:$4 sm:$0xff]  }
 0x199   : > { %3732 = vmatpush1.bf16.msra.mxu0 %v6649_v55  ;;  %4060 = vmatpush1.bf16.msra.mxu1 %v6652_v56  ;;  %v6741_v55 = vld [vmem:[%s6945_s12 + $0xde4] ss:$16 sps:$4 sm:$0xff]   ;;  %v6744_v56 = vld [vmem:[%s6945_s12 + $0xdec] ss:$16 sps:$4 sm:$0xff]  }
 0x19a   : > { %3733 = vmatprep.subr.bf16.mxu0 %v6657_v57  ;;  %4061 = vmatprep.subr.bf16.mxu1 %v6660_v58  ;;  %v7460_v57 = vrot.slane %v364_v33, %v6995_v50  ;;  %v6742_v58 = vld [vmem:[%s6945_s12 + $0xde8] ss:$16 sps:$4 sm:$0xff]  }
 0x19b   : > { %3763 = vmatprep.mubr.bf16.mxu0 %v410_v59  ;;  %4091 = vmatprep.mubr.bf16.mxu1 %v410_v59  ;;  %v6747_v59 = vld [vmem:[%s6945_s12 + $0xe04] ss:$16 sps:$4 sm:$0xff]   ;;  %v6820_v33 = vld [vmem:[%s6945_s12 + $0xf88] ss:$16 sps:$4 sm:$0xff]  }
 0x19d   : > { %3734 = vmatpush1.bf16.msra.mxu0 %v6655_v41  ;;  %4062 = vmatpush1.bf16.msra.mxu1 %v6658_v60  ;;  %v6750_v41 = vld [vmem:[%s6945_s12 + $0xe0c] ss:$16 sps:$4 sm:$0xff]   ;;  %v380_v60 = vcombine.high %v7460_v57, %v7460_v57 }
 0x19e   : > { %3735 = vmatprep.subr.bf16.mxu0 %v6663_v61  ;;  %4063 = vmatprep.subr.bf16.mxu1 %v6666_v62  ;;  %v409_v61 = vpack.c.bf16 %v7387_v48, %v7387_v48  ;;  %v6745_v62 = vld [vmem:[%s6945_s12 + $0xe00] ss:$16 sps:$4 sm:$0xff]  }
 0x19f   : > { %v6751_v48 = vld [vmem:[%s6945_s12 + $0xe20] ss:$16 sps:$4 sm:$0xff]  }
 0x1a1   : > { %3736 = vmatpush1.bf16.msra.mxu0 %v6661_v63  ;;  %4064 = vmatpush1.bf16.msra.mxu1 %v6664_v0  ;;  %v6748_v63 = vld [vmem:[%s6945_s12 + $0xe08] ss:$16 sps:$4 sm:$0xff]   ;;  %v6753_v0 = vld [vmem:[%s6945_s12 + $0xe24] ss:$16 sps:$4 sm:$0xff]  }
 0x1a2   : > { %3737 = vmatprep.subr.bf16.mxu0 %v6669_v1  ;;  %4065 = vmatprep.subr.bf16.mxu1 %v6672_v2  ;;  %v6756_v1 = vld [vmem:[%s6945_s12 + $0xe2c] ss:$16 sps:$4 sm:$0xff]   ;;  %v412_v2 = vpack.c.bf16 %v380_v60, %v380_v60  ;;  %v6837_v60 = vld [vmem:[%s6945_s12 + $0xfe4] ss:$16 sps:$4 sm:$0xff]  }
 0x1a5   : > { %3738 = vmatpush1.bf16.msra.mxu0 %v6667_v3  ;;  %4066 = vmatpush1.bf16.msra.mxu1 %v6670_v4  ;;  %v6754_v3 = vld [vmem:[%s6945_s12 + $0xe28] ss:$16 sps:$4 sm:$0xff]   ;;  %v6759_v4 = vld [vmem:[%s6945_s12 + $0xe44] ss:$16 sps:$4 sm:$0xff]  }
 0x1a6   : > { %3739 = vmatprep.subr.bf16.mxu0 %v6675_v5  ;;  %4067 = vmatprep.subr.bf16.mxu1 %v6678_v6  ;;  %v6762_v5 = vld [vmem:[%s6945_s12 + $0xe4c] ss:$16 sps:$4 sm:$0xff]   ;;  %v6757_v6 = vld [vmem:[%s6945_s12 + $0xe40] ss:$16 sps:$4 sm:$0xff]  }
 0x1a9   : > { %3740 = vmatpush1.bf16.msra.mxu0 %v6673_v7  ;;  %4068 = vmatpush1.bf16.msra.mxu1 %v6676_v8  ;;  %v6760_v7 = vld [vmem:[%s6945_s12 + $0xe48] ss:$16 sps:$4 sm:$0xff]   ;;  %v6765_v8 = vld [vmem:[%s6945_s12 + $0xe64] ss:$16 sps:$4 sm:$0xff]  }
 0x1aa   : > { %3741 = vmatprep.subr.bf16.mxu0 %v6681_v9  ;;  %4069 = vmatprep.subr.bf16.mxu1 %v6684_v11  ;;  %v6768_v9 = vld [vmem:[%s6945_s12 + $0xe6c] ss:$16 sps:$4 sm:$0xff]   ;;  %v6763_v11 = vld [vmem:[%s6945_s12 + $0xe60] ss:$16 sps:$4 sm:$0xff]  }
 0x1ad   : > { %3742 = vmatpush1.bf16.msra.mxu0 %v6679_v12  ;;  %4070 = vmatpush1.bf16.msra.mxu1 %v6682_v13  ;;  %v6766_v12 = vld [vmem:[%s6945_s12 + $0xe68] ss:$16 sps:$4 sm:$0xff]   ;;  %v6771_v13 = vld [vmem:[%s6945_s12 + $0xe84] ss:$16 sps:$4 sm:$0xff]  }
 0x1ae   : > { %3743 = vmatprep.subr.bf16.mxu0 %v6687_v14  ;;  %4071 = vmatprep.subr.bf16.mxu1 %v6690_v15  ;;  %v6774_v14 = vld [vmem:[%s6945_s12 + $0xe8c] ss:$16 sps:$4 sm:$0xff]   ;;  %v6769_v15 = vld [vmem:[%s6945_s12 + $0xe80] ss:$16 sps:$4 sm:$0xff]  }
 0x1b1   : > { %3744 = vmatpush1.bf16.msra.mxu0 %v6685_v16  ;;  %4072 = vmatpush1.bf16.msra.mxu1 %v6688_v17  ;;  %v6772_v16 = vld [vmem:[%s6945_s12 + $0xe88] ss:$16 sps:$4 sm:$0xff]   ;;  %v6777_v17 = vld [vmem:[%s6945_s12 + $0xea4] ss:$16 sps:$4 sm:$0xff]  }
 0x1b2   : > { %3745 = vmatprep.subr.bf16.mxu0 %v6693_v18  ;;  %4073 = vmatprep.subr.bf16.mxu1 %v6696_v19  ;;  %v6780_v18 = vld [vmem:[%s6945_s12 + $0xeac] ss:$16 sps:$4 sm:$0xff]   ;;  %v6775_v19 = vld [vmem:[%s6945_s12 + $0xea0] ss:$16 sps:$4 sm:$0xff]  }
 0x1b5   : > { %3746 = vmatpush1.bf16.msra.mxu0 %v6691_v20  ;;  %4074 = vmatpush1.bf16.msra.mxu1 %v6694_v21  ;;  %v6778_v20 = vld [vmem:[%s6945_s12 + $0xea8] ss:$16 sps:$4 sm:$0xff]   ;;  %v6783_v21 = vld [vmem:[%s6945_s12 + $0xec4] ss:$16 sps:$4 sm:$0xff]  }
 0x1b6   : > { %3747 = vmatprep.subr.bf16.mxu0 %v6699_v22  ;;  %4075 = vmatprep.subr.bf16.mxu1 %v6702_v23  ;;  %v6786_v22 = vld [vmem:[%s6945_s12 + $0xecc] ss:$16 sps:$4 sm:$0xff]   ;;  %v6781_v23 = vld [vmem:[%s6945_s12 + $0xec0] ss:$16 sps:$4 sm:$0xff]  }
 0x1b9   : > { %3748 = vmatpush1.bf16.msra.mxu0 %v6697_v25  ;;  %4076 = vmatpush1.bf16.msra.mxu1 %v6700_v24  ;;  %v6784_v25 = vld [vmem:[%s6945_s12 + $0xec8] ss:$16 sps:$4 sm:$0xff]   ;;  %v6789_v24 = vld [vmem:[%s6945_s12 + $0xee4] ss:$16 sps:$4 sm:$0xff]  }
 0x1ba   : > { %3749 = vmatprep.subr.bf16.mxu0 %v6705_v10  ;;  %4077 = vmatprep.subr.bf16.mxu1 %v6708_v28  ;;  %v6792_v10 = vld [vmem:[%s6945_s12 + $0xeec] ss:$16 sps:$4 sm:$0xff]   ;;  %v6787_v28 = vld [vmem:[%s6945_s12 + $0xee0] ss:$16 sps:$4 sm:$0xff]  }
 0x1bd   : > { %3750 = vmatpush1.bf16.msra.mxu0 %v6703_v30  ;;  %4078 = vmatpush1.bf16.msra.mxu1 %v6706_v31  ;;  %v6790_v30 = vld [vmem:[%s6945_s12 + $0xee8] ss:$16 sps:$4 sm:$0xff]   ;;  %v6795_v31 = vld [vmem:[%s6945_s12 + $0xf04] ss:$16 sps:$4 sm:$0xff]  }
 0x1be   : > { %3751 = vmatprep.subr.bf16.mxu0 %v6711_v32  ;;  %4079 = vmatprep.subr.bf16.mxu1 %v6714_v34  ;;  %v6798_v32 = vld [vmem:[%s6945_s12 + $0xf0c] ss:$16 sps:$4 sm:$0xff]   ;;  %v6793_v34 = vld [vmem:[%s6945_s12 + $0xf00] ss:$16 sps:$4 sm:$0xff]  }
 0x1c1   : > { %3752 = vmatpush1.bf16.msra.mxu0 %v6709_v35  ;;  %4080 = vmatpush1.bf16.msra.mxu1 %v6712_v36  ;;  %v6796_v35 = vld [vmem:[%s6945_s12 + $0xf08] ss:$16 sps:$4 sm:$0xff]   ;;  %v6801_v36 = vld [vmem:[%s6945_s12 + $0xf24] ss:$16 sps:$4 sm:$0xff]  }
 0x1c2   : > { %3753 = vmatprep.subr.bf16.mxu0 %v6717_v27  ;;  %4081 = vmatprep.subr.bf16.mxu1 %v6720_v37  ;;  %v6804_v27 = vld [vmem:[%s6945_s12 + $0xf2c] ss:$16 sps:$4 sm:$0xff]   ;;  %v6799_v37 = vld [vmem:[%s6945_s12 + $0xf20] ss:$16 sps:$4 sm:$0xff]  }
 0x1c5   : > { %3754 = vmatpush1.bf16.msra.mxu0 %v6715_v38  ;;  %4082 = vmatpush1.bf16.msra.mxu1 %v6718_v39  ;;  %v6802_v38 = vld [vmem:[%s6945_s12 + $0xf28] ss:$16 sps:$4 sm:$0xff]   ;;  %v6807_v39 = vld [vmem:[%s6945_s12 + $0xf44] ss:$16 sps:$4 sm:$0xff]  }
 0x1c6   : > { %3755 = vmatprep.subr.bf16.mxu0 %v6723_v40  ;;  %4083 = vmatprep.subr.bf16.mxu1 %v6726_v29  ;;  %v6810_v40 = vld [vmem:[%s6945_s12 + $0xf4c] ss:$16 sps:$4 sm:$0xff]   ;;  %v6805_v29 = vld [vmem:[%s6945_s12 + $0xf40] ss:$16 sps:$4 sm:$0xff]  }
 0x1c9   : > { %3756 = vmatpush1.bf16.msra.mxu0 %v6721_v42  ;;  %4084 = vmatpush1.bf16.msra.mxu1 %v6724_v45  ;;  %v6808_v42 = vld [vmem:[%s6945_s12 + $0xf48] ss:$16 sps:$4 sm:$0xff]   ;;  %v6813_v45 = vld [vmem:[%s6945_s12 + $0xf64] ss:$16 sps:$4 sm:$0xff]  }
 0x1ca   : > { %3757 = vmatprep.subr.bf16.mxu0 %v6729_v46  ;;  %4085 = vmatprep.subr.bf16.mxu1 %v6732_v26  ;;  %v6816_v46 = vld [vmem:[%s6945_s12 + $0xf6c] ss:$16 sps:$4 sm:$0xff]   ;;  %v6811_v26 = vld [vmem:[%s6945_s12 + $0xf60] ss:$16 sps:$4 sm:$0xff]  }
 0x1cd   : > { %3758 = vmatpush1.bf16.msra.mxu0 %v6727_v47  ;;  %4086 = vmatpush1.bf16.msra.mxu1 %v6730_v49  ;;  %v6814_v47 = vld [vmem:[%s6945_s12 + $0xf68] ss:$16 sps:$4 sm:$0xff]   ;;  %v6819_v49 = vld [vmem:[%s6945_s12 + $0xf84] ss:$16 sps:$4 sm:$0xff]  }
 0x1ce   : > { %3759 = vmatprep.subr.bf16.mxu0 %v6735_v51  ;;  %4087 = vmatprep.subr.bf16.mxu1 %v6738_v52  ;;  %v6822_v51 = vld [vmem:[%s6945_s12 + $0xf8c] ss:$16 sps:$4 sm:$0xff]   ;;  %v6817_v52 = vld [vmem:[%s6945_s12 + $0xf80] ss:$16 sps:$4 sm:$0xff]  }
 0x1d1   : > { %3760 = vmatpush1.bf16.msra.mxu0 %v6733_v53  ;;  %4088 = vmatpush1.bf16.msra.mxu1 %v6736_v54  ;;  %v6825_v53 = vld [vmem:[%s6945_s12 + $0xfa4] ss:$16 sps:$4 sm:$0xff]   ;;  %v6828_v54 = vld [vmem:[%s6945_s12 + $0xfac] ss:$16 sps:$4 sm:$0xff]  }
 0x1d2   : > { %3761 = vmatprep.subr.bf16.mxu0 %v6741_v55  ;;  %4089 = vmatprep.subr.bf16.mxu1 %v6744_v56  ;;  %v6823_v55 = vld [vmem:[%s6945_s12 + $0xfa0] ss:$16 sps:$4 sm:$0xff]   ;;  %v6826_v56 = vld [vmem:[%s6945_s12 + $0xfa8] ss:$16 sps:$4 sm:$0xff]  }
 0x1d5   : > { %3762 = vmatpush1.bf16.msra.mxu0 %v6739_v43  ;;  %4090 = vmatpush1.bf16.msra.mxu1 %v6742_v58  ;;  %v6831_v43 = vld [vmem:[%s6945_s12 + $0xfc4] ss:$16 sps:$4 sm:$0xff]   ;;  %v6834_v58 = vld [vmem:[%s6945_s12 + $0xfcc] ss:$16 sps:$4 sm:$0xff]  }
 0x1d6   : > { %3772 = vmatprep.subr.bf16.mxu0 %v6747_v59  ;;  %4100 = vmatprep.subr.bf16.mxu1 %v6750_v41  ;;  %v6829_v59 = vld [vmem:[%s6945_s12 + $0xfc0] ss:$16 sps:$4 sm:$0xff]   ;;  %v6832_v41 = vld [vmem:[%s6945_s12 + $0xfc8] ss:$16 sps:$4 sm:$0xff]  }
 0x1d8   : > { %3764 = vmatmul.mubr.bf16.vlgmr.msra.gmra.mrb[0].mxu0 %v409_v61  ;;  %4092 = vmatmul.mubr.bf16.vlgmr.msra.gmra.mrb[0].mxu1 %v409_v61  ;;  %v6840_v61 = vld [vmem:[%s6945_s12 + $0xfec] ss:$16 sps:$4 sm:$0xff]  }
 0x1d9   : > { %3773 = vmatpush1.bf16.msra.mxu0 %v6745_v62  ;;  %4101 = vmatpush1.bf16.msra.mxu1 %v6748_v63  ;;  %v6835_v62 = vld [vmem:[%s6945_s12 + $0xfe0] ss:$16 sps:$4 sm:$0xff]   ;;  %v6838_v63 = vld [vmem:[%s6945_s12 + $0xfe8] ss:$16 sps:$4 sm:$0xff]  }
 0x1da   : > { %3774 = vmatprep.subr.bf16.mxu0 %v6753_v0  ;;  %4102 = vmatprep.subr.bf16.mxu1 %v6756_v1  ;;  %v411_v0 = vpack.c.bf16 %v7460_v57, %v7460_v57 }
 0x1db   : > { %3804 = vmatprep.mubr.bf16.mxu0 %v412_v2  ;;  %4132 = vmatprep.mubr.bf16.mxu1 %v412_v2 }
 0x1dd   : > { %3775 = vmatpush1.bf16.msra.mxu0 %v6751_v48  ;;  %4103 = vmatpush1.bf16.msra.mxu1 %v6754_v3 }
 0x1de   : > { %3776 = vmatprep.subr.bf16.mxu0 %v6759_v4  ;;  %4104 = vmatprep.subr.bf16.mxu1 %v6762_v5 }
 0x1e1   : > { %3777 = vmatpush1.bf16.msra.mxu0 %v6757_v6  ;;  %4105 = vmatpush1.bf16.msra.mxu1 %v6760_v7 }
 0x1e2   : > { %3778 = vmatprep.subr.bf16.mxu0 %v6765_v8  ;;  %4106 = vmatprep.subr.bf16.mxu1 %v6768_v9 }
 0x1e5   : > { %3779 = vmatpush1.bf16.msra.mxu0 %v6763_v11  ;;  %4107 = vmatpush1.bf16.msra.mxu1 %v6766_v12  ;;  %v304_v12 = vld [vmem:[#allocation2] sm:$0xff] }
 0x1e6   : > { %3780 = vmatprep.subr.bf16.mxu0 %v6771_v13  ;;  %4108 = vmatprep.subr.bf16.mxu1 %v6774_v14 }
 0x1e9   : > { %3781 = vmatpush1.bf16.msra.mxu0 %v6769_v15  ;;  %4109 = vmatpush1.bf16.msra.mxu1 %v6772_v16  ;;  %v4216_v15 = vld [vmem:[%s8573_s3 + $0x8] sm:$0xff] (!%p5612_p6) }
 0x1ea   : > { %3782 = vmatprep.subr.bf16.mxu0 %v6777_v17  ;;  %4110 = vmatprep.subr.bf16.mxu1 %v6780_v18  ;;  %v4220_v16 = vld [vmem:[%s8573_s3 + $0x28] sm:$0xff] (!%p5612_p6)  ;;  %v4218_v17 = vld [vmem:[%s8573_s3 + $0x18] sm:$0xff] (!%p5612_p6) }
 0x1eb   : > { %v5662_v18 = vpack.c.bf16 (!%p5612_p6), %v4220_v16, %v4216_v15 }
 0x1ed   : > { %3783 = vmatpush1.bf16.msra.mxu0 %v6775_v19  ;;  %4111 = vmatpush1.bf16.msra.mxu1 %v6778_v20  ;;  %v4222_v19 = vld [vmem:[%s8573_s3 + $0x38] sm:$0xff] (!%p5612_p6)  ;;  %v4215_v20 = vld [vmem:[%s8573_s3] sm:$0xff] (!%p5612_p6) }
 0x1ee   : > { %3784 = vmatprep.subr.bf16.mxu0 %v6783_v21  ;;  %4112 = vmatprep.subr.bf16.mxu1 %v6786_v22  ;;  %v4219_v21 = vld [vmem:[%s8573_s3 + $0x20] sm:$0xff] (!%p5612_p6)  ;;  %v5786_v22 = vpack.c.bf16 (!%p5612_p6), %v4222_v19, %v4218_v17 }
 0x1ef   : > { %v4259_v19 = vld [vmem:[%s8573_s3 + $0x160] sm:$0xff] (!%p5612_p6) }
 0x1f1   : > { %3785 = vmatpush1.bf16.msra.mxu0 %v6781_v23  ;;  %4113 = vmatpush1.bf16.msra.mxu1 %v6784_v25  ;;  %v5664_v23 = vpack.c.bf16 (!%p5612_p6), %v4219_v21, %v4215_v20  ;;  %v4217_v25 = vld [vmem:[%s8573_s3 + $0x10] sm:$0xff] (!%p5612_p6) }
 0x1f2   : > { %3786 = vmatprep.subr.bf16.mxu0 %v6789_v24  ;;  %4114 = vmatprep.subr.bf16.mxu1 %v6792_v10  ;;  %v4221_v24 = vld [vmem:[%s8573_s3 + $0x30] sm:$0xff] (!%p5612_p6)  ;;  %v4224_v10 = vld [vmem:[%s8573_s3 + $0x48] sm:$0xff] (!%p5612_p6) }
 0x1f3   : > { %v4257_v20 = vld [vmem:[%s8573_s3 + $0x150] sm:$0xff] (!%p5612_p6) }
 0x1f5   : > { %3787 = vmatpush1.bf16.msra.mxu0 %v6787_v28  ;;  %4115 = vmatpush1.bf16.msra.mxu1 %v6790_v30  ;;  %v5788_v28 = vpack.c.bf16 (!%p5612_p6), %v4221_v24, %v4217_v25  ;;  %v4228_v30 = vld [vmem:[%s8573_s3 + $0x68] sm:$0xff] (!%p5612_p6)  ;;  %v4266_v24 = vld [vmem:[%s8573_s3 + $0x198] sm:$0xff] (!%p5612_p6) }
 0x1f6   : > { %3788 = vmatprep.subr.bf16.mxu0 %v6795_v31  ;;  %4116 = vmatprep.subr.bf16.mxu1 %v6798_v32  ;;  %v4226_v31 = vld [vmem:[%s8573_s3 + $0x58] sm:$0xff] (!%p5612_p6)  ;;  %v4268_v25 = vld [vmem:[%s8573_s3 + $0x1a8] sm:$0xff] (!%p5612_p6) }
 0x1f7   : > { %v4230_v32 = vld [vmem:[%s8573_s3 + $0x78] sm:$0xff] (!%p5612_p6) }
 0x1f9   : > { %3789 = vmatpush1.bf16.msra.mxu0 %v6793_v34  ;;  %4117 = vmatpush1.bf16.msra.mxu1 %v6796_v35  ;;  %v5666_v34 = vpack.c.bf16 (!%p5612_p6), %v4228_v30, %v4224_v10  ;;  %v5790_v35 = vpack.c.bf16 (!%p5612_p6), %v4230_v32, %v4226_v31  ;;  %v4270_v10 = vld [vmem:[%s8573_s3 + $0x1b8] sm:$0xff] (!%p5612_p6)  ;;  %v4263_v32 = vld [vmem:[%s8573_s3 + $0x180] sm:$0xff] (!%p5612_p6) }
 0x1fa   : > { %3790 = vmatprep.subr.bf16.mxu0 %v6801_v36  ;;  %4118 = vmatprep.subr.bf16.mxu1 %v6804_v27  ;;  %v4223_v36 = vld [vmem:[%s8573_s3 + $0x40] sm:$0xff] (!%p5612_p6) }
 0x1fb   : > { %v4227_v27 = vld [vmem:[%s8573_s3 + $0x60] sm:$0xff] (!%p5612_p6) }
 0x1fd   : > { %3791 = vmatpush1.bf16.msra.mxu0 %v6799_v37  ;;  %4119 = vmatpush1.bf16.msra.mxu1 %v6802_v38  ;;  %v4225_v37 = vld [vmem:[%s8573_s3 + $0x50] sm:$0xff] (!%p5612_p6)  ;;  %v5668_v38 = vpack.c.bf16 (!%p5612_p6), %v4227_v27, %v4223_v36  ;;  %v5810_v36 = vpack.c.bf16 (!%p5612_p6), %v4270_v10, %v4266_v24  ;;  %v4181_v24 = vsub.s32 (!%p5612_p6), 0, %v6987_v44 }
 0x1fe   : > { %3792 = vmatprep.subr.bf16.mxu0 %v6807_v39  ;;  %4120 = vmatprep.subr.bf16.mxu1 %v6810_v40  ;;  %v4229_v39 = vld [vmem:[%s8573_s3 + $0x70] sm:$0xff] (!%p5612_p6)  ;;  %v4232_v40 = vld [vmem:[%s8573_s3 + $0x88] sm:$0xff] (!%p5612_p6) }
 0x1ff   : > { %v4269_v27 = vld [vmem:[%s8573_s3 + $0x1b0] sm:$0xff] (!%p5612_p6) }
 0x201   : > { %3793 = vmatpush1.bf16.msra.mxu0 %v6805_v29  ;;  %4121 = vmatpush1.bf16.msra.mxu1 %v6808_v42  ;;  %v4236_v29 = vld [vmem:[%s8573_s3 + $0xa8] sm:$0xff] (!%p5612_p6)  ;;  %v5792_v42 = vpack.c.bf16 (!%p5612_p6), %v4229_v39, %v4225_v37  ;;  %v4274_v39 = vld [vmem:[%s8573_s3 + $0x1d8] sm:$0xff] (!%p5612_p6) }
 0x202   : > { %3794 = vmatprep.subr.bf16.mxu0 %v6813_v45  ;;  %4122 = vmatprep.subr.bf16.mxu1 %v6816_v46  ;;  %v5670_v45 = vpack.c.bf16 (!%p5612_p6), %v4236_v29, %v4232_v40  ;;  %v4234_v46 = vld [vmem:[%s8573_s3 + $0x98] sm:$0xff] (!%p5612_p6)  ;;  %v4272_v37 = vld [vmem:[%s8573_s3 + $0x1c8] sm:$0xff] (!%p5612_p6) }
 0x203   : > { %v4278_v40 = vld [vmem:[%s8573_s3 + $0x1f8] sm:$0xff] (!%p5612_p6) }
 0x205   : > { %3795 = vmatpush1.bf16.msra.mxu0 %v6811_v26  ;;  %4123 = vmatpush1.bf16.msra.mxu1 %v6814_v47  ;;  %v4238_v26 = vld [vmem:[%s8573_s3 + $0xb8] sm:$0xff] (!%p5612_p6)  ;;  %v4231_v47 = vld [vmem:[%s8573_s3 + $0x80] sm:$0xff] (!%p5612_p6) }
 0x206   : > { %3796 = vmatprep.subr.bf16.mxu0 %v6819_v49  ;;  %4124 = vmatprep.subr.bf16.mxu1 %v6822_v51  ;;  %v5794_v49 = vpack.c.bf16 (!%p5612_p6), %v4238_v26, %v4234_v46  ;;  %v4235_v51 = vld [vmem:[%s8573_s3 + $0xa0] sm:$0xff] (!%p5612_p6) }
 0x207   : > { %v4271_v46 = vld [vmem:[%s8573_s3 + $0x1c0] sm:$0xff] (!%p5612_p6) }
 0x208   : > { %v4275_v26 = vld [vmem:[%s8573_s3 + $0x1e0] sm:$0xff] (!%p5612_p6) }
 0x209   : > { %3797 = vmatpush1.bf16.msra.mxu0 %v6817_v52  ;;  %4125 = vmatpush1.bf16.msra.mxu1 %v6820_v33  ;;  %v4233_v52 = vld [vmem:[%s8573_s3 + $0x90] sm:$0xff] (!%p5612_p6) }
 0x20a   : > { %3798 = vmatprep.subr.bf16.mxu0 %v6825_v53  ;;  %4126 = vmatprep.subr.bf16.mxu1 %v6828_v54  ;;  %v4237_v33 = vld [vmem:[%s8573_s3 + $0xb0] sm:$0xff] (!%p5612_p6)  ;;  %v5672_v53 = vpack.c.bf16 (!%p5612_p6), %v4235_v51, %v4231_v47  ;;  %v4240_v54 = vld [vmem:[%s8573_s3 + $0xc8] sm:$0xff] (!%p5612_p6) }
 0x20b   : > { %v4273_v47 = vld [vmem:[%s8573_s3 + $0x1d0] sm:$0xff] (!%p5612_p6) }
 0x20c   : > { %v4277_v51 = vld [vmem:[%s8573_s3 + $0x1f0] sm:$0xff] (!%p5612_p6) }
 0x20d   : > { %3799 = vmatpush1.bf16.msra.mxu0 %v6823_v55  ;;  %4127 = vmatpush1.bf16.msra.mxu1 %v6826_v56  ;;  %v4244_v55 = vld [vmem:[%s8573_s3 + $0xe8] sm:$0xff] (!%p5612_p6)  ;;  %v4242_v56 = vld [vmem:[%s8573_s3 + $0xd8] sm:$0xff] (!%p5612_p6) }
 0x20e   : > { %3800 = vmatprep.subr.bf16.mxu0 %v6831_v43  ;;  %4128 = vmatprep.subr.bf16.mxu1 %v6834_v58  ;;  %v5796_v43 = vpack.c.bf16 (!%p5612_p6), %v4237_v33, %v4233_v52  ;;  %v5674_v58 = vpack.c.bf16 (!%p5612_p6), %v4244_v55, %v4240_v54  ;;  %v4280_v52 = vld [vmem:[%s8573_s3 + $0x208] sm:$0xff] (!%p5612_p6)  ;;  %v4286_v54 = vld [vmem:[%s8573_s3 + $0x238] sm:$0xff] (!%p5612_p6)  ;;  %v5692_v55 = vpack.c.bf16 (!%p5612_p6), %v4275_v26, %v4271_v46  ;;  %v4177_v46 = vld [vmem:[%s8572_s2] sm:$0xf] (!%p5612_p6) }
 0x20f   : > { %v4284_v33 = vld [vmem:[%s8573_s3 + $0x228] sm:$0xff] (!%p5612_p6)  ;;  %v4182_v26 = vrot.slane (!%p5612_p6), %v4177_v46, %v4181_v24 }
 0x211   : > { %3801 = vmatpush1.bf16.msra.mxu0 %v6829_v59  ;;  %4129 = vmatpush1.bf16.msra.mxu1 %v6832_v41  ;;  %v4246_v59 = vld [vmem:[%s8573_s3 + $0xf8] sm:$0xff] (!%p5612_p6)  ;;  %v4239_v41 = vld [vmem:[%s8573_s3 + $0xc0] sm:$0xff] (!%p5612_p6) }
 0x212   : > { %3802 = vmatprep.subr.bf16.mxu0 %v6837_v60  ;;  %4130 = vmatprep.subr.bf16.mxu1 %v6840_v61  ;;  %v4243_v60 = vld [vmem:[%s8573_s3 + $0xe0] sm:$0xff] (!%p5612_p6)  ;;  %v5798_v61 = vpack.c.bf16 (!%p5612_p6), %v4246_v59, %v4242_v56  ;;  %v5816_v56 = vpack.c.bf16 (!%p5612_p6), %v4277_v51, %v4273_v47 }
 0x213   : > { %v4283_v59 = vld [vmem:[%s8573_s3 + $0x220] sm:$0xff] (!%p5612_p6) }
 0x215   : > { %3803 = vmatpush1.bf16.msra.mxu0 %v6835_v62  ;;  %4131 = vmatpush1.bf16.msra.mxu1 %v6838_v63  ;;  %v4241_v62 = vld [vmem:[%s8573_s3 + $0xd0] sm:$0xff] (!%p5612_p6) }
 0x216   : > { %5663 = vmatprep.subr.bf16.mxu0 (!%p5612_p6), %v5662_v18  ;;  %5787 = vmatprep.subr.bf16.mxu1 (!%p5612_p6), %v5786_v22  ;;  %v4245_v63 = vld [vmem:[%s8573_s3 + $0xf0] sm:$0xff] (!%p5612_p6)  ;;  %v4255_v18 = vld [vmem:[%s8573_s3 + $0x140] sm:$0xff] (!%p5612_p6) }
 0x217   : > { %v4261_v22 = vld [vmem:[%s8573_s3 + $0x170] sm:$0xff] (!%p5612_p6) }
 0x218   : > { %3805 = vmatmul.mubr.bf16.vlgmr.msra.gmra.mrb[0].mxu0 %v411_v0  ;;  %4133 = vmatmul.mubr.bf16.vlgmr.msra.gmra.mrb[0].mxu1 %v411_v0  ;;  %v4248_v0 = vld [vmem:[%s8573_s3 + $0x108] sm:$0xff] (!%p5612_p6)  ;;  %v5808_v30 = vpack.c.bf16 (!%p5612_p6), %v4261_v22, %v4257_v20  ;;  %v4301_v20 = vld [vmem:[%s8573_s3 + $0x2b0] sm:$0xff] (!%p5612_p6) }
 0x219   : > { %5665 = vmatpush1.bf16.msra.mxu0 (!%p5612_p6), %v5664_v23  ;;  %5789 = vmatpush1.bf16.msra.mxu1 (!%p5612_p6), %v5788_v28  ;;  %v4264_v23 = vld [vmem:[%s8573_s3 + $0x188] sm:$0xff] (!%p5612_p6)  ;;  %v5684_v28 = vpack.c.bf16 (!%p5612_p6), %v4259_v19, %v4255_v18  ;;  %v4297_v18 = vld [vmem:[%s8573_s3 + $0x290] sm:$0xff] (!%p5612_p6) }
 0x21a   : > { %5667 = vmatprep.subr.bf16.mxu0 (!%p5612_p6), %v5666_v34  ;;  %5791 = vmatprep.subr.bf16.mxu1 (!%p5612_p6), %v5790_v35  ;;  %v5686_v31 = vpack.c.bf16 (!%p5612_p6), %v4268_v25, %v4264_v23  ;;  %v4267_v34 = vld [vmem:[%s8573_s3 + $0x1a0] sm:$0xff] (!%p5612_p6)  ;;  %v4265_v35 = vld [vmem:[%s8573_s3 + $0x190] sm:$0xff] (!%p5612_p6)  ;;  %v4308_v22 = vld [vmem:[%s8573_s3 + $0x2e8] sm:$0xff] (!%p5612_p6) }
 0x21b   : > { %v5688_v29 = vpack.c.bf16 (!%p5612_p6), %v4267_v34, %v4263_v32  ;;  %v4306_v23 = vld [vmem:[%s8573_s3 + $0x2d8] sm:$0xff] (!%p5612_p6)  ;;  %v4189_v32 = vsub.s32 (!%p5612_p6), 2, %v6987_v44  ;;  %v4193_v34 = vsub.s32 (!%p5612_p6), 3, %v6987_v44 }
 0x21c   : > { %v4310_v25 = vld [vmem:[%s8573_s3 + $0x2f8] sm:$0xff] (!%p5612_p6) }
 0x21d   : > { %5669 = vmatpush1.bf16.msra.mxu0 (!%p5612_p6), %v5668_v38  ;;  %5793 = vmatpush1.bf16.msra.mxu1 (!%p5612_p6), %v5792_v42  ;;  %v4276_v38 = vld [vmem:[%s8573_s3 + $0x1e8] sm:$0xff] (!%p5612_p6)  ;;  %v5812_v42 = vpack.c.bf16 (!%p5612_p6), %v4269_v27, %v4265_v35  ;;  %v5828_v35 = vpack.c.bf16 (!%p5612_p6), %v4301_v20, %v4297_v18  ;;  %v4305_v27 = vld [vmem:[%s8573_s3 + $0x2d0] sm:$0xff] (!%p5612_p6)  ;;  %v4194_v51 = vrot.slane (!%p5612_p6), %v4177_v46, %v4193_v34  ;;  %v4327_v18 = vld [vmem:[%s8573_s3 + $0x380] sm:$0xff] (!%p5612_p6) }
 0x21e   : > { %5671 = vmatprep.subr.bf16.mxu0 (!%p5612_p6), %v5670_v45  ;;  %5795 = vmatprep.subr.bf16.mxu1 (!%p5612_p6), %v5794_v49  ;;  %v5690_v45 = vpack.c.bf16 (!%p5612_p6), %v4276_v38, %v4272_v37  ;;  %v5814_v49 = vpack.c.bf16 (!%p5612_p6), %v4278_v40, %v4274_v39  ;;  %v5830_v37 = vpack.c.bf16 (!%p5612_p6), %v4310_v25, %v4306_v23  ;;  %v4309_v38 = vld [vmem:[%s8573_s3 + $0x2f0] sm:$0xff] (!%p5612_p6)  ;;  %v4312_v39 = vld [vmem:[%s8573_s3 + $0x308] sm:$0xff] (!%p5612_p6) }
 0x21f   : > { %v4316_v40 = vld [vmem:[%s8573_s3 + $0x328] sm:$0xff] (!%p5612_p6)  ;;  %v4329_v20 = vld [vmem:[%s8573_s3 + $0x390] sm:$0xff] (!%p5612_p6) }
 0x220   : > { %v4336_v23 = vld [vmem:[%s8573_s3 + $0x3c8] sm:$0xff] (!%p5612_p6) }
 0x221   : > { %5673 = vmatpush1.bf16.msra.mxu0 (!%p5612_p6), %v5672_v53  ;;  %5797 = vmatpush1.bf16.msra.mxu1 (!%p5612_p6), %v5796_v43  ;;  %v4282_v53 = vld [vmem:[%s8573_s3 + $0x218] sm:$0xff] (!%p5612_p6)  ;;  %v5694_v43 = vpack.c.bf16 (!%p5612_p6), %v4284_v33, %v4280_v52  ;;  %v5832_v52 = vpack.c.bf16 (!%p5612_p6), %v4309_v38, %v4305_v27  ;;  %v5710_v33 = vpack.c.bf16 (!%p5612_p6), %v4316_v40, %v4312_v39  ;;  %v4340_v25 = vld [vmem:[%s8573_s3 + $0x3e8] sm:$0xff] (!%p5612_p6)  ;;  %v4335_v38 = vld [vmem:[%s8573_s3 + $0x3c0] sm:$0xff] (!%p5612_p6) }
 0x222   : > { %5675 = vmatprep.subr.bf16.mxu0 (!%p5612_p6), %v5674_v58  ;;  %5799 = vmatprep.subr.bf16.mxu1 (!%p5612_p6), %v5798_v61  ;;  %v4279_v58 = vld [vmem:[%s8573_s3 + $0x200] sm:$0xff] (!%p5612_p6)  ;;  %v4285_v61 = vld [vmem:[%s8573_s3 + $0x230] sm:$0xff] (!%p5612_p6) }
 0x223   : > { %v4339_v39 = vld [vmem:[%s8573_s3 + $0x3e0] sm:$0xff] (!%p5612_p6)  ;;  %v4337_v40 = vld [vmem:[%s8573_s3 + $0x3d0] sm:$0xff] (!%p5612_p6) }
 0x2eb   : > { %v3806_v1 = vpop.f32.mrb[0].mxu0  ;;  %v4134_v2 = vpop.f32.mrb[0].mxu1 }
 0x2ec   : > { %v3808_v48 = vpop.f32.mrb[1].mxu0  ;;  %v4136_v3 = vpop.f32.mrb[1].mxu1 }
 0x2ed   : > { %v4145_v4 = vcombine.low %v3806_v1, %v3808_v48  ;;  %v4146_v5 = vcombine.low %v4134_v2, %v4136_v3  ;;  %v3810_v6 = vpop.f32.mrb[2].mxu0  ;;  %v4138_v7 = vpop.f32.mrb[2].mxu1  ;;  %v4252_v1 = vld [vmem:[%s8573_s3 + $0x128] sm:$0xff] (!%p5612_p6)  ;;  %v4250_v2 = vld [vmem:[%s8573_s3 + $0x118] sm:$0xff] (!%p5612_p6)  ;;  %v5676_v3 = vpack.c.bf16 (!%p5612_p6), %v4243_v60, %v4239_v41  ;;  %v4281_v41 = vld [vmem:[%s8573_s3 + $0x210] sm:$0xff] (!%p5612_p6)  ;;  %v5818_v60 = vpack.c.bf16 (!%p5612_p6), %v4286_v54, %v4282_v53 }
 0x2ee   : > { %v3811_v8 = vpop.f32.mrb[3].mxu0  ;;  %v4139_v9 = vpop.f32.mrb[3].mxu1  ;;  %v4254_v48 = vld [vmem:[%s8573_s3 + $0x138] sm:$0xff] (!%p5612_p6)  ;;  %v4247_v6 = vld [vmem:[%s8573_s3 + $0x100] sm:$0xff] (!%p5612_p6) }
 0x2ef   : > { %v4153_v57 = vrot.slane %v4145_v4, %v6995_v50  ;;  %v4160_v11 = vrot.slane %v4146_v5, %v6995_v50  ;;  %4175 = sbr.rel (%p5612_p6) target bundleno = 1302 (0x516), region = 56  ;;  %v5800_v4 = vpack.c.bf16 (!%p5612_p6), %v4245_v63, %v4241_v62  ;;  %v5678_v5 = vpack.c.bf16 (!%p5612_p6), %v4252_v1, %v4248_v0  ;;  %v4251_v7 = vld [vmem:[%s8573_s3 + $0x120] sm:$0xff] (!%p5612_p6)  ;;  %v4249_v8 = vld [vmem:[%s8573_s3 + $0x110] sm:$0xff] (!%p5612_p6)  ;;  %5677 = vmatpush1.bf16.msra.mxu0 (!%p5612_p6), %v5676_v3  ;;  %v4288_v62 = vld [vmem:[%s8573_s3 + $0x248] sm:$0xff] (!%p5612_p6) }
 0x2f0   : > { %v5802_v9 = vpack.c.bf16 (!%p5612_p6), %v4254_v48, %v4250_v2  ;;  %v5680_v15 = vpack.c.bf16 (!%p5612_p6), %v4251_v7, %v4247_v6  ;;  %v4292_v63 = vld [vmem:[%s8573_s3 + $0x268] sm:$0xff] (!%p5612_p6)  ;;  %v4290_v0 = vld [vmem:[%s8573_s3 + $0x258] sm:$0xff] (!%p5612_p6)  ;;  %v5696_v2 = vpack.c.bf16 (!%p5612_p6), %v4283_v59, %v4279_v58  ;;  %v5820_v48 = vpack.c.bf16 (!%p5612_p6), %v4285_v61, %v4281_v41  ;;  %v4289_v6 = vld [vmem:[%s8573_s3 + $0x250] sm:$0xff] (!%p5612_p6) }
 0x2f1   : > { %v4161_v13 = vcombine.low %v4153_v57, %v4160_v11  ;;  %v4253_v57 = vld [vmem:[%s8573_s3 + $0x130] sm:$0xff] (!%p5612_p6)  ;;  %v4256_v11 = vld [vmem:[%s8573_s3 + $0x148] sm:$0xff] (!%p5612_p6)  ;;  %5801 = vmatpush1.bf16.msra.mxu1 (!%p5612_p6), %v5800_v4  ;;  %5679 = vmatprep.subr.bf16.mxu0 (!%p5612_p6), %v5678_v5  ;;  %v4294_v1 = vld [vmem:[%s8573_s3 + $0x278] sm:$0xff] (!%p5612_p6)  ;;  %v5698_v3 = vpack.c.bf16 (!%p5612_p6), %v4292_v63, %v4288_v62 }
 0x2f2   : > { %v5804_v16 = vpack.c.bf16 (!%p5612_p6), %v4253_v57, %v4249_v8  ;;  %5803 = vmatprep.subr.bf16.mxu1 (!%p5612_p6), %v5802_v9  ;;  %v4287_v4 = vld [vmem:[%s8573_s3 + $0x240] sm:$0xff] (!%p5612_p6)  ;;  %v5822_v7 = vpack.c.bf16 (!%p5612_p6), %v4294_v1, %v4290_v0  ;;  %v4293_v8 = vld [vmem:[%s8573_s3 + $0x270] sm:$0xff] (!%p5612_p6)  ;;  %v4296_v9 = vld [vmem:[%s8573_s3 + $0x288] sm:$0xff] (!%p5612_p6) }
 0x2f3   : > { %v4163_v14 = vadd.f32 %v4161_v13, %v304_v12  ;;  %v4260_v12 = vld [vmem:[%s8573_s3 + $0x168] sm:$0xff] (!%p5612_p6)  ;;  %v4258_v13 = vld [vmem:[%s8573_s3 + $0x158] sm:$0xff] (!%p5612_p6)  ;;  %5681 = vmatpush1.bf16.msra.mxu0 (!%p5612_p6), %v5680_v15  ;;  %v4291_v5 = vld [vmem:[%s8573_s3 + $0x260] sm:$0xff] (!%p5612_p6) }
 0x2f4   : > { %v5682_v17 = vpack.c.bf16 (!%p5612_p6), %v4260_v12, %v4256_v11  ;;  %v4300_v57 = vld [vmem:[%s8573_s3 + $0x2a8] sm:$0xff] (!%p5612_p6)  ;;  %v4298_v11 = vld [vmem:[%s8573_s3 + $0x298] sm:$0xff] (!%p5612_p6)  ;;  %v4311_v53 = vld [vmem:[%s8573_s3 + $0x300] sm:$0xff] (!%p5612_p6) }
 0x2f5   : > { %4171 = vst.msk [vmem:[#allocation2] sm:$0xff] %vm4170_vm13, %v4163_v14  ;;  %v4262_v14 = vld [vmem:[%s8573_s3 + $0x178] sm:$0xff] (!%p5612_p6)  ;;  %5805 = vmatpush1.bf16.msra.mxu1 (!%p5612_p6), %v5804_v16  ;;  %v5702_v15 = vpack.c.bf16 (!%p5612_p6), %v4300_v57, %v4296_v9  ;;  %v4295_v16 = vld [vmem:[%s8573_s3 + $0x280] sm:$0xff] (!%p5612_p6)  ;;  %v4320_v58 = vld [vmem:[%s8573_s3 + $0x348] sm:$0xff] (!%p5612_p6) }
 0x2f6   : > { %v5806_v21 = vpack.c.bf16 %v4262_v14, %v4258_v13  ;;  %5683 = vmatprep.subr.bf16.mxu0 %v5682_v17  ;;  %v4302_v12 = vld [vmem:[%s8573_s3 + $0x2b8] sm:$0xff]  ;;  %v5700_v13 = vpack.c.bf16 %v4291_v5, %v4287_v4  ;;  %v5824_v14 = vpack.c.bf16 %v4293_v8, %v4289_v6  ;;  %v4299_v17 = vld [vmem:[%s8573_s3 + $0x2a0] sm:$0xff]  ;;  %v4324_v59 = vld [vmem:[%s8573_s3 + $0x368] sm:$0xff] }
 0x2f7   : > { %5685 = vmatpush1.bf16.msra.mxu0 %v5684_v28  ;;  %v5826_v19 = vpack.c.bf16 %v4302_v12, %v4298_v11  ;;  %v5704_v10 = vpack.c.bf16 %v4299_v17, %v4295_v16  ;;  %v4303_v28 = vld [vmem:[%s8573_s3 + $0x2c0] sm:$0xff]  ;;  %v4322_v61 = vld [vmem:[%s8573_s3 + $0x358] sm:$0xff]  ;;  %v4321_v5 = vld [vmem:[%s8573_s3 + $0x350] sm:$0xff] }
 0x2f8   : > { %5807 = vmatprep.subr.bf16.mxu1 %v5806_v21  ;;  %5687 = vmatprep.subr.bf16.mxu0 %v5686_v31  ;;  %v4304_v21 = vld [vmem:[%s8573_s3 + $0x2c8] sm:$0xff]  ;;  %v4185_v31 = vsub.s32 1, %v6987_v44  ;;  %v4315_v54 = vld [vmem:[%s8573_s3 + $0x320] sm:$0xff]  ;;  %v4326_v62 = vld [vmem:[%s8573_s3 + $0x378] sm:$0xff] }
 0x2f9   : > { %5809 = vmatpush1.bf16.msra.mxu1 %v5808_v30  ;;  %v4307_v30 = vld [vmem:[%s8573_s3 + $0x2e0] sm:$0xff]  ;;  %v5712_v63 = vpack.c.bf16 %v4315_v54, %v4311_v53  ;;  %v4325_v8 = vld [vmem:[%s8573_s3 + $0x370] sm:$0xff]  ;;  %v4328_v9 = vld [vmem:[%s8573_s3 + $0x388] sm:$0xff] }
 0x2fa   : > { %5811 = vmatprep.subr.bf16.mxu1 %v5810_v36  ;;  %v5706_v36 = vpack.c.bf16 %v4308_v22, %v4304_v21  ;;  %v4186_v47 = vrot.slane %v4177_v46, %v4185_v31  ;;  %v4319_v0 = vld [vmem:[%s8573_s3 + $0x340] sm:$0xff]  ;;  %v4332_v57 = vld [vmem:[%s8573_s3 + $0x3a8] sm:$0xff]  ;;  %v4330_v12 = vld [vmem:[%s8573_s3 + $0x398] sm:$0xff]  ;;  %v5840_v16 = vpack.c.bf16 %v4325_v8, %v4321_v5 }
 0x2fb   : > { %5689 = vmatpush1.bf16.msra.mxu0 %v5688_v29  ;;  %v5708_v29 = vpack.c.bf16 %v4307_v30, %v4303_v28  ;;  %v4323_v4 = vld [vmem:[%s8573_s3 + $0x360] sm:$0xff]  ;;  %v5718_v17 = vpack.c.bf16 %v4332_v57, %v4328_v9  ;;  %v4333_v22 = vld [vmem:[%s8573_s3 + $0x3b0] sm:$0xff]  ;;  %v4338_v28 = vld [vmem:[%s8573_s3 + $0x3d8] sm:$0xff] }
 0x2fc   : > { %5691 = vmatprep.subr.bf16.mxu0 %v5690_v45  ;;  %v4318_v45 = vld [vmem:[%s8573_s3 + $0x338] sm:$0xff]  ;;  %v4195_v41 = vcombine.low %v4182_v26, %v4186_v47  ;;  %v4176_v6 = vld [vmem:[#allocation2] sm:$0xff]  ;;  %v5844_v27 = vpack.c.bf16 %v4333_v22, %v4329_v20  ;;  %v4344_v26 = vld [vmem:[%s8573_s3 + $0x408] sm:$0xff] }
 0x2fd   : > { %5813 = vmatpush1.bf16.msra.mxu1 %v5812_v42  ;;  %v4314_v42 = vld [vmem:[%s8573_s3 + $0x318] sm:$0xff]  ;;  %v4348_v47 = vld [vmem:[%s8573_s3 + $0x428] sm:$0xff]  ;;  %v4343_v54 = vld [vmem:[%s8573_s3 + $0x400] sm:$0xff] }
 0x2fe   : > { %5815 = vmatprep.subr.bf16.mxu1 %v5814_v49  ;;  %v4190_v49 = vrot.slane %v4177_v46, %v4189_v32  ;;  %v4203_v1 = vrot.slane %v4195_v41, %v6995_v50  ;;  %v4342_v30 = vld [vmem:[%s8573_s3 + $0x3f8] sm:$0xff]  ;;  %v5726_v53 = vpack.c.bf16 %v4348_v47, %v4344_v26  ;;  %v4352_v41 = vld [vmem:[%s8573_s3 + $0x448] sm:$0xff]  ;;  %v4377_v26 = vld [vmem:[%s8573_s3 + $0x510] sm:$0xff] }
 0x2ff   : > { %5693 = vmatpush1.bf16.msra.mxu0 %v5692_v55  ;;  %v4313_v55 = vld [vmem:[%s8573_s3 + $0x310] sm:$0xff]  ;;  %v4360_v5 = vld [vmem:[%s8573_s3 + $0x488] sm:$0xff]  ;;  %v4362_v8 = vld [vmem:[%s8573_s3 + $0x498] sm:$0xff] }
 0x300   : > { %5695 = vmatprep.subr.bf16.mxu0 %v5694_v43  ;;  %v4317_v43 = vld [vmem:[%s8573_s3 + $0x330] sm:$0xff]  ;;  %v4366_v9 = vld [vmem:[%s8573_s3 + $0x4b8] sm:$0xff] }
 0x301   : > { %5817 = vmatpush1.bf16.msra.mxu1 %v5816_v56  ;;  %v5834_v56 = vpack.c.bf16 %v4318_v45, %v4314_v42  ;;  %v4341_v42 = vld [vmem:[%s8573_s3 + $0x3f0] sm:$0xff]  ;;  %v4370_v20 = vld [vmem:[%s8573_s3 + $0x4d8] sm:$0xff] }
 0x302   : > { %5819 = vmatprep.subr.bf16.mxu1 %v5818_v60  ;;  %v4196_v60 = vcombine.low %v4190_v49, %v4194_v51  ;;  %v4346_v49 = vld [vmem:[%s8573_s3 + $0x418] sm:$0xff] }
 0x303   : > { %5697 = vmatpush1.bf16.msra.mxu0 %v5696_v2  ;;  %v4350_v51 = vld [vmem:[%s8573_s3 + $0x438] sm:$0xff] }
 0x304   : > { %5699 = vmatprep.subr.bf16.mxu0 %v5698_v3  ;;  %v4210_v2 = vrot.slane %v4196_v60, %v6995_v50  ;;  %v5714_v3 = vpack.c.bf16 %v4324_v59, %v4320_v58  ;;  %v5850_v58 = vpack.c.bf16 %v4350_v51, %v4346_v49  ;;  %v4349_v59 = vld [vmem:[%s8573_s3 + $0x430] sm:$0xff]  ;;  %v4356_v60 = vld [vmem:[%s8573_s3 + $0x468] sm:$0xff] }
 0x305   : > { %5821 = vmatpush1.bf16.msra.mxu1 %v5820_v48  ;;  %v5836_v48 = vpack.c.bf16 %v4317_v43, %v4313_v55  ;;  %v4347_v55 = vld [vmem:[%s8573_s3 + $0x420] sm:$0xff]  ;;  %v4381_v49 = vld [vmem:[%s8573_s3 + $0x530] sm:$0xff]  ;;  %v4384_v51 = vld [vmem:[%s8573_s3 + $0x548] sm:$0xff] }
 0x306   : > { %5823 = vmatprep.subr.bf16.mxu1 %v5822_v7  ;;  %v5838_v7 = vpack.c.bf16 %v4326_v62, %v4322_v61  ;;  %v4211_v11 = vcombine.low %v4203_v1, %v4210_v2  ;;  %v4354_v61 = vld [vmem:[%s8573_s3 + $0x458] sm:$0xff]  ;;  %v5728_v62 = vpack.c.bf16 %v4347_v55, %v4343_v54  ;;  %v4351_v1 = vld [vmem:[%s8573_s3 + $0x440] sm:$0xff]  ;;  %v5868_v55 = vpack.c.bf16 %v4381_v49, %v4377_v26  ;;  %v4417_v49 = vld [vmem:[%s8573_s3 + $0x650] sm:$0xff] }
 0x307   : > { %5701 = vmatpush1.bf16.msra.mxu0 %v5700_v13  ;;  %v4334_v13 = vld [vmem:[%s8573_s3 + $0x3b8] sm:$0xff]  ;;  %v4355_v2 = vld [vmem:[%s8573_s3 + $0x460] sm:$0xff] }
 0x308   : > { %5703 = vmatprep.subr.bf16.mxu0 %v5702_v15  ;;  %v4213_v15 = vadd.f32 %v4211_v11, %v4176_v6  ;;  %v5842_v21 = vpack.c.bf16 %v4334_v13, %v4330_v12  ;;  %v4364_v6 = vld [vmem:[%s8573_s3 + $0x4a8] sm:$0xff]  ;;  %v5732_v57 = vpack.c.bf16 %v4355_v2, %v4351_v1  ;;  %v4359_v13 = vld [vmem:[%s8573_s3 + $0x480] sm:$0xff] }
 0x309   : > { %5825 = vmatpush1.bf16.msra.mxu1 %v5824_v14  ;;  %v5716_v14 = vpack.c.bf16 %v4323_v4, %v4319_v0  ;;  %v5730_v0 = vpack.c.bf16 %v4356_v60, %v4352_v41  ;;  %v4357_v4 = vld [vmem:[%s8573_s3 + $0x470] sm:$0xff]  ;;  %v5734_v12 = vpack.c.bf16 %v4364_v6, %v4360_v5  ;;  %v4415_v26 = vld [vmem:[%s8573_s3 + $0x640] sm:$0xff] }
 0x30a   : > { %5827 = vmatprep.subr.bf16.mxu1 %v5826_v19  ;;  %v4331_v19 = vld [vmem:[%s8573_s3 + $0x3a0] sm:$0xff]  ;;  %v4385_v41 = vld [vmem:[%s8573_s3 + $0x550] sm:$0xff] }
 0x30b   : > { %5705 = vmatpush1.bf16.msra.mxu0 %v5704_v10  ;;  %v4214_v10 = vmax.f32 %v4213_v15, 0.0  ;;  %v4361_v15 = vld [vmem:[%s8573_s3 + $0x490] sm:$0xff] }
 0x30c   : > { %5707 = vmatprep.subr.bf16.mxu0 %v5706_v36  ;;  %v4393_v5 = vld [vmem:[%s8573_s3 + $0x590] sm:$0xff] }
 0x30d   : > { %5829 = vmatpush1.bf16.msra.mxu1 %v5828_v35  ;;  %v5720_v35 = vpack.c.bf16 %v4331_v19, %v4327_v18  ;;  %v4497_v36 = vrot.slane %v4214_v10, %v6995_v50  ;;  %v4490_v45 = vcombine.high %v4214_v10, %v4214_v10  ;;  %v4368_v18 = vld [vmem:[%s8573_s3 + $0x4c8] sm:$0xff]  ;;  %v4367_v10 = vld [vmem:[%s8573_s3 + $0x4c0] sm:$0xff] }
 0x30e   : > { %5831 = vmatprep.subr.bf16.mxu1 %v5830_v37  ;;  %v5722_v37 = vpack.c.bf16 %v4340_v25, %v4336_v23  ;;  %v4372_v19 = vld [vmem:[%s8573_s3 + $0x4e8] sm:$0xff] }
 0x30f   : > { %5709 = vmatpush1.bf16.msra.mxu0 %v5708_v29  ;;  %v5846_v29 = vpack.c.bf16 %v4342_v30, %v4338_v28  ;;  %v4505_v46 = vcombine.high %v4497_v36, %v4497_v36  ;;  %v7961_v43 = vrot.slane %v4490_v45, %v6995_v50  ;;  %v4358_v50 = vld [vmem:[%s8573_s3 + $0x478] sm:$0xff]  ;;  %v5738_v25 = vpack.c.bf16 %v4372_v19, %v4368_v18  ;;  %v4371_v28 = vld [vmem:[%s8573_s3 + $0x4e0] sm:$0xff]  ;;  %v4369_v30 = vld [vmem:[%s8573_s3 + $0x4d0] sm:$0xff] }
 0x310   : > { %5711 = vmatprep.subr.bf16.mxu0 %v5710_v33  ;;  %v5848_v33 = vpack.c.bf16 %v4341_v42, %v4337_v40  ;;  %v5740_v40 = vpack.c.bf16 %v4371_v28, %v4367_v10  ;;  %v4375_v45 = vld [vmem:[%s8573_s3 + $0x500] sm:$0xff]  ;;  %v4405_v19 = vld [vmem:[%s8573_s3 + $0x5f0] sm:$0xff] }
 0x311   : > { %5833 = vmatpush1.bf16.msra.mxu1 %v5832_v52  ;;  %v5724_v52 = vpack.c.bf16 %v4339_v39, %v4335_v38  ;;  %4590 = vmatprep.mubr.f32.mxu0 %v4505_v46  ;;  %v4378_v38 = vld [vmem:[%s8573_s3 + $0x518] sm:$0xff] }
 0x312   : > { %5835 = vmatprep.subr.bf16.mxu1 %v5834_v56  ;;  %v4345_v56 = vld [vmem:[%s8573_s3 + $0x410] sm:$0xff]  ;;  %4732 = vmatprep.mubr.f32.mxu1 %v4505_v46  ;;  %v4382_v39 = vld [vmem:[%s8573_s3 + $0x538] sm:$0xff]  ;;  %v4379_v46 = vld [vmem:[%s8573_s3 + $0x520] sm:$0xff] }
 0x313   : > { %5713 = vmatpush1.bf16.msra.mxu0 %v5712_v63  ;;  %v5852_v63 = vpack.c.bf16 %v4349_v59, %v4345_v56  ;;  %v5866_v47 = vpack.c.bf16 %v4382_v39, %v4378_v38  ;;  %v5744_v54 = vpack.c.bf16 %v4379_v46, %v4375_v45  ;;  %v4387_v59 = vld [vmem:[%s8573_s3 + $0x560] sm:$0xff]  ;;  %v4416_v38 = vld [vmem:[%s8573_s3 + $0x648] sm:$0xff] }
 0x314   : > { %5715 = vmatprep.subr.bf16.mxu0 %v5714_v3  ;;  %v5854_v3 = vpack.c.bf16 %v4358_v50, %v4354_v61  ;;  %v4389_v61 = vld [vmem:[%s8573_s3 + $0x570] sm:$0xff]  ;;  %v4392_v50 = vld [vmem:[%s8573_s3 + $0x588] sm:$0xff] }
 0x315   : > { %5837 = vmatpush1.bf16.msra.mxu1 %v5836_v48  ;;  %v4353_v48 = vld [vmem:[%s8573_s3 + $0x450] sm:$0xff]  ;;  %v5872_v2 = vpack.c.bf16 %v4389_v61, %v4385_v41  ;;  %v4420_v39 = vld [vmem:[%s8573_s3 + $0x668] sm:$0xff]  ;;  %v4423_v41 = vld [vmem:[%s8573_s3 + $0x680] sm:$0xff] }
 0x316   : > { %5839 = vmatprep.subr.bf16.mxu1 %v5838_v7  ;;  %v4506_v7 = vcombine.high %v7961_v43, %v7961_v43  ;;  %v5856_v11 = vpack.c.bf16 %v4357_v4, %v4353_v48  ;;  %v4395_v4 = vld [vmem:[%s8573_s3 + $0x5a0] sm:$0xff]  ;;  %v5762_v46 = vpack.c.bf16 %v4420_v39, %v4416_v38  ;;  %v4425_v61 = vld [vmem:[%s8573_s3 + $0x690] sm:$0xff] }
 0x317   : > { %5717 = vmatpush1.bf16.msra.mxu0 %v5716_v14  ;;  %v4363_v14 = vld [vmem:[%s8573_s3 + $0x4a0] sm:$0xff]  ;;  %v4453_v39 = vld [vmem:[%s8573_s3 + $0x770] sm:$0xff] }
 0x318   : > { %5719 = vmatprep.subr.bf16.mxu0 %v5718_v17  ;;  %v4365_v17 = vld [vmem:[%s8573_s3 + $0x4b0] sm:$0xff]  ;;  %v5736_v22 = vpack.c.bf16 %v4363_v14, %v4359_v13 }
 0x319   : > { %5841 = vmatpush1.bf16.msra.mxu1 %v5840_v16  ;;  %v5858_v16 = vpack.c.bf16 %v4366_v9, %v4362_v8  ;;  %v5860_v23 = vpack.c.bf16 %v4365_v17, %v4361_v15  ;;  %v4400_v8 = vld [vmem:[%s8573_s3 + $0x5c8] sm:$0xff]  ;;  %v4399_v15 = vld [vmem:[%s8573_s3 + $0x5c0] sm:$0xff]  ;;  %v4401_v17 = vld [vmem:[%s8573_s3 + $0x5d0] sm:$0xff] }
 0x31a   : > { %5843 = vmatprep.subr.bf16.mxu1 %v5842_v21  ;;  %v4374_v21 = vld [vmem:[%s8573_s3 + $0x4f8] sm:$0xff]  ;;  %v4404_v9 = vld [vmem:[%s8573_s3 + $0x5e8] sm:$0xff]  ;;  %v5880_v10 = vpack.c.bf16 %v4405_v19, %v4401_v17  ;;  %v4439_v17 = vld [vmem:[%s8573_s3 + $0x700] sm:$0xff] }
 0x31b   : > { %5721 = vmatpush1.bf16.msra.mxu0 %v5720_v35  ;;  %v5862_v35 = vpack.c.bf16 %v4374_v21, %v4370_v20  ;;  %v5754_v14 = vpack.c.bf16 %v4404_v9, %v4400_v8  ;;  %v4408_v20 = vld [vmem:[%s8573_s3 + $0x608] sm:$0xff]  ;;  %v4437_v9 = vld [vmem:[%s8573_s3 + $0x6f0] sm:$0xff] }
 0x31c   : > { %5723 = vmatprep.subr.bf16.mxu0 %v5722_v37  ;;  %v4380_v37 = vld [vmem:[%s8573_s3 + $0x528] sm:$0xff]  ;;  %v4441_v19 = vld [vmem:[%s8573_s3 + $0x710] sm:$0xff] }
 0x31d   : > { %5845 = vmatpush1.bf16.msra.mxu1 %v5844_v27  ;;  %v4376_v27 = vld [vmem:[%s8573_s3 + $0x508] sm:$0xff] }
 0x31e   : > { %5847 = vmatprep.subr.bf16.mxu1 %v5846_v29  ;;  %v5742_v42 = vpack.c.bf16 %v4380_v37, %v4376_v27  ;;  %v4412_v21 = vld [vmem:[%s8573_s3 + $0x628] sm:$0xff]  ;;  %v4413_v37 = vld [vmem:[%s8573_s3 + $0x630] sm:$0xff] }
 0x31f   : > { %5725 = vmatpush1.bf16.msra.mxu0 %v5724_v52  ;;  %v4388_v52 = vld [vmem:[%s8573_s3 + $0x568] sm:$0xff]  ;;  %v5758_v28 = vpack.c.bf16 %v4412_v21, %v4408_v20  ;;  %v4445_v21 = vld [vmem:[%s8573_s3 + $0x730] sm:$0xff] }
 0x320   : > { %5727 = vmatprep.subr.bf16.mxu0 %v5726_v53  ;;  %v4390_v53 = vld [vmem:[%s8573_s3 + $0x578] sm:$0xff]  ;;  %v5746_v56 = vpack.c.bf16 %v4388_v52, %v4384_v51  ;;  %v4421_v52 = vld [vmem:[%s8573_s3 + $0x670] sm:$0xff] }
 0x321   : > { %5849 = vmatpush1.bf16.msra.mxu1 %v5848_v33  ;;  %v4386_v33 = vld [vmem:[%s8573_s3 + $0x558] sm:$0xff] }
 0x322   : > { %5851 = vmatprep.subr.bf16.mxu1 %v5850_v58  ;;  %4591 = vmatmul.mubr.f32.vlgmr.msra.gmra.mrb[0].mxu0 %v4497_v36  ;;  %v4383_v58 = vld [vmem:[%s8573_s3 + $0x540] sm:$0xff]  ;;  %v5870_v60 = vpack.c.bf16 %v4390_v53, %v4386_v33  ;;  %v4424_v33 = vld [vmem:[%s8573_s3 + $0x688] sm:$0xff] }
 0x323   : > { %5729 = vmatpush1.bf16.msra.mxu0 %v5728_v62  ;;  %5615 = vmatprep.mubr.msk.f32.mxu0 %vm4510_vm14, %v4506_v7  ;;  %v4396_v62 = vld [vmem:[%s8573_s3 + $0x5a8] sm:$0xff]  ;;  %v5748_v1 = vpack.c.bf16 %v4387_v59, %v4383_v58  ;;  %v5888_v58 = vpack.c.bf16 %v4421_v52, %v4417_v49  ;;  %v4455_v49 = vld [vmem:[%s8573_s3 + $0x780] sm:$0xff] }
 0x324   : > { %4733 = vmatmul.mubr.f32.vlgmr.msra.gmra.mrb[0].mxu1 %v4497_v36  ;;  %5731 = vmatprep.subr.bf16.mxu0 %v5730_v0  ;;  %v4373_v36 = vld [vmem:[%s8573_s3 + $0x4f0] sm:$0xff]  ;;  %v4398_v0 = vld [vmem:[%s8573_s3 + $0x5b8] sm:$0xff]  ;;  %v5750_v48 = vpack.c.bf16 %v4396_v62, %v4392_v50  ;;  %v4428_v53 = vld [vmem:[%s8573_s3 + $0x6a8] sm:$0xff] }
 0x325   : > { %5853 = vmatpush1.bf16.msra.mxu1 %v5852_v63  ;;  %5618 = vmatprep.mubr.msk.f32.mxu1 %vm4510_vm14, %v4506_v7  ;;  %v5864_v29 = vpack.c.bf16 %v4373_v36, %v4369_v30  ;;  %v4394_v63 = vld [vmem:[%s8573_s3 + $0x598] sm:$0xff]  ;;  %v4397_v7 = vld [vmem:[%s8573_s3 + $0x5b0] sm:$0xff]  ;;  %v4407_v30 = vld [vmem:[%s8573_s3 + $0x600] sm:$0xff]  ;;  %v5766_v59 = vpack.c.bf16 %v4428_v53, %v4424_v33 }
 0x326   : > { %5855 = vmatprep.subr.bf16.mxu1 %v5854_v3  ;;  %v4391_v3 = vld [vmem:[%s8573_s3 + $0x580] sm:$0xff]  ;;  %v5874_v6 = vpack.c.bf16 %v4398_v0, %v4394_v63  ;;  %v5876_v13 = vpack.c.bf16 %v4397_v7, %v4393_v5  ;;  %v4409_v36 = vld [vmem:[%s8573_s3 + $0x610] sm:$0xff]  ;;  %v4432_v63 = vld [vmem:[%s8573_s3 + $0x6c8] sm:$0xff] }
 0x327   : > { %5733 = vmatpush1.bf16.msra.mxu0 %v5732_v57  ;;  %v4402_v57 = vld [vmem:[%s8573_s3 + $0x5d8] sm:$0xff]  ;;  %v5884_v45 = vpack.c.bf16 %v4413_v37, %v4409_v36  ;;  %v4429_v62 = vld [vmem:[%s8573_s3 + $0x6b0] sm:$0xff]  ;;  %v4436_v0 = vld [vmem:[%s8573_s3 + $0x6e8] sm:$0xff] }
 0x328   : > { %5735 = vmatprep.subr.bf16.mxu0 %v5734_v12  ;;  %v5752_v12 = vpack.c.bf16 %v4395_v4, %v4391_v3  ;;  %v5892_v3 = vpack.c.bf16 %v4429_v62, %v4425_v61  ;;  %v5770_v4 = vpack.c.bf16 %v4436_v0, %v4432_v63  ;;  %v4431_v5 = vld [vmem:[%s8573_s3 + $0x6c0] sm:$0xff]  ;;  %v4433_v7 = vld [vmem:[%s8573_s3 + $0x6d0] sm:$0xff]  ;;  %v4831_v61 = vld [vmem:[%s8575_s5 + $0x88] sm:$0xff] }
 0x329   : > { %5857 = vmatpush1.bf16.msra.mxu1 %v5856_v11  ;;  %v4406_v11 = vld [vmem:[%s8573_s3 + $0x5f8] sm:$0xff]  ;;  %v4447_v36 = vld [vmem:[%s8573_s3 + $0x740] sm:$0xff]  ;;  %v4449_v37 = vld [vmem:[%s8573_s3 + $0x750] sm:$0xff] }
 0x32a   : > { %5859 = vmatprep.subr.bf16.mxu1 %v5858_v16  ;;  %v4403_v16 = vld [vmem:[%s8573_s3 + $0x5e0] sm:$0xff]  ;;  %v5878_v18 = vpack.c.bf16 %v4406_v11, %v4402_v57  ;;  %v4440_v57 = vld [vmem:[%s8573_s3 + $0x708] sm:$0xff]  ;;  %v4457_v33 = vld [vmem:[%s8573_s3 + $0x790] sm:$0xff] }
 0x32b   : > { %5737 = vmatpush1.bf16.msra.mxu0 %v5736_v22  ;;  %v4410_v22 = vld [vmem:[%s8573_s3 + $0x618] sm:$0xff]  ;;  %v4444_v11 = vld [vmem:[%s8573_s3 + $0x728] sm:$0xff]  ;;  %v4461_v53 = vld [vmem:[%s8573_s3 + $0x7b0] sm:$0xff] }
 0x32c   : > { %5739 = vmatprep.subr.bf16.mxu0 %v5738_v25  ;;  %v5756_v25 = vpack.c.bf16 %v4403_v16, %v4399_v15  ;;  %v5896_v15 = vpack.c.bf16 %v4437_v9, %v4433_v7  ;;  %v5774_v16 = vpack.c.bf16 %v4444_v11, %v4440_v57  ;;  %v4814_v62 = vld [vmem:[%s8575_s5] sm:$0xff]  ;;  %v4815_v63 = vld [vmem:[%s8575_s5 + $0x8] sm:$0xff]  ;;  %v4465_v0 = vld [vmem:[%s8573_s3 + $0x7d0] sm:$0xf]  ;;  %v6882_v57 = vmov 0.0|0.0  }
 0x32d   : > { %5861 = vmatpush1.bf16.msra.mxu1 %v5860_v23  ;;  %v4414_v23 = vld [vmem:[%s8573_s3 + $0x638] sm:$0xff]  ;;  %v4834_v11 = vld [vmem:[%s8575_s5 + $0xa0] sm:$0xff] }
 0x32e   : > { %5863 = vmatprep.subr.bf16.mxu1 %v5862_v35  ;;  %v4411_v35 = vld [vmem:[%s8573_s3 + $0x620] sm:$0xff]  ;;  %v5882_v27 = vpack.c.bf16 %v4414_v23, %v4410_v22  ;;  %v4448_v22 = vld [vmem:[%s8573_s3 + $0x748] sm:$0xff]  ;;  %v4817_v9 = vld [vmem:[%s8575_s5 + $0x18] sm:$0xff] }
 0x32f   : > { %5741 = vmatpush1.bf16.msra.mxu0 %v5740_v40  ;;  %v4418_v40 = vld [vmem:[%s8573_s3 + $0x658] sm:$0xff]  ;;  %v4452_v23 = vld [vmem:[%s8573_s3 + $0x768] sm:$0xff] }
 0x330   : > { %5743 = vmatprep.subr.bf16.mxu0 %v5742_v42  ;;  %v5760_v42 = vpack.c.bf16 %v4411_v35, %v4407_v30  ;;  %v5900_v30 = vpack.c.bf16 %v4445_v21, %v4441_v19  ;;  %v5778_v35 = vpack.c.bf16 %v4452_v23, %v4448_v22  ;;  %v4836_v19 = vld [vmem:[%s8575_s5 + $0xb0] sm:$0xff]  ;;  %v4853_v23 = vld [vmem:[%s8575_s5 + $0x138] sm:$0xff] }
 0x331   : > { %5865 = vmatpush1.bf16.msra.mxu1 %v5864_v29  ;;  %v4422_v29 = vld [vmem:[%s8573_s3 + $0x678] sm:$0xff]  ;;  %v4852_v22 = vld [vmem:[%s8575_s5 + $0x130] sm:$0xff] }
 0x332   : > { %5867 = vmatprep.subr.bf16.mxu1 %v5866_v47  ;;  %v4419_v47 = vld [vmem:[%s8573_s3 + $0x660] sm:$0xff]  ;;  %v5886_v51 = vpack.c.bf16 %v4422_v29, %v4418_v40  ;;  %v4456_v40 = vld [vmem:[%s8573_s3 + $0x788] sm:$0xff] }
 0x333   : > { %5745 = vmatpush1.bf16.msra.mxu0 %v5744_v54  ;;  %v4426_v54 = vld [vmem:[%s8573_s3 + $0x698] sm:$0xff]  ;;  %v4460_v29 = vld [vmem:[%s8573_s3 + $0x7a8] sm:$0xff] }
 0x334   : > { %5747 = vmatprep.subr.bf16.mxu0 %v5746_v56  ;;  %v5764_v56 = vpack.c.bf16 %v4419_v47, %v4415_v26  ;;  %v5904_v26 = vpack.c.bf16 %v4453_v39, %v4449_v37  ;;  %v5782_v47 = vpack.c.bf16 %v4460_v29, %v4456_v40  ;;  %v4854_v37 = vld [vmem:[%s8575_s5 + $0x140] sm:$0xff] }
 0x335   : > { %5869 = vmatpush1.bf16.msra.mxu1 %v5868_v55  ;;  %v4430_v55 = vld [vmem:[%s8573_s3 + $0x6b8] sm:$0xff]  ;;  %v4822_v29 = vld [vmem:[%s8575_s5 + $0x40] sm:$0xff] }
 0x336   : > { %5871 = vmatprep.subr.bf16.mxu1 %v5870_v60  ;;  %v4427_v60 = vld [vmem:[%s8573_s3 + $0x6a0] sm:$0xff]  ;;  %v5890_v50 = vpack.c.bf16 %v4430_v55, %v4426_v54  ;;  %v5908_v55 = vpack.c.bf16 %v4461_v53, %v4457_v33  ;;  %v4824_v33 = vld [vmem:[%s8575_s5 + $0x50] sm:$0xff]  ;;  %v4825_v53 = vld [vmem:[%s8575_s5 + $0x58] sm:$0xff] }
 0x337   : > { %5749 = vmatpush1.bf16.msra.mxu0 %v5748_v1  ;;  %v4434_v1 = vld [vmem:[%s8573_s3 + $0x6d8] sm:$0xff] }
 0x338   : > { %5751 = vmatprep.subr.bf16.mxu0 %v5750_v48  ;;  %v5768_v48 = vpack.c.bf16 %v4427_v60, %v4423_v41  ;;  %v4847_v41 = vld [vmem:[%s8575_s5 + $0x108] sm:$0xff]  ;;  %v4830_v60 = vld [vmem:[%s8575_s5 + $0x80] sm:$0xff] }
 0x339   : > { %5873 = vmatpush1.bf16.msra.mxu1 %v5872_v2  ;;  %v4438_v2 = vld [vmem:[%s8573_s3 + $0x6f8] sm:$0xff] }
 0x33a   : > { %5875 = vmatprep.subr.bf16.mxu1 %v5874_v6  ;;  %v4435_v6 = vld [vmem:[%s8573_s3 + $0x6e0] sm:$0xff]  ;;  %v5894_v8 = vpack.c.bf16 %v4438_v2, %v4434_v1  ;;  %v4832_v1 = vld [vmem:[%s8575_s5 + $0x90] sm:$0xff]  ;;  %v4833_v2 = vld [vmem:[%s8575_s5 + $0x98] sm:$0xff] }
 0x33b   : > { %5753 = vmatpush1.bf16.msra.mxu0 %v5752_v12  ;;  %v4442_v12 = vld [vmem:[%s8573_s3 + $0x718] sm:$0xff]  ;;  %v5914_v7 = vpack.c.bf16 %v4833_v2, %v4832_v1  ;;  %v4863_v1 = vld [vmem:[%s8575_s5 + $0x188] sm:$0xff] }
 0x33c   : > { %5755 = vmatprep.subr.bf16.mxu0 %v5754_v14  ;;  %v5772_v14 = vpack.c.bf16 %v4435_v6, %v4431_v5  ;;  %v4849_v5 = vld [vmem:[%s8575_s5 + $0x118] sm:$0xff]  ;;  %v5912_v6 = vpack.c.bf16 %v4815_v63, %v4814_v62 }
 0x33d   : > { %5877 = vmatpush1.bf16.msra.mxu1 %v5876_v13  ;;  %v4446_v13 = vld [vmem:[%s8573_s3 + $0x738] sm:$0xff] }
 0x33e   : > { %5879 = vmatprep.subr.bf16.mxu1 %v5878_v18  ;;  %v4443_v18 = vld [vmem:[%s8573_s3 + $0x720] sm:$0xff]  ;;  %v5898_v20 = vpack.c.bf16 %v4446_v13, %v4442_v12  ;;  %v4835_v12 = vld [vmem:[%s8575_s5 + $0xa8] sm:$0xff]  ;;  %v4861_v62 = vld [vmem:[%s8575_s5 + $0x178] sm:$0xff] }
 0x33f   : > { %5757 = vmatpush1.bf16.msra.mxu0 %v5756_v25  ;;  %v4450_v25 = vld [vmem:[%s8573_s3 + $0x758] sm:$0xff] }
 0x340   : > { %5759 = vmatprep.subr.bf16.mxu0 %v5758_v28  ;;  %v5776_v28 = vpack.c.bf16 %v4443_v18, %v4439_v17  ;;  %v4818_v17 = vld [vmem:[%s8575_s5 + $0x20] sm:$0xff]  ;;  %v4819_v18 = vld [vmem:[%s8575_s5 + $0x28] sm:$0xff] }
 0x341   : > { %5881 = vmatpush1.bf16.msra.mxu1 %v5880_v10  ;;  %v4454_v10 = vld [vmem:[%s8573_s3 + $0x778] sm:$0xff] }
 0x342   : > { %5883 = vmatprep.subr.bf16.mxu1 %v5882_v27  ;;  %v4451_v27 = vld [vmem:[%s8573_s3 + $0x760] sm:$0xff]  ;;  %v5902_v38 = vpack.c.bf16 %v4454_v10, %v4450_v25  ;;  %v5920_v25 = vpack.c.bf16 %v4819_v18, %v4818_v17  ;;  %v4827_v18 = vld [vmem:[%s8575_s5 + $0x68] sm:$0xff] }
 0x343   : > { %5761 = vmatpush1.bf16.msra.mxu0 %v5760_v42  ;;  %v4458_v42 = vld [vmem:[%s8573_s3 + $0x798] sm:$0xff]  ;;  %v4826_v17 = vld [vmem:[%s8575_s5 + $0x60] sm:$0xff] }
 0x344   : > { %5763 = vmatprep.subr.bf16.mxu0 %v5762_v46  ;;  %v5780_v46 = vpack.c.bf16 %v4451_v27, %v4447_v36  ;;  %v4839_v36 = vld [vmem:[%s8575_s5 + $0xc8] sm:$0xff]  ;;  %v5952_v27 = vpack.c.bf16 %v4853_v23, %v4852_v22  ;;  %v4845_v23 = vld [vmem:[%s8575_s5 + $0xf8] sm:$0xff] }
 0x345   : > { %5885 = vmatpush1.bf16.msra.mxu1 %v5884_v45  ;;  %v4462_v45 = vld [vmem:[%s8573_s3 + $0x7b8] sm:$0xff] }
 0x346   : > { %5887 = vmatprep.subr.bf16.mxu1 %v5886_v51  ;;  %v4459_v51 = vld [vmem:[%s8573_s3 + $0x7a0] sm:$0xff]  ;;  %v5906_v52 = vpack.c.bf16 %v4462_v45, %v4458_v42  ;;  %v4823_v42 = vld [vmem:[%s8575_s5 + $0x48] sm:$0xff]  ;;  %v4840_v45 = vld [vmem:[%s8575_s5 + $0xd0] sm:$0xff] }
 0x347   : > { %5765 = vmatpush1.bf16.msra.mxu0 %v5764_v56  ;;  %v5784_v54 = vpack.c.bf16 %v4459_v51, %v4455_v49  ;;  %v4464_v56 = vld [vmem:[%s8573_s3 + $0x7c8] sm:$0xf]  ;;  %v4857_v49 = vld [vmem:[%s8575_s5 + $0x158] sm:$0xff]  ;;  %v5928_v51 = vpack.c.bf16 %v4823_v42, %v4822_v29 }
 0x348   : > { %5767 = vmatprep.subr.bf16.mxu0 %v5766_v59  ;;  %v4846_v59 = vld [vmem:[%s8575_s5 + $0x100] sm:$0xff] }
 0x349   : > { %5889 = vmatpush1.bf16.msra.mxu1 %v5888_v58  ;;  %v4466_v58 = vld [vmem:[%s8573_s3 + $0x7d8] sm:$0xf] }
 0x34a   : > { %5891 = vmatprep.subr.bf16.mxu1 %v5890_v50  ;;  %v4463_v50 = vld [vmem:[%s8573_s3 + $0x7c0] sm:$0xf] }
 0x34b   : > { %5769 = vmatpush1.bf16.msra.mxu0 %v5768_v48  ;;  %v5943_v48 = vpack.c.bf16 %v4847_v41, %v4846_v59  ;;  %v4859_v59 = vld [vmem:[%s8575_s5 + $0x168] sm:$0xff]  ;;  %v5932_v41 = vpack.c.bf16 %v4825_v53, %v4824_v33 }
 0x34c   : > { %5771 = vmatprep.subr.bf16.mxu0 %v5770_v4  ;;  %v4848_v4 = vld [vmem:[%s8575_s5 + $0x110] sm:$0xff] }
 0x34d   : > { %5893 = vmatpush1.bf16.msra.mxu1 %v5892_v3  ;;  %v5910_v3 = vpack.c.bf16 %v4831_v61, %v4830_v60  ;;  %v5946_v13 = vpack.c.bf16 %v4849_v5, %v4848_v4  ;;  %v4866_v5 = vld [vmem:[%s8575_s5 + $0x1a0] sm:$0xff] }
 0x34e   : > { %5895 = vmatprep.subr.bf16.mxu1 %v5894_v8  ;;  %v4816_v8 = vld [vmem:[%s8575_s5 + $0x10] sm:$0xff] }
 0x34f   : > { %5773 = vmatpush1.bf16.msra.mxu0 %v5772_v14  ;;  %v4851_v14 = vld [vmem:[%s8575_s5 + $0x128] sm:$0xff] }
 0x350   : > { %5775 = vmatprep.subr.bf16.mxu0 %v5774_v16  ;;  %v5918_v16 = vpack.c.bf16 %v4835_v12, %v4834_v11  ;;  %v4870_v12 = vld [vmem:[%s8575_s5 + $0x1c0] sm:$0xff] }
 0x351   : > { %5897 = vmatpush1.bf16.msra.mxu1 %v5896_v15  ;;  %v5916_v15 = vpack.c.bf16 %v4817_v9, %v4816_v8  ;;  %v4868_v8 = vld [vmem:[%s8575_s5 + $0x1b0] sm:$0xff]  ;;  %v4869_v9 = vld [vmem:[%s8575_s5 + $0x1b8] sm:$0xff] }
 0x352   : > { %5899 = vmatprep.subr.bf16.mxu1 %v5898_v20  ;;  %v4837_v20 = vld [vmem:[%s8575_s5 + $0xb8] sm:$0xff]  ;;  %v5976_v11 = vpack.c.bf16 %v4869_v9, %v4868_v8 }
 0x353   : > { %5777 = vmatpush1.bf16.msra.mxu0 %v5776_v28  ;;  %v5922_v10 = vpack.c.bf16 %v4837_v20, %v4836_v19  ;;  %v4820_v28 = vld [vmem:[%s8575_s5 + $0x30] sm:$0xff]  ;;  %v5936_v19 = vpack.c.bf16 %v4827_v18, %v4826_v17  ;;  %v4874_v20 = vld [vmem:[%s8575_s5 + $0x1e0] sm:$0xff] }
 0x354   : > { %5779 = vmatprep.subr.bf16.mxu0 %v5778_v35  ;;  %v4838_v35 = vld [vmem:[%s8575_s5 + $0xc0] sm:$0xff] }
 0x355   : > { %5901 = vmatpush1.bf16.msra.mxu1 %v5900_v30  ;;  %v4821_v30 = vld [vmem:[%s8575_s5 + $0x38] sm:$0xff]  ;;  %v5926_v40 = vpack.c.bf16 %v4839_v36, %v4838_v35  ;;  %v6883_v35 = vmov 0.0   ;;  %v4876_v36 = vld [vmem:[%s8575_s5 + $0x1f0] sm:$0xf] }
 0x356   : > { %5903 = vmatprep.subr.bf16.mxu1 %v5902_v38  ;;  %v4855_v38 = vld [vmem:[%s8575_s5 + $0x148] sm:$0xff]  ;;  %v5924_v39 = vpack.c.bf16 %v4821_v30, %v4820_v28  ;;  %v4829_v28 = vld [vmem:[%s8575_s5 + $0x78] sm:$0xff] }
 0x357   : > { %5781 = vmatpush1.bf16.msra.mxu0 %v5780_v46  ;;  %v4841_v46 = vld [vmem:[%s8575_s5 + $0xd8] sm:$0xff] }
 0x358   : > { %5783 = vmatprep.subr.bf16.mxu0 %v5782_v47  ;;  %v4856_v47 = vld [vmem:[%s8575_s5 + $0x150] sm:$0xff] }
 0x359   : > { %5905 = vmatpush1.bf16.msra.mxu1 %v5904_v26  ;;  %v5955_v26 = vpack.c.bf16 %v4855_v38, %v4854_v37 }
 0x35a   : > { %5907 = vmatprep.subr.bf16.mxu1 %v5906_v52  ;;  %v5930_v52 = vpack.c.bf16 %v4841_v46, %v4840_v45 }
 0x35b   : > { %5785 = vmatpush1.bf16.msra.mxu0 %v5784_v54  ;;  %v4842_v54 = vld [vmem:[%s8575_s5 + $0xe0] sm:$0xff] }
 0x35c   : > { %5613 = vmatprep.subr.msk.mxu0 %vm4513_vm15, %v4464_v56  ;;  %v5958_v56 = vpack.c.bf16 %v4857_v49, %v4856_v47 }
 0x35d   : > { %5909 = vmatpush1.bf16.msra.mxu1 %v5908_v55  ;;  %v4843_v55 = vld [vmem:[%s8575_s5 + $0xe8] sm:$0xff] }
 0x35e   : > { %5616 = vmatprep.subr.msk.mxu1 %vm4513_vm15, %v4466_v58  ;;  %v4858_v58 = vld [vmem:[%s8575_s5 + $0x160] sm:$0xff]  ;;  %v5934_v60 = vpack.c.bf16 %v4843_v55, %v4842_v54 }
 0x35f   : > { %5614 = vmatpush1.msk.msra.mxu0 %vm4513_vm15, %v4463_v50  ;;  %v5961_v61 = vpack.c.bf16 %v4859_v59, %v4858_v58  ;;  %v4860_v50 = vld [vmem:[%s8575_s5 + $0x170] sm:$0xff] }
 0x360   : > { %4662 = vmatmul.mubr.f32.vlgmr.msra.gmra.mrb[0].mxu0 %v7961_v43  ;;  %5911 = vmatprep.subr.bf16.mxu0 %v5910_v3  ;;  %v5964_v63 = vpack.c.bf16 %v4861_v62, %v4860_v50  ;;  %v4865_v3 = vld [vmem:[%s8575_s5 + $0x198] sm:$0xff] }
 0x361   : > { %5617 = vmatpush1.msk.msra.mxu1 %vm4513_vm15, %v4465_v0  ;;  %5913 = vmatpush3.bf16.msra.mxu0 %v5912_v6  ;;  %v4862_v0 = vld [vmem:[%s8575_s5 + $0x180] sm:$0xff]  ;;  %v4867_v6 = vld [vmem:[%s8575_s5 + $0x1a8] sm:$0xff] }
 0x362   : > { %4804 = vmatmul.mubr.f32.vlgmr.msra.gmra.mrb[0].mxu1 %v7961_v43  ;;  %5942 = vmatprep.subr.bf16.mxu1 %v6882_v57  ;;  %v4850_v43 = vld [vmem:[%s8575_s5 + $0x120] sm:$0xff]  ;;  %v5967_v2 = vpack.c.bf16 %v4863_v1, %v4862_v0 }
 0x363   : > { %5944 = vmatpush1.bf16.msra.mxu1 %v5943_v48  ;;  %5915 = vmatprep.subr.bf16.mxu0 %v5914_v7  ;;  %v5949_v21 = vpack.c.bf16 %v4851_v14, %v4850_v43  ;;  %v4864_v48 = vld [vmem:[%s8575_s5 + $0x190] sm:$0xff]  ;;  %v5973_v7 = vpack.c.bf16 %v4867_v6, %v4866_v5 }
 0x364   : > { %5945 = vmatprep.subr.bf16.mxu1 %v6882_v57  ;;  %v5970_v4 = vpack.c.bf16 %v4865_v3, %v4864_v48  ;;  %v4872_v14 = vld [vmem:[%s8575_s5 + $0x1d0] sm:$0xff] }
 0x365   : > { %5917 = vmatpush3.bf16.msra.mxu0 %v5916_v15  ;;  %v4873_v15 = vld [vmem:[%s8575_s5 + $0x1d8] sm:$0xff] }
 0x366   : > { %5919 = vmatprep.subr.bf16.mxu0 %v5918_v16  ;;  %v5982_v16 = vpack.c.bf16 %v4873_v15, %v4872_v14 }
 0x367   : > { %5947 = vmatpush1.bf16.msra.mxu1 %v5946_v13  ;;  %v4871_v13 = vld [vmem:[%s8575_s5 + $0x1c8] sm:$0xff] }
 0x368   : > { %5948 = vmatprep.subr.bf16.mxu1 %v6882_v57  ;;  %v5979_v43 = vpack.c.bf16 %v4871_v13, %v4870_v12 }
 0x369   : > { %5921 = vmatpush3.bf16.msra.mxu0 %v5920_v25 }
 0x36a   : > { %5923 = vmatprep.subr.bf16.mxu0 %v5922_v10  ;;  %v4828_v10 = vld [vmem:[%s8575_s5 + $0x70] sm:$0xff] }
 0x36b   : > { %5950 = vmatpush1.bf16.msra.mxu1 %v5949_v21  ;;  %v4875_v21 = vld [vmem:[%s8575_s5 + $0x1e8] sm:$0xff]  ;;  %v5940_v30 = vpack.c.bf16 %v4829_v28, %v4828_v10 }
 0x36c   : > { %5951 = vmatprep.subr.bf16.mxu1 %v6882_v57  ;;  %v5985_v22 = vpack.c.bf16 %v4875_v21, %v4874_v20 }
 0x36d   : > { %5925 = vmatpush3.bf16.msra.mxu0 %v5924_v39 }
 0x36e   : > { %5927 = vmatprep.subr.bf16.mxu0 %v5926_v40 }
 0x36f   : > { %5953 = vmatpush1.bf16.msra.mxu1 %v5952_v27  ;;  %v4467_v27 = vld [vmem:[%s8574_s4] sm:$0xf] }
 0x370   : > { %5954 = vmatprep.subr.bf16.mxu1 %v6882_v57  ;;  %v4472_v37 = vrot.slane %v4467_v27, %v4181_v24  ;;  %v4480_v38 = vrot.slane %v4467_v27, %v4189_v32  ;;  %v4476_v39 = vrot.slane %v4467_v27, %v4185_v31  ;;  %v4484_v40 = vrot.slane %v4467_v27, %v4193_v34  ;;  %v5619_v32 = vld [vmem:[%s8576_s6] ss:$0 sm:$0xff] }
 0x371   : > { %5929 = vmatpush3.bf16.msra.mxu0 %v5928_v51 }
 0x372   : > { %5931 = vmatprep.subr.bf16.mxu0 %v5930_v52 }
 0x373   : > { %5956 = vmatpush1.bf16.msra.mxu1 %v5955_v26 }
 0x374   : > { %5957 = vmatprep.subr.bf16.mxu1 %v6882_v57 }
 0x375   : > { %5933 = vmatpush3.bf16.msra.mxu0 %v5932_v41 }
 0x376   : > { %5935 = vmatprep.subr.bf16.mxu0 %v5934_v60 }
 0x377   : > { %5959 = vmatpush1.bf16.msra.mxu1 %v5958_v56 }
 0x378   : > { %5960 = vmatprep.subr.bf16.mxu1 %v6882_v57 }
 0x379   : > { %5937 = vmatpush3.bf16.msra.mxu0 %v5936_v19 }
 0x37b   : > { %5962 = vmatpush1.bf16.msra.mxu1 %v5961_v61 }
 0x37c   : > { %5963 = vmatprep.subr.bf16.mxu1 %v6882_v57 }
 0x37f   : > { %5965 = vmatpush1.bf16.msra.mxu1 %v5964_v63 }
 0x380   : > { %5966 = vmatprep.subr.bf16.mxu1 %v6882_v57 }
 0x383   : > { %5968 = vmatpush1.bf16.msra.mxu1 %v5967_v2 }
 0x384   : > { %5969 = vmatprep.subr.bf16.mxu1 %v6882_v57 }
 0x387   : > { %5971 = vmatpush1.bf16.msra.mxu1 %v5970_v4 }
 0x388   : > { %5972 = vmatprep.subr.bf16.mxu1 %v6882_v57 }
 0x38b   : > { %5974 = vmatpush1.bf16.msra.mxu1 %v5973_v7 }
 0x38c   : > { %5975 = vmatprep.subr.bf16.mxu1 %v6882_v57 }
 0x38f   : > { %5977 = vmatpush1.bf16.msra.mxu1 %v5976_v11 }
 0x390   : > { %5978 = vmatprep.subr.bf16.mxu1 %v6882_v57 }
 0x393   : > { %5980 = vmatpush1.bf16.msra.mxu1 %v5979_v43 }
 0x394   : > { %5981 = vmatprep.subr.bf16.mxu1 %v6882_v57 }
 0x397   : > { %5983 = vmatpush1.bf16.msra.mxu1 %v5982_v16 }
 0x398   : > { %5984 = vmatprep.subr.bf16.mxu1 %v6882_v57  ;;  %v4844_v57 = vld [vmem:[%s8575_s5 + $0xf0] sm:$0xff] }
 0x399   : > { %v5938_v25 = vpack.c.bf16 %v4845_v23, %v4844_v57 }
 0x39b   : > { %5986 = vmatpush1.bf16.msra.mxu1 %v5985_v22  ;;  %5939 = vmatprep.subr.bf16.mxu0 %v5938_v25 }
 0x39c   : > { %5941 = vmatpush3.bf16.msra.mxu0 %v5940_v30  ;;  %5020 = vmatprep.subr.mxu1 %v6883_v35 }
 0x39f   : > { %5620 = vmatpush1.msk.msra.mxu1 %vm4513_vm15, %v4876_v36 }
 0x433   : > { %v4663_v29 = vpop.f32.mrb[0].mxu0 }
 0x434   : > { %v6043_v42 = vadd.f32 %v4663_v29, %v4472_v37  ;;  %v4665_v46 = vpop.f32.mrb[1].mxu0 }
 0x435   : > { %v4805_v45 = vpop.f32.mrb[0].mxu1  ;;  %v6044_v47 = vadd.f32 %v4665_v46, %v4476_v39 }
 0x436   : > { %v6045_v26 = vadd.f32 %v4805_v45, %v4480_v38  ;;  %v4807_v49 = vpop.f32.mrb[1].mxu1  ;;  %v4810_v33 = vmax.f32 %v6043_v42, 0.0 }
 0x437   : > { %v6046_v51 = vadd.f32 %v4807_v49, %v4484_v40  ;;  %v4811_v52 = vmax.f32 %v6044_v47, 0.0 }
 0x438   : > { %v4812_v53 = vmax.f32 %v6045_v26, 0.0 }
 0x439   : > { %v4813_v24 = vmax.f32 %v6046_v51, 0.0  ;;  %4954 = vmatprep.mubr.f32.mxu0 %v4811_v52 }
 0x43a   : > { %4955 = vmatmul.mubr.f32.vlgmr.msra.gmra.mrb[2].mxu0 %v4810_v33 }
 0x43b   : > { %5621 = vmatprep.mubr.msk.f32.mxu1 %vm4510_vm14, %v4813_v24 }
 0x43c   : > { %5025 = vmatmul.mubr.f32.vlgmr.msra.gmra.mrb[2].mxu1 %v4812_v53 }
 0x50d   : > { %v5659_v31 = vpop.f32.mrb[2].mxu0 }
 0x50e   : > { %v5660_v34 = vpop.f32.mrb[3].mxu0 }
 0x50f   : > { %v5026_v44 = vpop.f32.mrb[2].mxu1  ;;  %v5661_v54 = vadd.f32 %v5660_v34, %v5659_v31 }
 0x510   : > { %v5028_v55 = vpop.f32.mrb[3].mxu1 }
 0x511   : > { %v4957_v56 = vadd.f32 %v5661_v54, %v5619_v32 }
 0x513   : > { %v5027_v58 = vadd.f32 %v5026_v44, %v4957_v56 }
 0x515   : > { %5031 = vst.msk [vmem:[#allocation3] sm:$0x3] %vm5030_vm0, %v5027_v58 }
 0x516 PF: > { %p6055_p7 = scmp.eq.s32.totalorder %s6931_s25, 3  ;;  %s6884_s19 = smov [#allocation3]  }
 0x517   : > { %s5039_s20 = sshll.u32 %s6884_s19, 4  ;;  %s5040_s20 = int_to_ptr.vmem [resolvable:$true] %s5039_s20 }
 0x518   : > { %s6842_s21 = scalar_lea.vmem %s5040_s20, 32  ;;  %p6849_p11 = scmp.lt.s32.totalorder %s5040_s20, %s5040_s20 }
 0x519   : > { %p6843_p8 = scmp.ne.s32.totalorder %s5040_s20, %s6842_s21  ;;  %p6850_p12 = scmp.lt.s32.totalorder %s6842_s21, %s6842_s21 }
 0x51b   : > { %p6844_p9 = pnand %p6843_p8, %p6055_p7  ;;  %p6851_p13 = por %p6850_p12, %p6849_p11 }
 0x51d   : > { %p6845_p10 = pneg %p6844_p9 }
 0x51f   : > { %p6852_p0 = pnand %p6851_p13, %p6845_p10 }
 0x521   : > { %6855 = shalt.err (!%p6852_p0)
}
 0x522   : > { %s6856_s26 = scalar_lea.hbm %s8577_s7, 32 }
 0x523   : > { %p6857_p1 = scmp.ne.s32.totalorder %s8577_s7, %s6856_s26  ;;  %p6862_p4 = scmp.lt.u32.totalorder %s6856_s26, %s8577_s7 }
 0x525   : > { %p6858_p2 = pnand %p6857_p1, %p6055_p7 }
 0x527   : > { %p6859_p3 = pneg %p6858_p2 }
 0x529   : > { %p6864_p5 = pnand %p6862_p4, %p6859_p3 }
 0x52b   : > { %6867 = shalt.err (!%p6864_p5)
}
 0x52c   : > { %6052 = dma.vmem_to_hbm [thread:$0]  (%p6055_p7), %s5040_s20, 32, %s8577_s7, [#allocation4]  }
 0x52d   : > { %6873 = dma.done.wait (%p6055_p7), [#allocation4], 32  }
 0x52e   : > { %6875 = vsyncadd (%p6055_p7), [#allocation4], 4294967264 }
 0x52f PF: > { %s18_s24 = sadd.s32 1, %s6878_s24  }
 0x530   : > { %p15_p6 = scmp.ge.s32.totalorder %s18_s24, 6  }
 0x532   :  { %17 = sbr.rel (!%p15_p6) target bundleno = 1 (0x1), region = 86 }
 0x539   :  { %5052 = vsyncpa [#allocation4], 1 }
 0x53a   :  { %5054 = vsyncpa [#allocation4 + $0x1], 1 }

</bundles_post_ra>
